<compile_context>
chip_gen: v5e
topology: v5e:2x2
jax: 0.10.0
libtpu: 0.0.40
codegen_flags: <defaults>
</compile_context>

<pallas_src>
import math

import jax
import jax.numpy as jnp
from jax import lax
from jax.experimental import pallas as pl
from jax.experimental.pallas import tpu as pltpu


_COMPUTE_DTYPE = jnp.bfloat16


def _gelu_exact(x):
    # PyTorch nn.GELU() default: exact erf-based GELU (kept in f32).
    return 0.5 * x * (1.0 + lax.erf(x / math.sqrt(2.0)))


def _gelu_wide(x):
    # tanh-approx GELU for the widest (6E) activation: the tanh lands on the
    # EUP slot instead of a long erf polynomial on the (bottleneck) VALU slot.
    return jax.nn.gelu(x, approximate=True)


# --------------------------------------------------------------------------- #
# Kernel
# --------------------------------------------------------------------------- #
def _decoder_kernel(
    x_ref,
    w1_ref, b1_ref,
    w2_ref, b2_ref,   # eval-mode BatchNorm already folded into (w2, b2)
    w3_ref, b3_ref,
    w4_ref, b4_ref,
    w5_ref, b5_ref,
    w6_ref, b6_ref,
    w7r_ref, b7_ref,  # w7 stored as (1, 128) for a lane-dense final matmul
    o_ref,
):
    cdt = w1_ref.dtype  # compute dtype for MXU inputs (bf16)

    def lin(h, w_ref, b_ref):
        return jnp.dot(h.astype(cdt), w_ref[...],
                       preferred_element_type=jnp.float32) + b_ref[...]

    h = _gelu_wide(lin(x_ref[...], w1_ref, b1_ref))   # Linear(2E->6E)+GELU (BN folded)
    h = _gelu_exact(lin(h, w2_ref, b2_ref))           # Linear(6E->1024)+GELU
    h = _gelu_exact(lin(h, w3_ref, b3_ref))           # Linear(1024->128)+GELU
    h = _gelu_exact(lin(h, w4_ref, b4_ref))           # Linear(128->128)+GELU
    h = _gelu_exact(lin(h, w5_ref, b5_ref))           # Linear(128->128)+GELU
    h = _gelu_exact(lin(h, w6_ref, b6_ref))           # Linear(128->128)+GELU

    # Final Linear(128->1) + sigmoid, lane-dense (1, tile), contracting axis 1
    # of BOTH operands so no (tile, 128) f32 transpose is materialized.
    logit = lax.dot_general(
        w7r_ref[...], h,
        dimension_numbers=(((1,), (1,)), ((), ())),
        preferred_element_type=jnp.float32) + b7_ref[...]
    o_ref[...] = jax.nn.sigmoid(logit)[None].astype(o_ref.dtype)


# --------------------------------------------------------------------------- #
# Wrapper helpers
# --------------------------------------------------------------------------- #
def _vmem_capacity_bytes():
    try:
        return int(pltpu.get_tpu_info().vmem_capacity_bytes)
    except Exception:
        return 64 << 20  # conservative (v7x-sized) fallback


def _vmem_limit_bytes(capacity):
    return max(32 << 20, min(100 << 20, int(capacity * 0.85)))


def _round_up(n, m):
    return ((n + m - 1) // m) * m


def _choose_batch_tile(B, d1, capacity):
    small_vmem = capacity < (100 << 20)        # v7x-class part (64 MiB / TC)
    single_tile_max = 256 if small_vmem else 512
    if B <= single_tile_max:
        # One grid step: one TC, weights DMA'd exactly once, minimal padding.
        return _round_up(max(B, 8), 8)
    if small_vmem:
        # Keep ~10 MiB slack under the 54 MiB limit at production widths.
        return 128 if d1 >= 2048 else 256
    # 128 MiB parts: bigger tiles amortize the ~0.35 us/step pipeline overhead.
    return 512 if B >= 2048 else 256


def _make_call(d_in, batch_tile, num_tiles, prepared, vmem_limit,
               single_buffer_weights, cost_estimate):
    x_spec = pl.BlockSpec((batch_tile, d_in), lambda i: (i, 0))

    def const_spec(arr):
        if single_buffer_weights:
            # Grid-invariant parameters: one resident buffer is enough.
            return pl.BlockSpec(arr.shape, lambda i: (0, 0),
                                pipeline_mode=pl.Buffered(1))
        return pl.BlockSpec(arr.shape, lambda i: (0, 0))

    in_specs = [x_spec] + [const_spec(p) for p in prepared]
    out_spec = pl.BlockSpec((1, 1, batch_tile), lambda i: (i, 0, 0))
    semantics = ("arbitrary",) if num_tiles == 1 else ("parallel",)

    return pl.pallas_call(
        _decoder_kernel,
        out_shape=jax.ShapeDtypeStruct((num_tiles, 1, batch_tile), jnp.float32),
        grid_spec=pltpu.PrefetchScalarGridSpec(
            num_scalar_prefetch=0,
            grid=(num_tiles,),
            in_specs=in_specs,
            out_specs=out_spec,
        ),
        compiler_params=pltpu.CompilerParams(
            dimension_semantics=semantics,
            vmem_limit_bytes=vmem_limit,
        ),
        cost_estimate=cost_estimate,
    )


def encoding2score_forward(features, prepared_params, *, batch_tile=None):
    """features: [B, 2*n_embed] float32 -> prediction: [B] float32 (eval mode)."""
    B, d_in = features.shape
    d1 = int(prepared_params[0].shape[1])

    capacity = _vmem_capacity_bytes()
    vmem_limit = _vmem_limit_bytes(capacity)
    if batch_tile is None:
        batch_tile = _choose_batch_tile(B, d1, capacity)

    b_pad = _round_up(B, batch_tile)
    num_tiles = b_pad // batch_tile

    # Pre-cast to bf16 (bit-identical to the old in-kernel cast): halves the
    # activation HBM traffic and the x double-buffer VMEM footprint.
    x = features.astype(_COMPUTE_DTYPE)
    if b_pad != B:
        x = jnp.pad(x, ((0, b_pad - B), (0, 0)))

    # Advisory cost estimate so XLA schedules surrounding ops sensibly.
    weights = prepared_params[0::2]
    dims = [(int(w.shape[0]), int(w.shape[1])) for w in weights[:-1]]
    dims.append((int(weights[-1].shape[1]), 1))          # w7 stored as (1, 128)
    flops = sum(2 * b_pad * din * dout for din, dout in dims)
    transcendentals = sum(b_pad * dout for _, dout in dims)
    param_bytes = sum(int(p.size) * p.dtype.itemsize for p in prepared_params)
    cost = pl.CostEstimate(
        flops=int(flops),
        transcendentals=int(transcendentals),
        bytes_accessed=int(param_bytes + b_pad * d_in * x.dtype.itemsize + b_pad * 4),
    )

    try:
        out = _make_call(d_in, batch_tile, num_tiles, prepared_params, vmem_limit,
                         single_buffer_weights=True, cost_estimate=cost)(
                             x, *prepared_params)
    except Exception as err:
        # Fallback only for Pallas builds that reject Buffered(1) specs, and only
        # when double-buffered weights actually fit VMEM -- never silently blow
        # up the VMEM budget (v7x at n_embed=1024 cannot fit two weight copies).
        act_bytes = batch_tile * (6 * d1 + 6 * 1024 + 4 * d_in)
        if 2 * param_bytes + act_bytes > vmem_limit:
            raise RuntimeError(
                "Single-buffered weight specs were rejected and the double-buffered "
                f"fallback (~{(2 * param_bytes + act_bytes) >> 20} MiB) does not fit "
                f"the VMEM limit ({vmem_limit >> 20} MiB); refusing to fall back."
            ) from err
        out = _make_call(d_in, batch_tile, num_tiles, prepared_params, vmem_limit,
                         single_buffer_weights=False, cost_estimate=cost)(
                             x, *prepared_params)

    return out.reshape(-1)[:B]   # drop padded rows; == sigmoid(score).squeeze(-1)


# --------------------------------------------------------------------------- #
# Parameters
# --------------------------------------------------------------------------- #
def init_params(key, n_embed=128, expand_ratio=3, dtype=jnp.float32):
    """Deterministic synthetic PyTorch-equivalent params (weights as (in, out))."""
    d0 = n_embed * 2
    d1 = n_embed * expand_ratio * 2
    d2 = 1024
    d3 = 128

    dims = [(d0, d1), (d1, d2), (d2, d3), (d3, d3), (d3, d3), (d3, d3), (d3, 1)]
    keys = jax.random.split(key, 2 * len(dims))
    params = []

    def linear(kw, din, dout):
        std = math.sqrt(2.0 / dout)  # kaiming-normal (fan_out, relu) intent
        w = (jax.random.normal(kw, (din, dout), dtype) * std).astype(dtype)
        b = jnp.zeros((1, dout), dtype)
        return w, b

    w1, b1 = linear(keys[0], *dims[0])
    params += [w1, b1]
    # BatchNorm1d(d1): weight=1, bias=0, running_mean=0, running_var=1
    params += [jnp.ones((1, d1), dtype), jnp.zeros((1, d1), dtype),
               jnp.zeros((1, d1), dtype), jnp.ones((1, d1), dtype)]
    for li, (din, dout) in enumerate(dims[1:], start=1):
        w, b = linear(keys[2 * li], din, dout)
        params += [w, b]
    return tuple(params)


def prepare_params(params, compute_dtype=_COMPUTE_DTYPE, eps=1e-5):
    """Fold eval-mode BN into the next Linear, transpose w7, cast big weights to bf16."""
    (w1, b1, bn_g, bn_b, bn_m, bn_v,
     w2, b2, w3, b3, w4, b4, w5, b5, w6, b6, w7, b7) = params

    inv_std = lax.rsqrt(bn_v.astype(jnp.float32) + eps)          # (1, d1)
    scale = (bn_g * inv_std).reshape(-1)                         # (d1,)
    shift = (bn_b - bn_m * bn_g * inv_std)                       # (1, d1)
    w2f = scale[:, None] * w2.astype(jnp.float32)                # fold along K
    b2f = b2.astype(jnp.float32) + shift @ w2.astype(jnp.float32)

    c = lambda w: w.astype(compute_dtype)
    f = lambda b: b.astype(jnp.float32)
    w7r = jnp.transpose(w7).astype(jnp.float32)                  # (1, 128)

    return (c(w1), f(b1), c(w2f), f(b2f), c(w3), f(b3),
            c(w4), f(b4), c(w5), f(b5), c(w6), f(b6), w7r, f(b7))


# --------------------------------------------------------------------------- #
# Plain-JAX references
# --------------------------------------------------------------------------- #
def _reference_forward(features, params):
    """PyTorch-faithful f32 reference (eval mode, exact erf-GELU everywhere)."""
    (w1, b1, bn_g, bn_b, bn_m, bn_v,
     w2, b2, w3, b3, w4, b4, w5, b5, w6, b6, w7, b7) = params
    h = _gelu_exact(features @ w1 + b1)
    h = (h - bn_m) / jnp.sqrt(bn_v + 1e-5) * bn_g + bn_b
    h = _gelu_exact(h @ w2 + b2)
    h = _gelu_exact(h @ w3 + b3)
    h = _gelu_exact(h @ w4 + b4)
    h = _gelu_exact(h @ w5 + b5)
    h = _gelu_exact(h @ w6 + b6)
    return jax.nn.sigmoid(h @ w7 + b7)[..., 0]


def _reference_prepared(features, prep):
    """Reference mirroring the kernel's numerics (bf16 weights, folded BN,
    tanh-approx GELU on the widest layer)."""
    (w1, b1, w2, b2, w3, b3, w4, b4, w5, b5, w6, b6, w7r, b7) = prep
    cdt = w1.dtype

    def lin(h, w, b):
        return jnp.dot(h.astype(cdt), w, preferred_element_type=jnp.float32) + b

    h = _gelu_wide(lin(features, w1, b1))
    for w, b in ((w2, b2), (w3, b3), (w4, b4), (w5, b5), (w6, b6)):
        h = _gelu_exact(lin(h, w, b))
    logit = jnp.dot(h, w7r.T, preferred_element_type=jnp.float32) + b7
    return jax.nn.sigmoid(logit)[:, 0]


# --------------------------------------------------------------------------- #
if __name__ == "__main__":
    key = jax.random.PRNGKey(0)
    k_param, k_x = jax.random.split(key)

    n_embed = 128          # small, consistent with the module (default is 1024)
    batch = 8
    raw_params = init_params(k_param, n_embed=n_embed, expand_ratio=3)
    prep_params = prepare_params(raw_params)
    features = jax.random.normal(k_x, (batch, 2 * n_embed), jnp.float32)

    pred = encoding2score_forward(features, prep_params)
    pred = jax.block_until_ready(pred)
    assert pred.shape == (batch,)

    ref_bf16 = _reference_prepared(features, prep_params)   # matches kernel numerics
    ref_f32 = _reference_forward(features, raw_params)      # PyTorch-faithful f32
    assert jnp.allclose(pred, ref_bf16, atol=5e-3, rtol=0), (pred, ref_bf16)
    assert jnp.allclose(pred, ref_f32, atol=5e-2, rtol=0), (pred, ref_f32)

    print("KERNEL_OK")
</pallas_src>

<mosaic_0001>
module attributes {stable_mosaic.version = 11 : i64} {
  func.func @_decoder_kernel(%arg0: i32, %arg1: memref<8x256xbf16, #tpu.memory_space<vmem>>, %arg2: memref<256x768xbf16, #tpu.memory_space<vmem>>, %arg3: memref<1x768xf32, #tpu.memory_space<vmem>>, %arg4: memref<768x1024xbf16, #tpu.memory_space<vmem>>, %arg5: memref<1x1024xf32, #tpu.memory_space<vmem>>, %arg6: memref<1024x128xbf16, #tpu.memory_space<vmem>>, %arg7: memref<1x128xf32, #tpu.memory_space<vmem>>, %arg8: memref<128x128xbf16, #tpu.memory_space<vmem>>, %arg9: memref<1x128xf32, #tpu.memory_space<vmem>>, %arg10: memref<128x128xbf16, #tpu.memory_space<vmem>>, %arg11: memref<1x128xf32, #tpu.memory_space<vmem>>, %arg12: memref<128x128xbf16, #tpu.memory_space<vmem>>, %arg13: memref<1x128xf32, #tpu.memory_space<vmem>>, %arg14: memref<1x128xf32, #tpu.memory_space<vmem>>, %arg15: memref<1x1xf32, #tpu.memory_space<vmem>>, %arg16: memref<1x1x8xf32, #tpu.memory_space<vmem>>) attributes {dimension_semantics = [#tpu.dimension_semantics<arbitrary>], iteration_bounds = array<i64: 1>, scalar_prefetch = 0 : i64, scratch_operands = 0 : i64, tpu.core_type = #tpu.core_type<tc>, window_params = [{transform_indices = @transform_0, window_bounds = array<i64: 8, 256>}, {pipeline_mode = #tpu.pipeline_mode<synchronous>, transform_indices = @transform_1, window_bounds = array<i64: 256, 768>}, {pipeline_mode = #tpu.pipeline_mode<synchronous>, transform_indices = @transform_2, window_bounds = array<i64: 1, 768>}, {pipeline_mode = #tpu.pipeline_mode<synchronous>, transform_indices = @transform_3, window_bounds = array<i64: 768, 1024>}, {pipeline_mode = #tpu.pipeline_mode<synchronous>, transform_indices = @transform_4, window_bounds = array<i64: 1, 1024>}, {pipeline_mode = #tpu.pipeline_mode<synchronous>, transform_indices = @transform_5, window_bounds = array<i64: 1024, 128>}, {pipeline_mode = #tpu.pipeline_mode<synchronous>, transform_indices = @transform_6, window_bounds = array<i64: 1, 128>}, {pipeline_mode = #tpu.pipeline_mode<synchronous>, transform_indices = @transform_7, window_bounds = array<i64: 128, 128>}, {pipeline_mode = #tpu.pipeline_mode<synchronous>, transform_indices = @transform_8, window_bounds = array<i64: 1, 128>}, {pipeline_mode = #tpu.pipeline_mode<synchronous>, transform_indices = @transform_9, window_bounds = array<i64: 128, 128>}, {pipeline_mode = #tpu.pipeline_mode<synchronous>, transform_indices = @transform_10, window_bounds = array<i64: 1, 128>}, {pipeline_mode = #tpu.pipeline_mode<synchronous>, transform_indices = @transform_11, window_bounds = array<i64: 128, 128>}, {pipeline_mode = #tpu.pipeline_mode<synchronous>, transform_indices = @transform_12, window_bounds = array<i64: 1, 128>}, {pipeline_mode = #tpu.pipeline_mode<synchronous>, transform_indices = @transform_13, window_bounds = array<i64: 1, 128>}, {pipeline_mode = #tpu.pipeline_mode<synchronous>, transform_indices = @transform_14, window_bounds = array<i64: 1, 1>}, {transform_indices = @transform_15, window_bounds = array<i64: 1, 1, 8>}]} {
    %c0 = arith.constant 0 : index
    %c0_0 = arith.constant 0 : index
    %0 = vector.load %arg1[%c0, %c0_0] : memref<8x256xbf16, #tpu.memory_space<vmem>>, vector<8x256xbf16>
    %c0_1 = arith.constant 0 : index
    %c0_2 = arith.constant 0 : index
    %1 = vector.load %arg2[%c0_1, %c0_2] : memref<256x768xbf16, #tpu.memory_space<vmem>>, vector<256x768xbf16>
    %cst = arith.constant dense<0.000000e+00> : vector<8x768xf32>
    %2 = tpu.matmul %0, %1, %cst {dimension_numbers = #tpu.dot_dimension_numbers<[1], [0], [0], [1], [0, 0, 1, 1], [], []>} : vector<8x256xbf16>, vector<256x768xbf16>, vector<8x768xf32> -> vector<8x768xf32>
    %c0_3 = arith.constant 0 : index
    %c0_4 = arith.constant 0 : index
    %3 = vector.load %arg3[%c0_3, %c0_4] : memref<1x768xf32, #tpu.memory_space<vmem>>, vector<1x768xf32>
    %4 = vector.broadcast %3 : vector<1x768xf32> to vector<8x768xf32>
    %5 = arith.addf %2, %4 : vector<8x768xf32>
    %6 = arith.mulf %5, %5 : vector<8x768xf32>
    %7 = arith.mulf %5, %6 : vector<8x768xf32>
    %cst_5 = arith.constant 4.471500e-02 : f32
    %8 = vector.broadcast %cst_5 : f32 to vector<8x768xf32>
    %9 = arith.mulf %8, %7 : vector<8x768xf32>
    %10 = arith.addf %5, %9 : vector<8x768xf32>
    %cst_6 = arith.constant 0.797884583 : f32
    %11 = vector.broadcast %cst_6 : f32 to vector<8x768xf32>
    %12 = arith.mulf %11, %10 : vector<8x768xf32>
    %13 = math.tanh %12 : vector<8x768xf32>
    %cst_7 = arith.constant 1.000000e+00 : f32
    %14 = vector.broadcast %cst_7 : f32 to vector<8x768xf32>
    %15 = arith.addf %14, %13 : vector<8x768xf32>
    %cst_8 = arith.constant 5.000000e-01 : f32
    %16 = vector.broadcast %cst_8 : f32 to vector<8x768xf32>
    %17 = arith.mulf %16, %15 : vector<8x768xf32>
    %18 = arith.mulf %5, %17 : vector<8x768xf32>
    %19 = arith.truncf %18 : vector<8x768xf32> to vector<8x768xbf16>
    %c0_9 = arith.constant 0 : index
    %c0_10 = arith.constant 0 : index
    %20 = vector.load %arg4[%c0_9, %c0_10] : memref<768x1024xbf16, #tpu.memory_space<vmem>>, vector<768x1024xbf16>
    %cst_11 = arith.constant dense<0.000000e+00> : vector<8x1024xf32>
    %21 = tpu.matmul %19, %20, %cst_11 {dimension_numbers = #tpu.dot_dimension_numbers<[1], [0], [0], [1], [0, 0, 1, 1], [], []>} : vector<8x768xbf16>, vector<768x1024xbf16>, vector<8x1024xf32> -> vector<8x1024xf32>
    %c0_12 = arith.constant 0 : index
    %c0_13 = arith.constant 0 : index
    %22 = vector.load %arg5[%c0_12, %c0_13] : memref<1x1024xf32, #tpu.memory_space<vmem>>, vector<1x1024xf32>
    %23 = vector.broadcast %22 : vector<1x1024xf32> to vector<8x1024xf32>
    %24 = arith.addf %21, %23 : vector<8x1024xf32>
    %cst_14 = arith.constant 5.000000e-01 : f32
    %25 = vector.broadcast %cst_14 : f32 to vector<8x1024xf32>
    %26 = arith.mulf %25, %24 : vector<8x1024xf32>
    %cst_15 = arith.constant 1.41421354 : f32
    %27 = vector.broadcast %cst_15 : f32 to vector<8x1024xf32>
    %28 = arith.divf %24, %27 : vector<8x1024xf32>
    %29 = math.erf %28 : vector<8x1024xf32>
    %cst_16 = arith.constant 1.000000e+00 : f32
    %30 = vector.broadcast %cst_16 : f32 to vector<8x1024xf32>
    %31 = arith.addf %30, %29 : vector<8x1024xf32>
    %32 = arith.mulf %26, %31 : vector<8x1024xf32>
    %33 = arith.truncf %32 : vector<8x1024xf32> to vector<8x1024xbf16>
    %c0_17 = arith.constant 0 : index
    %c0_18 = arith.constant 0 : index
    %34 = vector.load %arg6[%c0_17, %c0_18] : memref<1024x128xbf16, #tpu.memory_space<vmem>>, vector<1024x128xbf16>
    %cst_19 = arith.constant dense<0.000000e+00> : vector<8x128xf32>
    %35 = tpu.matmul %33, %34, %cst_19 {dimension_numbers = #tpu.dot_dimension_numbers<[1], [0], [0], [1], [0, 0, 1, 1], [], []>} : vector<8x1024xbf16>, vector<1024x128xbf16>, vector<8x128xf32> -> vector<8x128xf32>
    %c0_20 = arith.constant 0 : index
    %c0_21 = arith.constant 0 : index
    %36 = vector.load %arg7[%c0_20, %c0_21] : memref<1x128xf32, #tpu.memory_space<vmem>>, vector<1x128xf32>
    %37 = vector.broadcast %36 : vector<1x128xf32> to vector<8x128xf32>
    %38 = arith.addf %35, %37 : vector<8x128xf32>
    %cst_22 = arith.constant 5.000000e-01 : f32
    %39 = vector.broadcast %cst_22 : f32 to vector<8x128xf32>
    %40 = arith.mulf %39, %38 : vector<8x128xf32>
    %cst_23 = arith.constant 1.41421354 : f32
    %41 = vector.broadcast %cst_23 : f32 to vector<8x128xf32>
    %42 = arith.divf %38, %41 : vector<8x128xf32>
    %43 = math.erf %42 : vector<8x128xf32>
    %cst_24 = arith.constant 1.000000e+00 : f32
    %44 = vector.broadcast %cst_24 : f32 to vector<8x128xf32>
    %45 = arith.addf %44, %43 : vector<8x128xf32>
    %46 = arith.mulf %40, %45 : vector<8x128xf32>
    %47 = arith.truncf %46 : vector<8x128xf32> to vector<8x128xbf16>
    %c0_25 = arith.constant 0 : index
    %c0_26 = arith.constant 0 : index
    %48 = vector.load %arg8[%c0_25, %c0_26] : memref<128x128xbf16, #tpu.memory_space<vmem>>, vector<128x128xbf16>
    %cst_27 = arith.constant dense<0.000000e+00> : vector<8x128xf32>
    %49 = tpu.matmul %47, %48, %cst_27 {dimension_numbers = #tpu.dot_dimension_numbers<[1], [0], [0], [1], [0, 0, 1, 1], [], []>} : vector<8x128xbf16>, vector<128x128xbf16>, vector<8x128xf32> -> vector<8x128xf32>
    %c0_28 = arith.constant 0 : index
    %c0_29 = arith.constant 0 : index
    %50 = vector.load %arg9[%c0_28, %c0_29] : memref<1x128xf32, #tpu.memory_space<vmem>>, vector<1x128xf32>
    %51 = vector.broadcast %50 : vector<1x128xf32> to vector<8x128xf32>
    %52 = arith.addf %49, %51 : vector<8x128xf32>
    %cst_30 = arith.constant 5.000000e-01 : f32
    %53 = vector.broadcast %cst_30 : f32 to vector<8x128xf32>
    %54 = arith.mulf %53, %52 : vector<8x128xf32>
    %cst_31 = arith.constant 1.41421354 : f32
    %55 = vector.broadcast %cst_31 : f32 to vector<8x128xf32>
    %56 = arith.divf %52, %55 : vector<8x128xf32>
    %57 = math.erf %56 : vector<8x128xf32>
    %cst_32 = arith.constant 1.000000e+00 : f32
    %58 = vector.broadcast %cst_32 : f32 to vector<8x128xf32>
    %59 = arith.addf %58, %57 : vector<8x128xf32>
    %60 = arith.mulf %54, %59 : vector<8x128xf32>
    %61 = arith.truncf %60 : vector<8x128xf32> to vector<8x128xbf16>
    %c0_33 = arith.constant 0 : index
    %c0_34 = arith.constant 0 : index
    %62 = vector.load %arg10[%c0_33, %c0_34] : memref<128x128xbf16, #tpu.memory_space<vmem>>, vector<128x128xbf16>
    %cst_35 = arith.constant dense<0.000000e+00> : vector<8x128xf32>
    %63 = tpu.matmul %61, %62, %cst_35 {dimension_numbers = #tpu.dot_dimension_numbers<[1], [0], [0], [1], [0, 0, 1, 1], [], []>} : vector<8x128xbf16>, vector<128x128xbf16>, vector<8x128xf32> -> vector<8x128xf32>
    %c0_36 = arith.constant 0 : index
    %c0_37 = arith.constant 0 : index
    %64 = vector.load %arg11[%c0_36, %c0_37] : memref<1x128xf32, #tpu.memory_space<vmem>>, vector<1x128xf32>
    %65 = vector.broadcast %64 : vector<1x128xf32> to vector<8x128xf32>
    %66 = arith.addf %63, %65 : vector<8x128xf32>
    %cst_38 = arith.constant 5.000000e-01 : f32
    %67 = vector.broadcast %cst_38 : f32 to vector<8x128xf32>
    %68 = arith.mulf %67, %66 : vector<8x128xf32>
    %cst_39 = arith.constant 1.41421354 : f32
    %69 = vector.broadcast %cst_39 : f32 to vector<8x128xf32>
    %70 = arith.divf %66, %69 : vector<8x128xf32>
    %71 = math.erf %70 : vector<8x128xf32>
    %cst_40 = arith.constant 1.000000e+00 : f32
    %72 = vector.broadcast %cst_40 : f32 to vector<8x128xf32>
    %73 = arith.addf %72, %71 : vector<8x128xf32>
    %74 = arith.mulf %68, %73 : vector<8x128xf32>
    %75 = arith.truncf %74 : vector<8x128xf32> to vector<8x128xbf16>
    %c0_41 = arith.constant 0 : index
    %c0_42 = arith.constant 0 : index
    %76 = vector.load %arg12[%c0_41, %c0_42] : memref<128x128xbf16, #tpu.memory_space<vmem>>, vector<128x128xbf16>
    %cst_43 = arith.constant dense<0.000000e+00> : vector<8x128xf32>
    %77 = tpu.matmul %75, %76, %cst_43 {dimension_numbers = #tpu.dot_dimension_numbers<[1], [0], [0], [1], [0, 0, 1, 1], [], []>} : vector<8x128xbf16>, vector<128x128xbf16>, vector<8x128xf32> -> vector<8x128xf32>
    %c0_44 = arith.constant 0 : index
    %c0_45 = arith.constant 0 : index
    %78 = vector.load %arg13[%c0_44, %c0_45] : memref<1x128xf32, #tpu.memory_space<vmem>>, vector<1x128xf32>
    %79 = vector.broadcast %78 : vector<1x128xf32> to vector<8x128xf32>
    %80 = arith.addf %77, %79 : vector<8x128xf32>
    %cst_46 = arith.constant 5.000000e-01 : f32
    %81 = vector.broadcast %cst_46 : f32 to vector<8x128xf32>
    %82 = arith.mulf %81, %80 : vector<8x128xf32>
    %cst_47 = arith.constant 1.41421354 : f32
    %83 = vector.broadcast %cst_47 : f32 to vector<8x128xf32>
    %84 = arith.divf %80, %83 : vector<8x128xf32>
    %85 = math.erf %84 : vector<8x128xf32>
    %cst_48 = arith.constant 1.000000e+00 : f32
    %86 = vector.broadcast %cst_48 : f32 to vector<8x128xf32>
    %87 = arith.addf %86, %85 : vector<8x128xf32>
    %88 = arith.mulf %82, %87 : vector<8x128xf32>
    %c0_49 = arith.constant 0 : index
    %c0_50 = arith.constant 0 : index
    %89 = vector.load %arg14[%c0_49, %c0_50] : memref<1x128xf32, #tpu.memory_space<vmem>>, vector<1x128xf32>
    %cst_51 = arith.constant dense<0.000000e+00> : vector<1x8xf32>
    %90 = tpu.matmul %89, %88, %cst_51 {dimension_numbers = #tpu.dot_dimension_numbers<[1], [1], [0], [0], [0, 0, 1, 0], [], []>} : vector<1x128xf32>, vector<8x128xf32>, vector<1x8xf32> -> vector<1x8xf32>
    %c0_52 = arith.constant 0 : index
    %c0_53 = arith.constant 0 : index
    %91 = vector.load %arg15[%c0_52, %c0_53] : memref<1x1xf32, #tpu.memory_space<vmem>>, vector<1x1xf32>
    %92 = vector.broadcast %91 : vector<1x1xf32> to vector<1x8xf32>
    %93 = arith.addf %90, %92 : vector<1x8xf32>
    %94 = arith.negf %93 : vector<1x8xf32>
    %95 = math.exp %94 : vector<1x8xf32>
    %cst_54 = arith.constant 1.000000e+00 : f32
    %96 = vector.broadcast %cst_54 : f32 to vector<1x8xf32>
    %97 = arith.addf %96, %95 : vector<1x8xf32>
    %98 = arith.divf %96, %97 : vector<1x8xf32>
    %99 = vector.shape_cast %98 : vector<1x8xf32> to vector<1x1x8xf32>
    %c0_55 = arith.constant 0 : index
    %c0_56 = arith.constant 0 : index
    %c0_57 = arith.constant 0 : index
    %100 = vector.load %arg16[%c0_55, %c0_56, %c0_57] : memref<1x1x8xf32, #tpu.memory_space<vmem>>, vector<1x1x8xf32>
    tpu.vector_store %arg16[%c0_55, %c0_56, %c0_57], %99 {strides = array<i32>} : memref<1x1x8xf32, #tpu.memory_space<vmem>>, vector<1x1x8xf32>,
    return
  }
  func.func @transform_0(%arg0: i32) -> (i32, i32) {
    %c0_i32 = arith.constant 0 : i32
    %c0_i32_0 = arith.constant 0 : i32
    return %arg0, %c0_i32 : i32, i32
  }
  func.func @transform_1(%arg0: i32) -> (i32, i32) {
    %c0_i32 = arith.constant 0 : i32
    %c0_i32_0 = arith.constant 0 : i32
    %c0_i32_1 = arith.constant 0 : i32
    return %c0_i32, %c0_i32_0 : i32, i32
  }
  func.func @transform_2(%arg0: i32) -> (i32, i32) {
    %c0_i32 = arith.constant 0 : i32
    %c0_i32_0 = arith.constant 0 : i32
    %c0_i32_1 = arith.constant 0 : i32
    return %c0_i32, %c0_i32_0 : i32, i32
  }
  func.func @transform_3(%arg0: i32) -> (i32, i32) {
    %c0_i32 = arith.constant 0 : i32
    %c0_i32_0 = arith.constant 0 : i32
    %c0_i32_1 = arith.constant 0 : i32
    return %c0_i32, %c0_i32_0 : i32, i32
  }
  func.func @transform_4(%arg0: i32) -> (i32, i32) {
    %c0_i32 = arith.constant 0 : i32
    %c0_i32_0 = arith.constant 0 : i32
    %c0_i32_1 = arith.constant 0 : i32
    return %c0_i32, %c0_i32_0 : i32, i32
  }
  func.func @transform_5(%arg0: i32) -> (i32, i32) {
    %c0_i32 = arith.constant 0 : i32
    %c0_i32_0 = arith.constant 0 : i32
    %c0_i32_1 = arith.constant 0 : i32
    return %c0_i32, %c0_i32_0 : i32, i32
  }
  func.func @transform_6(%arg0: i32) -> (i32, i32) {
    %c0_i32 = arith.constant 0 : i32
    %c0_i32_0 = arith.constant 0 : i32
    %c0_i32_1 = arith.constant 0 : i32
    return %c0_i32, %c0_i32_0 : i32, i32
  }
  func.func @transform_7(%arg0: i32) -> (i32, i32) {
    %c0_i32 = arith.constant 0 : i32
    %c0_i32_0 = arith.constant 0 : i32
    %c0_i32_1 = arith.constant 0 : i32
    return %c0_i32, %c0_i32_0 : i32, i32
  }
  func.func @transform_8(%arg0: i32) -> (i32, i32) {
    %c0_i32 = arith.constant 0 : i32
    %c0_i32_0 = arith.constant 0 : i32
    %c0_i32_1 = arith.constant 0 : i32
    return %c0_i32, %c0_i32_0 : i32, i32
  }
  func.func @transform_9(%arg0: i32) -> (i32, i32) {
    %c0_i32 = arith.constant 0 : i32
    %c0_i32_0 = arith.constant 0 : i32
    %c0_i32_1 = arith.constant 0 : i32
    return %c0_i32, %c0_i32_0 : i32, i32
  }
  func.func @transform_10(%arg0: i32) -> (i32, i32) {
    %c0_i32 = arith.constant 0 : i32
    %c0_i32_0 = arith.constant 0 : i32
    %c0_i32_1 = arith.constant 0 : i32
    return %c0_i32, %c0_i32_0 : i32, i32
  }
  func.func @transform_11(%arg0: i32) -> (i32, i32) {
    %c0_i32 = arith.constant 0 : i32
    %c0_i32_0 = arith.constant 0 : i32
    %c0_i32_1 = arith.constant 0 : i32
    return %c0_i32, %c0_i32_0 : i32, i32
  }
  func.func @transform_12(%arg0: i32) -> (i32, i32) {
    %c0_i32 = arith.constant 0 : i32
    %c0_i32_0 = arith.constant 0 : i32
    %c0_i32_1 = arith.constant 0 : i32
    return %c0_i32, %c0_i32_0 : i32, i32
  }
  func.func @transform_13(%arg0: i32) -> (i32, i32) {
    %c0_i32 = arith.constant 0 : i32
    %c0_i32_0 = arith.constant 0 : i32
    %c0_i32_1 = arith.constant 0 : i32
    return %c0_i32, %c0_i32_0 : i32, i32
  }
  func.func @transform_14(%arg0: i32) -> (i32, i32) {
    %c0_i32 = arith.constant 0 : i32
    %c0_i32_0 = arith.constant 0 : i32
    %c0_i32_1 = arith.constant 0 : i32
    return %c0_i32, %c0_i32_0 : i32, i32
  }
  func.func @transform_15(%arg0: i32) -> (i32, i32, i32) {
    %c0_i32 = arith.constant 0 : i32
    %c0_i32_0 = arith.constant 0 : i32
    %c0_i32_1 = arith.constant 0 : i32
    return %arg0, %c0_i32, %c0_i32_0 : i32, i32, i32
  }
}

module attributes {stable_mosaic.version = 11 : i64} {
  func.func @_decoder_kernel(%arg0: i32, %arg1: memref<8x256xbf16, #tpu.memory_space<vmem>>, %arg2: memref<256x768xbf16, #tpu.memory_space<vmem>>, %arg3: memref<1x768xf32, #tpu.memory_space<vmem>>, %arg4: memref<768x1024xbf16, #tpu.memory_space<vmem>>, %arg5: memref<1x1024xf32, #tpu.memory_space<vmem>>, %arg6: memref<1024x128xbf16, #tpu.memory_space<vmem>>, %arg7: memref<1x128xf32, #tpu.memory_space<vmem>>, %arg8: memref<128x128xbf16, #tpu.memory_space<vmem>>, %arg9: memref<1x128xf32, #tpu.memory_space<vmem>>, %arg10: memref<128x128xbf16, #tpu.memory_space<vmem>>, %arg11: memref<1x128xf32, #tpu.memory_space<vmem>>, %arg12: memref<128x128xbf16, #tpu.memory_space<vmem>>, %arg13: memref<1x128xf32, #tpu.memory_space<vmem>>, %arg14: memref<1x128xf32, #tpu.memory_space<vmem>>, %arg15: memref<1x1xf32, #tpu.memory_space<vmem>>, %arg16: memref<1x1x8xf32, #tpu.memory_space<vmem>>) attributes {dimension_semantics = [#tpu.dimension_semantics<arbitrary>], iteration_bounds = array<i64: 1>, scalar_prefetch = 0 : i64, scratch_operands = 0 : i64, tpu.core_type = #tpu.core_type<tc>, window_params = [{transform_indices = @transform_0, window_bounds = array<i64: 8, 256>}, {pipeline_mode = #tpu.pipeline_mode<synchronous>, transform_indices = @transform_1, window_bounds = array<i64: 256, 768>}, {pipeline_mode = #tpu.pipeline_mode<synchronous>, transform_indices = @transform_2, window_bounds = array<i64: 1, 768>}, {pipeline_mode = #tpu.pipeline_mode<synchronous>, transform_indices = @transform_3, window_bounds = array<i64: 768, 1024>}, {pipeline_mode = #tpu.pipeline_mode<synchronous>, transform_indices = @transform_4, window_bounds = array<i64: 1, 1024>}, {pipeline_mode = #tpu.pipeline_mode<synchronous>, transform_indices = @transform_5, window_bounds = array<i64: 1024, 128>}, {pipeline_mode = #tpu.pipeline_mode<synchronous>, transform_indices = @transform_6, window_bounds = array<i64: 1, 128>}, {pipeline_mode = #tpu.pipeline_mode<synchronous>, transform_indices = @transform_7, window_bounds = array<i64: 128, 128>}, {pipeline_mode = #tpu.pipeline_mode<synchronous>, transform_indices = @transform_8, window_bounds = array<i64: 1, 128>}, {pipeline_mode = #tpu.pipeline_mode<synchronous>, transform_indices = @transform_9, window_bounds = array<i64: 128, 128>}, {pipeline_mode = #tpu.pipeline_mode<synchronous>, transform_indices = @transform_10, window_bounds = array<i64: 1, 128>}, {pipeline_mode = #tpu.pipeline_mode<synchronous>, transform_indices = @transform_11, window_bounds = array<i64: 128, 128>}, {pipeline_mode = #tpu.pipeline_mode<synchronous>, transform_indices = @transform_12, window_bounds = array<i64: 1, 128>}, {pipeline_mode = #tpu.pipeline_mode<synchronous>, transform_indices = @transform_13, window_bounds = array<i64: 1, 128>}, {pipeline_mode = #tpu.pipeline_mode<synchronous>, transform_indices = @transform_14, window_bounds = array<i64: 1, 1>}, {transform_indices = @transform_15, window_bounds = array<i64: 1, 1, 8>}]} {
    %c0 = arith.constant 0 : index
    %c0_0 = arith.constant 0 : index
    %0 = vector.load %arg1[%c0, %c0_0] : memref<8x256xbf16, #tpu.memory_space<vmem>>, vector<8x256xbf16>
    %c0_1 = arith.constant 0 : index
    %c0_2 = arith.constant 0 : index
    %1 = vector.load %arg2[%c0_1, %c0_2] : memref<256x768xbf16, #tpu.memory_space<vmem>>, vector<256x768xbf16>
    %cst = arith.constant dense<0.000000e+00> : vector<8x768xf32>
    %2 = tpu.matmul %0, %1, %cst {dimension_numbers = #tpu.dot_dimension_numbers<[1], [0], [0], [1], [0, 0, 1, 1], [], []>} : vector<8x256xbf16>, vector<256x768xbf16>, vector<8x768xf32> -> vector<8x768xf32>
    %c0_3 = arith.constant 0 : index
    %c0_4 = arith.constant 0 : index
    %3 = vector.load %arg3[%c0_3, %c0_4] : memref<1x768xf32, #tpu.memory_space<vmem>>, vector<1x768xf32>
    %4 = vector.broadcast %3 : vector<1x768xf32> to vector<8x768xf32>
    %5 = arith.addf %2, %4 : vector<8x768xf32>
    %6 = arith.mulf %5, %5 : vector<8x768xf32>
    %7 = arith.mulf %5, %6 : vector<8x768xf32>
    %cst_5 = arith.constant 4.471500e-02 : f32
    %8 = vector.broadcast %cst_5 : f32 to vector<8x768xf32>
    %9 = arith.mulf %8, %7 : vector<8x768xf32>
    %10 = arith.addf %5, %9 : vector<8x768xf32>
    %cst_6 = arith.constant 0.797884583 : f32
    %11 = vector.broadcast %cst_6 : f32 to vector<8x768xf32>
    %12 = arith.mulf %11, %10 : vector<8x768xf32>
    %13 = math.tanh %12 : vector<8x768xf32>
    %cst_7 = arith.constant 1.000000e+00 : f32
    %14 = vector.broadcast %cst_7 : f32 to vector<8x768xf32>
    %15 = arith.addf %14, %13 : vector<8x768xf32>
    %cst_8 = arith.constant 5.000000e-01 : f32
    %16 = vector.broadcast %cst_8 : f32 to vector<8x768xf32>
    %17 = arith.mulf %16, %15 : vector<8x768xf32>
    %18 = arith.mulf %5, %17 : vector<8x768xf32>
    %19 = arith.truncf %18 : vector<8x768xf32> to vector<8x768xbf16>
    %c0_9 = arith.constant 0 : index
    %c0_10 = arith.constant 0 : index
    %20 = vector.load %arg4[%c0_9, %c0_10] : memref<768x1024xbf16, #tpu.memory_space<vmem>>, vector<768x1024xbf16>
    %cst_11 = arith.constant dense<0.000000e+00> : vector<8x1024xf32>
    %21 = tpu.matmul %19, %20, %cst_11 {dimension_numbers = #tpu.dot_dimension_numbers<[1], [0], [0], [1], [0, 0, 1, 1], [], []>} : vector<8x768xbf16>, vector<768x1024xbf16>, vector<8x1024xf32> -> vector<8x1024xf32>
    %c0_12 = arith.constant 0 : index
    %c0_13 = arith.constant 0 : index
    %22 = vector.load %arg5[%c0_12, %c0_13] : memref<1x1024xf32, #tpu.memory_space<vmem>>, vector<1x1024xf32>
    %23 = vector.broadcast %22 : vector<1x1024xf32> to vector<8x1024xf32>
    %24 = arith.addf %21, %23 : vector<8x1024xf32>
    %cst_14 = arith.constant 5.000000e-01 : f32
    %25 = vector.broadcast %cst_14 : f32 to vector<8x1024xf32>
    %26 = arith.mulf %25, %24 : vector<8x1024xf32>
    %cst_15 = arith.constant 1.41421354 : f32
    %27 = vector.broadcast %cst_15 : f32 to vector<8x1024xf32>
    %28 = arith.divf %24, %27 : vector<8x1024xf32>
    %29 = math.erf %28 : vector<8x1024xf32>
    %cst_16 = arith.constant 1.000000e+00 : f32
    %30 = vector.broadcast %cst_16 : f32 to vector<8x1024xf32>
    %31 = arith.addf %30, %29 : vector<8x1024xf32>
    %32 = arith.mulf %26, %31 : vector<8x1024xf32>
    %33 = arith.truncf %32 : vector<8x1024xf32> to vector<8x1024xbf16>
    %c0_17 = arith.constant 0 : index
    %c0_18 = arith.constant 0 : index
    %34 = vector.load %arg6[%c0_17, %c0_18] : memref<1024x128xbf16, #tpu.memory_space<vmem>>, vector<1024x128xbf16>
    %cst_19 = arith.constant dense<0.000000e+00> : vector<8x128xf32>
    %35 = tpu.matmul %33, %34, %cst_19 {dimension_numbers = #tpu.dot_dimension_numbers<[1], [0], [0], [1], [0, 0, 1, 1], [], []>} : vector<8x1024xbf16>, vector<1024x128xbf16>, vector<8x128xf32> -> vector<8x128xf32>
    %c0_20 = arith.constant 0 : index
    %c0_21 = arith.constant 0 : index
    %36 = vector.load %arg7[%c0_20, %c0_21] : memref<1x128xf32, #tpu.memory_space<vmem>>, vector<1x128xf32>
    %37 = vector.broadcast %36 : vector<1x128xf32> to vector<8x128xf32>
    %38 = arith.addf %35, %37 : vector<8x128xf32>
    %cst_22 = arith.constant 5.000000e-01 : f32
    %39 = vector.broadcast %cst_22 : f32 to vector<8x128xf32>
    %40 = arith.mulf %39, %38 : vector<8x128xf32>
    %cst_23 = arith.constant 1.41421354 : f32
    %41 = vector.broadcast %cst_23 : f32 to vector<8x128xf32>
    %42 = arith.divf %38, %41 : vector<8x128xf32>
    %43 = math.erf %42 : vector<8x128xf32>
    %cst_24 = arith.constant 1.000000e+00 : f32
    %44 = vector.broadcast %cst_24 : f32 to vector<8x128xf32>
    %45 = arith.addf %44, %43 : vector<8x128xf32>
    %46 = arith.mulf %40, %45 : vector<8x128xf32>
    %47 = arith.truncf %46 : vector<8x128xf32> to vector<8x128xbf16>
    %c0_25 = arith.constant 0 : index
    %c0_26 = arith.constant 0 : index
    %48 = vector.load %arg8[%c0_25, %c0_26] : memref<128x128xbf16, #tpu.memory_space<vmem>>, vector<128x128xbf16>
    %cst_27 = arith.constant dense<0.000000e+00> : vector<8x128xf32>
    %49 = tpu.matmul %47, %48, %cst_27 {dimension_numbers = #tpu.dot_dimension_numbers<[1], [0], [0], [1], [0, 0, 1, 1], [], []>} : vector<8x128xbf16>, vector<128x128xbf16>, vector<8x128xf32> -> vector<8x128xf32>
    %c0_28 = arith.constant 0 : index
    %c0_29 = arith.constant 0 : index
    %50 = vector.load %arg9[%c0_28, %c0_29] : memref<1x128xf32, #tpu.memory_space<vmem>>, vector<1x128xf32>
    %51 = vector.broadcast %50 : vector<1x128xf32> to vector<8x128xf32>
    %52 = arith.addf %49, %51 : vector<8x128xf32>
    %cst_30 = arith.constant 5.000000e-01 : f32
    %53 = vector.broadcast %cst_30 : f32 to vector<8x128xf32>
    %54 = arith.mulf %53, %52 : vector<8x128xf32>
    %cst_31 = arith.constant 1.41421354 : f32
    %55 = vector.broadcast %cst_31 : f32 to vector<8x128xf32>
    %56 = arith.divf %52, %55 : vector<8x128xf32>
    %57 = math.erf %56 : vector<8x128xf32>
    %cst_32 = arith.constant 1.000000e+00 : f32
    %58 = vector.broadcast %cst_32 : f32 to vector<8x128xf32>
    %59 = arith.addf %58, %57 : vector<8x128xf32>
    %60 = arith.mulf %54, %59 : vector<8x128xf32>
    %61 = arith.truncf %60 : vector<8x128xf32> to vector<8x128xbf16>
    %c0_33 = arith.constant 0 : index
    %c0_34 = arith.constant 0 : index
    %62 = vector.load %arg10[%c0_33, %c0_34] : memref<128x128xbf16, #tpu.memory_space<vmem>>, vector<128x128xbf16>
    %cst_35 = arith.constant dense<0.000000e+00> : vector<8x128xf32>
    %63 = tpu.matmul %61, %62, %cst_35 {dimension_numbers = #tpu.dot_dimension_numbers<[1], [0], [0], [1], [0, 0, 1, 1], [], []>} : vector<8x128xbf16>, vector<128x128xbf16>, vector<8x128xf32> -> vector<8x128xf32>
    %c0_36 = arith.constant 0 : index
    %c0_37 = arith.constant 0 : index
    %64 = vector.load %arg11[%c0_36, %c0_37] : memref<1x128xf32, #tpu.memory_space<vmem>>, vector<1x128xf32>
    %65 = vector.broadcast %64 : vector<1x128xf32> to vector<8x128xf32>
    %66 = arith.addf %63, %65 : vector<8x128xf32>
    %cst_38 = arith.constant 5.000000e-01 : f32
    %67 = vector.broadcast %cst_38 : f32 to vector<8x128xf32>
    %68 = arith.mulf %67, %66 : vector<8x128xf32>
    %cst_39 = arith.constant 1.41421354 : f32
    %69 = vector.broadcast %cst_39 : f32 to vector<8x128xf32>
    %70 = arith.divf %66, %69 : vector<8x128xf32>
    %71 = math.erf %70 : vector<8x128xf32>
    %cst_40 = arith.constant 1.000000e+00 : f32
    %72 = vector.broadcast %cst_40 : f32 to vector<8x128xf32>
    %73 = arith.addf %72, %71 : vector<8x128xf32>
    %74 = arith.mulf %68, %73 : vector<8x128xf32>
    %75 = arith.truncf %74 : vector<8x128xf32> to vector<8x128xbf16>
    %c0_41 = arith.constant 0 : index
    %c0_42 = arith.constant 0 : index
    %76 = vector.load %arg12[%c0_41, %c0_42] : memref<128x128xbf16, #tpu.memory_space<vmem>>, vector<128x128xbf16>
    %cst_43 = arith.constant dense<0.000000e+00> : vector<8x128xf32>
    %77 = tpu.matmul %75, %76, %cst_43 {dimension_numbers = #tpu.dot_dimension_numbers<[1], [0], [0], [1], [0, 0, 1, 1], [], []>} : vector<8x128xbf16>, vector<128x128xbf16>, vector<8x128xf32> -> vector<8x128xf32>
    %c0_44 = arith.constant 0 : index
    %c0_45 = arith.constant 0 : index
    %78 = vector.load %arg13[%c0_44, %c0_45] : memref<1x128xf32, #tpu.memory_space<vmem>>, vector<1x128xf32>
    %79 = vector.broadcast %78 : vector<1x128xf32> to vector<8x128xf32>
    %80 = arith.addf %77, %79 : vector<8x128xf32>
    %cst_46 = arith.constant 5.000000e-01 : f32
    %81 = vector.broadcast %cst_46 : f32 to vector<8x128xf32>
    %82 = arith.mulf %81, %80 : vector<8x128xf32>
    %cst_47 = arith.constant 1.41421354 : f32
    %83 = vector.broadcast %cst_47 : f32 to vector<8x128xf32>
    %84 = arith.divf %80, %83 : vector<8x128xf32>
    %85 = math.erf %84 : vector<8x128xf32>
    %cst_48 = arith.constant 1.000000e+00 : f32
    %86 = vector.broadcast %cst_48 : f32 to vector<8x128xf32>
    %87 = arith.addf %86, %85 : vector<8x128xf32>
    %88 = arith.mulf %82, %87 : vector<8x128xf32>
    %c0_49 = arith.constant 0 : index
    %c0_50 = arith.constant 0 : index
    %89 = vector.load %arg14[%c0_49, %c0_50] : memref<1x128xf32, #tpu.memory_space<vmem>>, vector<1x128xf32>
    %cst_51 = arith.constant dense<0.000000e+00> : vector<1x8xf32>
    %90 = tpu.matmul %89, %88, %cst_51 {dimension_numbers = #tpu.dot_dimension_numbers<[1], [1], [0], [0], [0, 0, 1, 0], [], []>} : vector<1x128xf32>, vector<8x128xf32>, vector<1x8xf32> -> vector<1x8xf32>
    %c0_52 = arith.constant 0 : index
    %c0_53 = arith.constant 0 : index
    %91 = vector.load %arg15[%c0_52, %c0_53] : memref<1x1xf32, #tpu.memory_space<vmem>>, vector<1x1xf32>
    %92 = vector.broadcast %91 : vector<1x1xf32> to vector<1x8xf32>
    %93 = arith.addf %90, %92 : vector<1x8xf32>
    %94 = arith.negf %93 : vector<1x8xf32>
    %95 = math.exp %94 : vector<1x8xf32>
    %cst_54 = arith.constant 1.000000e+00 : f32
    %96 = vector.broadcast %cst_54 : f32 to vector<1x8xf32>
    %97 = arith.addf %96, %95 : vector<1x8xf32>
    %98 = arith.divf %96, %97 : vector<1x8xf32>
    %99 = vector.shape_cast %98 : vector<1x8xf32> to vector<1x1x8xf32>
    %c0_55 = arith.constant 0 : index
    %c0_56 = arith.constant 0 : index
    %c0_57 = arith.constant 0 : index
    %100 = vector.load %arg16[%c0_55, %c0_56, %c0_57] : memref<1x1x8xf32, #tpu.memory_space<vmem>>, vector<1x1x8xf32>
    tpu.vector_store %arg16[%c0_55, %c0_56, %c0_57], %99 {strides = array<i32>} : memref<1x1x8xf32, #tpu.memory_space<vmem>>, vector<1x1x8xf32>,
    return
  }
  func.func @transform_0(%arg0: i32) -> (i32, i32) {
    %c0_i32 = arith.constant 0 : i32
    %c0_i32_0 = arith.constant 0 : i32
    return %arg0, %c0_i32 : i32, i32
  }
  func.func @transform_1(%arg0: i32) -> (i32, i32) {
    %c0_i32 = arith.constant 0 : i32
    %c0_i32_0 = arith.constant 0 : i32
    %c0_i32_1 = arith.constant 0 : i32
    return %c0_i32, %c0_i32_0 : i32, i32
  }
  func.func @transform_2(%arg0: i32) -> (i32, i32) {
    %c0_i32 = arith.constant 0 : i32
    %c0_i32_0 = arith.constant 0 : i32
    %c0_i32_1 = arith.constant 0 : i32
    return %c0_i32, %c0_i32_0 : i32, i32
  }
  func.func @transform_3(%arg0: i32) -> (i32, i32) {
    %c0_i32 = arith.constant 0 : i32
    %c0_i32_0 = arith.constant 0 : i32
    %c0_i32_1 = arith.constant 0 : i32
    return %c0_i32, %c0_i32_0 : i32, i32
  }
  func.func @transform_4(%arg0: i32) -> (i32, i32) {
    %c0_i32 = arith.constant 0 : i32
    %c0_i32_0 = arith.constant 0 : i32
    %c0_i32_1 = arith.constant 0 : i32
    return %c0_i32, %c0_i32_0 : i32, i32
  }
  func.func @transform_5(%arg0: i32) -> (i32, i32) {
    %c0_i32 = arith.constant 0 : i32
    %c0_i32_0 = arith.constant 0 : i32
    %c0_i32_1 = arith.constant 0 : i32
    return %c0_i32, %c0_i32_0 : i32, i32
  }
  func.func @transform_6(%arg0: i32) -> (i32, i32) {
    %c0_i32 = arith.constant 0 : i32
    %c0_i32_0 = arith.constant 0 : i32
    %c0_i32_1 = arith.constant 0 : i32
    return %c0_i32, %c0_i32_0 : i32, i32
  }
  func.func @transform_7(%arg0: i32) -> (i32, i32) {
    %c0_i32 = arith.constant 0 : i32
    %c0_i32_0 = arith.constant 0 : i32
    %c0_i32_1 = arith.constant 0 : i32
    return %c0_i32, %c0_i32_0 : i32, i32
  }
  func.func @transform_8(%arg0: i32) -> (i32, i32) {
    %c0_i32 = arith.constant 0 : i32
    %c0_i32_0 = arith.constant 0 : i32
    %c0_i32_1 = arith.constant 0 : i32
    return %c0_i32, %c0_i32_0 : i32, i32
  }
  func.func @transform_9(%arg0: i32) -> (i32, i32) {
    %c0_i32 = arith.constant 0 : i32
    %c0_i32_0 = arith.constant 0 : i32
    %c0_i32_1 = arith.constant 0 : i32
    return %c0_i32, %c0_i32_0 : i32, i32
  }
  func.func @transform_10(%arg0: i32) -> (i32, i32) {
    %c0_i32 = arith.constant 0 : i32
    %c0_i32_0 = arith.constant 0 : i32
    %c0_i32_1 = arith.constant 0 : i32
    return %c0_i32, %c0_i32_0 : i32, i32
  }
  func.func @transform_11(%arg0: i32) -> (i32, i32) {
    %c0_i32 = arith.constant 0 : i32
    %c0_i32_0 = arith.constant 0 : i32
    %c0_i32_1 = arith.constant 0 : i32
    return %c0_i32, %c0_i32_0 : i32, i32
  }
  func.func @transform_12(%arg0: i32) -> (i32, i32) {
    %c0_i32 = arith.constant 0 : i32
    %c0_i32_0 = arith.constant 0 : i32
    %c0_i32_1 = arith.constant 0 : i32
    return %c0_i32, %c0_i32_0 : i32, i32
  }
  func.func @transform_13(%arg0: i32) -> (i32, i32) {
    %c0_i32 = arith.constant 0 : i32
    %c0_i32_0 = arith.constant 0 : i32
    %c0_i32_1 = arith.constant 0 : i32
    return %c0_i32, %c0_i32_0 : i32, i32
  }
  func.func @transform_14(%arg0: i32) -> (i32, i32) {
    %c0_i32 = arith.constant 0 : i32
    %c0_i32_0 = arith.constant 0 : i32
    %c0_i32_1 = arith.constant 0 : i32
    return %c0_i32, %c0_i32_0 : i32, i32
  }
  func.func @transform_15(%arg0: i32) -> (i32, i32, i32) {
    %c0_i32 = arith.constant 0 : i32
    %c0_i32_0 = arith.constant 0 : i32
    %c0_i32_1 = arith.constant 0 : i32
    return %arg0, %c0_i32, %c0_i32_0 : i32, i32, i32
  }
}

</mosaic_0001>

<bundles_post_ra>
// kernel: tpu_custom_call.1
= control target key start
LH: loop header
LB: loop body
LE: loop exit
PB: predicated region body
PF: predicated region fallthrough
CT: control target
= control target key end

     0   :  { %s9397_s0 = inlined_call_operand.hbm [shape: bf16[8,256], index: 0, kind: input, shape index: {}]   ;;  %s9398_s1 = inlined_call_operand.hbm [shape: bf16[256,768], index: 1, kind: input, shape index: {}]   ;;  %s9399_s2 = inlined_call_operand.hbm [shape: f32[1,768], index: 2, kind: input, shape index: {}]   ;;  %s9400_s3 = inlined_call_operand.hbm [shape: bf16[768,1024], index: 3, kind: input, shape index: {}]   ;;  %s9401_s4 = inlined_call_operand.hbm [shape: f32[1,1024], index: 4, kind: input, shape index: {}]   ;;  %s9402_s5 = inlined_call_operand.hbm [shape: bf16[1024,128], index: 5, kind: input, shape index: {}]   ;;  %s9403_s6 = inlined_call_operand.hbm [shape: f32[1,128], index: 6, kind: input, shape index: {}]   ;;  %s9404_s7 = inlined_call_operand.hbm [shape: bf16[128,128], index: 7, kind: input, shape index: {}]   ;;  %s9405_s8 = inlined_call_operand.hbm [shape: f32[1,128], index: 8, kind: input, shape index: {}]   ;;  %s9406_s9 = inlined_call_operand.hbm [shape: bf16[128,128], index: 9, kind: input, shape index: {}]   ;;  %s9407_s10 = inlined_call_operand.hbm [shape: f32[1,128], index: 10, kind: input, shape index: {}]   ;;  %s9408_s11 = inlined_call_operand.hbm [shape: bf16[128,128], index: 11, kind: input, shape index: {}]   ;;  %s9409_s12 = inlined_call_operand.hbm [shape: f32[1,128], index: 12, kind: input, shape index: {}]   ;;  %s9410_s13 = inlined_call_operand.hbm [shape: f32[1,128], index: 13, kind: input, shape index: {}]   ;;  %s9411_s14 = inlined_call_operand.<no memory space> [shape: f32[1,1], index: 14, kind: input, shape index: {}]   ;;  %s9412_s15 = inlined_call_operand.hbm [shape: f32[1,1,8], index: 15, kind: output, shape index: {}]  }
   0x1   :  { %v20_v0 = vstv %s9411_s14 }
   0x2   :  { %21 = vst [vmem:[#allocation2] sm:$0x1] %v20_v0 }
   0x3   :  { %22 = vsyncpa [#allocation4], 0 }
   0x4   :  { %23 = vsyncpa [#allocation7], 0 }
   0x5   :  { %24 = vsyncpa [#allocation10], 0 }
   0x6   :  { %25 = vsyncpa [#allocation13], 0 }
   0x7   :  { %26 = vsyncpa [#allocation16], 0 }
   0x8   :  { %27 = vsyncpa [#allocation19], 0 }
   0x9   :  { %28 = vsyncpa [#allocation22], 0 }
   0xa   :  { %29 = vsyncpa [#allocation25], 0  ;;  %s46_s22 = sshll.u32 %s9398_s1, 4  ;;  %s47_s22 = int_to_ptr.hbm [resolvable:$true] %s46_s22 }
   0xb   :  { %30 = vsyncpa [#allocation5], 0  ;;  %s8800_s23 = smov [#allocation6]   ;;  %s70_s26 = sshll.u32 %s9400_s3, 4  ;;  %s71_s26 = int_to_ptr.hbm [resolvable:$true] %s70_s26 }
   0xc   :  { %s48_s24 = sshll.u32 %s8800_s23, 4  ;;  %s8801_s27 = smov 384   ;;  %s49_s24 = int_to_ptr.vmem [resolvable:$true] %s48_s24 }
   0xd   :  { %s8802_s28 = smov 24   ;;  %s8803_s29 = smov [#allocation9]  }
   0xe   :  { %54 = dma.hbm_to_vmem [thread:$0]  %s47_s22, 12288, %s49_s24, [#allocation7], %s8801_s27, %s8801_s27, %s8802_s28  }
   0xf   :  { %s72_s30 = sshll.u32 %s8803_s29, 4  ;;  %s8804_s16 = smov 512   ;;  %s73_s30 = int_to_ptr.vmem [resolvable:$true] %s72_s30 }
  0x10   :  { %s8805_s17 = smov 32   ;;  %s94_s19 = sshll.u32 %s9402_s5, 4  ;;  %s95_s19 = int_to_ptr.hbm [resolvable:$true] %s94_s19 }
  0x11   :  { %78 = dma.hbm_to_vmem [thread:$0]  %s71_s26, 49152, %s73_s30, [#allocation10], %s8804_s16, %s8804_s16, %s8805_s17  }
  0x12   :  { %s8806_s20 = smov [#allocation12]   ;;  %s118_s25 = sshll.u32 %s9404_s7, 4  ;;  %s119_s25 = int_to_ptr.hbm [resolvable:$true] %s118_s25 }
  0x13   :  { %s96_s21 = sshll.u32 %s8806_s20, 4  ;;  %s8807_s22 = smov 64   ;;  %s97_s21 = int_to_ptr.vmem [resolvable:$true] %s96_s21 }
  0x14   :  { %s8808_s24 = smov 4   ;;  %s8809_s14 = smov [#allocation15]  }
  0x15   :  { %102 = dma.hbm_to_vmem [thread:$0]  %s95_s19, 8192, %s97_s21, [#allocation13], %s8807_s22, %s8807_s22, %s8808_s24  }
  0x16   :  { %s120_s27 = sshll.u32 %s8809_s14, 4  ;;  %s142_s29 = sshll.u32 %s9406_s9, 4  ;;  %s121_s27 = int_to_ptr.vmem [resolvable:$true] %s120_s27  ;;  %s143_s29 = int_to_ptr.hbm [resolvable:$true] %s142_s29 }
  0x17   :  { %126 = dma.hbm_to_vmem [thread:$0]  %s119_s25, 1024, %s121_s27, [#allocation16], %s8807_s22, %s8807_s22, %s8808_s24  }
  0x18   :  { %s166_s16 = sshll.u32 %s9408_s11, 4  ;;  %s8810_s17 = smov [#allocation18]   ;;  %s167_s16 = int_to_ptr.hbm [resolvable:$true] %s166_s16 }
  0x19   :  { %s144_s1 = sshll.u32 %s8810_s17, 4  ;;  %s8811_s7 = smov [#allocation21]   ;;  %s145_s1 = int_to_ptr.vmem [resolvable:$true] %s144_s1 }
  0x1a   :  { %150 = dma.hbm_to_vmem [thread:$0]  %s143_s29, 1024, %s145_s1, [#allocation19], %s8807_s22, %s8807_s22, %s8808_s24  }
  0x1b   :  { %s168_s18 = sshll.u32 %s8811_s7, 4  ;;  %s36_s21 = sshll.u32 %s9397_s0, 4  ;;  %s169_s18 = int_to_ptr.vmem [resolvable:$true] %s168_s18  ;;  %s37_s21 = int_to_ptr.hbm [resolvable:$true] %s36_s21 }
  0x1c   :  { %174 = dma.hbm_to_vmem [thread:$0]  %s167_s16, 1024, %s169_s18, [#allocation22], %s8807_s22, %s8807_s22, %s8808_s24  }
  0x1d   :  { %s60_s3 = sshll.u32 %s9399_s2, 4  ;;  %s8812_s25 = smov [#allocation3]   ;;  %s61_s3 = int_to_ptr.hbm [resolvable:$true] %s60_s3 }
  0x1e   :  { %s38_s11 = sshll.u32 %s8812_s25, 4  ;;  %s8813_s14 = smov [#allocation8]   ;;  %s39_s11 = int_to_ptr.vmem [resolvable:$true] %s38_s11 }
  0x1f   :  { %41 = dma.hbm_to_vmem [thread:$0]  %s37_s21, 128, %s39_s11, [#allocation4]  }
  0x20   :  { %s62_s27 = sshll.u32 %s8813_s14, 4  ;;  %s84_s29 = sshll.u32 %s9401_s4, 4  ;;  %s63_s27 = int_to_ptr.vmem [resolvable:$true] %s62_s27  ;;  %s85_s29 = int_to_ptr.hbm [resolvable:$true] %s84_s29 }
  0x21   :  { %65 = dma.hbm_to_vmem [thread:$0]  %s61_s3, 96, %s63_s27, [#allocation7]  }
  0x22   :  { %s108_s24 = sshll.u32 %s9403_s6, 4  ;;  %s8814_s5 = smov [#allocation11]   ;;  %s109_s24 = int_to_ptr.hbm [resolvable:$true] %s108_s24 }
  0x23   :  { %s86_s2 = sshll.u32 %s8814_s5, 4  ;;  %s8815_s30 = smov [#allocation14]   ;;  %s87_s2 = int_to_ptr.vmem [resolvable:$true] %s86_s2 }
  0x24   :  { %89 = dma.hbm_to_vmem [thread:$0]  %s85_s29, 128, %s87_s2, [#allocation10]  }
  0x25   :  { %s110_s16 = sshll.u32 %s8815_s30, 4  ;;  %s132_s7 = sshll.u32 %s9405_s8, 4  ;;  %s111_s16 = int_to_ptr.vmem [resolvable:$true] %s110_s16  ;;  %s133_s7 = int_to_ptr.hbm [resolvable:$true] %s132_s7 }
  0x26   :  { %113 = dma.hbm_to_vmem [thread:$0]  %s109_s24, 16, %s111_s16, [#allocation13]  }
  0x27   :  { %s156_s19 = sshll.u32 %s9407_s10, 4  ;;  %s8816_s20 = smov [#allocation17]   ;;  %s157_s19 = int_to_ptr.hbm [resolvable:$true] %s156_s19 }
  0x28   :  { %s134_s6 = sshll.u32 %s8816_s20, 4  ;;  %s8817_s21 = smov [#allocation20]   ;;  %s135_s6 = int_to_ptr.vmem [resolvable:$true] %s134_s6 }
  0x29   :  { %137 = dma.hbm_to_vmem [thread:$0]  %s133_s7, 16, %s135_s6, [#allocation16]  }
  0x2a   :  { %s158_s9 = sshll.u32 %s8817_s21, 4  ;;  %s180_s25 = sshll.u32 %s9409_s12, 4  ;;  %s159_s9 = int_to_ptr.vmem [resolvable:$true] %s158_s9  ;;  %s181_s25 = int_to_ptr.hbm [resolvable:$true] %s180_s25 }
  0x2b   :  { %161 = dma.hbm_to_vmem [thread:$0]  %s157_s19, 16, %s159_s9, [#allocation19]  }
  0x2c   :  { %s191_s14 = sshll.u32 %s9410_s13, 4  ;;  %s8818_s27 = smov [#allocation23]   ;;  %s192_s14 = int_to_ptr.hbm [resolvable:$true] %s191_s14 }
  0x2d   :  { %s182_s10 = sshll.u32 %s8818_s27, 4  ;;  %s8819_s28 = smov [#allocation24]   ;;  %s183_s10 = int_to_ptr.vmem [resolvable:$true] %s182_s10 }
  0x2e   :  { %185 = dma.hbm_to_vmem [thread:$0]  %s181_s25, 16, %s183_s10, [#allocation22]  }
  0x2f   :  { %s193_s26 = sshll.u32 %s8819_s28, 4  ;;  %s194_s26 = int_to_ptr.vmem [resolvable:$true] %s193_s26 }
  0x30   :  { %196 = dma.hbm_to_vmem [thread:$0]  %s192_s14, 16, %s194_s26, [#allocation25]  }
  0x31   :  { %8782 = dma.done.wait [#allocation4], 128  }
  0x32   :  { %8783 = vsyncadd [#allocation4], 4294967168 }
  0x33   :  { %8784 = dma.done.wait [#allocation7], 12384  }
  0x34   :  { %8785 = vsyncadd [#allocation7], 4294954912 }
  0x35   :  { %8786 = dma.done.wait [#allocation10], 49280  }
  0x36   :  { %8787 = vsyncadd [#allocation10], 4294918016 }
  0x37   :  { %8788 = dma.done.wait [#allocation13], 8208  }
  0x38   :  { %8789 = vsyncadd [#allocation13], 4294959088 }
  0x39   :  { %8790 = dma.done.wait [#allocation16], 1040  }
  0x3a   :  { %8791 = vsyncadd [#allocation16], 4294966256 }
  0x3b   :  { %8792 = dma.done.wait [#allocation19], 1040  }
  0x3c   :  { %8793 = vsyncadd [#allocation19], 4294966256 }
  0x3d   :  { %8794 = dma.done.wait [#allocation22], 1040  }
  0x3e   :  { %8795 = vsyncadd [#allocation22], 4294966256 }
  0x3f   :  { %8796 = dma.done.wait [#allocation25], 16  }
  0x40   :  { %8797 = vsyncadd [#allocation25], 4294967280  ;;  %v5667_v1 = vld [vmem:[#allocation6 + $0x150] sm:$0xf]  ;;  %v7827_v2 = vld [vmem:[#allocation6 + $0x164] sm:$0xf0] }
  0x41   :  { %v5859_v3 = vld [vmem:[#allocation6 + $0x2d0] sm:$0xf]  ;;  %v5668_v4 = vor.u32 %v7827_v2, %v5667_v1  ;;  %v7875_v5 = vld [vmem:[#allocation6 + $0x2e4] sm:$0xf0]  ;;  %v7824_v6 = vld [vmem:[#allocation6 + $0x154] sm:$0xf] }
  0x42   :  { %v5669_v7 = vld [vmem:[#allocation6 + $0x168] sm:$0xf0]  ;;  %v5860_v8 = vor.u32 %v7875_v5, %v5859_v3  ;;  %v7872_v10 = vld [vmem:[#allocation6 + $0x2d4] sm:$0xf]  ;;  %v5643_v12 = vld [vmem:[#allocation6 + $0x120] sm:$0xf] }
  0x43   :  { %v5672_v9 = vor.u32 %v7824_v6, %v5669_v7  ;;  %v5861_v11 = vld [vmem:[#allocation6 + $0x2e8] sm:$0xf0]  ;;  %853 = vmatpush.bf16.msra.mxu0 %v5668_v4  ;;  %v7821_v14 = vld [vmem:[#allocation6 + $0x134] sm:$0xf0]  ;;  %v5835_v15 = vld [vmem:[#allocation6 + $0x2a0] sm:$0xf] }
  0x44   :  { %v5864_v13 = vor.u32 %v7872_v10, %v5861_v11  ;;  %v7869_v16 = vld [vmem:[#allocation6 + $0x2b4] sm:$0xf0]  ;;  %866 = vmatpush.bf16.msra.mxu1 %v5860_v8  ;;  %v5644_v17 = vor.u32 %v7821_v14, %v5643_v12  ;;  %v7818_v19 = vld [vmem:[#allocation6 + $0x124] sm:$0xf]  ;;  %v5645_v20 = vld [vmem:[#allocation6 + $0x138] sm:$0xf0] }
  0x45   :  { %879 = vmatpush.bf16.msra.mxu2 %v5672_v9  ;;  %v5836_v18 = vor.u32 %v7869_v16, %v5835_v15  ;;  %v7866_v21 = vld [vmem:[#allocation6 + $0x2a4] sm:$0xf]  ;;  %v5648_v22 = vor.u32 %v7818_v19, %v5645_v20  ;;  %v5837_v23 = vld [vmem:[#allocation6 + $0x2b8] sm:$0xf0]  ;;  %v5619_v24 = vld [vmem:[#allocation6 + $0xf0] sm:$0xf] }
  0x46   :  { %892 = vmatpush.bf16.msra.mxu3 %v5864_v13  ;;  %v7815_v25 = vld [vmem:[#allocation6 + $0x104] sm:$0xf0]  ;;  %v5840_v26 = vor.u32 %v7866_v21, %v5837_v23  ;;  %v5811_v27 = vld [vmem:[#allocation6 + $0x270] sm:$0xf]  ;;  %v7812_v29 = vld [vmem:[#allocation6 + $0xf4] sm:$0xf] }
  0x47   :  { %v7863_v28 = vld [vmem:[#allocation6 + $0x284] sm:$0xf0]  ;;  %854 = vmatpush.bf16.msra.mxu0 %v5644_v17  ;;  %v5620_v30 = vor.u32 %v7815_v25, %v5619_v24  ;;  %v5621_v31 = vld [vmem:[#allocation6 + $0x108] sm:$0xf0]  ;;  %v7860_v32 = vld [vmem:[#allocation6 + $0x274] sm:$0xf] }
  0x48   :  { %v5813_v33 = vld [vmem:[#allocation6 + $0x288] sm:$0xf0]  ;;  %867 = vmatpush.bf16.msra.mxu1 %v5836_v18  ;;  %v5812_v34 = vor.u32 %v7863_v28, %v5811_v27  ;;  %v5624_v35 = vor.u32 %v7812_v29, %v5621_v31  ;;  %v5595_v36 = vld [vmem:[#allocation6 + $0xc0] sm:$0xf]  ;;  %v7809_v37 = vld [vmem:[#allocation6 + $0xd4] sm:$0xf0] }
  0x49   :  { %880 = vmatpush.bf16.msra.mxu2 %v5648_v22  ;;  %v5787_v38 = vld [vmem:[#allocation6 + $0x240] sm:$0xf]  ;;  %v5816_v39 = vor.u32 %v7860_v32, %v5813_v33  ;;  %v7857_v40 = vld [vmem:[#allocation6 + $0x254] sm:$0xf0]  ;;  %v7806_v41 = vld [vmem:[#allocation6 + $0xc4] sm:$0xf]  ;;  %v5596_v45 = vor.u32 %v7809_v37, %v5595_v36 }
  0x4a   :  { %893 = vmatpush.bf16.msra.mxu3 %v5840_v26  ;;  %v5597_v42 = vld [vmem:[#allocation6 + $0xd8] sm:$0xf0]  ;;  %v7854_v43 = vld [vmem:[#allocation6 + $0x244] sm:$0xf]  ;;  %v5788_v46 = vor.u32 %v7857_v40, %v5787_v38  ;;  %v5571_v48 = vld [vmem:[#allocation6 + $0x90] sm:$0xf] }
  0x4b   :  { %v5789_v44 = vld [vmem:[#allocation6 + $0x258] sm:$0xf0]  ;;  %855 = vmatpush.bf16.msra.mxu0 %v5620_v30  ;;  %v5600_v47 = vor.u32 %v7806_v41, %v5597_v42  ;;  %v7803_v49 = vld [vmem:[#allocation6 + $0xa4] sm:$0xf0]  ;;  %v5763_v50 = vld [vmem:[#allocation6 + $0x210] sm:$0xf] }
  0x4c   :  { %868 = vmatpush.bf16.msra.mxu1 %v5812_v34  ;;  %v5792_v51 = vor.u32 %v7854_v43, %v5789_v44  ;;  %v7851_v52 = vld [vmem:[#allocation6 + $0x224] sm:$0xf0]  ;;  %v7800_v53 = vld [vmem:[#allocation6 + $0x94] sm:$0xf]  ;;  %v5573_v54 = vld [vmem:[#allocation6 + $0xa8] sm:$0xf0]  ;;  %v5572_v57 = vor.u32 %v7803_v49, %v5571_v48 }
  0x4d   :  { %881 = vmatpush.bf16.msra.mxu2 %v5624_v35  ;;  %v7848_v55 = vld [vmem:[#allocation6 + $0x214] sm:$0xf]  ;;  %v5765_v56 = vld [vmem:[#allocation6 + $0x228] sm:$0xf0]  ;;  %v5764_v58 = vor.u32 %v7851_v52, %v5763_v50  ;;  %v5576_v59 = vor.u32 %v7800_v53, %v5573_v54  ;;  %v5547_v60 = vld [vmem:[#allocation6 + $0x60] sm:$0xf] }
  0x4e   :  { %894 = vmatpush.bf16.msra.mxu3 %v5816_v39  ;;  %v7797_v61 = vld [vmem:[#allocation6 + $0x74] sm:$0xf0]  ;;  %v5739_v62 = vld [vmem:[#allocation6 + $0x1e0] sm:$0xf]  ;;  %v5768_v63 = vor.u32 %v7848_v55, %v5765_v56  ;;  %v7794_v1 = vld [vmem:[#allocation6 + $0x64] sm:$0xf] }
  0x4f   :  { %856 = vmatpush.bf16.msra.mxu0 %v5596_v45  ;;  %v7845_v0 = vld [vmem:[#allocation6 + $0x1f4] sm:$0xf0]  ;;  %v5549_v2 = vld [vmem:[#allocation6 + $0x78] sm:$0xf0]  ;;  %v7842_v3 = vld [vmem:[#allocation6 + $0x1e4] sm:$0xf]  ;;  %v5548_v5 = vor.u32 %v7797_v61, %v5547_v60 }
  0x50   :  { %869 = vmatpush.bf16.msra.mxu1 %v5788_v46  ;;  %v5741_v4 = vld [vmem:[#allocation6 + $0x1f8] sm:$0xf0]  ;;  %v5740_v6 = vor.u32 %v7845_v0, %v5739_v62  ;;  %v5552_v7 = vor.u32 %v7794_v1, %v5549_v2  ;;  %v5523_v8 = vld [vmem:[#allocation6 + $0x30] sm:$0xf]  ;;  %v7791_v9 = vld [vmem:[#allocation6 + $0x44] sm:$0xf0] }
  0x51   :  { %882 = vmatpush.bf16.msra.mxu2 %v5600_v47  ;;  %v5715_v10 = vld [vmem:[#allocation6 + $0x1b0] sm:$0xf]  ;;  %v5744_v11 = vor.u32 %v7842_v3, %v5741_v4  ;;  %v7839_v12 = vld [vmem:[#allocation6 + $0x1c4] sm:$0xf0]  ;;  %v7788_v13 = vld [vmem:[#allocation6 + $0x34] sm:$0xf]  ;;  %v5524_v17 = vor.u32 %v7791_v9, %v5523_v8 }
  0x52   :  { %895 = vmatpush.bf16.msra.mxu3 %v5792_v51  ;;  %v5525_v14 = vld [vmem:[#allocation6 + $0x48] sm:$0xf0]  ;;  %v7836_v15 = vld [vmem:[#allocation6 + $0x1b4] sm:$0xf]  ;;  %v5499_v18 = vld [vmem:[#allocation6] sm:$0xf]  ;;  %v5716_v21 = vor.u32 %v7839_v12, %v5715_v10 }
  0x53   :  { %857 = vmatpush.bf16.msra.mxu0 %v5572_v57  ;;  %v5717_v16 = vld [vmem:[#allocation6 + $0x1c8] sm:$0xf0]  ;;  %v7785_v19 = vld [vmem:[#allocation6 + $0x14] sm:$0xf0]  ;;  %v5691_v20 = vld [vmem:[#allocation6 + $0x180] sm:$0xf]  ;;  %v5528_v22 = vor.u32 %v7788_v13, %v5525_v14 }
  0x54   :  { %870 = vmatpush.bf16.msra.mxu1 %v5764_v58  ;;  %v7833_v23 = vld [vmem:[#allocation6 + $0x194] sm:$0xf0]  ;;  %v7782_v24 = vld [vmem:[#allocation6 + $0x4] sm:$0xf]  ;;  %v5720_v26 = vor.u32 %v7836_v15, %v5717_v16  ;;  %v5501_v27 = vld [vmem:[#allocation6 + $0x18] sm:$0xf0]  ;;  %v5500_v33 = vor.u32 %v7785_v19, %v5499_v18 }
  0x55   :  { %883 = vmatpush.bf16.msra.mxu2 %v5576_v59  ;;  %v255_v25 = vld [vmem:[#allocation3] sm:$0xff]  ;;  %v7830_v28 = vld [vmem:[#allocation6 + $0x184] sm:$0xf]  ;;  %v7828_v31 = vld [vmem:[#allocation6 + $0x16c] sm:$0xf0]  ;;  %v5692_v38 = vor.u32 %v7833_v23, %v5691_v20  ;;  %v5504_v39 = vor.u32 %v7782_v24, %v5501_v27  ;;  %s8822_s12 = smov [#allocation26]  }
  0x56   :  { %896 = vmatpush.bf16.msra.mxu3 %v5768_v63  ;;  %v5693_v29 = vld [vmem:[#allocation6 + $0x198] sm:$0xf0]  ;;  %v5675_v30 = vld [vmem:[#allocation6 + $0x158] sm:$0xf]  ;;  %v7876_v34 = vld [vmem:[#allocation6 + $0x2ec] sm:$0xf0]  ;;  %v367_v37 = vunpack.c.l.b16 %v255_v25  ;;  %v368_v42 = vunpack.c.h.b16 %v255_v25 }
  0x57   :  { %858 = vmatpush.bf16.msra.mxu0 %v5548_v5  ;;  %v5867_v32 = vld [vmem:[#allocation6 + $0x2d8] sm:$0xf]  ;;  %v7825_v35 = vld [vmem:[#allocation6 + $0x15c] sm:$0xf]  ;;  %v5677_v36 = vld [vmem:[#allocation6 + $0x170] sm:$0xf0]  ;;  %v5696_v43 = vor.u32 %v7830_v28, %v5693_v29  ;;  %v5676_v44 = vor.u32 %v7828_v31, %v5675_v30 }
  0x58   :  { %871 = vmatpush.bf16.msra.mxu1 %v5740_v6  ;;  %v7873_v40 = vld [vmem:[#allocation6 + $0x2dc] sm:$0xf]  ;;  %v5869_v41 = vld [vmem:[#allocation6 + $0x2f0] sm:$0xf0]  ;;  %v5868_v45 = vor.u32 %v7876_v34, %v5867_v32  ;;  %v5680_v46 = vor.u32 %v7825_v35, %v5677_v36  ;;  %v5651_v47 = vld [vmem:[#allocation6 + $0x128] sm:$0xf]  ;;  %v8948_v51 = vpack.c.b16 %v367_v37, %v367_v37  ;;  %v8950_v55 = vpack.c.b16 %v368_v42, %v368_v42 }
  0x59   :  { %884 = vmatpush.bf16.msra.mxu2 %v5552_v7  ;;  %v7822_v48 = vld [vmem:[#allocation6 + $0x13c] sm:$0xf0]  ;;  %v5843_v49 = vld [vmem:[#allocation6 + $0x2a8] sm:$0xf]  ;;  %v5872_v50 = vor.u32 %v7873_v40, %v5869_v41  ;;  %v7819_v53 = vld [vmem:[#allocation6 + $0x12c] sm:$0xf] }
  0x5a   :  { %897 = vmatpush.bf16.msra.mxu3 %v5744_v11  ;;  %v7870_v52 = vld [vmem:[#allocation6 + $0x2bc] sm:$0xf0]  ;;  %v5653_v54 = vld [vmem:[#allocation6 + $0x140] sm:$0xf0]  ;;  %v7867_v56 = vld [vmem:[#allocation6 + $0x2ac] sm:$0xf]  ;;  %v5652_v58 = vor.u32 %v7822_v48, %v5651_v47 }
  0x5b   :  { %859 = vmatpush.bf16.msra.mxu0 %v5524_v17  ;;  %v5845_v57 = vld [vmem:[#allocation6 + $0x2c0] sm:$0xf0]  ;;  %v5844_v59 = vor.u32 %v7870_v52, %v5843_v49  ;;  %v5656_v60 = vor.u32 %v7819_v53, %v5653_v54  ;;  %v5627_v61 = vld [vmem:[#allocation6 + $0xf8] sm:$0xf]  ;;  %v7816_v62 = vld [vmem:[#allocation6 + $0x10c] sm:$0xf0] }
  0x5c   :  { %872 = vmatpush.bf16.msra.mxu1 %v5716_v21  ;;  %v5819_v63 = vld [vmem:[#allocation6 + $0x278] sm:$0xf]  ;;  %v5848_v0 = vor.u32 %v7867_v56, %v5845_v57  ;;  %v7864_v1 = vld [vmem:[#allocation6 + $0x28c] sm:$0xf0]  ;;  %v7813_v2 = vld [vmem:[#allocation6 + $0xfc] sm:$0xf]  ;;  %v5628_v6 = vor.u32 %v7816_v62, %v5627_v61 }
  0x5d   :  { %885 = vmatpush.bf16.msra.mxu2 %v5528_v22  ;;  %v5629_v3 = vld [vmem:[#allocation6 + $0x110] sm:$0xf0]  ;;  %v7861_v4 = vld [vmem:[#allocation6 + $0x27c] sm:$0xf]  ;;  %v5820_v7 = vor.u32 %v7864_v1, %v5819_v63  ;;  %v5603_v9 = vld [vmem:[#allocation6 + $0xc8] sm:$0xf] }
  0x5e   :  { %898 = vmatpush.bf16.msra.mxu3 %v5720_v26  ;;  %v5821_v5 = vld [vmem:[#allocation6 + $0x290] sm:$0xf0]  ;;  %v5632_v8 = vor.u32 %v7813_v2, %v5629_v3  ;;  %v7810_v10 = vld [vmem:[#allocation6 + $0xdc] sm:$0xf0]  ;;  %v5795_v11 = vld [vmem:[#allocation6 + $0x248] sm:$0xf] }
  0x5f   :  { %860 = vmatpush.bf16.msra.mxu0 %v5500_v33  ;;  %v5824_v12 = vor.u32 %v7861_v4, %v5821_v5  ;;  %v7858_v13 = vld [vmem:[#allocation6 + $0x25c] sm:$0xf0]  ;;  %v7807_v14 = vld [vmem:[#allocation6 + $0xcc] sm:$0xf]  ;;  %v5605_v15 = vld [vmem:[#allocation6 + $0xe0] sm:$0xf0]  ;;  %v5604_v18 = vor.u32 %v7810_v10, %v5603_v9 }
  0x60   :  { %873 = vmatpush.bf16.msra.mxu1 %v5692_v38  ;;  %v7855_v16 = vld [vmem:[#allocation6 + $0x24c] sm:$0xf]  ;;  %v5797_v17 = vld [vmem:[#allocation6 + $0x260] sm:$0xf0]  ;;  %v5796_v19 = vor.u32 %v7858_v13, %v5795_v11  ;;  %v5608_v20 = vor.u32 %v7807_v14, %v5605_v15  ;;  %v5579_v21 = vld [vmem:[#allocation6 + $0x98] sm:$0xf] }
  0x61   :  { %886 = vmatpush.bf16.msra.mxu2 %v5504_v39  ;;  %v7804_v22 = vld [vmem:[#allocation6 + $0xac] sm:$0xf0]  ;;  %v5771_v23 = vld [vmem:[#allocation6 + $0x218] sm:$0xf]  ;;  %v5800_v24 = vor.u32 %v7855_v16, %v5797_v17  ;;  %v7801_v26 = vld [vmem:[#allocation6 + $0x9c] sm:$0xf] }
  0x62   :  { %899 = vmatpush.bf16.msra.mxu3 %v5696_v43  ;;  %861 = vmatmul.bf16.vlgmr.msra.gmra.mxu0 %v8948_v51  ;;  %v7852_v25 = vld [vmem:[#allocation6 + $0x22c] sm:$0xf0]  ;;  %v5581_v27 = vld [vmem:[#allocation6 + $0xb0] sm:$0xf0]  ;;  %v7849_v28 = vld [vmem:[#allocation6 + $0x21c] sm:$0xf]  ;;  %v5580_v30 = vor.u32 %v7804_v22, %v5579_v21 }
  0x63   :  { %905 = vmatpush.bf16.msrb.mxu0 %v5676_v44  ;;  %874 = vmatmul.bf16.vlgmr.msra.gmra.mxu1 %v8950_v55  ;;  %v5773_v29 = vld [vmem:[#allocation6 + $0x230] sm:$0xf0]  ;;  %v5772_v31 = vor.u32 %v7852_v25, %v5771_v23  ;;  %v5584_v32 = vor.u32 %v7801_v26, %v5581_v27  ;;  %v5555_v33 = vld [vmem:[#allocation6 + $0x68] sm:$0xf]  ;;  %v7798_v34 = vld [vmem:[#allocation6 + $0x7c] sm:$0xf0] }
  0x64   :  { %918 = vmatpush.bf16.msrb.mxu1 %v5868_v45  ;;  %887 = vmatmul.bf16.vlgmr.msra.gmra.mxu2 %v8948_v51  ;;  %v5747_v35 = vld [vmem:[#allocation6 + $0x1e8] sm:$0xf]  ;;  %v5776_v36 = vor.u32 %v7849_v28, %v5773_v29  ;;  %v7846_v37 = vld [vmem:[#allocation6 + $0x1fc] sm:$0xf0]  ;;  %v7795_v38 = vld [vmem:[#allocation6 + $0x6c] sm:$0xf]  ;;  %v5556_v42 = vor.u32 %v7798_v34, %v5555_v33 }
  0x65   :  { %931 = vmatpush.bf16.msrb.mxu2 %v5680_v46  ;;  %900 = vmatmul.bf16.vlgmr.msra.gmra.mxu3 %v8950_v55  ;;  %v5557_v39 = vld [vmem:[#allocation6 + $0x80] sm:$0xf0]  ;;  %v7843_v40 = vld [vmem:[#allocation6 + $0x1ec] sm:$0xf]  ;;  %v5748_v43 = vor.u32 %v7846_v37, %v5747_v35  ;;  %v5531_v45 = vld [vmem:[#allocation6 + $0x38] sm:$0xf] }
  0x66   :  { %944 = vmatpush.bf16.msrb.mxu3 %v5872_v50  ;;  %v5749_v41 = vld [vmem:[#allocation6 + $0x200] sm:$0xf0]  ;;  %v5560_v44 = vor.u32 %v7795_v38, %v5557_v39  ;;  %v7792_v46 = vld [vmem:[#allocation6 + $0x4c] sm:$0xf0]  ;;  %v5723_v47 = vld [vmem:[#allocation6 + $0x1b8] sm:$0xf] }
  0x67   :  { %906 = vmatpush.bf16.msrb.mxu0 %v5652_v58  ;;  %v5752_v48 = vor.u32 %v7843_v40, %v5749_v41  ;;  %v7840_v49 = vld [vmem:[#allocation6 + $0x1cc] sm:$0xf0]  ;;  %v7789_v50 = vld [vmem:[#allocation6 + $0x3c] sm:$0xf]  ;;  %v5533_v52 = vld [vmem:[#allocation6 + $0x50] sm:$0xf0]  ;;  %v5532_v56 = vor.u32 %v7792_v46, %v5531_v45 }
  0x68   :  { %919 = vmatpush.bf16.msrb.mxu1 %v5844_v59  ;;  %v7837_v53 = vld [vmem:[#allocation6 + $0x1bc] sm:$0xf]  ;;  %v5725_v54 = vld [vmem:[#allocation6 + $0x1d0] sm:$0xf0]  ;;  %v5507_v57 = vld [vmem:[#allocation6 + $0x8] sm:$0xf]  ;;  %v5724_v59 = vor.u32 %v7840_v49, %v5723_v47 }
  0x69   :  { %932 = vmatpush.bf16.msrb.mxu2 %v5656_v60  ;;  %v7786_v58 = vld [vmem:[#allocation6 + $0x1c] sm:$0xf0]  ;;  %v5536_v60 = vor.u32 %v7789_v50, %v5533_v52  ;;  %v5699_v61 = vld [vmem:[#allocation6 + $0x188] sm:$0xf]  ;;  %v7783_v63 = vld [vmem:[#allocation6 + $0xc] sm:$0xf] }
  0x6a   :  { %945 = vmatpush.bf16.msrb.mxu3 %v5848_v0  ;;  %v7834_v62 = vld [vmem:[#allocation6 + $0x19c] sm:$0xf0]  ;;  %v5728_v0 = vor.u32 %v7837_v53, %v5725_v54  ;;  %v5509_v1 = vld [vmem:[#allocation6 + $0x20] sm:$0xf0]  ;;  %v7831_v2 = vld [vmem:[#allocation6 + $0x18c] sm:$0xf] }
  0x6b   :  { %907 = vmatpush.bf16.msrb.mxu0 %v5628_v6  ;;  %v5701_v3 = vld [vmem:[#allocation6 + $0x1a0] sm:$0xf0]  ;;  %v5683_v4 = vld [vmem:[#allocation6 + $0x160] sm:$0xf]  ;;  %v7829_v5 = vld [vmem:[#allocation6 + $0x174] sm:$0xf0]  ;;  %v5700_v11 = vor.u32 %v7834_v62, %v5699_v61 }
  0x6c   :  { %920 = vmatpush.bf16.msrb.mxu1 %v5820_v7  ;;  %v5875_v6 = vld [vmem:[#allocation6 + $0x2e0] sm:$0xf]  ;;  %v5508_v7 = vor.u32 %v7786_v58, %v5507_v57  ;;  %v7826_v9 = vld [vmem:[#allocation6 + $0x164] sm:$0xf]  ;;  %v5685_v10 = vld [vmem:[#allocation6 + $0x178] sm:$0xf0]  ;;  %v5704_v15 = vor.u32 %v7831_v2, %v5701_v3  ;;  %v5684_v16 = vor.u32 %v7829_v5, %v5683_v4 }
  0x6d   :  { %933 = vmatpush.bf16.msrb.mxu2 %v5632_v8  ;;  %v7877_v8 = vld [vmem:[#allocation6 + $0x2f4] sm:$0xf0]  ;;  %v7874_v13 = vld [vmem:[#allocation6 + $0x2e4] sm:$0xf]  ;;  %v5877_v14 = vld [vmem:[#allocation6 + $0x2f8] sm:$0xf0] }
  0x6e   :  { %946 = vmatpush.bf16.msrb.mxu3 %v5824_v12  ;;  %v5512_v12 = vor.u32 %v7783_v63, %v5509_v1  ;;  %v5876_v17 = vor.u32 %v7877_v8, %v5875_v6  ;;  %v5851_v21 = vld [vmem:[#allocation6 + $0x2b0] sm:$0xf]  ;;  %v5880_v22 = vor.u32 %v7874_v13, %v5877_v14  ;;  %v7871_v23 = vld [vmem:[#allocation6 + $0x2c4] sm:$0xf0]  ;;  %v5661_v25 = vld [vmem:[#allocation6 + $0x148] sm:$0xf0] }
  0x6f   :  { %908 = vmatpush.bf16.msrb.mxu0 %v5604_v18  ;;  %v5688_v18 = vor.u32 %v7826_v9, %v5685_v10  ;;  %v7868_v26 = vld [vmem:[#allocation6 + $0x2b4] sm:$0xf]  ;;  %v5853_v27 = vld [vmem:[#allocation6 + $0x2c8] sm:$0xf0]  ;;  %v5635_v29 = vld [vmem:[#allocation6 + $0x100] sm:$0xf] }
  0x70   :  { %921 = vmatpush.bf16.msrb.mxu1 %v5796_v19  ;;  %v5659_v19 = vld [vmem:[#allocation6 + $0x130] sm:$0xf]  ;;  %v7865_v34 = vld [vmem:[#allocation6 + $0x294] sm:$0xf0]  ;;  %v7814_v35 = vld [vmem:[#allocation6 + $0x104] sm:$0xf]  ;;  %v5856_v37 = vor.u32 %v7868_v26, %v5853_v27 }
  0x71   :  { %934 = vmatpush.bf16.msrb.mxu2 %v5608_v20  ;;  %v7823_v20 = vld [vmem:[#allocation6 + $0x144] sm:$0xf0]  ;;  %v7862_v38 = vld [vmem:[#allocation6 + $0x284] sm:$0xf]  ;;  %v5829_v39 = vld [vmem:[#allocation6 + $0x298] sm:$0xf0] }
  0x72   :  { %947 = vmatpush.bf16.msrb.mxu3 %v5800_v24  ;;  %v7820_v24 = vld [vmem:[#allocation6 + $0x134] sm:$0xf]  ;;  %v5660_v28 = vor.u32 %v7823_v20, %v5659_v19  ;;  %v5803_v45 = vld [vmem:[#allocation6 + $0x250] sm:$0xf]  ;;  %v5832_v46 = vor.u32 %v7862_v38, %v5829_v39  ;;  %v7859_v47 = vld [vmem:[#allocation6 + $0x264] sm:$0xf0] }
  0x73   :  { %909 = vmatpush.bf16.msrb.mxu0 %v5580_v30  ;;  %v7817_v30 = vld [vmem:[#allocation6 + $0x114] sm:$0xf0]  ;;  %v5664_v33 = vor.u32 %v7820_v24, %v5661_v25  ;;  %v5613_v49 = vld [vmem:[#allocation6 + $0xe8] sm:$0xf0]  ;;  %v7856_v50 = vld [vmem:[#allocation6 + $0x254] sm:$0xf]  ;;  %v5804_v54 = vor.u32 %v7859_v47, %v5803_v45 }
  0x74   :  { %922 = vmatpush.bf16.msrb.mxu1 %v5772_v31  ;;  %v5827_v31 = vld [vmem:[#allocation6 + $0x280] sm:$0xf]  ;;  %v5636_v40 = vor.u32 %v7817_v30, %v5635_v29  ;;  %v5805_v52 = vld [vmem:[#allocation6 + $0x268] sm:$0xf0]  ;;  %v7805_v58 = vld [vmem:[#allocation6 + $0xb4] sm:$0xf0] }
  0x75   :  { %935 = vmatpush.bf16.msrb.mxu2 %v5584_v32  ;;  %v5852_v32 = vor.u32 %v7871_v23, %v5851_v21  ;;  %v5828_v41 = vor.u32 %v7865_v34, %v5827_v31  ;;  %v5587_v57 = vld [vmem:[#allocation6 + $0xa0] sm:$0xf]  ;;  %v7853_v61 = vld [vmem:[#allocation6 + $0x234] sm:$0xf0]  ;;  %v7802_v62 = vld [vmem:[#allocation6 + $0xa4] sm:$0xf] }
  0x76   :  { %948 = vmatpush.bf16.msrb.mxu3 %v5776_v36  ;;  %v5637_v36 = vld [vmem:[#allocation6 + $0x118] sm:$0xf0]  ;;  %v5588_v2 = vor.u32 %v7805_v58, %v5587_v57  ;;  %v5563_v5 = vld [vmem:[#allocation6 + $0x70] sm:$0xf]  ;;  %v7799_v6 = vld [vmem:[#allocation6 + $0x84] sm:$0xf0] }
  0x77   :  { %910 = vmatpush.bf16.msrb.mxu0 %v5556_v42  ;;  %v5640_v42 = vor.u32 %v7814_v35, %v5637_v36  ;;  %v5589_v63 = vld [vmem:[#allocation6 + $0xb8] sm:$0xf0]  ;;  %v7847_v9 = vld [vmem:[#allocation6 + $0x204] sm:$0xf0]  ;;  %v7796_v10 = vld [vmem:[#allocation6 + $0x74] sm:$0xf]  ;;  %v5564_v14 = vor.u32 %v7799_v6, %v5563_v5 }
  0x78   :  { %923 = vmatpush.bf16.msrb.mxu1 %v5748_v43  ;;  %v5611_v43 = vld [vmem:[#allocation6 + $0xd0] sm:$0xf]  ;;  %v5781_v1 = vld [vmem:[#allocation6 + $0x238] sm:$0xf0]  ;;  %v5592_v4 = vor.u32 %v7802_v62, %v5589_v63  ;;  %v5757_v13 = vld [vmem:[#allocation6 + $0x208] sm:$0xf0] }
  0x79   :  { %936 = vmatpush.bf16.msrb.mxu2 %v5560_v44  ;;  %v7811_v44 = vld [vmem:[#allocation6 + $0xe4] sm:$0xf0]  ;;  %v5731_v19 = vld [vmem:[#allocation6 + $0x1c0] sm:$0xf]  ;;  %v7841_v21 = vld [vmem:[#allocation6 + $0x1d4] sm:$0xf0] }
  0x7a   :  { %949 = vmatpush.bf16.msrb.mxu3 %v5752_v48  ;;  %v7808_v48 = vld [vmem:[#allocation6 + $0xd4] sm:$0xf]  ;;  %v5612_v53 = vor.u32 %v7811_v44, %v5611_v43  ;;  %v5541_v23 = vld [vmem:[#allocation6 + $0x58] sm:$0xf0]  ;;  %v7838_v24 = vld [vmem:[#allocation6 + $0x1c4] sm:$0xf] }
  0x7b   :  { %911 = vmatpush.bf16.msrb.mxu0 %v5532_v56  ;;  %v5616_v56 = vor.u32 %v7808_v48, %v5613_v49  ;;  %v5733_v25 = vld [vmem:[#allocation6 + $0x1d8] sm:$0xf0]  ;;  %v5515_v27 = vld [vmem:[#allocation6 + $0x10] sm:$0xf]  ;;  %v7787_v30 = vld [vmem:[#allocation6 + $0x24] sm:$0xf0] }
  0x7c   :  { %924 = vmatpush.bf16.msrb.mxu1 %v5724_v59  ;;  %v5779_v59 = vld [vmem:[#allocation6 + $0x220] sm:$0xf]  ;;  %v5707_v31 = vld [vmem:[#allocation6 + $0x190] sm:$0xf]  ;;  %v7784_v34 = vld [vmem:[#allocation6 + $0x14] sm:$0xf] }
  0x7d   :  { %937 = vmatpush.bf16.msrb.mxu2 %v5536_v60  ;;  %v5808_v60 = vor.u32 %v7856_v50, %v5805_v52  ;;  %v5780_v3 = vor.u32 %v7853_v61, %v5779_v59  ;;  %v5517_v35 = vld [vmem:[#allocation6 + $0x28] sm:$0xf0]  ;;  %v7832_v36 = vld [vmem:[#allocation6 + $0x194] sm:$0xf]  ;;  %v6107_v38 = vld [vmem:[#allocation9 + $0x1c0] sm:$0xf] }
  0x7e   :  { %950 = vmatpush.bf16.msrb.mxu3 %v5728_v0  ;;  %v7850_v0 = vld [vmem:[#allocation6 + $0x224] sm:$0xf]  ;;  %s5478_s13 = sshll.u32 %s8822_s12, 4  ;;  %s5480_s22 = sshll.u32 %s9412_s15, 4  ;;  %s5479_s13 = int_to_ptr.vmem [resolvable:$true] %s5478_s13  ;;  %s5481_s22 = int_to_ptr.hbm [resolvable:$true] %s5480_s22 }
  0x7f   :  { %912 = vmatpush.bf16.msrb.mxu0 %v5508_v7  ;;  %v5755_v7 = vld [vmem:[#allocation6 + $0x1f0] sm:$0xf]  ;;  %v5784_v8 = vor.u32 %v7850_v0, %v5781_v1  ;;  %v7938_v39 = vld [vmem:[#allocation9 + $0x1dc] sm:$0xf0] }
  0x80   :  { %925 = vmatpush.bf16.msrb.mxu1 %v5700_v11  ;;  %v5565_v11 = vld [vmem:[#allocation6 + $0x88] sm:$0xf0]  ;;  %v6108_v44 = vor.u32 %v7938_v39, %v6107_v38  ;;  %v6619_v45 = vld [vmem:[#allocation9 + $0x5c0] sm:$0xf] }
  0x81   :  { %938 = vmatpush.bf16.msrb.mxu2 %v5512_v12  ;;  %v7844_v12 = vld [vmem:[#allocation6 + $0x1f4] sm:$0xf]  ;;  %v6075_v48 = vld [vmem:[#allocation9 + $0x180] sm:$0xf] }
  0x82   :  { %951 = vmatpush.bf16.msrb.mxu3 %v5704_v15  ;;  %913 = vmatmul.bf16.vlgmr.msrb.gmra.mxu0 %v8948_v51  ;;  %v5756_v15 = vor.u32 %v7847_v9, %v5755_v7  ;;  %v5760_v20 = vor.u32 %v7844_v12, %v5757_v13  ;;  %v7930_v49 = vld [vmem:[#allocation9 + $0x19c] sm:$0xf0] }
  0x83   :  { %957 = vmatpush.bf16.msra.mxu0 %v5684_v16  ;;  %926 = vmatmul.bf16.vlgmr.msrb.gmra.mxu1 %v8950_v55  ;;  %v5568_v16 = vor.u32 %v7796_v10, %v5565_v11  ;;  %v6076_v50 = vor.u32 %v7930_v49, %v6075_v48  ;;  %v6363_v52 = vld [vmem:[#allocation9 + $0x3c0] sm:$0xf] }
  0x84   :  { %970 = vmatpush.bf16.msra.mxu1 %v5876_v17  ;;  %939 = vmatmul.bf16.vlgmr.msrb.gmra.mxu2 %v8948_v51  ;;  %v5539_v17 = vld [vmem:[#allocation6 + $0x40] sm:$0xf]  ;;  %v8058_v57 = vld [vmem:[#allocation9 + $0x59c] sm:$0xf0] }
  0x85   :  { %983 = vmatpush.bf16.msra.mxu2 %v5688_v18  ;;  %952 = vmatmul.bf16.vlgmr.msrb.gmra.mxu3 %v8950_v55  ;;  %v7793_v18 = vld [vmem:[#allocation6 + $0x54] sm:$0xf0]  ;;  %v6043_v59 = vld [vmem:[#allocation9 + $0x140] sm:$0xf] }
  0x86   :  { %996 = vmatpush.bf16.msra.mxu3 %v5880_v22  ;;  %v7790_v22 = vld [vmem:[#allocation6 + $0x44] sm:$0xf]  ;;  %v5540_v26 = vor.u32 %v7793_v18, %v5539_v17 }
  0x87   :  { %958 = vmatpush.bf16.msra.mxu0 %v5660_v28  ;;  %v5732_v28 = vor.u32 %v7841_v21, %v5731_v19  ;;  %v5544_v29 = vor.u32 %v7790_v22, %v5541_v23  ;;  %v6875_v61 = vld [vmem:[#allocation9 + $0x7c0] sm:$0xf] }
  0x88   :  { %971 = vmatpush.bf16.msra.mxu1 %v5852_v32  ;;  %v7835_v32 = vld [vmem:[#allocation6 + $0x1a4] sm:$0xf0] }
  0x89   :  { %984 = vmatpush.bf16.msra.mxu2 %v5664_v33  ;;  %v5736_v33 = vor.u32 %v7838_v24, %v5733_v25  ;;  %v6331_v63 = vld [vmem:[#allocation9 + $0x380] sm:$0xf] }
  0x8a   :  { %997 = vmatpush.bf16.msra.mxu3 %v5856_v37  ;;  %v5709_v37 = vld [vmem:[#allocation6 + $0x1a8] sm:$0xf0]  ;;  %v7994_v0 = vld [vmem:[#allocation9 + $0x39c] sm:$0xf0] }
  0x8b   :  { %959 = vmatpush.bf16.msra.mxu0 %v5636_v40  ;;  %v5516_v40 = vor.u32 %v7787_v30, %v5515_v27  ;;  %v5712_v43 = vor.u32 %v7832_v36, %v5709_v37  ;;  %v6555_v1 = vld [vmem:[#allocation9 + $0x540] sm:$0xf] }
  0x8c   :  { %972 = vmatpush.bf16.msra.mxu1 %v5828_v41  ;;  %v5708_v41 = vor.u32 %v7835_v32, %v5707_v31  ;;  %v6011_v5 = vld [vmem:[#allocation9 + $0x100] sm:$0xf] }
  0x8d   :  { %985 = vmatpush.bf16.msra.mxu2 %v5640_v42  ;;  %v5520_v42 = vor.u32 %v7784_v34, %v5517_v35  ;;  %v7914_v6 = vld [vmem:[#allocation9 + $0x11c] sm:$0xf0] }
  0x8e   :  { %998 = vmatpush.bf16.msra.mxu3 %v5832_v46  ;;  %v8066_v46 = vld [vmem:[#allocation9 + $0x5dc] sm:$0xf0] }
  0x8f   :  { %960 = vmatpush.bf16.msra.mxu0 %v5612_v53  ;;  %v6620_v47 = vor.u32 %v8066_v46, %v6619_v45  ;;  %v8002_v53 = vld [vmem:[#allocation9 + $0x3dc] sm:$0xf0] }
  0x90   :  { %973 = vmatpush.bf16.msra.mxu1 %v5804_v54  ;;  %v6587_v54 = vld [vmem:[#allocation9 + $0x580] sm:$0xf] }
  0x91   :  { %986 = vmatpush.bf16.msra.mxu2 %v5616_v56  ;;  %v6364_v56 = vor.u32 %v8002_v53, %v6363_v52  ;;  %v6588_v58 = vor.u32 %v8058_v57, %v6587_v54  ;;  %v6843_v7 = vld [vmem:[#allocation9 + $0x780] sm:$0xf] }
  0x92   :  { %999 = vmatpush.bf16.msra.mxu3 %v5808_v60  ;;  %v7922_v60 = vld [vmem:[#allocation9 + $0x15c] sm:$0xf0] }
  0x93   :  { %961 = vmatpush.bf16.msra.mxu0 %v5588_v2  ;;  %v6332_v2 = vor.u32 %v7994_v0, %v6331_v63  ;;  %v8122_v9 = vld [vmem:[#allocation9 + $0x79c] sm:$0xf0] }
  0x94   :  { %974 = vmatpush.bf16.msra.mxu1 %v5780_v3  ;;  %v8050_v3 = vld [vmem:[#allocation9 + $0x55c] sm:$0xf0]  ;;  %v6844_v10 = vor.u32 %v8122_v9, %v6843_v7  ;;  %v6109_v7 = vld [vmem:[#allocation9 + $0x1e0] sm:$0xf0] }
  0x95   :  { %987 = vmatpush.bf16.msra.mxu2 %v5592_v4  ;;  %v6556_v4 = vor.u32 %v8050_v3, %v6555_v1  ;;  %v6299_v11 = vld [vmem:[#allocation9 + $0x340] sm:$0xf] }
  0x96   :  { %1000 = vmatpush.bf16.msra.mxu3 %v5784_v8  ;;  %v6012_v8 = vor.u32 %v7914_v6, %v6011_v5  ;;  %v7986_v12 = vld [vmem:[#allocation9 + $0x35c] sm:$0xf0]  ;;  %v7934_v6 = vld [vmem:[#allocation9 + $0x1c4] sm:$0xf] }
  0x97   :  { %962 = vmatpush.bf16.msra.mxu0 %v5564_v14  ;;  %v6523_v13 = vld [vmem:[#allocation9 + $0x500] sm:$0xf]  ;;  %v6300_v14 = vor.u32 %v7986_v12, %v6299_v11  ;;  %v6112_v9 = vor.u32 %v7934_v6, %v6109_v7  ;;  %v6301_v6 = vld [vmem:[#allocation9 + $0x360] sm:$0xf0] }
  0x98   :  { %975 = vmatpush.bf16.msra.mxu1 %v5756_v15  ;;  %v8042_v15 = vld [vmem:[#allocation9 + $0x51c] sm:$0xf0] }
  0x99   :  { %988 = vmatpush.bf16.msra.mxu2 %v5568_v16  ;;  %v6524_v16 = vor.u32 %v8042_v15, %v6523_v13  ;;  %v5979_v17 = vld [vmem:[#allocation9 + $0xc0] sm:$0xf] }
  0x9a   :  { %1001 = vmatpush.bf16.msra.mxu3 %v5760_v20  ;;  %v7906_v18 = vld [vmem:[#allocation9 + $0xdc] sm:$0xf0] }
  0x9b   :  { %963 = vmatpush.bf16.msra.mxu0 %v5540_v26  ;;  %v6811_v19 = vld [vmem:[#allocation9 + $0x740] sm:$0xf]  ;;  %v5980_v20 = vor.u32 %v7906_v18, %v5979_v17 }
  0x9c   :  { %976 = vmatpush.bf16.msra.mxu1 %v5732_v28  ;;  %v8114_v21 = vld [vmem:[#allocation9 + $0x75c] sm:$0xf0] }
  0x9d   :  { %989 = vmatpush.bf16.msra.mxu2 %v5544_v29  ;;  %v6812_v22 = vor.u32 %v8114_v21, %v6811_v19  ;;  %v6267_v23 = vld [vmem:[#allocation9 + $0x300] sm:$0xf]  ;;  %v7926_v21 = vld [vmem:[#allocation9 + $0x184] sm:$0xf] }
  0x9e   :  { %1002 = vmatpush.bf16.msra.mxu3 %v5736_v33  ;;  %v7978_v24 = vld [vmem:[#allocation9 + $0x31c] sm:$0xf0] }
  0x9f   :  { %964 = vmatpush.bf16.msra.mxu0 %v5516_v40  ;;  %v6491_v25 = vld [vmem:[#allocation9 + $0x4c0] sm:$0xf]  ;;  %v6268_v26 = vor.u32 %v7978_v24, %v6267_v23  ;;  %v6077_v24 = vld [vmem:[#allocation9 + $0x1a0] sm:$0xf0] }
  0xa0   :  { %977 = vmatpush.bf16.msra.mxu1 %v5708_v41  ;;  %v8034_v27 = vld [vmem:[#allocation9 + $0x4dc] sm:$0xf0] }
  0xa1   :  { %990 = vmatpush.bf16.msra.mxu2 %v5520_v42  ;;  %v6492_v28 = vor.u32 %v8034_v27, %v6491_v25  ;;  %v5947_v29 = vld [vmem:[#allocation9 + $0x80] sm:$0xf]  ;;  %v6080_v27 = vor.u32 %v7926_v21, %v6077_v24  ;;  %v7974_v21 = vld [vmem:[#allocation9 + $0x304] sm:$0xf] }
  0xa2   :  { %1003 = vmatpush.bf16.msra.mxu3 %v5712_v43  ;;  %965 = vmatmul.bf16.vlgmr.msra.gmra.mxu0 %v8948_v51  ;;  %v7898_v30 = vld [vmem:[#allocation9 + $0x9c] sm:$0xf0] }
  0xa3   :  { %3391 = vmatpush.bf16.msrb.mxu0 %v6108_v44  ;;  %978 = vmatmul.bf16.vlgmr.msra.gmra.mxu1 %v8950_v55  ;;  %v6779_v31 = vld [vmem:[#allocation9 + $0x700] sm:$0xf]  ;;  %v5948_v32 = vor.u32 %v7898_v30, %v5947_v29  ;;  %v8964_v44 = vld [vmem:[#allocation8] sm:$0x3f] }
  0xa4   :  { %991 = vmatmul.bf16.vlgmr.msra.gmra.mxu2 %v8948_v51  ;;  %3404 = vmatpush.bf16.msrb.mxu1 %v6364_v56  ;;  %v6044_v51 = vor.u32 %v7922_v60, %v6043_v59  ;;  %v8106_v33 = vld [vmem:[#allocation9 + $0x71c] sm:$0xf0]  ;;  %v354_v59 = vperm.slane %v8964_v44, 0 }
  0xa5   :  { %1004 = vmatmul.bf16.vlgmr.msra.gmra.mxu3 %v8950_v55  ;;  %3417 = vmatpush.bf16.msrb.mxu2 %v6620_v47  ;;  %v8130_v55 = vld [vmem:[#allocation9 + $0x7dc] sm:$0xf0]  ;;  %v6780_v34 = vor.u32 %v8106_v33, %v6779_v31  ;;  %v7998_v31 = vld [vmem:[#allocation9 + $0x3c4] sm:$0xf] }
  0xa6   :  { %v6876_v62 = vor.u32 %v8130_v55, %v6875_v61  ;;  %v6235_v35 = vld [vmem:[#allocation9 + $0x2c0] sm:$0xf] }
  0xa7   :  { %3392 = vmatpush.bf16.msrb.mxu0 %v6076_v50  ;;  %v7970_v36 = vld [vmem:[#allocation9 + $0x2dc] sm:$0xf0] }
  0xa8   :  { %3430 = vmatpush.bf16.msrb.mxu3 %v6876_v62  ;;  %3405 = vmatpush.bf16.msrb.mxu1 %v6332_v2  ;;  %v6459_v37 = vld [vmem:[#allocation9 + $0x480] sm:$0xf]  ;;  %v6236_v38 = vor.u32 %v7970_v36, %v6235_v35 }
  0xa9   :  { %3418 = vmatpush.bf16.msrb.mxu2 %v6588_v58  ;;  %v8026_v39 = vld [vmem:[#allocation9 + $0x49c] sm:$0xf0] }
  0xaa   :  { %v6460_v40 = vor.u32 %v8026_v39, %v6459_v37  ;;  %v5915_v41 = vld [vmem:[#allocation9 + $0x40] sm:$0xf] }
  0xab   :  { %3393 = vmatpush.bf16.msrb.mxu0 %v6044_v51  ;;  %v7890_v42 = vld [vmem:[#allocation9 + $0x5c] sm:$0xf0] }
  0xac   :  { %3431 = vmatpush.bf16.msrb.mxu3 %v6844_v10  ;;  %3406 = vmatpush.bf16.msrb.mxu1 %v6300_v14  ;;  %v6747_v43 = vld [vmem:[#allocation9 + $0x6c0] sm:$0xf]  ;;  %v5916_v45 = vor.u32 %v7890_v42, %v5915_v41  ;;  %v355_v14 = vperm.slane %v8964_v44, 1  ;;  %v6045_v42 = vld [vmem:[#allocation9 + $0x160] sm:$0xf0] }
  0xad   :  { %3419 = vmatpush.bf16.msrb.mxu2 %v6556_v4  ;;  %v8098_v46 = vld [vmem:[#allocation9 + $0x6dc] sm:$0xf0] }
  0xae   :  { %v6748_v47 = vor.u32 %v8098_v46, %v6747_v43  ;;  %v6203_v48 = vld [vmem:[#allocation9 + $0x280] sm:$0xf] }
  0xaf   :  { %3394 = vmatpush.bf16.msrb.mxu0 %v6012_v8  ;;  %v7962_v49 = vld [vmem:[#allocation9 + $0x29c] sm:$0xf0] }
  0xb0   :  { %3432 = vmatpush.bf16.msrb.mxu3 %v6812_v22  ;;  %3407 = vmatpush.bf16.msrb.mxu1 %v6268_v26  ;;  %v6427_v50 = vld [vmem:[#allocation9 + $0x440] sm:$0xf]  ;;  %v6204_v52 = vor.u32 %v7962_v49, %v6203_v48 }
  0xb1   :  { %3420 = vmatpush.bf16.msrb.mxu2 %v6524_v16  ;;  %v8018_v53 = vld [vmem:[#allocation9 + $0x45c] sm:$0xf0] }
  0xb2   :  { %v6428_v54 = vor.u32 %v8018_v53, %v6427_v50  ;;  %v5883_v56 = vld [vmem:[#allocation9] sm:$0xf]  ;;  %v7990_v50 = vld [vmem:[#allocation9 + $0x384] sm:$0xf] }
  0xb3   :  { %3395 = vmatpush.bf16.msrb.mxu0 %v5980_v20  ;;  %v7882_v57 = vld [vmem:[#allocation9 + $0x1c] sm:$0xf0] }
  0xb4   :  { %3433 = vmatpush.bf16.msrb.mxu3 %v6780_v34  ;;  %3408 = vmatpush.bf16.msrb.mxu1 %v6236_v38  ;;  %v6715_v58 = vld [vmem:[#allocation9 + $0x680] sm:$0xf]  ;;  %v5884_v60 = vor.u32 %v7882_v57, %v5883_v56  ;;  %v6365_v34 = vld [vmem:[#allocation9 + $0x3e0] sm:$0xf0] }
  0xb5   :  { %3421 = vmatpush.bf16.msrb.mxu2 %v6492_v28  ;;  %v8090_v61 = vld [vmem:[#allocation9 + $0x69c] sm:$0xf0]  ;;  %v6368_v35 = vor.u32 %v7998_v31, %v6365_v34  ;;  %v7918_v38 = vld [vmem:[#allocation9 + $0x144] sm:$0xf] }
  0xb6   :  { %v6716_v51 = vor.u32 %v8090_v61, %v6715_v58  ;;  %v6171_v55 = vld [vmem:[#allocation9 + $0x240] sm:$0xf]  ;;  %v6333_v56 = vld [vmem:[#allocation9 + $0x3a0] sm:$0xf0] }
  0xb7   :  { %3396 = vmatpush.bf16.msrb.mxu0 %v5948_v32  ;;  %v7954_v62 = vld [vmem:[#allocation9 + $0x25c] sm:$0xf0]  ;;  %v6336_v58 = vor.u32 %v7990_v50, %v6333_v56  ;;  %v7910_v61 = vld [vmem:[#allocation9 + $0x104] sm:$0xf] }
  0xb8   :  { %3434 = vmatpush.bf16.msrb.mxu3 %v6748_v47  ;;  %3409 = vmatpush.bf16.msrb.mxu1 %v6204_v52  ;;  %v6395_v63 = vld [vmem:[#allocation9 + $0x400] sm:$0xf]  ;;  %v6172_v0 = vor.u32 %v7954_v62, %v6171_v55  ;;  %v6048_v47 = vor.u32 %v7918_v38, %v6045_v42  ;;  %v6013_v62 = vld [vmem:[#allocation9 + $0x120] sm:$0xf0] }
  0xb9   :  { %3422 = vmatpush.bf16.msrb.mxu2 %v6460_v40  ;;  %v8010_v1 = vld [vmem:[#allocation9 + $0x41c] sm:$0xf0]  ;;  %v6237_v38 = vld [vmem:[#allocation9 + $0x2e0] sm:$0xf0] }
  0xba   :  { %v7131_v2 = vld [vmem:[#allocation9 + $0x9c0] sm:$0xf]  ;;  %v6396_v4 = vor.u32 %v8010_v1, %v6395_v63  ;;  %v6205_v56 = vld [vmem:[#allocation9 + $0x2a0] sm:$0xf0] }
  0xbb   :  { %3397 = vmatpush.bf16.msrb.mxu0 %v5916_v45  ;;  %v8194_v3 = vld [vmem:[#allocation9 + $0x9dc] sm:$0xf0] }
  0xbc   :  { %3435 = vmatpush.bf16.msrb.mxu3 %v6716_v51  ;;  %v7132_v5 = vor.u32 %v8194_v3, %v7131_v2  ;;  %3410 = vmatpush.bf16.msrb.mxu1 %v6172_v0  ;;  %v6683_v10 = vld [vmem:[#allocation9 + $0x640] sm:$0xf]  ;;  %v6016_v0 = vor.u32 %v7910_v61, %v6013_v62  ;;  %v7982_v3 = vld [vmem:[#allocation9 + $0x344] sm:$0xf] }
  0xbd   :  { %3423 = vmatpush.bf16.msrb.mxu2 %v6428_v54  ;;  %v8082_v11 = vld [vmem:[#allocation9 + $0x65c] sm:$0xf0]  ;;  %v5885_v62 = vld [vmem:[#allocation9 + $0x20] sm:$0xf0] }
  0xbe   :  { %v6684_v15 = vor.u32 %v8082_v11, %v6683_v10  ;;  %v6139_v16 = vld [vmem:[#allocation9 + $0x200] sm:$0xf]  ;;  %v7902_v11 = vld [vmem:[#allocation9 + $0xc4] sm:$0xf] }
  0xbf   :  { %3398 = vmatpush.bf16.msrb.mxu0 %v5884_v60  ;;  %v7946_v17 = vld [vmem:[#allocation9 + $0x21c] sm:$0xf0] }
  0xc0   :  { %v6140_v18 = vor.u32 %v7946_v17, %v6139_v16  ;;  %v7099_v19 = vld [vmem:[#allocation9 + $0x980] sm:$0xf]  ;;  %3436 = vmatpush.bf16.msrb.mxu3 %v6684_v15 }
  0xc1   :  { %3424 = vmatpush.bf16.msrb.mxu2 %v6396_v4  ;;  %v8186_v20 = vld [vmem:[#allocation9 + $0x99c] sm:$0xf0] }
  0xc2   :  { %v7100_v23 = vor.u32 %v8186_v20, %v7099_v19  ;;  %v6651_v25 = vld [vmem:[#allocation9 + $0x600] sm:$0xf]  ;;  %3411 = vmatpush.bf16.msrb.mxu1 %v6140_v18 }
  0xc3   :  { %3443 = vmatpush.bf16.msra.mxu0 %v7132_v5  ;;  %v8074_v26 = vld [vmem:[#allocation9 + $0x61c] sm:$0xf0] }
  0xc4   :  { %v6652_v28 = vor.u32 %v8074_v26, %v6651_v25  ;;  %v7387_v29 = vld [vmem:[#allocation9 + $0xbc0] sm:$0xf] }
  0xc5   :  { %3469 = vmatpush.bf16.msra.mxu2 %v6112_v9  ;;  %v8258_v30 = vld [vmem:[#allocation9 + $0xbdc] sm:$0xf0] }
  0xc6   :  { %v7388_v33 = vor.u32 %v8258_v30, %v7387_v29  ;;  %v7067_v36 = vld [vmem:[#allocation9 + $0x940] sm:$0xf]  ;;  %3437 = vmatpush.bf16.msrb.mxu3 %v6652_v28  ;;  %v7894_v28 = vld [vmem:[#allocation9 + $0x84] sm:$0xf] }
  0xc7   :  { %3444 = vmatpush.bf16.msra.mxu0 %v7100_v23  ;;  %v8178_v37 = vld [vmem:[#allocation9 + $0x95c] sm:$0xf0]  ;;  %v6269_v23 = vld [vmem:[#allocation9 + $0x320] sm:$0xf0] }
  0xc8   :  { %3456 = vmatpush.bf16.msra.mxu1 %v7388_v33  ;;  %v7068_v41 = vor.u32 %v8178_v37, %v7067_v36  ;;  %v7355_v48 = vld [vmem:[#allocation9 + $0xb80] sm:$0xf]  ;;  %v6272_v25 = vor.u32 %v7974_v21, %v6269_v23  ;;  %v5949_v30 = vld [vmem:[#allocation9 + $0xa0] sm:$0xf0] }
  0xc9   :  { %3470 = vmatpush.bf16.msra.mxu2 %v6080_v27  ;;  %v8250_v49 = vld [vmem:[#allocation9 + $0xb9c] sm:$0xf0]  ;;  %v7966_v37 = vld [vmem:[#allocation9 + $0x2c4] sm:$0xf] }
  0xca   :  { %3482 = vmatpush.bf16.msra.mxu3 %v6368_v35  ;;  %v7356_v54 = vor.u32 %v8250_v49, %v7355_v48  ;;  %v8170_v60 = vld [vmem:[#allocation9 + $0x91c] sm:$0xf0]  ;;  %v7942_v23 = vld [vmem:[#allocation9 + $0x204] sm:$0xf] }
  0xcb   :  { %3445 = vmatpush.bf16.msra.mxu0 %v7068_v41  ;;  %v7323_v1 = vld [vmem:[#allocation9 + $0xb40] sm:$0xf] }
  0xcc   :  { %3457 = vmatpush.bf16.msra.mxu1 %v7356_v54  ;;  %v8242_v2 = vld [vmem:[#allocation9 + $0xb5c] sm:$0xf0]  ;;  %v7958_v54 = vld [vmem:[#allocation9 + $0x284] sm:$0xf] }
  0xcd   :  { %3471 = vmatpush.bf16.msra.mxu2 %v6048_v47  ;;  %v7324_v5 = vor.u32 %v8242_v2, %v7323_v1  ;;  %v7003_v9 = vld [vmem:[#allocation9 + $0x8c0] sm:$0xf] }
  0xce   :  { %3483 = vmatpush.bf16.msra.mxu3 %v6336_v58  ;;  %v8162_v10 = vld [vmem:[#allocation9 + $0x8dc] sm:$0xf0] }
  0xcf   :  { %v7291_v18 = vld [vmem:[#allocation9 + $0xb00] sm:$0xf] }
  0xd0   :  { %3458 = vmatpush.bf16.msra.mxu1 %v7324_v5  ;;  %v8234_v19 = vld [vmem:[#allocation9 + $0xb1c] sm:$0xf0] }
  0xd1   :  { %3472 = vmatpush.bf16.msra.mxu2 %v6016_v0  ;;  %v7292_v20 = vor.u32 %v8234_v19, %v7291_v18  ;;  %v6971_v26 = vld [vmem:[#allocation9 + $0x880] sm:$0xf]  ;;  %v6621_v0 = vld [vmem:[#allocation9 + $0x5e0] sm:$0xf0] }
  0xd2   :  { %v8154_v27 = vld [vmem:[#allocation9 + $0x89c] sm:$0xf0] }
  0xd3   :  { %v6972_v29 = vor.u32 %v8154_v27, %v6971_v26  ;;  %v7259_v33 = vld [vmem:[#allocation9 + $0xac0] sm:$0xf] }
  0xd4   :  { %3459 = vmatpush.bf16.msra.mxu1 %v7292_v20  ;;  %v8226_v34 = vld [vmem:[#allocation9 + $0xadc] sm:$0xf0] }
  0xd5   :  { %v7260_v36 = vor.u32 %v8226_v34, %v7259_v33  ;;  %v6939_v41 = vld [vmem:[#allocation9 + $0x840] sm:$0xf]  ;;  %v6557_v33 = vld [vmem:[#allocation9 + $0x560] sm:$0xf0] }
  0xd6   :  { %v8146_v42 = vld [vmem:[#allocation9 + $0x85c] sm:$0xf0] }
  0xd7   :  { %v7227_v49 = vld [vmem:[#allocation9 + $0xa80] sm:$0xf] }
  0xd8   :  { %3460 = vmatpush.bf16.msra.mxu1 %v7260_v36  ;;  %v8218_v50 = vld [vmem:[#allocation9 + $0xa9c] sm:$0xf0] }
  0xd9   :  { %v8138_v61 = vld [vmem:[#allocation9 + $0x81c] sm:$0xf0] }
  0xda   :  { %v7163_v18 = vld [vmem:[#allocation9 + $0xa00] sm:$0xf] }
  0xdb   :  { %v8202_v21 = vld [vmem:[#allocation9 + $0xa1c] sm:$0xf0] }
  0xdc   :  { %v7164_v26 = vor.u32 %v8202_v21, %v7163_v18  ;;  %v7133_v21 = vld [vmem:[#allocation9 + $0x9e0] sm:$0xf0] }
  0xdf   :  { %v862_v8 = vpop.f32.mrf.mxu0 }
  0xe0   :  { %v863_v12 = vadd.f32 %v862_v8, %v354_v59  ;;  %v875_v13 = vpop.f32.mrf.mxu1  ;;  %v7035_v59 = vld [vmem:[#allocation9 + $0x900] sm:$0xf]  ;;  %v6304_v8 = vor.u32 %v7982_v3, %v6301_v6 }
  0xe1   :  { %v7036_v55 = vor.u32 %v8170_v60, %v7035_v59  ;;  %v6208_v59 = vor.u32 %v7958_v54, %v6205_v56  ;;  %v6907_v60 = vld [vmem:[#allocation9 + $0x800] sm:$0xf] }
  0xe2   :  { %v8968_v22 = vadd.f32 %v875_v13, %v863_v12  ;;  %v7004_v13 = vor.u32 %v8162_v10, %v7003_v9  ;;  %3484 = vmatpush.bf16.msra.mxu3 %v6304_v8  ;;  %v7195_v6 = vld [vmem:[#allocation9 + $0xa40] sm:$0xf]  ;;  %v7950_v9 = vld [vmem:[#allocation9 + $0x244] sm:$0xf] }
  0xe3   :  { %3446 = vmatpush.bf16.msra.mxu0 %v7036_v55  ;;  %v6908_v55 = vor.u32 %v8138_v61, %v6907_v60  ;;  %v6173_v10 = vld [vmem:[#allocation9 + $0x260] sm:$0xf0] }
  0xe4   :  { %v1009_v32 = vmul.f32 %v8968_v22, %v8968_v22  ;;  %v6493_v60 = vld [vmem:[#allocation9 + $0x4e0] sm:$0xf0] }
  0xe6   :  { %v1015_v39 = vmul.f32 %v1009_v32, %v8968_v22  ;;  %3485 = vmatpush.bf16.msra.mxu3 %v6272_v25  ;;  %v5952_v32 = vor.u32 %v7894_v28, %v5949_v30  ;;  %v357_v25 = vperm.slane %v8964_v44, 3  ;;  %v8126_v28 = vld [vmem:[#allocation9 + $0x7c4] sm:$0xf] }
  0xe7   :  { %v888_v40 = vpop.f32.mrf.mxu2  ;;  %v864_v46 = vpop.f32.mrf.mxu0  ;;  %3447 = vmatpush.bf16.msra.mxu0 %v7004_v13 }
  0xe8   :  { %v889_v43 = vadd.f32 %v888_v40, %v355_v14  ;;  %v901_v45 = vpop.f32.mrf.mxu3  ;;  %v1021_v52 = vmul.f32 0.044715, %v1015_v39  ;;  %v877_v53 = vpop.f32.mrf.mxu1  ;;  %v5981_v14 = vld [vmem:[#allocation9 + $0xe0] sm:$0xf0]  ;;  %v6240_v40 = vor.u32 %v7966_v37, %v6237_v38 }
  0xe9   :  { %v5984_v17 = vor.u32 %v7902_v11, %v5981_v14  ;;  %v5917_v46 = vld [vmem:[#allocation9 + $0x60] sm:$0xf0]  ;;  %v7228_v53 = vor.u32 %v8218_v50, %v7227_v49  ;;  %v6176_v14 = vor.u32 %v7950_v9, %v6173_v10 }
  0xea   :  { %v8973_v57 = vadd.f32 %v901_v45, %v889_v43  ;;  %v1027_v51 = vadd.f32 %v1021_v52, %v8968_v22  ;;  %v6940_v43 = vor.u32 %v8146_v42, %v6939_v41  ;;  %v7886_v45 = vld [vmem:[#allocation9 + $0x44] sm:$0xf]  ;;  %3486 = vmatpush.bf16.msra.mxu3 %v6240_v40  ;;  %v356_v52 = vperm.slane %v8964_v44, 2 }
  0xeb   :  { %3473 = vmatpush.bf16.msra.mxu2 %v5984_v17  ;;  %3448 = vmatpush.bf16.msra.mxu0 %v6972_v29  ;;  %v5920_v48 = vor.u32 %v7886_v45, %v5917_v46  ;;  %v6877_v29 = vld [vmem:[#allocation9 + $0x7e0] sm:$0xf0] }
  0xec   :  { %v1010_v63 = vmul.f32 %v8973_v57, %v8973_v57  ;;  %v1033_v4 = vmul.f32 0.7978846, %v1027_v51  ;;  %v7878_v51 = vld [vmem:[#allocation9 + $0x4] sm:$0xf]  ;;  %3461 = vmatpush.bf16.msra.mxu1 %v7228_v53 }
  0xed   :  { %v5888_v3 = vor.u32 %v7878_v51, %v5885_v62  ;;  %v8118_v37 = vld [vmem:[#allocation9 + $0x784] sm:$0xf] }
  0xee   :  { %v1016_v7 = vmul.f32 %v1010_v63, %v8973_v57  ;;  %8378 = vtanh.f32 %v1033_v4  ;;  %v8062_v63 = vld [vmem:[#allocation9 + $0x5c4] sm:$0xf]  ;;  %3487 = vmatpush.bf16.msra.mxu3 %v6208_v59 }
  0xef   :  { %v890_v12 = vpop.f32.mrf.mxu2  ;;  %3474 = vmatpush.bf16.msra.mxu2 %v5952_v32  ;;  %3449 = vmatpush.bf16.msra.mxu0 %v6940_v43  ;;  %v6624_v4 = vor.u32 %v8062_v63, %v6621_v0  ;;  %v6880_v32 = vor.u32 %v8126_v28, %v6877_v29  ;;  %v6845_v38 = vld [vmem:[#allocation9 + $0x7a0] sm:$0xf0] }
  0xf0   :  { %v1022_v15 = vmul.f32 0.044715, %v1016_v7  ;;  %v903_v16 = vpop.f32.mrf.mxu3  ;;  %v6848_v42 = vor.u32 %v8118_v37, %v6845_v38  ;;  %v8038_v46 = vld [vmem:[#allocation9 + $0x504] sm:$0xf] }
  0xf1   :  { %v6589_v16 = vld [vmem:[#allocation9 + $0x5a0] sm:$0xf0] }
  0xf2   :  { %v1028_v24 = vadd.f32 %v1022_v15, %v8973_v57  ;;  %v8054_v15 = vld [vmem:[#allocation9 + $0x584] sm:$0xf]  ;;  %3488 = vmatpush.bf16.msra.mxu3 %v6176_v14 }
  0xf3   :  { %3475 = vmatpush.bf16.msra.mxu2 %v5920_v48  ;;  %3450 = vmatpush.bf16.msra.mxu0 %v6908_v55  ;;  %v6592_v17 = vor.u32 %v8054_v15, %v6589_v16  ;;  %v6813_v53 = vld [vmem:[#allocation9 + $0x760] sm:$0xf0] }
  0xf4   :  { %v1034_v31 = vmul.f32 0.7978846, %v1028_v24  ;;  %v8379_v35 = vpop.eup %8378  ;;  %v6141_v24 = vld [vmem:[#allocation9 + $0x220] sm:$0xf0] }
  0xf5   :  { %v1045_v39 = vadd.f32 1.0, %v8379_v35  ;;  %v6144_v27 = vor.u32 %v7942_v23, %v6141_v24  ;;  %v8030_v59 = vld [vmem:[#allocation9 + $0x4c4] sm:$0xf] }
  0xf6   :  { %8380 = vtanh.f32 %v1034_v31  ;;  %v6496_v51 = vor.u32 %v8030_v59, %v6493_v60  ;;  %v8102_v62 = vld [vmem:[#allocation9 + $0x704] sm:$0xf] }
  0xf7   :  { %v1051_v47 = vmul.f32 0.5, %v1045_v39  ;;  %3476 = vmatpush.bf16.msra.mxu2 %v5888_v3  ;;  %3489 = vmatpush.bf16.msra.mxu3 %v6144_v27  ;;  %v6781_v63 = vld [vmem:[#allocation9 + $0x720] sm:$0xf0]  ;;  %v358_v27 = vperm.slane %v8964_v44, 4 }
  0xf8   :  { %v6784_v3 = vor.u32 %v8102_v62, %v6781_v63  ;;  %v8086_v16 = vld [vmem:[#allocation9 + $0x684] sm:$0xf] }
  0xf9   :  { %v1057_v58 = vmul.f32 %v1051_v47, %v8968_v22  ;;  %v8210_v22 = vld [vmem:[#allocation9 + $0xa5c] sm:$0xf0]  ;;  %v6525_v47 = vld [vmem:[#allocation9 + $0x520] sm:$0xf0] }
  0xfa   :  { %v7196_v8 = vor.u32 %v8210_v22, %v7195_v6  ;;  %v6528_v49 = vor.u32 %v8038_v46, %v6525_v47  ;;  %v8006_v24 = vld [vmem:[#allocation9 + $0x404] sm:$0xf] }
  0xfb   :  { %v8982_v2 = vpack.c.bf16 %v1057_v58, %v1057_v58  ;;  %v8174_v47 = vld [vmem:[#allocation9 + $0x944] sm:$0xf] }
  0xfc   :  { %v8381_v1 = vpop.eup %8380  ;;  %3462 = vmatpush.bf16.msra.mxu1 %v7196_v8  ;;  %v6749_v8 = vld [vmem:[#allocation9 + $0x6e0] sm:$0xf0] }
  0xfd   :  { %v1046_v5 = vadd.f32 1.0, %v8381_v1  ;;  %3399 = vmatmul.bf16.vlgmr.msrb.gmra.mxu0 %v8982_v2  ;;  %v8166_v63 = vld [vmem:[#allocation9 + $0x904] sm:$0xf] }
  0xfe   :  { %3495 = vmatpush.bf16.msrb.mxu0 %v6624_v4  ;;  %v8022_v4 = vld [vmem:[#allocation9 + $0x484] sm:$0xf] }
  0xff   :  { %v914_v7 = vpop.f32.mrf.mxu0  ;;  %v1052_v11 = vmul.f32 0.5, %v1046_v5  ;;  %v6461_v5 = vld [vmem:[#allocation9 + $0x4a0] sm:$0xf0] }
 0x100   :  { %v915_v12 = vadd.f32 %v914_v7, %v356_v52  ;;  %v927_v13 = vpop.f32.mrf.mxu1  ;;  %3463 = vmatpush.bf16.msra.mxu1 %v7164_v26  ;;  %v8110_v52 = vld [vmem:[#allocation9 + $0x744] sm:$0xf]  ;;  %v6464_v22 = vor.u32 %v8022_v4, %v6461_v5 }
 0x101   :  { %v1058_v19 = vmul.f32 %v1052_v11, %v8973_v57  ;;  %v8046_v57 = vld [vmem:[#allocation9 + $0x544] sm:$0xf]  ;;  %v6816_v56 = vor.u32 %v8110_v52, %v6813_v53  ;;  %v359_v53 = vperm.slane %v8964_v44, 5 }
 0x102   :  { %v8986_v20 = vadd.f32 %v927_v13, %v915_v12  ;;  %3496 = vmatpush.bf16.msrb.mxu0 %v6592_v17  ;;  %v6560_v36 = vor.u32 %v8046_v57, %v6557_v33  ;;  %v8094_v7 = vld [vmem:[#allocation9 + $0x6c4] sm:$0xf] }
 0x103   :  { %v8989_v30 = vpack.c.bf16 %v1058_v19, %v1058_v19  ;;  %v6752_v10 = vor.u32 %v8094_v7, %v6749_v8  ;;  %v8014_v12 = vld [vmem:[#allocation9 + $0x444] sm:$0xf] }
 0x104   :  { %v1011_v31 = vmul.f32 %v8986_v20, %v8986_v20  ;;  %v6429_v13 = vld [vmem:[#allocation9 + $0x460] sm:$0xf0] }
 0x105   :  { %3412 = vmatmul.bf16.vlgmr.msrb.gmra.mxu1 %v8989_v30  ;;  %v6432_v15 = vor.u32 %v8014_v12, %v6429_v13  ;;  %v6717_v17 = vld [vmem:[#allocation9 + $0x6a0] sm:$0xf0] }
 0x106   :  { %v1017_v34 = vmul.f32 %v1011_v31, %v8986_v20  ;;  %3508 = vmatpush.bf16.msrb.mxu1 %v6880_v32  ;;  %3497 = vmatpush.bf16.msrb.mxu0 %v6560_v36  ;;  %v8190_v19 = vld [vmem:[#allocation9 + $0x9c4] sm:$0xf]  ;;  %v6720_v23 = vor.u32 %v8086_v16, %v6717_v17 }
 0x107   :  { %v940_v35 = vpop.f32.mrf.mxu2  ;;  %v916_v41 = vpop.f32.mrf.mxu0  ;;  %v7136_v29 = vor.u32 %v8190_v19, %v7133_v21  ;;  %v8078_v31 = vld [vmem:[#allocation9 + $0x644] sm:$0xf] }
 0x108   :  { %v941_v39 = vadd.f32 %v940_v35, %v357_v25  ;;  %v953_v40 = vpop.f32.mrf.mxu3  ;;  %v1023_v43 = vmul.f32 0.044715, %v1017_v34  ;;  %v929_v45 = vpop.f32.mrf.mxu1  ;;  %v6397_v25 = vld [vmem:[#allocation9 + $0x420] sm:$0xf0] }
 0x109   :  { %v6400_v28 = vor.u32 %v8006_v24, %v6397_v25  ;;  %v8182_v33 = vld [vmem:[#allocation9 + $0x984] sm:$0xf] }
 0x10a   :  { %v8995_v48 = vadd.f32 %v953_v40, %v941_v39  ;;  %v1029_v50 = vadd.f32 %v1023_v43, %v8986_v20  ;;  %3509 = vmatpush.bf16.msrb.mxu1 %v6848_v42  ;;  %3498 = vmatpush.bf16.msrb.mxu0 %v6528_v49  ;;  %v7101_v34 = vld [vmem:[#allocation9 + $0x9a0] sm:$0xf0] }
 0x10b   :  { %v6685_v35 = vld [vmem:[#allocation9 + $0x660] sm:$0xf0]  ;;  %v7104_v42 = vor.u32 %v8182_v33, %v7101_v34 }
 0x10c   :  { %v1012_v54 = vmul.f32 %v8995_v48, %v8995_v48  ;;  %v1035_v58 = vmul.f32 0.7978846, %v1029_v50  ;;  %v6688_v38 = vor.u32 %v8078_v31, %v6685_v35  ;;  %v7389_v43 = vld [vmem:[#allocation9 + $0xbe0] sm:$0xf0] }
 0x10d   :  { %v8070_v45 = vld [vmem:[#allocation9 + $0x604] sm:$0xf] }
 0x10e   :  { %v1018_v61 = vmul.f32 %v1012_v54, %v8995_v48  ;;  %8382 = vtanh.f32 %v1035_v58  ;;  %3510 = vmatpush.bf16.msrb.mxu1 %v6816_v56  ;;  %3499 = vmatpush.bf16.msrb.mxu0 %v6496_v51  ;;  %v7069_v49 = vld [vmem:[#allocation9 + $0x960] sm:$0xf0] }
 0x10f   :  { %v942_v55 = vpop.f32.mrf.mxu2  ;;  %v6653_v50 = vld [vmem:[#allocation9 + $0x620] sm:$0xf0]  ;;  %v7072_v60 = vor.u32 %v8174_v47, %v7069_v49  ;;  %v6627_v47 = vld [vmem:[#allocation9 + $0x5c8] sm:$0xf] }
 0x110   :  { %v1024_v0 = vmul.f32 0.044715, %v1018_v61  ;;  %v955_v1 = vpop.f32.mrf.mxu3  ;;  %v6656_v54 = vor.u32 %v8070_v45, %v6653_v50  ;;  %v8246_v61 = vld [vmem:[#allocation9 + $0xb84] sm:$0xf]  ;;  %v8067_v49 = vld [vmem:[#allocation9 + $0x5e4] sm:$0xf0] }
 0x111   :  { %v7357_v51 = vld [vmem:[#allocation9 + $0xba0] sm:$0xf0] }
 0x112   :  { %v1030_v6 = vadd.f32 %v1024_v0, %v8995_v48  ;;  %3511 = vmatpush.bf16.msrb.mxu1 %v6784_v3  ;;  %3500 = vmatpush.bf16.msrb.mxu0 %v6464_v22  ;;  %v7037_v0 = vld [vmem:[#allocation9 + $0x920] sm:$0xf0]  ;;  %v7360_v5 = vor.u32 %v8246_v61, %v7357_v51  ;;  %v6083_v61 = vld [vmem:[#allocation9 + $0x188] sm:$0xf] }
 0x113   :  { %v7040_v22 = vor.u32 %v8166_v63, %v7037_v0  ;;  %v8238_v7 = vld [vmem:[#allocation9 + $0xb44] sm:$0xf]  ;;  %v6595_v63 = vld [vmem:[#allocation9 + $0x588] sm:$0xf] }
 0x114   :  { %v1036_v9 = vmul.f32 0.7978846, %v1030_v6  ;;  %v8383_v11 = vpop.eup %8382  ;;  %v7325_v8 = vld [vmem:[#allocation9 + $0xb60] sm:$0xf0]  ;;  %v8059_v0 = vld [vmem:[#allocation9 + $0x5a4] sm:$0xf0] }
 0x115   :  { %v1047_v14 = vadd.f32 1.0, %v8383_v11  ;;  %v7005_v11 = vld [vmem:[#allocation9 + $0x8e0] sm:$0xf0] }
 0x116   :  { %8384 = vtanh.f32 %v1036_v9  ;;  %3512 = vmatpush.bf16.msrb.mxu1 %v6752_v10  ;;  %3501 = vmatpush.bf16.msrb.mxu0 %v6432_v15  ;;  %v8158_v10 = vld [vmem:[#allocation9 + $0x8c4] sm:$0xf] }
 0x117   :  { %v1053_v18 = vmul.f32 0.5, %v1047_v14  ;;  %v7328_v14 = vor.u32 %v8238_v7, %v7325_v8  ;;  %v7008_v16 = vor.u32 %v8158_v10, %v7005_v11  ;;  %v8230_v17 = vld [vmem:[#allocation9 + $0xb04] sm:$0xf]  ;;  %v6596_v8 = vor.u32 %v8059_v0, %v6595_v63  ;;  %v6051_v10 = vld [vmem:[#allocation9 + $0x148] sm:$0xf] }
 0x118   :  { %v8150_v21 = vld [vmem:[#allocation9 + $0x884] sm:$0xf]  ;;  %v7923_v11 = vld [vmem:[#allocation9 + $0x164] sm:$0xf0] }
 0x119   :  { %v1059_v26 = vmul.f32 %v1053_v18, %v8986_v20  ;;  %v8254_v20 = vld [vmem:[#allocation9 + $0xbc4] sm:$0xf]  ;;  %v7971_v0 = vld [vmem:[#allocation9 + $0x2e4] sm:$0xf0] }
 0x11a   :  { %3513 = vmatpush.bf16.msrb.mxu1 %v6720_v23  ;;  %3502 = vmatpush.bf16.msrb.mxu0 %v6400_v28  ;;  %v7392_v58 = vor.u32 %v8254_v20, %v7389_v43  ;;  %v7293_v18 = vld [vmem:[#allocation9 + $0xb20] sm:$0xf0]  ;;  %v7939_v43 = vld [vmem:[#allocation9 + $0x1e4] sm:$0xf0] }
 0x11b   :  { %v9004_v57 = vpack.c.bf16 %v1059_v26, %v1059_v26  ;;  %v6973_v23 = vld [vmem:[#allocation9 + $0x8a0] sm:$0xf0]  ;;  %v7296_v26 = vor.u32 %v8230_v17, %v7293_v18  ;;  %v6339_v18 = vld [vmem:[#allocation9 + $0x388] sm:$0xf] }
 0x11c   :  { %v8385_v32 = vpop.eup %8384  ;;  %v6976_v28 = vor.u32 %v8150_v21, %v6973_v23  ;;  %v7261_v31 = vld [vmem:[#allocation9 + $0xae0] sm:$0xf0]  ;;  %v6052_v23 = vor.u32 %v7923_v11, %v6051_v10  ;;  %v7963_v10 = vld [vmem:[#allocation9 + $0x2a4] sm:$0xf0] }
 0x11d   :  { %v1048_v36 = vadd.f32 1.0, %v8385_v32  ;;  %3425 = vmatmul.bf16.vlgmr.msrb.gmra.mxu2 %v9004_v57  ;;  %v8142_v32 = vld [vmem:[#allocation9 + $0x844] sm:$0xf]  ;;  %v6723_v11 = vld [vmem:[#allocation9 + $0x688] sm:$0xf] }
 0x11e   :  { %3521 = vmatpush.bf16.msrb.mxu2 %v7136_v29  ;;  %3514 = vmatpush.bf16.msrb.mxu1 %v6688_v38  ;;  %v8222_v29 = vld [vmem:[#allocation9 + $0xac4] sm:$0xf] }
 0x11f   :  { %v966_v37 = vpop.f32.mrf.mxu0  ;;  %v1054_v41 = vmul.f32 0.5, %v1048_v36  ;;  %v6941_v33 = vld [vmem:[#allocation9 + $0x860] sm:$0xf0]  ;;  %v7264_v36 = vor.u32 %v8222_v29, %v7261_v31  ;;  %v6531_v29 = vld [vmem:[#allocation9 + $0x508] sm:$0xf] }
 0x120   :  { %v967_v39 = vadd.f32 %v966_v37, %v358_v27  ;;  %v979_v40 = vpop.f32.mrf.mxu1  ;;  %v8214_v37 = vld [vmem:[#allocation9 + $0xa84] sm:$0xf] }
 0x121   :  { %v1060_v52 = vmul.f32 %v1054_v41, %v8995_v48  ;;  %v8134_v20 = vld [vmem:[#allocation9 + $0x804] sm:$0xf] }
 0x122   :  { %v9007_v46 = vadd.f32 %v979_v40, %v967_v39  ;;  %3522 = vmatpush.bf16.msrb.mxu2 %v7104_v42  ;;  %3515 = vmatpush.bf16.msrb.mxu1 %v6656_v54  ;;  %v6944_v39 = vor.u32 %v8142_v32, %v6941_v33  ;;  %v7229_v40 = vld [vmem:[#allocation9 + $0xaa0] sm:$0xf0]  ;;  %v6115_v42 = vld [vmem:[#allocation9 + $0x1c8] sm:$0xf] }
 0x123   :  { %v9013_v59 = vpack.c.bf16 %v1060_v52, %v1060_v52  ;;  %v6909_v41 = vld [vmem:[#allocation9 + $0x820] sm:$0xf0]  ;;  %v7232_v50 = vor.u32 %v8214_v37, %v7229_v40  ;;  %v6307_v33 = vld [vmem:[#allocation9 + $0x348] sm:$0xf] }
 0x124   :  { %v1013_v56 = vmul.f32 %v9007_v46, %v9007_v46  ;;  %v8206_v54 = vld [vmem:[#allocation9 + $0xa44] sm:$0xf]  ;;  %v6819_v37 = vld [vmem:[#allocation9 + $0x748] sm:$0xf] }
 0x125   :  { %3438 = vmatmul.bf16.vlgmr.msrb.gmra.mxu3 %v9013_v59  ;;  %v8035_v40 = vld [vmem:[#allocation9 + $0x4e4] sm:$0xf0] }
 0x126   :  { %v1019_v55 = vmul.f32 %v1013_v56, %v9007_v46  ;;  %3534 = vmatpush.bf16.msrb.mxu3 %v7392_v58  ;;  %3523 = vmatpush.bf16.msrb.mxu2 %v7072_v60  ;;  %v7197_v56 = vld [vmem:[#allocation9 + $0xa60] sm:$0xf0]  ;;  %v6116_v58 = vor.u32 %v7939_v43, %v6115_v42  ;;  %v6628_v60 = vor.u32 %v8067_v49, %v6627_v47  ;;  %v7979_v49 = vld [vmem:[#allocation9 + $0x324] sm:$0xf0] }
 0x127   :  { %v992_v62 = vpop.f32.mrf.mxu2  ;;  %v968_v44 = vpop.f32.mrf.mxu0 }
 0x128   :  { %v993_v48 = vadd.f32 %v992_v62, %v359_v53  ;;  %v1005_v1 = vpop.f32.mrf.mxu3  ;;  %v1025_v3 = vmul.f32 0.044715, %v1019_v55  ;;  %v981_v4 = vpop.f32.mrf.mxu1  ;;  %v6912_v53 = vor.u32 %v8134_v20, %v6909_v41  ;;  %v7931_v62 = vld [vmem:[#allocation9 + $0x1a4] sm:$0xf0]  ;;  %v8198_v44 = vld [vmem:[#allocation9 + $0xa04] sm:$0xf] }
 0x129   :  { %v8003_v4 = vld [vmem:[#allocation9 + $0x3e4] sm:$0xf0]  ;;  %v6084_v7 = vor.u32 %v7931_v62, %v6083_v61 }
 0x12a   :  { %v9017_v6 = vadd.f32 %v1005_v1, %v993_v48  ;;  %v1031_v9 = vadd.f32 %v1025_v3, %v9007_v46  ;;  %3535 = vmatpush.bf16.msrb.mxu3 %v7360_v5  ;;  %3524 = vmatpush.bf16.msrb.mxu2 %v7040_v22  ;;  %v7200_v1 = vor.u32 %v8206_v54, %v7197_v56  ;;  %v7165_v3 = vld [vmem:[#allocation9 + $0xa20] sm:$0xf0]  ;;  %v6883_v5 = vld [vmem:[#allocation9 + $0x7c8] sm:$0xf] }
 0x12b   :  { %v5987_v20 = vld [vmem:[#allocation9 + $0xc8] sm:$0xf] }
 0x12c   :  { %v1014_v12 = vmul.f32 %v9017_v6, %v9017_v6  ;;  %v1037_v13 = vmul.f32 0.7978846, %v1031_v9  ;;  %v8131_v9 = vld [vmem:[#allocation9 + $0x7e4] sm:$0xf0] }
 0x12d   :  { %3477 = vmatmul.bf16.vlgmr.msra.gmra.mxu2 %v8982_v2  ;;  %v6884_v17 = vor.u32 %v8131_v9, %v6883_v5  ;;  %v7907_v41 = vld [vmem:[#allocation9 + $0xe4] sm:$0xf0] }
 0x12e   :  { %v1020_v15 = vmul.f32 %v1014_v12, %v9017_v6  ;;  %8386 = vtanh.f32 %v1037_v13  ;;  %3536 = vmatpush.bf16.msrb.mxu3 %v7328_v14  ;;  %3525 = vmatpush.bf16.msrb.mxu2 %v7008_v16  ;;  %v6563_v12 = vld [vmem:[#allocation9 + $0x548] sm:$0xf] }
 0x12f   :  { %v994_v19 = vpop.f32.mrf.mxu2  ;;  %v8051_v13 = vld [vmem:[#allocation9 + $0x564] sm:$0xf0] }
 0x130   :  { %v1026_v24 = vmul.f32 0.044715, %v1020_v15  ;;  %v1007_v25 = vpop.f32.mrf.mxu3  ;;  %v7168_v15 = vor.u32 %v8198_v44, %v7165_v3  ;;  %v7995_v19 = vld [vmem:[#allocation9 + $0x3a4] sm:$0xf0] }
 0x131   :  { %v6851_v25 = vld [vmem:[#allocation9 + $0x788] sm:$0xf]  ;;  %v6340_v31 = vor.u32 %v7995_v19, %v6339_v18  ;;  %v7935_v18 = vld [vmem:[#allocation9 + $0x1cc] sm:$0xf] }
 0x132   :  { %v1032_v27 = vadd.f32 %v1026_v24, %v9017_v6  ;;  %3537 = vmatpush.bf16.msrb.mxu3 %v7296_v26  ;;  %3526 = vmatpush.bf16.msrb.mxu2 %v6976_v28  ;;  %v6564_v24 = vor.u32 %v8051_v13, %v6563_v12  ;;  %v8123_v26 = vld [vmem:[#allocation9 + $0x7a4] sm:$0xf0]  ;;  %v6117_v19 = vld [vmem:[#allocation9 + $0x1e8] sm:$0xf0] }
 0x133   :  { %v7915_v28 = vld [vmem:[#allocation9 + $0x124] sm:$0xf0]  ;;  %v6852_v32 = vor.u32 %v8123_v26, %v6851_v25 }
 0x134   :  { %v1038_v34 = vmul.f32 0.7978846, %v1032_v27  ;;  %v8387_v35 = vpop.eup %8386  ;;  %v6019_v27 = vld [vmem:[#allocation9 + $0x108] sm:$0xf] }
 0x135   :  { %v1049_v38 = vadd.f32 1.0, %v8387_v35  ;;  %3490 = vmatmul.bf16.vlgmr.msra.gmra.mxu3 %v8989_v30  ;;  %v6467_v54 = vld [vmem:[#allocation9 + $0x488] sm:$0xf] }
 0x136   :  { %8388 = vtanh.f32 %v1038_v34  ;;  %3538 = vmatpush.bf16.msrb.mxu3 %v7264_v36  ;;  %3527 = vmatpush.bf16.msrb.mxu2 %v6944_v39  ;;  %v6020_v34 = vor.u32 %v7915_v28, %v6019_v27  ;;  %v7987_v36 = vld [vmem:[#allocation9 + $0x364] sm:$0xf0] }
 0x137   :  { %v1055_v45 = vmul.f32 0.5, %v1049_v38  ;;  %v8115_v38 = vld [vmem:[#allocation9 + $0x764] sm:$0xf0]  ;;  %v6308_v42 = vor.u32 %v7987_v36, %v6307_v33  ;;  %v6120_v33 = vor.u32 %v7935_v18, %v6117_v19  ;;  %v7927_v36 = vld [vmem:[#allocation9 + $0x18c] sm:$0xf] }
 0x138   :  { %v6499_v39 = vld [vmem:[#allocation9 + $0x4c8] sm:$0xf]  ;;  %v6820_v43 = vor.u32 %v8115_v38, %v6819_v37  ;;  %v6085_v37 = vld [vmem:[#allocation9 + $0x1a8] sm:$0xf0] }
 0x139   :  { %v1061_v52 = vmul.f32 %v1055_v45, %v9007_v46  ;;  %v6371_v46 = vld [vmem:[#allocation9 + $0x3c8] sm:$0xf]  ;;  %v6500_v47 = vor.u32 %v8035_v40, %v6499_v39 }
 0x13a   :  { %3539 = vmatpush.bf16.msrb.mxu3 %v7232_v50  ;;  %3528 = vmatpush.bf16.msrb.mxu2 %v6912_v53  ;;  %v6372_v16 = vor.u32 %v8003_v4, %v6371_v46  ;;  %v6275_v45 = vld [vmem:[#allocation9 + $0x308] sm:$0xf]  ;;  %v5988_v53 = vor.u32 %v7907_v41, %v5987_v20 }
 0x13b   :  { %v9027_v55 = vpack.c.bf16 %v1061_v52, %v1061_v52  ;;  %v6787_v50 = vld [vmem:[#allocation9 + $0x708] sm:$0xf]  ;;  %v6276_v61 = vor.u32 %v7979_v49, %v6275_v45 }
 0x13c   :  { %v8389_v51 = vpop.eup %8388  ;;  %v8107_v52 = vld [vmem:[#allocation9 + $0x724] sm:$0xf0] }
 0x13d   :  { %v1050_v48 = vadd.f32 1.0, %v8389_v51  ;;  %3451 = vmatmul.bf16.vlgmr.msra.gmra.mxu0 %v9027_v55  ;;  %3529 = vmatmul.bf16.vlgmr.msrb.gmra.mxu2 %v9027_v55  ;;  %v8027_v56 = vld [vmem:[#allocation9 + $0x4a4] sm:$0xf0]  ;;  %v6788_v51 = vor.u32 %v8107_v52, %v6787_v50  ;;  %v7999_v50 = vld [vmem:[#allocation9 + $0x3cc] sm:$0xf] }
 0x13e   :  { %3547 = vmatpush.bf16.msra.mxu0 %v6116_v58  ;;  %3573 = vmatpush.bf16.msra.mxu2 %v6628_v60  ;;  %v5955_v58 = vld [vmem:[#allocation9 + $0x88] sm:$0xf]  ;;  %v6468_v63 = vor.u32 %v8027_v56, %v6467_v54  ;;  %v6373_v52 = vld [vmem:[#allocation9 + $0x3e8] sm:$0xf0] }
 0x13f   :  { %v1056_v22 = vmul.f32 0.5, %v1050_v48  ;;  %3540 = vmatpush.bf16.msrb.mxu3 %v7200_v1  ;;  %v7899_v60 = vld [vmem:[#allocation9 + $0xa4] sm:$0xf0]  ;;  %v7919_v54 = vld [vmem:[#allocation9 + $0x14c] sm:$0xf] }
 0x140   :  { %v6243_v62 = vld [vmem:[#allocation9 + $0x2c8] sm:$0xf]  ;;  %v5956_v44 = vor.u32 %v7899_v60, %v5955_v58  ;;  %v6053_v56 = vld [vmem:[#allocation9 + $0x168] sm:$0xf0] }
 0x141   :  { %v1062_v14 = vmul.f32 %v1056_v22, %v9017_v6  ;;  %v8043_v6 = vld [vmem:[#allocation9 + $0x524] sm:$0xf0]  ;;  %v6244_v22 = vor.u32 %v7971_v0, %v6243_v62 }
 0x142   :  { %3548 = vmatpush.bf16.msra.mxu0 %v6084_v7  ;;  %3574 = vmatpush.bf16.msra.mxu2 %v6596_v8  ;;  %v6532_v35 = vor.u32 %v8043_v6, %v6531_v29  ;;  %v6755_v48 = vld [vmem:[#allocation9 + $0x6c8] sm:$0xf] }
 0x143   :  { %v9032_v21 = vpack.c.bf16 %v1062_v14, %v1062_v14  ;;  %3541 = vmatpush.bf16.msrb.mxu3 %v7168_v15  ;;  %v8099_v1 = vld [vmem:[#allocation9 + $0x6e4] sm:$0xf0] }
 0x144   :  { %v6435_v3 = vld [vmem:[#allocation9 + $0x448] sm:$0xf]  ;;  %v6756_v7 = vor.u32 %v8099_v1, %v6755_v48  ;;  %v6056_v48 = vor.u32 %v7919_v54, %v6053_v56  ;;  %v7959_v56 = vld [vmem:[#allocation9 + $0x28c] sm:$0xf] }
 0x145   :  { %3464 = vmatmul.bf16.vlgmr.msra.gmra.mxu1 %v9032_v21  ;;  %v8019_v46 = vld [vmem:[#allocation9 + $0x464] sm:$0xf0] }
 0x146   :  { %3560 = vmatpush.bf16.msra.mxu1 %v6372_v16  ;;  %3549 = vmatpush.bf16.msra.mxu0 %v6052_v23  ;;  %v5923_v4 = vld [vmem:[#allocation9 + $0x48] sm:$0xf]  ;;  %v6436_v9 = vor.u32 %v8019_v46, %v6435_v3  ;;  %v6341_v3 = vld [vmem:[#allocation9 + $0x3a8] sm:$0xf0] }
 0x147   :  { %3586 = vmatpush.bf16.msra.mxu3 %v6884_v17  ;;  %3575 = vmatpush.bf16.msra.mxu2 %v6564_v24  ;;  %v7891_v5 = vld [vmem:[#allocation9 + $0x64] sm:$0xf0] }
 0x148   :  { %3542 = vmatmul.bf16.vlgmr.msrb.gmra.mxu3 %v9032_v21  ;;  %v6211_v8 = vld [vmem:[#allocation9 + $0x288] sm:$0xf]  ;;  %v5924_v13 = vor.u32 %v7891_v5, %v5923_v4  ;;  %v7911_v4 = vld [vmem:[#allocation9 + $0x10c] sm:$0xf] }
 0x149   :  { %v8091_v12 = vld [vmem:[#allocation9 + $0x6a4] sm:$0xf0]  ;;  %v6212_v23 = vor.u32 %v7963_v10, %v6211_v8  ;;  %v6021_v5 = vld [vmem:[#allocation9 + $0x128] sm:$0xf0] }
 0x14a   :  { %3561 = vmatpush.bf16.msra.mxu1 %v6340_v31  ;;  %3550 = vmatpush.bf16.msra.mxu0 %v6020_v34  ;;  %v5891_v14 = vld [vmem:[#allocation9 + $0x8] sm:$0xf]  ;;  %v6724_v24 = vor.u32 %v8091_v12, %v6723_v11  ;;  %v6024_v11 = vor.u32 %v7911_v4, %v6021_v5 }
 0x14b   :  { %3587 = vmatpush.bf16.msra.mxu3 %v6852_v32  ;;  %3576 = vmatpush.bf16.msra.mxu2 %v6532_v35  ;;  %v6403_v15 = vld [vmem:[#allocation9 + $0x408] sm:$0xf] }
 0x14c   :  { %v8011_v16 = vld [vmem:[#allocation9 + $0x424] sm:$0xf0] }
 0x14d   :  { %3503 = vmatmul.bf16.vlgmr.msrb.gmra.mxu0 %v9004_v57  ;;  %v7883_v17 = vld [vmem:[#allocation9 + $0x24] sm:$0xf0]  ;;  %v6404_v28 = vor.u32 %v8011_v16, %v6403_v15  ;;  %v7903_v16 = vld [vmem:[#allocation9 + $0xcc] sm:$0xf] }
 0x14e   :  { %3562 = vmatpush.bf16.msra.mxu1 %v6308_v42  ;;  %3551 = vmatpush.bf16.msra.mxu0 %v5988_v53  ;;  %v7139_v25 = vld [vmem:[#allocation9 + $0x9c8] sm:$0xf]  ;;  %v5892_v32 = vor.u32 %v7883_v17, %v5891_v14  ;;  %v6309_v14 = vld [vmem:[#allocation9 + $0x368] sm:$0xf0] }
 0x14f   :  { %3588 = vmatpush.bf16.msra.mxu3 %v6820_v43  ;;  %3577 = vmatpush.bf16.msra.mxu2 %v6500_v47  ;;  %v8195_v26 = vld [vmem:[#allocation9 + $0x9e4] sm:$0xf0]  ;;  %v6088_v47 = vor.u32 %v7927_v36, %v6085_v37  ;;  %v5989_v17 = vld [vmem:[#allocation9 + $0xe8] sm:$0xf0] }
 0x150   :  { %v6179_v27 = vld [vmem:[#allocation9 + $0x248] sm:$0xf]  ;;  %v7140_v34 = vor.u32 %v8195_v26, %v7139_v25  ;;  %v5992_v26 = vor.u32 %v7903_v16, %v5989_v17  ;;  %v6597_v17 = vld [vmem:[#allocation9 + $0x5a8] sm:$0xf0] }
 0x151   :  { %v7955_v29 = vld [vmem:[#allocation9 + $0x264] sm:$0xf0] }
 0x152   :  { %3563 = vmatpush.bf16.msra.mxu1 %v6276_v61  ;;  %3552 = vmatpush.bf16.msra.mxu0 %v5956_v44  ;;  %v6691_v6 = vld [vmem:[#allocation9 + $0x648] sm:$0xf]  ;;  %v6180_v38 = vor.u32 %v7955_v29, %v6179_v27  ;;  %v7991_v44 = vld [vmem:[#allocation9 + $0x38c] sm:$0xf] }
 0x153   :  { %3589 = vmatpush.bf16.msra.mxu3 %v6788_v51  ;;  %3578 = vmatpush.bf16.msra.mxu2 %v6468_v63  ;;  %v8083_v31 = vld [vmem:[#allocation9 + $0x664] sm:$0xf0]  ;;  %v6376_v63 = vor.u32 %v7999_v50, %v6373_v52  ;;  %v6277_v29 = vld [vmem:[#allocation9 + $0x328] sm:$0xf0] }
 0x154   :  { %v7107_v35 = vld [vmem:[#allocation9 + $0x988] sm:$0xf]  ;;  %v6692_v39 = vor.u32 %v8083_v31, %v6691_v6  ;;  %v7895_v31 = vld [vmem:[#allocation9 + $0x8c] sm:$0xf] }
 0x155   :  { %3516 = vmatmul.bf16.vlgmr.msrb.gmra.mxu1 %v9013_v59  ;;  %v8187_v40 = vld [vmem:[#allocation9 + $0x9a4] sm:$0xf0] }
 0x156   :  { %3564 = vmatpush.bf16.msra.mxu1 %v6244_v22  ;;  %3553 = vmatpush.bf16.msra.mxu0 %v5924_v13  ;;  %v6147_v20 = vld [vmem:[#allocation9 + $0x208] sm:$0xf]  ;;  %v7108_v53 = vor.u32 %v8187_v40, %v7107_v35  ;;  %v7983_v13 = vld [vmem:[#allocation9 + $0x34c] sm:$0xf] }
 0x157   :  { %3590 = vmatpush.bf16.msra.mxu3 %v6756_v7  ;;  %3579 = vmatpush.bf16.msra.mxu2 %v6436_v9  ;;  %v7947_v41 = vld [vmem:[#allocation9 + $0x224] sm:$0xf0]  ;;  %v6344_v9 = vor.u32 %v7991_v44, %v6341_v3  ;;  %v7967_v40 = vld [vmem:[#allocation9 + $0x2cc] sm:$0xf] }
 0x158   :  { %v6659_v42 = vld [vmem:[#allocation9 + $0x608] sm:$0xf]  ;;  %v6148_v58 = vor.u32 %v7947_v41, %v6147_v20  ;;  %v6245_v20 = vld [vmem:[#allocation9 + $0x2e8] sm:$0xf0] }
 0x159   :  { %v8075_v43 = vld [vmem:[#allocation9 + $0x624] sm:$0xf0]  ;;  %v6248_v50 = vor.u32 %v7967_v40, %v6245_v20  ;;  %v8063_v3 = vld [vmem:[#allocation9 + $0x5cc] sm:$0xf] }
 0x15a   :  { %3565 = vmatpush.bf16.msra.mxu1 %v6212_v23  ;;  %v7395_v45 = vld [vmem:[#allocation9 + $0xbc8] sm:$0xf]  ;;  %3554 = vmatpush.bf16.msra.mxu0 %v5892_v32  ;;  %v6660_v60 = vor.u32 %v8075_v43, %v6659_v42  ;;  %v5957_v32 = vld [vmem:[#allocation9 + $0xa8] sm:$0xf0] }
 0x15b   :  { %3591 = vmatpush.bf16.msra.mxu3 %v6724_v24  ;;  %3580 = vmatpush.bf16.msra.mxu2 %v6404_v28  ;;  %v8259_v49 = vld [vmem:[#allocation9 + $0xbe4] sm:$0xf0]  ;;  %v6312_v24 = vor.u32 %v7983_v13, %v6309_v14  ;;  %v7975_v28 = vld [vmem:[#allocation9 + $0x30c] sm:$0xf] }
 0x15c   :  { %v7075_v61 = vld [vmem:[#allocation9 + $0x948] sm:$0xf]  ;;  %v7396_v62 = vor.u32 %v8259_v49, %v7395_v45  ;;  %v6280_v36 = vor.u32 %v7975_v28, %v6277_v29  ;;  %v7887_v42 = vld [vmem:[#allocation9 + $0x4c] sm:$0xf] }
 0x15d   :  { %v8179_v51 = vld [vmem:[#allocation9 + $0x964] sm:$0xf0]  ;;  %3555 = vmatmul.bf16.vlgmr.msra.gmra.mxu0 %v8982_v2  ;;  %v5925_v43 = vld [vmem:[#allocation9 + $0x68] sm:$0xf0] }
 0x15e   :  { %3599 = vmatpush.bf16.msrb.mxu0 %v7140_v34  ;;  %3566 = vmatpush.bf16.msra.mxu1 %v6180_v38  ;;  %v7363_v0 = vld [vmem:[#allocation9 + $0xb88] sm:$0xf]  ;;  %v7076_v46 = vor.u32 %v8179_v51, %v7075_v61  ;;  %v5960_v38 = vor.u32 %v7895_v31, %v5957_v32  ;;  %v7879_v51 = vld [vmem:[#allocation9 + $0xc] sm:$0xf] }
 0x15f   :  { %3625 = vmatpush.bf16.msrb.mxu2 %v6120_v33  ;;  %3592 = vmatpush.bf16.msra.mxu3 %v6692_v39  ;;  %v8251_v1 = vld [vmem:[#allocation9 + $0xba4] sm:$0xf0]  ;;  %v8183_v13 = vld [vmem:[#allocation9 + $0x98c] sm:$0xf] }
 0x160   :  { %3581 = vmatmul.bf16.vlgmr.msra.gmra.mxu2 %v9004_v57  ;;  %v7043_v22 = vld [vmem:[#allocation9 + $0x908] sm:$0xf]  ;;  %v7364_v8 = vor.u32 %v8251_v1, %v7363_v0  ;;  %v8191_v0 = vld [vmem:[#allocation9 + $0x9cc] sm:$0xf] }
 0x161   :  { %v8171_v7 = vld [vmem:[#allocation9 + $0x924] sm:$0xf0]  ;;  %v7109_v14 = vld [vmem:[#allocation9 + $0x9a8] sm:$0xf0] }
 0x162   :  { %3600 = vmatpush.bf16.msrb.mxu0 %v7108_v53  ;;  %3567 = vmatpush.bf16.msra.mxu1 %v6148_v58  ;;  %v7331_v10 = vld [vmem:[#allocation9 + $0xb48] sm:$0xf]  ;;  %v7044_v15 = vor.u32 %v8171_v7, %v7043_v22  ;;  %v5928_v53 = vor.u32 %v7887_v42, %v5925_v43  ;;  %v6213_v58 = vld [vmem:[#allocation9 + $0x2a8] sm:$0xf0] }
 0x163   :  { %3626 = vmatpush.bf16.msrb.mxu2 %v6088_v47  ;;  %3593 = vmatpush.bf16.msra.mxu3 %v6660_v60  ;;  %v8243_v12 = vld [vmem:[#allocation9 + $0xb64] sm:$0xf0]  ;;  %v6216_v44 = vor.u32 %v7959_v56, %v6213_v58  ;;  %v7951_v7 = vld [vmem:[#allocation9 + $0x24c] sm:$0xf] }
 0x164   :  { %v7011_v18 = vld [vmem:[#allocation9 + $0x8c8] sm:$0xf]  ;;  %v7332_v23 = vor.u32 %v8243_v12, %v7331_v10  ;;  %v8055_v12 = vld [vmem:[#allocation9 + $0x58c] sm:$0xf] }
 0x165   :  { %3568 = vmatmul.bf16.vlgmr.msra.gmra.mxu1 %v8989_v30  ;;  %v8163_v19 = vld [vmem:[#allocation9 + $0x8e4] sm:$0xf0]  ;;  %v8255_v28 = vld [vmem:[#allocation9 + $0xbcc] sm:$0xf] }
 0x166   :  { %3612 = vmatpush.bf16.msrb.mxu1 %v7396_v62  ;;  %3594 = vmatmul.bf16.vlgmr.msra.gmra.mxu3 %v9013_v59  ;;  %v7299_v25 = vld [vmem:[#allocation9 + $0xb08] sm:$0xf]  ;;  %v7012_v6 = vor.u32 %v8163_v19, %v7011_v18  ;;  %v5893_v62 = vld [vmem:[#allocation9 + $0x28] sm:$0xf0] }
 0x167   :  { %3638 = vmatpush.bf16.msrb.mxu3 %v6376_v63  ;;  %3627 = vmatpush.bf16.msrb.mxu2 %v6056_v48  ;;  %v8235_v27 = vld [vmem:[#allocation9 + $0xb24] sm:$0xf0]  ;;  %v7141_v48 = vld [vmem:[#allocation9 + $0x9e8] sm:$0xf0]  ;;  %v5896_v5 = vor.u32 %v7879_v51, %v5893_v62 }
 0x168   :  { %3601 = vmatpush.bf16.msrb.mxu0 %v7076_v46  ;;  %v6979_v33 = vld [vmem:[#allocation9 + $0x888] sm:$0xf]  ;;  %v7300_v35 = vor.u32 %v8235_v27, %v7299_v25  ;;  %v6629_v46 = vld [vmem:[#allocation9 + $0x5e8] sm:$0xf0]  ;;  %v7144_v10 = vor.u32 %v8191_v0, %v7141_v48 }
 0x169   :  { %v8155_v34 = vld [vmem:[#allocation9 + $0x8a4] sm:$0xf0]  ;;  %v8127_v25 = vld [vmem:[#allocation9 + $0x7cc] sm:$0xf] }
 0x16a   :  { %3613 = vmatpush.bf16.msrb.mxu1 %v7364_v8  ;;  %v7267_v37 = vld [vmem:[#allocation9 + $0xac8] sm:$0xf]  ;;  %v6980_v41 = vor.u32 %v8155_v34, %v6979_v33  ;;  %v6181_v8 = vld [vmem:[#allocation9 + $0x268] sm:$0xf0] }
 0x16b   :  { %3639 = vmatpush.bf16.msrb.mxu3 %v6344_v9  ;;  %3628 = vmatpush.bf16.msrb.mxu2 %v6024_v11  ;;  %v8227_v39 = vld [vmem:[#allocation9 + $0xae4] sm:$0xf0]  ;;  %v6632_v11 = vor.u32 %v8063_v3, %v6629_v46  ;;  %v6184_v16 = vor.u32 %v7951_v7, %v6181_v8  ;;  %v6885_v27 = vld [vmem:[#allocation9 + $0x7e8] sm:$0xf0] }
 0x16c   :  { %3602 = vmatpush.bf16.msrb.mxu0 %v7044_v15  ;;  %v6947_v45 = vld [vmem:[#allocation9 + $0x848] sm:$0xf]  ;;  %v7268_v49 = vor.u32 %v8227_v39, %v7267_v37  ;;  %v7397_v29 = vld [vmem:[#allocation9 + $0xbe8] sm:$0xf0] }
 0x16d   :  { %v8147_v47 = vld [vmem:[#allocation9 + $0x864] sm:$0xf0]  ;;  %v8175_v31 = vld [vmem:[#allocation9 + $0x94c] sm:$0xf] }
 0x16e   :  { %3614 = vmatpush.bf16.msrb.mxu1 %v7332_v23  ;;  %v7235_v52 = vld [vmem:[#allocation9 + $0xa88] sm:$0xf]  ;;  %v6948_v60 = vor.u32 %v8147_v47, %v6947_v45  ;;  %v7943_v23 = vld [vmem:[#allocation9 + $0x20c] sm:$0xf] }
 0x16f   :  { %3640 = vmatpush.bf16.msrb.mxu3 %v6312_v24  ;;  %3629 = vmatpush.bf16.msrb.mxu2 %v5992_v26  ;;  %v8219_v54 = vld [vmem:[#allocation9 + $0xaa4] sm:$0xf0]  ;;  %v6149_v24 = vld [vmem:[#allocation9 + $0x228] sm:$0xf0]  ;;  %v7112_v26 = vor.u32 %v8183_v13, %v7109_v14 }
 0x170   :  { %3603 = vmatpush.bf16.msrb.mxu0 %v7012_v6  ;;  %v6915_v61 = vld [vmem:[#allocation9 + $0x808] sm:$0xf]  ;;  %v7236_v1 = vor.u32 %v8219_v54, %v7235_v52  ;;  %v6600_v6 = vor.u32 %v8055_v12, %v6597_v17  ;;  %v7077_v32 = vld [vmem:[#allocation9 + $0x968] sm:$0xf0]  ;;  %v6152_v34 = vor.u32 %v7943_v23, %v6149_v24 }
 0x171   :  { %v8139_v63 = vld [vmem:[#allocation9 + $0x824] sm:$0xf0]  ;;  %v8047_v37 = vld [vmem:[#allocation9 + $0x54c] sm:$0xf]  ;;  %v7080_v40 = vor.u32 %v8175_v31, %v7077_v32 }
 0x172   :  { %3615 = vmatpush.bf16.msrb.mxu1 %v7300_v35  ;;  %v7203_v4 = vld [vmem:[#allocation9 + $0xa48] sm:$0xf]  ;;  %v6916_v9 = vor.u32 %v8139_v63, %v6915_v61  ;;  %v6888_v35 = vor.u32 %v8127_v25, %v6885_v27  ;;  %v8119_v39 = vld [vmem:[#allocation9 + $0x78c] sm:$0xf] }
 0x173   :  { %3641 = vmatpush.bf16.msrb.mxu3 %v6280_v36  ;;  %3630 = vmatpush.bf16.msrb.mxu2 %v5960_v38  ;;  %v8211_v22 = vld [vmem:[#allocation9 + $0xa64] sm:$0xf0]  ;;  %v7400_v36 = vor.u32 %v8255_v28, %v7397_v29  ;;  %v6565_v38 = vld [vmem:[#allocation9 + $0x568] sm:$0xf0] }
 0x174   :  { %3604 = vmatpush.bf16.msrb.mxu0 %v6980_v41  ;;  %v7204_v15 = vor.u32 %v8211_v22, %v7203_v4  ;;  %v7171_v18 = vld [vmem:[#allocation9 + $0xa08] sm:$0xf]  ;;  %v6853_v20 = vld [vmem:[#allocation9 + $0x7a8] sm:$0xf0]  ;;  %v6568_v47 = vor.u32 %v8047_v37, %v6565_v38 }
 0x175   :  { %v8203_v19 = vld [vmem:[#allocation9 + $0xa24] sm:$0xf0]  ;;  %v8247_v41 = vld [vmem:[#allocation9 + $0xb8c] sm:$0xf]  ;;  %v6856_v52 = vor.u32 %v8119_v39, %v6853_v20 }
 0x176   :  { %3616 = vmatpush.bf16.msrb.mxu1 %v7268_v49  ;;  %v7172_v33 = vor.u32 %v8203_v19, %v7171_v18  ;;  %v7365_v42 = vld [vmem:[#allocation9 + $0xba8] sm:$0xf0]  ;;  %v9044_v49 = vld [vmem:[#allocation11] sm:$0xff] }
 0x177   :  { %3642 = vmatpush.bf16.msrb.mxu3 %v6248_v50  ;;  %3631 = vmatpush.bf16.msrb.mxu2 %v5928_v53  ;;  %v8167_v43 = vld [vmem:[#allocation9 + $0x90c] sm:$0xf]  ;;  %v7368_v53 = vor.u32 %v8247_v41, %v7365_v42  ;;  %v1455_v63 = vperm.slane %v9044_v49, 0 }
 0x178   :  { %3605 = vmatpush.bf16.msrb.mxu0 %v6948_v60  ;;  %v7045_v45 = vld [vmem:[#allocation9 + $0x928] sm:$0xf0] }
 0x179   :  { %v8039_v54 = vld [vmem:[#allocation9 + $0x50c] sm:$0xf]  ;;  %v7048_v60 = vor.u32 %v8167_v43, %v7045_v45  ;;  %v6635_v45 = vld [vmem:[#allocation9 + $0x5d0] sm:$0xf] }
 0x17a   :  { %3617 = vmatpush.bf16.msrb.mxu1 %v7236_v1  ;;  %v3400_v50 = vpop.f32.mrf.mxu0  ;;  %v6533_v56 = vld [vmem:[#allocation9 + $0x528] sm:$0xf0] }
 0x17b   :  { %3643 = vmatpush.bf16.msrb.mxu3 %v6216_v44  ;;  %3632 = vmatpush.bf16.msrb.mxu2 %v5896_v5  ;;  %v8111_v58 = vld [vmem:[#allocation9 + $0x74c] sm:$0xf]  ;;  %v6536_v1 = vor.u32 %v8039_v54, %v6533_v56  ;;  %v6123_v56 = vld [vmem:[#allocation9 + $0x1d0] sm:$0xf] }
 0x17c   :  { %3606 = vmatpush.bf16.msrb.mxu0 %v6916_v9  ;;  %v6821_v61 = vld [vmem:[#allocation9 + $0x768] sm:$0xf0] }
 0x17d   :  { %v8239_v51 = vld [vmem:[#allocation9 + $0xb4c] sm:$0xf]  ;;  %v6824_v44 = vor.u32 %v8111_v58, %v6821_v61 }
 0x17e   :  { %3618 = vmatpush.bf16.msrb.mxu1 %v7204_v15  ;;  %3633 = vmatmul.bf16.vlgmr.msrb.gmra.mxu2 %v8982_v2  ;;  %v7333_v62 = vld [vmem:[#allocation9 + $0xb68] sm:$0xf0] }
 0x17f   :  { %3677 = vmatpush.bf16.msra.mxu2 %v7144_v10  ;;  %3644 = vmatpush.bf16.msrb.mxu3 %v6184_v16  ;;  %v8159_v0 = vld [vmem:[#allocation9 + $0x8cc] sm:$0xf]  ;;  %v7336_v3 = vor.u32 %v8239_v51, %v7333_v62  ;;  %v3401_v10 = vadd.f32 %v3400_v50, %v1455_v63 }
 0x180   :  { %3651 = vmatpush.bf16.msra.mxu0 %v6632_v11  ;;  %v7013_v48 = vld [vmem:[#allocation9 + $0x8e8] sm:$0xf0] }
 0x181   :  { %3607 = vmatmul.bf16.vlgmr.msrb.gmra.mxu0 %v9027_v55  ;;  %v8031_v46 = vld [vmem:[#allocation9 + $0x4cc] sm:$0xf]  ;;  %v7016_v22 = vor.u32 %v8159_v0, %v7013_v48 }
 0x182   :  { %3619 = vmatpush.bf16.msrb.mxu1 %v7172_v33  ;;  %v6501_v4 = vld [vmem:[#allocation9 + $0x4e8] sm:$0xf0]  ;;  %v3413_v13 = vpop.f32.mrf.mxu1  ;;  %v3402_v16 = vpop.f32.mrf.mxu0 }
 0x183   :  { %3678 = vmatpush.bf16.msra.mxu2 %v7112_v26  ;;  %3645 = vmatpush.bf16.msrb.mxu3 %v6152_v34  ;;  %v8103_v5 = vld [vmem:[#allocation9 + $0x70c] sm:$0xf]  ;;  %v6504_v14 = vor.u32 %v8031_v46, %v6501_v4  ;;  %v9049_v15 = vadd.f32 %v3413_v13, %v3401_v10  ;;  %v6091_v4 = vld [vmem:[#allocation9 + $0x190] sm:$0xf] }
 0x184   :  { %3652 = vmatpush.bf16.msra.mxu0 %v6600_v6  ;;  %v6789_v7 = vld [vmem:[#allocation9 + $0x728] sm:$0xf0]  ;;  %v8004_v13 = vld [vmem:[#allocation9 + $0x3ec] sm:$0xf0] }
 0x185   :  { %3620 = vmatmul.bf16.vlgmr.msrb.gmra.mxu1 %v9032_v21  ;;  %v8231_v8 = vld [vmem:[#allocation9 + $0xb0c] sm:$0xf]  ;;  %v6792_v17 = vor.u32 %v8103_v5, %v6789_v7  ;;  %v7932_v5 = vld [vmem:[#allocation9 + $0x1ac] sm:$0xf0] }
 0x186   :  { %3664 = vmatpush.bf16.msra.mxu1 %v6888_v35  ;;  %3646 = vmatmul.bf16.vlgmr.msrb.gmra.mxu3 %v8989_v30  ;;  %v7301_v9 = vld [vmem:[#allocation9 + $0xb28] sm:$0xf0]  ;;  %v8132_v16 = vld [vmem:[#allocation9 + $0x7ec] sm:$0xf0] }
 0x187   :  { %3690 = vmatpush.bf16.msra.mxu3 %v7400_v36  ;;  %3679 = vmatpush.bf16.msra.mxu2 %v7080_v40  ;;  %v8151_v11 = vld [vmem:[#allocation9 + $0x88c] sm:$0xf]  ;;  %v7304_v18 = vor.u32 %v8231_v8, %v7301_v9 }
 0x188   :  { %3653 = vmatpush.bf16.msra.mxu0 %v6568_v47  ;;  %v6981_v12 = vld [vmem:[#allocation9 + $0x8a8] sm:$0xf0]  ;;  %v8068_v47 = vld [vmem:[#allocation9 + $0x5ec] sm:$0xf0] }
 0x189   :  { %v8023_v19 = vld [vmem:[#allocation9 + $0x48c] sm:$0xf]  ;;  %v6984_v25 = vor.u32 %v8151_v11, %v6981_v12  ;;  %v6636_v62 = vor.u32 %v8068_v47, %v6635_v45  ;;  %v6379_v12 = vld [vmem:[#allocation9 + $0x3d0] sm:$0xf] }
 0x18a   :  { %3665 = vmatpush.bf16.msra.mxu1 %v6856_v52  ;;  %v6469_v23 = vld [vmem:[#allocation9 + $0x4a8] sm:$0xf0]  ;;  %v3415_v42 = vpop.f32.mrf.mxu1  ;;  %v8116_v45 = vld [vmem:[#allocation9 + $0x76c] sm:$0xf0] }
 0x18b   :  { %3691 = vmatpush.bf16.msra.mxu3 %v7368_v53  ;;  %3680 = vmatpush.bf16.msra.mxu2 %v7048_v60  ;;  %v8095_v24 = vld [vmem:[#allocation9 + $0x6cc] sm:$0xf]  ;;  %v6472_v31 = vor.u32 %v8023_v19, %v6469_v23  ;;  %v7940_v60 = vld [vmem:[#allocation9 + $0x1ec] sm:$0xf0]  ;;  %v6092_v19 = vor.u32 %v7932_v5, %v6091_v4 }
 0x18c   :  { %3654 = vmatpush.bf16.msra.mxu0 %v6536_v1  ;;  %v6757_v26 = vld [vmem:[#allocation9 + $0x6e8] sm:$0xf0]  ;;  %v6603_v1 = vld [vmem:[#allocation9 + $0x590] sm:$0xf] }
 0x18d   :  { %v8223_v27 = vld [vmem:[#allocation9 + $0xacc] sm:$0xf]  ;;  %v6760_v32 = vor.u32 %v8095_v24, %v6757_v26  ;;  %v6059_v26 = vld [vmem:[#allocation9 + $0x150] sm:$0xf] }
 0x18e   :  { %3666 = vmatpush.bf16.msra.mxu1 %v6824_v44  ;;  %v7269_v28 = vld [vmem:[#allocation9 + $0xae8] sm:$0xf0]  ;;  %v8060_v44 = vld [vmem:[#allocation9 + $0x5ac] sm:$0xf0] }
 0x18f   :  { %3692 = vmatpush.bf16.msra.mxu3 %v7336_v3  ;;  %3681 = vmatpush.bf16.msra.mxu2 %v7016_v22  ;;  %v8143_v29 = vld [vmem:[#allocation9 + $0x84c] sm:$0xf]  ;;  %v7272_v33 = vor.u32 %v8223_v27, %v7269_v28  ;;  %v6124_v3 = vor.u32 %v7940_v60, %v6123_v56  ;;  %v6604_v11 = vor.u32 %v8060_v44, %v6603_v1  ;;  %v7924_v27 = vld [vmem:[#allocation9 + $0x16c] sm:$0xf0] }
 0x190   :  { %v6949_v6 = vld [vmem:[#allocation9 + $0x868] sm:$0xf0]  ;;  %3655 = vmatpush.bf16.msra.mxu0 %v6504_v14  ;;  %v6891_v14 = vld [vmem:[#allocation9 + $0x7d0] sm:$0xf] }
 0x191   :  { %v8015_v34 = vld [vmem:[#allocation9 + $0x44c] sm:$0xf]  ;;  %v6952_v37 = vor.u32 %v8143_v29, %v6949_v6  ;;  %v6892_v28 = vor.u32 %v8132_v16, %v6891_v14  ;;  %v6347_v6 = vld [vmem:[#allocation9 + $0x390] sm:$0xf] }
 0x192   :  { %3667 = vmatpush.bf16.msra.mxu1 %v6792_v17  ;;  %v6437_v35 = vld [vmem:[#allocation9 + $0x468] sm:$0xf0]  ;;  %v6571_v17 = vld [vmem:[#allocation9 + $0x550] sm:$0xf] }
 0x193   :  { %3693 = vmatpush.bf16.msra.mxu3 %v7304_v18  ;;  %v8087_v36 = vld [vmem:[#allocation9 + $0x68c] sm:$0xf]  ;;  %3682 = vmatpush.bf16.msra.mxu2 %v6984_v25  ;;  %v6440_v43 = vor.u32 %v8015_v34, %v6437_v35  ;;  %v8052_v18 = vld [vmem:[#allocation9 + $0x56c] sm:$0xf0]  ;;  %v6380_v25 = vor.u32 %v8004_v13, %v6379_v12 }
 0x194   :  { %v6725_v38 = vld [vmem:[#allocation9 + $0x6a8] sm:$0xf0]  ;;  %3656 = vmatpush.bf16.msra.mxu0 %v6472_v31  ;;  %v6572_v29 = vor.u32 %v8052_v18, %v6571_v17  ;;  %v7996_v31 = vld [vmem:[#allocation9 + $0x3ac] sm:$0xf0] }
 0x195   :  { %v8215_v39 = vld [vmem:[#allocation9 + $0xa8c] sm:$0xf]  ;;  %v6728_v50 = vor.u32 %v8087_v36, %v6725_v38  ;;  %v6539_v34 = vld [vmem:[#allocation9 + $0x510] sm:$0xf]  ;;  %v6060_v36 = vor.u32 %v7924_v27, %v6059_v26 }
 0x196   :  { %v7237_v40 = vld [vmem:[#allocation9 + $0xaa8] sm:$0xf0]  ;;  %3668 = vmatpush.bf16.msra.mxu1 %v6760_v32  ;;  %v6859_v32 = vld [vmem:[#allocation9 + $0x790] sm:$0xf] }
 0x197   :  { %v8135_v20 = vld [vmem:[#allocation9 + $0x80c] sm:$0xf]  ;;  %3694 = vmatpush.bf16.msra.mxu3 %v7272_v33  ;;  %v7240_v52 = vor.u32 %v8215_v39, %v7237_v40  ;;  %3683 = vmatpush.bf16.msra.mxu2 %v6952_v37  ;;  %v8124_v33 = vld [vmem:[#allocation9 + $0x7ac] sm:$0xf0]  ;;  %v6348_v37 = vor.u32 %v7996_v31, %v6347_v6 }
 0x198   :  { %v6917_v41 = vld [vmem:[#allocation9 + $0x828] sm:$0xf0]  ;;  %3657 = vmatpush.bf16.msra.mxu0 %v6440_v43  ;;  %v8044_v35 = vld [vmem:[#allocation9 + $0x52c] sm:$0xf0]  ;;  %v6860_v40 = vor.u32 %v8124_v33, %v6859_v32  ;;  %v7936_v33 = vld [vmem:[#allocation9 + $0x1d4] sm:$0xf] }
 0x199   :  { %v8007_v53 = vld [vmem:[#allocation9 + $0x40c] sm:$0xf]  ;;  %v6920_v58 = vor.u32 %v8135_v20, %v6917_v41  ;;  %v6027_v38 = vld [vmem:[#allocation9 + $0x110] sm:$0xf]  ;;  %v6540_v20 = vor.u32 %v8044_v35, %v6539_v34  ;;  %v6125_v34 = vld [vmem:[#allocation9 + $0x1f0] sm:$0xf0] }
 0x19a   :  { %v6405_v54 = vld [vmem:[#allocation9 + $0x428] sm:$0xf0]  ;;  %3669 = vmatpush.bf16.msra.mxu1 %v6728_v50  ;;  %v7916_v39 = vld [vmem:[#allocation9 + $0x12c] sm:$0xf0] }
 0x19b   :  { %v8079_v61 = vld [vmem:[#allocation9 + $0x64c] sm:$0xf]  ;;  %v6408_v48 = vor.u32 %v8007_v53, %v6405_v54  ;;  %3695 = vmatpush.bf16.msra.mxu3 %v7240_v52  ;;  %3684 = vmatpush.bf16.msra.mxu2 %v6920_v58  ;;  %v6315_v41 = vld [vmem:[#allocation9 + $0x350] sm:$0xf]  ;;  %v6028_v52 = vor.u32 %v7916_v39, %v6027_v38 }
 0x19c   :  { %v6693_v51 = vld [vmem:[#allocation9 + $0x668] sm:$0xf0]  ;;  %v7988_v42 = vld [vmem:[#allocation9 + $0x36c] sm:$0xf0] }
 0x19d   :  { %v8207_v63 = vld [vmem:[#allocation9 + $0xa4c] sm:$0xf]  ;;  %v6696_v46 = vor.u32 %v8079_v61, %v6693_v51  ;;  %3658 = vmatpush.bf16.msra.mxu0 %v6408_v48  ;;  %v6827_v43 = vld [vmem:[#allocation9 + $0x750] sm:$0xf]  ;;  %v6316_v53 = vor.u32 %v7988_v42, %v6315_v41 }
 0x19e   :  { %v7205_v0 = vld [vmem:[#allocation9 + $0xa68] sm:$0xf0]  ;;  %3685 = vmatmul.bf16.vlgmr.msra.gmra.mxu2 %v9027_v55  ;;  %v6507_v47 = vld [vmem:[#allocation9 + $0x4d0] sm:$0xf]  ;;  %v6828_v58 = vor.u32 %v8116_v45, %v6827_v43  ;;  %v6128_v43 = vor.u32 %v7936_v33, %v6125_v34 }
 0x19f   :  { %v8071_v22 = vld [vmem:[#allocation9 + $0x60c] sm:$0xf]  ;;  %v7208_v7 = vor.u32 %v8207_v63, %v7205_v0  ;;  %3729 = vmatpush.bf16.msrb.mxu2 %v6636_v62  ;;  %3670 = vmatpush.bf16.msra.mxu1 %v6696_v46  ;;  %v8036_v50 = vld [vmem:[#allocation9 + $0x4ec] sm:$0xf0] }
 0x1a0   :  { %v6661_v8 = vld [vmem:[#allocation9 + $0x628] sm:$0xf0]  ;;  %3659 = vmatmul.bf16.vlgmr.msra.gmra.mxu0 %v9004_v57  ;;  %v5995_v54 = vld [vmem:[#allocation9 + $0xd0] sm:$0xf]  ;;  %v6508_v60 = vor.u32 %v8036_v50, %v6507_v47  ;;  %v3426_v1 = vpop.f32.mrf.mxu2 }
 0x1a1   :  { %v8199_v9 = vld [vmem:[#allocation9 + $0xa0c] sm:$0xf]  ;;  %3703 = vmatpush.bf16.msrb.mxu0 %v6124_v3  ;;  %v6664_v23 = vor.u32 %v8071_v22, %v6661_v8  ;;  %3696 = vmatpush.bf16.msra.mxu3 %v7208_v7  ;;  %v7908_v56 = vld [vmem:[#allocation9 + $0xec] sm:$0xf0]  ;;  %v3427_v3 = vadd.f32 %v3426_v1, %v9049_v15 }
 0x1a2   :  { %v7173_v10 = vld [vmem:[#allocation9 + $0xa28] sm:$0xf0]  ;;  %v6283_v61 = vld [vmem:[#allocation9 + $0x310] sm:$0xf]  ;;  %v5996_v44 = vor.u32 %v7908_v56, %v5995_v54 }
 0x1a3   :  { %v7176_v24 = vor.u32 %v8199_v9, %v7173_v10  ;;  %3730 = vmatpush.bf16.msrb.mxu2 %v6604_v11  ;;  %3671 = vmatpush.bf16.msra.mxu1 %v6664_v23  ;;  %v7980_v51 = vld [vmem:[#allocation9 + $0x32c] sm:$0xf0] }
 0x1a4   :  { %v6795_v62 = vld [vmem:[#allocation9 + $0x710] sm:$0xf]  ;;  %v6284_v46 = vor.u32 %v7980_v51, %v6283_v61 }
 0x1a5   :  { %3704 = vmatpush.bf16.msrb.mxu0 %v6092_v19  ;;  %3697 = vmatpush.bf16.msra.mxu3 %v7176_v24  ;;  %v8108_v63 = vld [vmem:[#allocation9 + $0x72c] sm:$0xf0] }
 0x1a6   :  { %3672 = vmatmul.bf16.vlgmr.msra.gmra.mxu1 %v9013_v59  ;;  %v6475_v0 = vld [vmem:[#allocation9 + $0x490] sm:$0xf]  ;;  %v6796_v22 = vor.u32 %v8108_v63, %v6795_v62 }
 0x1a7   :  { %3716 = vmatpush.bf16.msrb.mxu1 %v6380_v25  ;;  %3731 = vmatpush.bf16.msrb.mxu2 %v6572_v29  ;;  %v8028_v48 = vld [vmem:[#allocation9 + $0x4ac] sm:$0xf0] }
 0x1a8   :  { %3698 = vmatmul.bf16.vlgmr.msra.gmra.mxu3 %v9032_v21  ;;  %v5963_v4 = vld [vmem:[#allocation9 + $0x90] sm:$0xf]  ;;  %v6476_v7 = vor.u32 %v8028_v48, %v6475_v0  ;;  %v3439_v26 = vpop.f32.mrf.mxu3  ;;  %v3428_v31 = vpop.f32.mrf.mxu2 }
 0x1a9   :  { %3742 = vmatpush.bf16.msrb.mxu3 %v6892_v28  ;;  %3705 = vmatpush.bf16.msrb.mxu0 %v6060_v36  ;;  %v7900_v5 = vld [vmem:[#allocation9 + $0xac] sm:$0xf0]  ;;  %v9056_v6 = vadd.f32 %v3439_v26, %v3427_v3 }
 0x1aa   :  { %v6251_v8 = vld [vmem:[#allocation9 + $0x2d0] sm:$0xf]  ;;  %v5964_v14 = vor.u32 %v7900_v5, %v5963_v4  ;;  %v6381_v5 = vld [vmem:[#allocation9 + $0x3f0] sm:$0xf0] }
 0x1ab   :  { %3717 = vmatpush.bf16.msrb.mxu1 %v6348_v37  ;;  %3732 = vmatpush.bf16.msrb.mxu2 %v6540_v20  ;;  %v7972_v9 = vld [vmem:[#allocation9 + $0x2ec] sm:$0xf0] }
 0x1ac   :  { %v6763_v10 = vld [vmem:[#allocation9 + $0x6d0] sm:$0xf]  ;;  %v6252_v16 = vor.u32 %v7972_v9, %v6251_v8 }
 0x1ad   :  { %3743 = vmatpush.bf16.msrb.mxu3 %v6860_v40  ;;  %3706 = vmatpush.bf16.msrb.mxu0 %v6028_v52  ;;  %v8100_v11 = vld [vmem:[#allocation9 + $0x6ec] sm:$0xf0]  ;;  %v7928_v52 = vld [vmem:[#allocation9 + $0x194] sm:$0xf] }
 0x1ae   :  { %v6443_v12 = vld [vmem:[#allocation9 + $0x450] sm:$0xf]  ;;  %v6764_v15 = vor.u32 %v8100_v11, %v6763_v10  ;;  %v1456_v10 = vperm.slane %v9044_v49, 1 }
 0x1af   :  { %3718 = vmatpush.bf16.msrb.mxu1 %v6316_v53  ;;  %3733 = vmatpush.bf16.msrb.mxu2 %v6508_v60  ;;  %v8020_v13 = vld [vmem:[#allocation9 + $0x46c] sm:$0xf0]  ;;  %v6093_v53 = vld [vmem:[#allocation9 + $0x1b0] sm:$0xf0] }
 0x1b0   :  { %v5931_v17 = vld [vmem:[#allocation9 + $0x50] sm:$0xf]  ;;  %v6444_v19 = vor.u32 %v8020_v13, %v6443_v12  ;;  %v3441_v48 = vpop.f32.mrf.mxu3  ;;  %v6096_v1 = vor.u32 %v7928_v52, %v6093_v53  ;;  %v3478_v4 = vpop.f32.mrf.mxu2 }
 0x1b1   :  { %3744 = vmatpush.bf16.msrb.mxu3 %v6828_v58  ;;  %3707 = vmatpush.bf16.msrb.mxu0 %v5996_v44  ;;  %v7892_v18 = vld [vmem:[#allocation9 + $0x6c] sm:$0xf0] }
 0x1b2   :  { %v6219_v23 = vld [vmem:[#allocation9 + $0x290] sm:$0xf]  ;;  %v5932_v32 = vor.u32 %v7892_v18, %v5931_v17 }
 0x1b3   :  { %3719 = vmatpush.bf16.msrb.mxu1 %v6284_v46  ;;  %3734 = vmatpush.bf16.msrb.mxu2 %v6476_v7  ;;  %v7964_v24 = vld [vmem:[#allocation9 + $0x2ac] sm:$0xf0]  ;;  %v8000_v46 = vld [vmem:[#allocation9 + $0x3d4] sm:$0xf] }
 0x1b4   :  { %v6731_v25 = vld [vmem:[#allocation9 + $0x690] sm:$0xf]  ;;  %v6220_v35 = vor.u32 %v7964_v24, %v6219_v23  ;;  %v6061_v7 = vld [vmem:[#allocation9 + $0x170] sm:$0xf0] }
 0x1b5   :  { %3745 = vmatpush.bf16.msrb.mxu3 %v6796_v22  ;;  %v8092_v27 = vld [vmem:[#allocation9 + $0x6ac] sm:$0xf0]  ;;  %3708 = vmatpush.bf16.msrb.mxu0 %v5964_v14  ;;  %v7920_v22 = vld [vmem:[#allocation9 + $0x154] sm:$0xf] }
 0x1b6   :  { %v6411_v28 = vld [vmem:[#allocation9 + $0x410] sm:$0xf]  ;;  %v6732_v39 = vor.u32 %v8092_v27, %v6731_v25  ;;  %v6064_v17 = vor.u32 %v7920_v22, %v6061_v7  ;;  %v6349_v23 = vld [vmem:[#allocation9 + $0x3b0] sm:$0xf0]  ;;  %v3479_v27 = vadd.f32 %v3478_v4, %v1456_v10 }
 0x1b7   :  { %v8012_v29 = vld [vmem:[#allocation9 + $0x42c] sm:$0xf0]  ;;  %3720 = vmatpush.bf16.msrb.mxu1 %v6252_v16  ;;  %3735 = vmatpush.bf16.msrb.mxu2 %v6444_v19  ;;  %v6384_v16 = vor.u32 %v8000_v46, %v6381_v5  ;;  %v7992_v19 = vld [vmem:[#allocation9 + $0x394] sm:$0xf] }
 0x1b8   :  { %v5899_v36 = vld [vmem:[#allocation9 + $0x10] sm:$0xf]  ;;  %v6412_v40 = vor.u32 %v8012_v29, %v6411_v28  ;;  %v7912_v24 = vld [vmem:[#allocation9 + $0x114] sm:$0xf]  ;;  %v6352_v34 = vor.u32 %v7992_v19, %v6349_v23 }
 0x1b9   :  { %v7884_v37 = vld [vmem:[#allocation9 + $0x2c] sm:$0xf0]  ;;  %3746 = vmatpush.bf16.msrb.mxu3 %v6764_v15  ;;  %3709 = vmatpush.bf16.msrb.mxu0 %v5932_v32  ;;  %v6029_v25 = vld [vmem:[#allocation9 + $0x130] sm:$0xf0]  ;;  %v3491_v32 = vpop.f32.mrf.mxu3 }
 0x1ba   :  { %v7147_v38 = vld [vmem:[#allocation9 + $0x9d0] sm:$0xf]  ;;  %v5900_v50 = vor.u32 %v7884_v37, %v5899_v36  ;;  %v3452_v33 = vpop.f32.mrf.mxu0  ;;  %v6253_v10 = vld [vmem:[#allocation9 + $0x2f0] sm:$0xf0] }
 0x1bb   :  { %v8196_v20 = vld [vmem:[#allocation9 + $0x9ec] sm:$0xf0]  ;;  %3721 = vmatpush.bf16.msrb.mxu1 %v6220_v35  ;;  %3736 = vmatpush.bf16.msrb.mxu2 %v6412_v40  ;;  %v6032_v35 = vor.u32 %v7912_v24, %v6029_v25  ;;  %v3453_v40 = vadd.f32 %v3452_v33, %v9056_v6  ;;  %v6285_v6 = vld [vmem:[#allocation9 + $0x330] sm:$0xf0] }
 0x1bc   :  { %v6187_v41 = vld [vmem:[#allocation9 + $0x250] sm:$0xf]  ;;  %v7148_v54 = vor.u32 %v8196_v20, %v7147_v38  ;;  %v7984_v38 = vld [vmem:[#allocation9 + $0x354] sm:$0xf]  ;;  %v3480_v20 = vpop.f32.mrf.mxu2 }
 0x1bd   :  { %v7956_v42 = vld [vmem:[#allocation9 + $0x26c] sm:$0xf0]  ;;  %3747 = vmatpush.bf16.msrb.mxu3 %v6732_v39  ;;  %3710 = vmatpush.bf16.msrb.mxu0 %v5900_v50  ;;  %v9061_v39 = vadd.f32 %v3491_v32, %v3479_v27  ;;  %v7960_v24 = vld [vmem:[#allocation9 + $0x294] sm:$0xf]  ;;  %v8820_v32 = vmov 1.4142135  }
 0x1be   :  { %v6699_v45 = vld [vmem:[#allocation9 + $0x650] sm:$0xf]  ;;  %v6188_v56 = vor.u32 %v7956_v42, %v6187_v41  ;;  %3737 = vmatmul.bf16.vlgmr.msrb.gmra.mxu2 %v9004_v57  ;;  %v6317_v41 = vld [vmem:[#allocation9 + $0x370] sm:$0xf0]  ;;  %8390 = vrcp.f32 %v8820_v32 }
 0x1bf   :  { %v8084_v47 = vld [vmem:[#allocation9 + $0x66c] sm:$0xf0]  ;;  %3781 = vmatpush.bf16.msra.mxu2 %v6128_v43  ;;  %v7904_v42 = vld [vmem:[#allocation9 + $0xd4] sm:$0xf]  ;;  %v6320_v53 = vor.u32 %v7984_v38, %v6317_v41 }
 0x1c0   :  { %v7115_v58 = vld [vmem:[#allocation9 + $0x990] sm:$0xf]  ;;  %v6700_v51 = vor.u32 %v8084_v47, %v6699_v45  ;;  %3722 = vmatpush.bf16.msrb.mxu1 %v6188_v56  ;;  %3711 = vmatmul.bf16.vlgmr.msrb.gmra.mxu0 %v8982_v2  ;;  %v5997_v43 = vld [vmem:[#allocation9 + $0xf0] sm:$0xf0] }
 0x1c1   :  { %v8188_v60 = vld [vmem:[#allocation9 + $0x9ac] sm:$0xf0]  ;;  %3755 = vmatpush.bf16.msra.mxu0 %v7148_v54  ;;  %v6000_v54 = vor.u32 %v7904_v42, %v5997_v43  ;;  %v6221_v25 = vld [vmem:[#allocation9 + $0x2b0] sm:$0xf0] }
 0x1c2   :  { %v6155_v61 = vld [vmem:[#allocation9 + $0x210] sm:$0xf]  ;;  %v7116_v8 = vor.u32 %v8188_v60, %v7115_v58  ;;  %3748 = vmatpush.bf16.msrb.mxu3 %v6700_v51  ;;  %v7976_v60 = vld [vmem:[#allocation9 + $0x314] sm:$0xf]  ;;  %v3454_v46 = vpop.f32.mrf.mxu0 }
 0x1c3   :  { %v7948_v62 = vld [vmem:[#allocation9 + $0x22c] sm:$0xf0]  ;;  %3782 = vmatpush.bf16.msra.mxu2 %v6096_v1  ;;  %v5965_v51 = vld [vmem:[#allocation9 + $0xb0] sm:$0xf0]  ;;  %v6288_v4 = vor.u32 %v7976_v60, %v6285_v6 }
 0x1c4   :  { %v6667_v63 = vld [vmem:[#allocation9 + $0x610] sm:$0xf]  ;;  %v6156_v9 = vor.u32 %v7948_v62, %v6155_v61  ;;  %v7896_v61 = vld [vmem:[#allocation9 + $0x94] sm:$0xf]  ;;  %v9073_v46 = vpop.eup %8390 }
 0x1c5   :  { %v8076_v0 = vld [vmem:[#allocation9 + $0x62c] sm:$0xf0]  ;;  %3756 = vmatpush.bf16.msra.mxu0 %v7116_v8  ;;  %v5968_v5 = vor.u32 %v7896_v61, %v5965_v51  ;;  %v7968_v8 = vld [vmem:[#allocation9 + $0x2d4] sm:$0xf]  ;;  %vm4028_vm0 = vweird.f32 %v9073_v46 }
 0x1c6   :  { %v7403_v44 = vld [vmem:[#allocation9 + $0xbd0] sm:$0xf]  ;;  %v6668_v11 = vor.u32 %v8076_v0, %v6667_v63  ;;  %3723 = vmatpush.bf16.msrb.mxu1 %v6156_v9  ;;  %v3465_v63 = vpop.f32.mrf.mxu1  ;;  %v9068_v9 = vpop.f32.mrf.mxu2  ;;  %v5901_v27 = vld [vmem:[#allocation9 + $0x30] sm:$0xf0] }
 0x1c7   :  { %v8260_v3 = vld [vmem:[#allocation9 + $0xbec] sm:$0xf0]  ;;  %3783 = vmatpush.bf16.msra.mxu2 %v6064_v17  ;;  %v6637_v41 = vld [vmem:[#allocation9 + $0x5f0] sm:$0xf0] }
 0x1c8   :  { %v7404_v12 = vor.u32 %v8260_v3, %v7403_v44  ;;  %v7083_v13 = vld [vmem:[#allocation9 + $0x950] sm:$0xf]  ;;  %3749 = vmatpush.bf16.msrb.mxu3 %v6668_v11  ;;  %v9066_v44 = vadd.f32 %v3465_v63, %v3453_v40  ;;  %v3493_v3 = vpop.f32.mrf.mxu3  ;;  %v7888_v11 = vld [vmem:[#allocation9 + $0x54] sm:$0xf]  ;;  %v6224_v40 = vor.u32 %v7960_v24, %v6221_v25 }
 0x1c9   :  { %v8180_v14 = vld [vmem:[#allocation9 + $0x96c] sm:$0xf0]  ;;  %3724 = vmatmul.bf16.vlgmr.msrb.gmra.mxu1 %v8989_v30  ;;  %v7117_v60 = vld [vmem:[#allocation9 + $0x9b0] sm:$0xf0] }
 0x1ca   :  { %v7371_v18 = vld [vmem:[#allocation9 + $0xb90] sm:$0xf]  ;;  %v7084_v26 = vor.u32 %v8180_v14, %v7083_v13  ;;  %3768 = vmatpush.bf16.msra.mxu1 %v7404_v12  ;;  %v5933_v12 = vld [vmem:[#allocation9 + $0x70] sm:$0xf0] }
 0x1cb   :  { %v8252_v15 = vld [vmem:[#allocation9 + $0xbac] sm:$0xf0]  ;;  %3750 = vmatmul.bf16.vlgmr.msrb.gmra.mxu3 %v9013_v59  ;;  %3784 = vmatpush.bf16.msra.mxu2 %v6032_v35  ;;  %v8056_v51 = vld [vmem:[#allocation9 + $0x594] sm:$0xf] }
 0x1cc   :  { %v7372_v28 = vor.u32 %v8252_v15, %v7371_v18  ;;  %v7051_v29 = vld [vmem:[#allocation9 + $0x910] sm:$0xf]  ;;  %3794 = vmatpush.bf16.msra.mxu3 %v6384_v16  ;;  %3757 = vmatpush.bf16.msra.mxu0 %v7084_v26  ;;  %v6256_v18 = vor.u32 %v7968_v8, %v6253_v10  ;;  %v5936_v15 = vor.u32 %v7888_v11, %v5933_v12  ;;  %v7880_v26 = vld [vmem:[#allocation9 + $0x14] sm:$0xf] }
 0x1cd   :  { %v8172_v31 = vld [vmem:[#allocation9 + $0x92c] sm:$0xf0]  ;;  %v5904_v20 = vor.u32 %v7880_v26, %v5901_v27  ;;  %v6157_v3 = vld [vmem:[#allocation9 + $0x230] sm:$0xf0] }
 0x1ce   :  { %v7339_v36 = vld [vmem:[#allocation9 + $0xb50] sm:$0xf]  ;;  %v7052_v45 = vor.u32 %v8172_v31, %v7051_v29  ;;  %3769 = vmatpush.bf16.msra.mxu1 %v7372_v28  ;;  %v8192_v29 = vld [vmem:[#allocation9 + $0x9d4] sm:$0xf]  ;;  %v3467_v33 = vpop.f32.mrf.mxu1 }
 0x1cf   :  { %v8244_v37 = vld [vmem:[#allocation9 + $0xb6c] sm:$0xf0]  ;;  %3785 = vmatpush.bf16.msra.mxu2 %v6000_v54  ;;  %v7149_v31 = vld [vmem:[#allocation9 + $0x9f0] sm:$0xf0] }
 0x1d0   :  { %v7340_v47 = vor.u32 %v8244_v37, %v7339_v36  ;;  %v7019_v50 = vld [vmem:[#allocation9 + $0x8d0] sm:$0xf]  ;;  %3795 = vmatpush.bf16.msra.mxu3 %v6352_v34  ;;  %3758 = vmatpush.bf16.msra.mxu0 %v7052_v45  ;;  %v8064_v37 = vld [vmem:[#allocation9 + $0x5d4] sm:$0xf]  ;;  %v9070_v38 = vpop.f32.mrf.mxu3  ;;  %v3504_v45 = vpop.f32.mrf.mxu0 }
 0x1d1   :  { %v8164_v52 = vld [vmem:[#allocation9 + $0x8ec] sm:$0xf0]  ;;  %v3505_v54 = vadd.f32 %v3504_v45, %v9061_v39  ;;  %v6640_v6 = vor.u32 %v8064_v37, %v6637_v41  ;;  %v8128_v39 = vld [vmem:[#allocation9 + $0x7d4] sm:$0xf] }
 0x1d2   :  { %v7307_v56 = vld [vmem:[#allocation9 + $0xb10] sm:$0xf]  ;;  %v7020_v62 = vor.u32 %v8164_v52, %v7019_v50  ;;  %3770 = vmatpush.bf16.msra.mxu1 %v7340_v47  ;;  %v3532_v47 = vpop.f32.mrf.mxu2  ;;  %v7152_v50 = vor.u32 %v8192_v29, %v7149_v31  ;;  %v7952_v52 = vld [vmem:[#allocation9 + $0x254] sm:$0xf] }
 0x1d3   :  { %v8236_v58 = vld [vmem:[#allocation9 + $0xb2c] sm:$0xf0]  ;;  %3786 = vmatpush.bf16.msra.mxu2 %v5968_v5  ;;  %v6893_v5 = vld [vmem:[#allocation9 + $0x7f0] sm:$0xf0] }
 0x1d4   :  { %v7308_v0 = vor.u32 %v8236_v58, %v7307_v56  ;;  %v6987_v48 = vld [vmem:[#allocation9 + $0x890] sm:$0xf]  ;;  %3796 = vmatpush.bf16.msra.mxu3 %v6320_v53  ;;  %3759 = vmatpush.bf16.msra.mxu0 %v7020_v62  ;;  %v6189_v53 = vld [vmem:[#allocation9 + $0x270] sm:$0xf0] }
 0x1d5   :  { %v8156_v1 = vld [vmem:[#allocation9 + $0x8ac] sm:$0xf0]  ;;  %v8184_v58 = vld [vmem:[#allocation9 + $0x994] sm:$0xf] }
 0x1d6   :  { %v7275_v22 = vld [vmem:[#allocation9 + $0xad0] sm:$0xf]  ;;  %v6988_v13 = vor.u32 %v8156_v1, %v6987_v48  ;;  %3771 = vmatpush.bf16.msra.mxu1 %v7308_v0  ;;  %v6605_v62 = vld [vmem:[#allocation9 + $0x5b0] sm:$0xf0]  ;;  %v6192_v0 = vor.u32 %v7952_v52, %v6189_v53  ;;  %v3517_v11 = vpop.f32.mrf.mxu1 }
 0x1d7   :  { %v8228_v7 = vld [vmem:[#allocation9 + $0xaec] sm:$0xf0]  ;;  %3787 = vmatpush.bf16.msra.mxu2 %v5936_v15  ;;  %v7944_v1 = vld [vmem:[#allocation9 + $0x214] sm:$0xf]  ;;  %v6608_v12 = vor.u32 %v8056_v51, %v6605_v62  ;;  %v6896_v15 = vor.u32 %v8128_v39, %v6893_v5  ;;  %v1457_v39 = vperm.slane %v9044_v49, 2 }
 0x1d8   :  { %v7276_v14 = vor.u32 %v8228_v7, %v7275_v22  ;;  %v6955_v16 = vld [vmem:[#allocation9 + $0x850] sm:$0xf]  ;;  %3797 = vmatpush.bf16.msra.mxu3 %v6288_v4  ;;  %3760 = vmatpush.bf16.msra.mxu0 %v6988_v13  ;;  %v7120_v4 = vor.u32 %v8184_v58, %v7117_v60  ;;  %v8256_v22 = vld [vmem:[#allocation9 + $0xbd4] sm:$0xf]  ;;  %v3506_v24 = vpop.f32.mrf.mxu0 }
 0x1d9   :  { %v8148_v17 = vld [vmem:[#allocation9 + $0x86c] sm:$0xf0]  ;;  %v7405_v7 = vld [vmem:[#allocation9 + $0xbf0] sm:$0xf0] }
 0x1da   :  { %v7243_v19 = vld [vmem:[#allocation9 + $0xa90] sm:$0xf]  ;;  %v6956_v28 = vor.u32 %v8148_v17, %v6955_v16  ;;  %3772 = vmatpush.bf16.msra.mxu1 %v7276_v14  ;;  %v8176_v8 = vld [vmem:[#allocation9 + $0x954] sm:$0xf]  ;;  %v4024_v14 = vmul.f32 1.4142135, %v9073_v46  ;;  %v3518_v16 = vadd.f32 %v3517_v11, %v3505_v54  ;;  %v3545_v17 = vpop.f32.mrf.mxu3  ;;  %v7408_v25 = vor.u32 %v8256_v22, %v7405_v7 }
 0x1db   :  { %v8220_v23 = vld [vmem:[#allocation9 + $0xaac] sm:$0xf0]  ;;  %3788 = vmatpush.bf16.msra.mxu2 %v5904_v20  ;;  %v7085_v10 = vld [vmem:[#allocation9 + $0x970] sm:$0xf0] }
 0x1dc   :  { %v7244_v34 = vor.u32 %v8220_v23, %v7243_v19  ;;  %v6923_v35 = vld [vmem:[#allocation9 + $0x810] sm:$0xf]  ;;  %3798 = vmatpush.bf16.msra.mxu3 %v6256_v18  ;;  %3761 = vmatpush.bf16.msra.mxu0 %v6956_v28  ;;  %v6160_v18 = vor.u32 %v7944_v1, %v6157_v3  ;;  %v8048_v19 = vld [vmem:[#allocation9 + $0x554] sm:$0xf]  ;;  %v7088_v26 = vor.u32 %v8176_v8, %v7085_v10 }
 0x1dd   :  { %v8140_v36 = vld [vmem:[#allocation9 + $0x82c] sm:$0xf0]  ;;  %v6573_v23 = vld [vmem:[#allocation9 + $0x570] sm:$0xf0]  ;;  %v9079_v31 = vadd.f32 %v9068_v9, %v3518_v16 }
 0x1de   :  { %v7211_v42 = vld [vmem:[#allocation9 + $0xa50] sm:$0xf]  ;;  %v6924_v56 = vor.u32 %v8140_v36, %v6923_v35  ;;  %3773 = vmatpush.bf16.msra.mxu1 %v7244_v34  ;;  %3789 = vmatmul.bf16.vlgmr.msra.gmra.mxu2 %v8982_v2  ;;  %v8120_v27 = vld [vmem:[#allocation9 + $0x794] sm:$0xf]  ;;  %v6576_v35 = vor.u32 %v8048_v19, %v6573_v23  ;;  %v4025_v36 = vsub.f32 1.0, %v4024_v14  ;;  %v3519_v53 = vpop.f32.mrf.mxu1 }
 0x1df   :  { %v8212_v43 = vld [vmem:[#allocation9 + $0xa6c] sm:$0xf0]  ;;  %3833 = vmatpush.bf16.msrb.mxu2 %v7152_v50  ;;  %v6861_v28 = vld [vmem:[#allocation9 + $0x7b0] sm:$0xf0]  ;;  %v6131_v53 = vld [vmem:[#allocation9 + $0x1d8] sm:$0xf] }
 0x1e0   :  { %v7212_v61 = vor.u32 %v8212_v43, %v7211_v42  ;;  %v7179_v63 = vld [vmem:[#allocation9 + $0xa10] sm:$0xf]  ;;  %3799 = vmatpush.bf16.msra.mxu3 %v6224_v40  ;;  %3762 = vmatpush.bf16.msra.mxu0 %v6924_v56  ;;  %v8248_v29 = vld [vmem:[#allocation9 + $0xb94] sm:$0xf]  ;;  %v6864_v37 = vor.u32 %v8120_v27, %v6861_v28 }
 0x1e1   :  { %v8204_v48 = vld [vmem:[#allocation9 + $0xa2c] sm:$0xf0]  ;;  %v7373_v32 = vld [vmem:[#allocation9 + $0xbb0] sm:$0xf0] }
 0x1e2   :  { %3774 = vmatpush.bf16.msra.mxu1 %v7212_v61  ;;  %v7180_v13 = vor.u32 %v8204_v48, %v7179_v63  ;;  %v8168_v33 = vld [vmem:[#allocation9 + $0x914] sm:$0xf]  ;;  %v7376_v41 = vor.u32 %v8248_v29, %v7373_v32  ;;  %v4026_v48 = vmul.f32 %v9073_v46, %v4025_v36 }
 0x1e3   :  { %3763 = vmatmul.bf16.vlgmr.msra.gmra.mxu0 %v9027_v55  ;;  %3834 = vmatpush.bf16.msrb.mxu2 %v7120_v4  ;;  %v7053_v34 = vld [vmem:[#allocation9 + $0x930] sm:$0xf0]  ;;  %v3582_v19 = vpop.f32.mrf.mxu2 }
 0x1e4   :  { %3807 = vmatpush.bf16.msrb.mxu0 %v6640_v6  ;;  %3800 = vmatpush.bf16.msra.mxu3 %v6192_v0  ;;  %v8040_v40 = vld [vmem:[#allocation9 + $0x514] sm:$0xf]  ;;  %v7056_v42 = vor.u32 %v8168_v33, %v7053_v34  ;;  %v3556_v6 = vpop.f32.mrf.mxu0  ;;  %v4027_v16 = vadd.f32 %v9073_v46, %v4026_v48 }
 0x1e5   :  { %v6541_v20 = vld [vmem:[#allocation9 + $0x530] sm:$0xf0]  ;;  %v3557_v49 = vadd.f32 %v3556_v6, %v1457_v39 }
 0x1e6   :  { %3775 = vmatpush.bf16.msra.mxu1 %v7180_v13  ;;  %v8112_v43 = vld [vmem:[#allocation9 + $0x754] sm:$0xf]  ;;  %v6544_v54 = vor.u32 %v8040_v40, %v6541_v20  ;;  %v3569_v24 = vpop.f32.mrf.mxu1 }
 0x1e7   :  { %3835 = vmatpush.bf16.msrb.mxu2 %v7088_v26  ;;  %v6829_v45 = vld [vmem:[#allocation9 + $0x770] sm:$0xf0]  ;;  %v3570_v28 = vadd.f32 %v3569_v24, %v3557_v49  ;;  %v8133_v49 = vld [vmem:[#allocation9 + $0x7f4] sm:$0xf0]  ;;  %v9104_v24 = vadd.f32 %v9070_v38, %v9079_v31 }
 0x1e8   :  { %3808 = vmatpush.bf16.msrb.mxu0 %v6608_v12  ;;  %3801 = vmatpush.bf16.msra.mxu3 %v6160_v18  ;;  %v8240_v9 = vld [vmem:[#allocation9 + $0xb54] sm:$0xf]  ;;  %v6832_v56 = vor.u32 %v8112_v43, %v6829_v45  ;;  %v6643_v43 = vld [vmem:[#allocation9 + $0x5d8] sm:$0xf] }
 0x1e9   :  { %3776 = vmatmul.bf16.vlgmr.msra.gmra.mxu1 %v9032_v21  ;;  %v7341_v47 = vld [vmem:[#allocation9 + $0xb70] sm:$0xf0]  ;;  %v8069_v45 = vld [vmem:[#allocation9 + $0x5f4] sm:$0xf0] }
 0x1ea   :  { %3820 = vmatpush.bf16.msrb.mxu1 %v6896_v15  ;;  %v8160_v50 = vld [vmem:[#allocation9 + $0x8d4] sm:$0xf]  ;;  %v7344_v61 = vor.u32 %v8240_v9, %v7341_v47  ;;  %v9092_v9 = vadd.f32 %v3582_v19, %v3570_v28  ;;  %v6579_v19 = vld [vmem:[#allocation9 + $0x558] sm:$0xf] }
 0x1eb   :  { %v7021_v52 = vld [vmem:[#allocation9 + $0x8f0] sm:$0xf0]  ;;  %3802 = vmatmul.bf16.vlgmr.msra.gmra.mxu3 %v8989_v30  ;;  %3836 = vmatpush.bf16.msrb.mxu2 %v7056_v42  ;;  %v6355_v31 = vld [vmem:[#allocation9 + $0x398] sm:$0xf] }
 0x1ec   :  { %3846 = vmatpush.bf16.msrb.mxu3 %v7408_v25  ;;  %3809 = vmatpush.bf16.msrb.mxu0 %v6576_v35  ;;  %v8032_v58 = vld [vmem:[#allocation9 + $0x4d4] sm:$0xf]  ;;  %v7024_v51 = vor.u32 %v8160_v50, %v7021_v52  ;;  %v3558_v29 = vpop.f32.mrf.mxu0 }
 0x1ed   :  { %v6509_v60 = vld [vmem:[#allocation9 + $0x4f0] sm:$0xf0] }
 0x1ee   :  { %3821 = vmatpush.bf16.msrb.mxu1 %v6864_v37  ;;  %v8104_v62 = vld [vmem:[#allocation9 + $0x714] sm:$0xf]  ;;  %v6512_v5 = vor.u32 %v8032_v58, %v6509_v60  ;;  %v9090_v37 = vsel %vm4028_vm0, %v9073_v46, %v4027_v16  ;;  %v9098_v46 = vpop.f32.mrf.mxu3  ;;  %v7941_v60 = vld [vmem:[#allocation9 + $0x1f4] sm:$0xf0] }
 0x1ef   :  { %v6797_v63 = vld [vmem:[#allocation9 + $0x730] sm:$0xf0]  ;;  %3837 = vmatpush.bf16.msrb.mxu2 %v7024_v51  ;;  %v6644_v51 = vor.u32 %v8069_v45, %v6643_v43  ;;  %v6132_v39 = vor.u32 %v7941_v60, %v6131_v53  ;;  %v9112_v43 = vmul.f32 %v9090_v37, %v9104_v24  ;;  %v7917_v53 = vld [vmem:[#allocation9 + $0x134] sm:$0xf0] }
 0x1f0   :  { %3847 = vmatpush.bf16.msrb.mxu3 %v7376_v41  ;;  %v8232_v0 = vld [vmem:[#allocation9 + $0xb14] sm:$0xf]  ;;  %3810 = vmatpush.bf16.msrb.mxu0 %v6544_v54  ;;  %v6800_v22 = vor.u32 %v8104_v62, %v6797_v63  ;;  %v9096_v54 = vmul.f32 %v9090_v37, %v9066_v44  ;;  %v6323_v60 = vld [vmem:[#allocation9 + $0x358] sm:$0xf] }
 0x1f1   :  { %v7309_v1 = vld [vmem:[#allocation9 + $0xb30] sm:$0xf0] }
 0x1f2   :  { %v8152_v3 = vld [vmem:[#allocation9 + $0x894] sm:$0xf]  ;;  %3822 = vmatpush.bf16.msrb.mxu1 %v6832_v56  ;;  %v7312_v10 = vor.u32 %v8232_v0, %v7309_v1  ;;  %v3584_v0 = vpop.f32.mrf.mxu2  ;;  %v6611_v1 = vld [vmem:[#allocation9 + $0x598] sm:$0xf] }
 0x1f3   :  { %v6989_v4 = vld [vmem:[#allocation9 + $0x8b0] sm:$0xf0]  ;;  %v4078_v0 = vmul.f32 %v9112_v43, %v9112_v43 }
 0x1f4   :  { %v8024_v7 = vld [vmem:[#allocation9 + $0x494] sm:$0xf]  ;;  %3848 = vmatpush.bf16.msrb.mxu3 %v7344_v61  ;;  %v6992_v11 = vor.u32 %v8152_v3, %v6989_v4  ;;  %3811 = vmatpush.bf16.msrb.mxu0 %v6512_v5  ;;  %v8061_v3 = vld [vmem:[#allocation9 + $0x5b4] sm:$0xf0]  ;;  %v3571_v4 = vpop.f32.mrf.mxu1 }
 0x1f5   :  { %v6477_v8 = vld [vmem:[#allocation9 + $0x4b0] sm:$0xf0]  ;;  %v6612_v16 = vor.u32 %v8061_v3, %v6611_v1  ;;  %v6003_v4 = vld [vmem:[#allocation9 + $0xd8] sm:$0xf] }
 0x1f6   :  { %v8096_v12 = vld [vmem:[#allocation9 + $0x6d4] sm:$0xf]  ;;  %v6480_v23 = vor.u32 %v8024_v7, %v6477_v8  ;;  %3823 = vmatpush.bf16.msrb.mxu1 %v6800_v22  ;;  %3838 = vmatpush.bf16.msrb.mxu2 %v6992_v11  ;;  %v6099_v22 = vld [vmem:[#allocation9 + $0x198] sm:$0xf]  ;;  %v3597_v28 = vpop.f32.mrf.mxu3 }
 0x1f7   :  { %v6765_v13 = vld [vmem:[#allocation9 + $0x6f0] sm:$0xf0]  ;;  %v7933_v7 = vld [vmem:[#allocation9 + $0x1b4] sm:$0xf0] }
 0x1f8   :  { %v8224_v14 = vld [vmem:[#allocation9 + $0xad4] sm:$0xf]  ;;  %v6768_v25 = vor.u32 %v8096_v12, %v6765_v13  ;;  %3849 = vmatpush.bf16.msrb.mxu3 %v7312_v10  ;;  %3812 = vmatpush.bf16.msrb.mxu0 %v6480_v23  ;;  %v4038_v10 = vmul.f32 %v9096_v54, %v9096_v54  ;;  %v8053_v23 = vld [vmem:[#allocation9 + $0x574] sm:$0xf0] }
 0x1f9   :  { %v7277_v17 = vld [vmem:[#allocation9 + $0xaf0] sm:$0xf0]  ;;  %v6580_v38 = vor.u32 %v8053_v23, %v6579_v19  ;;  %v5971_v19 = vld [vmem:[#allocation9 + $0x98] sm:$0xf] }
 0x1fa   :  { %v8144_v18 = vld [vmem:[#allocation9 + $0x854] sm:$0xf]  ;;  %v7280_v32 = vor.u32 %v8224_v14, %v7277_v17  ;;  %3824 = vmatpush.bf16.msrb.mxu1 %v6768_v25  ;;  %v6387_v17 = vld [vmem:[#allocation9 + $0x3d8] sm:$0xf]  ;;  %v6100_v25 = vor.u32 %v7933_v7, %v6099_v22 }
 0x1fb   :  { %v6957_v15 = vld [vmem:[#allocation9 + $0x870] sm:$0xf0]  ;;  %v7901_v23 = vld [vmem:[#allocation9 + $0xb4] sm:$0xf0] }
 0x1fc   :  { %v8016_v26 = vld [vmem:[#allocation9 + $0x454] sm:$0xf]  ;;  %v6960_v33 = vor.u32 %v8144_v18, %v6957_v15  ;;  %3850 = vmatpush.bf16.msrb.mxu3 %v7280_v32  ;;  %v8005_v18 = vld [vmem:[#allocation9 + $0x3f4] sm:$0xf0] }
 0x1fd   :  { %v6445_v27 = vld [vmem:[#allocation9 + $0x470] sm:$0xf0]  ;;  %v6899_v15 = vld [vmem:[#allocation9 + $0x7d8] sm:$0xf]  ;;  %v6388_v32 = vor.u32 %v8005_v18, %v6387_v17 }
 0x1fe   :  { %v8088_v34 = vld [vmem:[#allocation9 + $0x694] sm:$0xf]  ;;  %v6448_v42 = vor.u32 %v8016_v26, %v6445_v27  ;;  %3839 = vmatpush.bf16.msrb.mxu2 %v6960_v33  ;;  %v9106_v27 = vmin.f32 %v4038_v10, 16.0  ;;  %v6067_v33 = vld [vmem:[#allocation9 + $0x158] sm:$0xf] }
 0x1ff   :  { %v6733_v35 = vld [vmem:[#allocation9 + $0x6b0] sm:$0xf0]  ;;  %v7981_v10 = vld [vmem:[#allocation9 + $0x334] sm:$0xf0] }
 0x200   :  { %v8216_v36 = vld [vmem:[#allocation9 + $0xa94] sm:$0xf]  ;;  %v6736_v47 = vor.u32 %v8088_v34, %v6733_v35  ;;  %3813 = vmatpush.bf16.msrb.mxu0 %v6448_v42  ;;  %v7925_v34 = vld [vmem:[#allocation9 + $0x174] sm:$0xf0]  ;;  %v6900_v35 = vor.u32 %v8133_v49, %v6899_v15  ;;  %v3596_v15 = vadd.f32 %v9098_v46, %v9092_v9 }
 0x201   :  { %v7245_v40 = vld [vmem:[#allocation9 + $0xab0] sm:$0xf0]  ;;  %v8045_v42 = vld [vmem:[#allocation9 + $0x534] sm:$0xf0]  ;;  %v6068_v45 = vor.u32 %v7925_v34, %v6067_v33 }
 0x202   :  { %v8136_v20 = vld [vmem:[#allocation9 + $0x814] sm:$0xf]  ;;  %v7248_v56 = vor.u32 %v8216_v36, %v7245_v40  ;;  %3825 = vmatpush.bf16.msrb.mxu1 %v6736_v47  ;;  %v7997_v36 = vld [vmem:[#allocation9 + $0x3b4] sm:$0xf0]  ;;  %v4051_v47 = vmul.f32 3.8918573e-05, %v9106_v27  ;;  %v3621_v46 = vpop.f32.mrf.mxu1 }
 0x203   :  { %v6925_v41 = vld [vmem:[#allocation9 + $0x830] sm:$0xf0]  ;;  %v6867_v40 = vld [vmem:[#allocation9 + $0x798] sm:$0xf] }
 0x204   :  { %v8008_v50 = vld [vmem:[#allocation9 + $0x414] sm:$0xf]  ;;  %v6928_v58 = vor.u32 %v8136_v20, %v6925_v41  ;;  %3851 = vmatpush.bf16.msrb.mxu3 %v7248_v56  ;;  %v8125_v20 = vld [vmem:[#allocation9 + $0x7b4] sm:$0xf0]  ;;  %v4052_v1 = vadd.f32 0.001143296, %v4051_v47 }
 0x205   :  { %v6413_v52 = vld [vmem:[#allocation9 + $0x430] sm:$0xf0]  ;;  %v6547_v41 = vld [vmem:[#allocation9 + $0x518] sm:$0xf]  ;;  %v6868_v56 = vor.u32 %v8125_v20, %v6867_v40  ;;  %v5972_v40 = vor.u32 %v7901_v23, %v5971_v19 }
 0x206   :  { %v8080_v6 = vld [vmem:[#allocation9 + $0x654] sm:$0xf]  ;;  %v6416_v48 = vor.u32 %v8008_v50, %v6413_v52  ;;  %3840 = vmatpush.bf16.msrb.mxu2 %v6928_v58  ;;  %v6356_v50 = vor.u32 %v7997_v36, %v6355_v31  ;;  %v6035_v52 = vld [vmem:[#allocation9 + $0x118] sm:$0xf]  ;;  %v6548_v58 = vor.u32 %v8045_v42, %v6547_v41  ;;  %v4053_v18 = vmul.f32 %v4052_v1, %v9106_v27  ;;  %v9128_v36 = vpop.f32.mrf.mxu2  ;;  %v6133_v1 = vld [vmem:[#allocation9 + $0x1f8] sm:$0xf0] }
 0x207   :  { %v6701_v61 = vld [vmem:[#allocation9 + $0x670] sm:$0xf0]  ;;  %v6259_v28 = vld [vmem:[#allocation9 + $0x2d8] sm:$0xf]  ;;  %v9125_v31 = vmul.f32 2.1237322e-06, %v9106_v27 }
 0x208   :  { %v8208_v62 = vld [vmem:[#allocation9 + $0xa54] sm:$0xf]  ;;  %v6704_v5 = vor.u32 %v8080_v6, %v6701_v61  ;;  %3814 = vmatpush.bf16.msrb.mxu0 %v6416_v48  ;;  %v7989_v6 = vld [vmem:[#allocation9 + $0x374] sm:$0xf0]  ;;  %v6036_v48 = vor.u32 %v7917_v53, %v6035_v52  ;;  %v9130_v20 = vadd.f32 0.014752088, %v4053_v18 }
 0x209   :  { %v7213_v63 = vld [vmem:[#allocation9 + $0xa70] sm:$0xf0]  ;;  %3841 = vmatmul.bf16.vlgmr.msrb.gmra.mxu2 %v9027_v55  ;;  %v6835_v61 = vld [vmem:[#allocation9 + $0x758] sm:$0xf]  ;;  %v6324_v3 = vor.u32 %v7989_v6, %v6323_v60 }
 0x20a   :  { %v8072_v8 = vld [vmem:[#allocation9 + $0x614] sm:$0xf]  ;;  %v7216_v11 = vor.u32 %v8208_v62, %v7213_v63  ;;  %3885 = vmatpush.bf16.msra.mxu2 %v6644_v51  ;;  %3826 = vmatpush.bf16.msrb.mxu1 %v6704_v5  ;;  %v8117_v51 = vld [vmem:[#allocation9 + $0x774] sm:$0xf0]  ;;  %v3608_v5 = vpop.f32.mrf.mxu0 }
 0x20b   :  { %v6669_v12 = vld [vmem:[#allocation9 + $0x630] sm:$0xf0]  ;;  %3815 = vmatmul.bf16.vlgmr.msrb.gmra.mxu0 %v9004_v57  ;;  %v6515_v62 = vld [vmem:[#allocation9 + $0x4d8] sm:$0xf]  ;;  %v6836_v22 = vor.u32 %v8117_v51, %v6835_v61  ;;  %v3609_v33 = vadd.f32 %v3608_v5, %v3596_v15 }
 0x20c   :  { %v8200_v13 = vld [vmem:[#allocation9 + $0xa14] sm:$0xf]  ;;  %3859 = vmatpush.bf16.msra.mxu0 %v6132_v39  ;;  %v6672_v26 = vor.u32 %v8072_v8, %v6669_v12  ;;  %3852 = vmatpush.bf16.msrb.mxu3 %v7216_v11  ;;  %v8037_v63 = vld [vmem:[#allocation9 + $0x4f4] sm:$0xf0] }
 0x20d   :  { %v7181_v14 = vld [vmem:[#allocation9 + $0xa30] sm:$0xf0]  ;;  %v7909_v39 = vld [vmem:[#allocation9 + $0xf4] sm:$0xf0]  ;;  %v6516_v7 = vor.u32 %v8037_v63, %v6515_v62  ;;  %v9132_v41 = vadd.f32 %v3621_v46, %v3609_v33 }
 0x20e   :  { %v7184_v29 = vor.u32 %v8200_v13, %v7181_v14  ;;  %3886 = vmatpush.bf16.msra.mxu2 %v6612_v16  ;;  %3827 = vmatpush.bf16.msrb.mxu1 %v6672_v26  ;;  %v6291_v8 = vld [vmem:[#allocation9 + $0x318] sm:$0xf]  ;;  %v9119_v16 = vmin.f32 %v4078_v0, 16.0  ;;  %v6004_v17 = vor.u32 %v7909_v39, %v6003_v4  ;;  %v3636_v19 = vpop.f32.mrf.mxu2 }
 0x20f   :  { %v6803_v11 = vld [vmem:[#allocation9 + $0x718] sm:$0xf]  ;;  %v6292_v49 = vor.u32 %v7981_v10, %v6291_v8  ;;  %v9136_v6 = vmul.f32 %v9090_v37, %v9132_v41 }
 0x210   :  { %3860 = vmatpush.bf16.msra.mxu0 %v6100_v25  ;;  %3853 = vmatpush.bf16.msrb.mxu3 %v7184_v29  ;;  %v8109_v12 = vld [vmem:[#allocation9 + $0x734] sm:$0xf0]  ;;  %v4091_v9 = vmul.f32 3.8918573e-05, %v9119_v16 }
 0x211   :  { %3828 = vmatmul.bf16.vlgmr.msrb.gmra.mxu1 %v9013_v59  ;;  %v6483_v13 = vld [vmem:[#allocation9 + $0x498] sm:$0xf]  ;;  %v6804_v25 = vor.u32 %v8109_v12, %v6803_v11 }
 0x212   :  { %3872 = vmatpush.bf16.msra.mxu1 %v6388_v32  ;;  %3887 = vmatpush.bf16.msra.mxu2 %v6580_v38  ;;  %v8029_v14 = vld [vmem:[#allocation9 + $0x4b4] sm:$0xf0]  ;;  %v4092_v63 = vadd.f32 0.001143296, %v4091_v9 }
 0x213   :  { %3854 = vmatmul.bf16.vlgmr.msrb.gmra.mxu3 %v9032_v21  ;;  %v6484_v26 = vor.u32 %v8029_v14, %v6483_v13  ;;  %v7973_v29 = vld [vmem:[#allocation9 + $0x2f4] sm:$0xf0] }
 0x214   :  { %3898 = vmatpush.bf16.msra.mxu3 %v6900_v35  ;;  %3861 = vmatpush.bf16.msra.mxu0 %v6068_v45  ;;  %v6771_v32 = vld [vmem:[#allocation9 + $0x6d8] sm:$0xf]  ;;  %v6260_v42 = vor.u32 %v7973_v29, %v6259_v28  ;;  %v6101_v28 = vld [vmem:[#allocation9 + $0x1b8] sm:$0xf0] }
 0x215   :  { %v8101_v34 = vld [vmem:[#allocation9 + $0x6f4] sm:$0xf0] }
 0x216   :  { %3873 = vmatpush.bf16.msra.mxu1 %v6356_v50  ;;  %3888 = vmatpush.bf16.msra.mxu2 %v6548_v58  ;;  %v6451_v35 = vld [vmem:[#allocation9 + $0x458] sm:$0xf]  ;;  %v3610_v50 = vpop.f32.mrf.mxu0  ;;  %v6772_v52 = vor.u32 %v8101_v34, %v6771_v32 }
 0x217   :  { %v8021_v38 = vld [vmem:[#allocation9 + $0x474] sm:$0xf0]  ;;  %v8001_v50 = vld [vmem:[#allocation9 + $0x3dc] sm:$0xf] }
 0x218   :  { %3899 = vmatpush.bf16.msra.mxu3 %v6868_v56  ;;  %3862 = vmatpush.bf16.msra.mxu0 %v6036_v48  ;;  %v5939_v45 = vld [vmem:[#allocation9 + $0x58] sm:$0xf]  ;;  %v6452_v53 = vor.u32 %v8021_v38, %v6451_v35  ;;  %v7937_v48 = vld [vmem:[#allocation9 + $0x1dc] sm:$0xf] }
 0x219   :  { %v7893_v47 = vld [vmem:[#allocation9 + $0x74] sm:$0xf0] }
 0x21a   :  { %3874 = vmatpush.bf16.msra.mxu1 %v6324_v3  ;;  %3889 = vmatpush.bf16.msra.mxu2 %v6516_v7  ;;  %v6227_v56 = vld [vmem:[#allocation9 + $0x298] sm:$0xf]  ;;  %v5940_v0 = vor.u32 %v7893_v47, %v5939_v45  ;;  %v4118_v3 = vmul.f32 %v9136_v6, %v9136_v6  ;;  %v9140_v7 = vpop.f32.mrf.mxu3 }
 0x21b   :  { %v7965_v58 = vld [vmem:[#allocation9 + $0x2b4] sm:$0xf0] }
 0x21c   :  { %3900 = vmatpush.bf16.msra.mxu3 %v6836_v22  ;;  %3863 = vmatpush.bf16.msra.mxu0 %v6004_v17  ;;  %v6739_v60 = vld [vmem:[#allocation9 + $0x698] sm:$0xf]  ;;  %v6228_v4 = vor.u32 %v7965_v58, %v6227_v56  ;;  %v9142_v14 = vmin.f32 %v4118_v3, 16.0  ;;  %v6136_v17 = vor.u32 %v7937_v48, %v6133_v1  ;;  %v6069_v56 = vld [vmem:[#allocation9 + $0x178] sm:$0xf0] }
 0x21d   :  { %v8093_v61 = vld [vmem:[#allocation9 + $0x6b4] sm:$0xf0]  ;;  %v4041_v58 = vadd.f32 0.00028619796, %v9125_v31 }
 0x21e   :  { %3875 = vmatpush.bf16.msra.mxu1 %v6292_v49  ;;  %3890 = vmatpush.bf16.msra.mxu2 %v6484_v26  ;;  %v6419_v51 = vld [vmem:[#allocation9 + $0x418] sm:$0xf]  ;;  %v6740_v8 = vor.u32 %v8093_v61, %v6739_v60  ;;  %v3623_v49 = vpop.f32.mrf.mxu1  ;;  %v7929_v26 = vld [vmem:[#allocation9 + $0x19c] sm:$0xf]  ;;  %v4131_v38 = vmul.f32 3.8918573e-05, %v9142_v14  ;;  %v4093_v60 = vmul.f32 %v4092_v63, %v9119_v16 }
 0x21f   :  { %v8013_v62 = vld [vmem:[#allocation9 + $0x434] sm:$0xf0] }
 0x220   :  { %3901 = vmatpush.bf16.msra.mxu3 %v6804_v25  ;;  %3864 = vmatpush.bf16.msra.mxu0 %v5972_v40  ;;  %v5907_v39 = vld [vmem:[#allocation9 + $0x18] sm:$0xf]  ;;  %v6420_v10 = vor.u32 %v8013_v62, %v6419_v51  ;;  %v4055_v62 = vmul.f32 %v9130_v20, %v9106_v27  ;;  %v6037_v20 = vld [vmem:[#allocation9 + $0x138] sm:$0xf0] }
 0x221   :  { %v7885_v5 = vld [vmem:[#allocation9 + $0x34] sm:$0xf0] }
 0x222   :  { %3876 = vmatpush.bf16.msra.mxu1 %v6260_v42  ;;  %v7155_v22 = vld [vmem:[#allocation9 + $0x9d8] sm:$0xf]  ;;  %3891 = vmatpush.bf16.msra.mxu2 %v6452_v53  ;;  %v5908_v23 = vor.u32 %v7885_v5, %v5907_v39  ;;  %v6104_v42 = vor.u32 %v7929_v26, %v6101_v28  ;;  %v7921_v53 = vld [vmem:[#allocation9 + $0x15c] sm:$0xf]  ;;  %v3649_v48 = vpop.f32.mrf.mxu3 }
 0x223   :  { %v8197_v11 = vld [vmem:[#allocation9 + $0x9f4] sm:$0xf0]  ;;  %v6072_v63 = vor.u32 %v7921_v53, %v6069_v56  ;;  %v7897_v48 = vld [vmem:[#allocation9 + $0x9c] sm:$0xf] }
 0x224   :  { %3902 = vmatpush.bf16.msra.mxu3 %v6772_v52  ;;  %v6195_v12 = vld [vmem:[#allocation9 + $0x258] sm:$0xf]  ;;  %3865 = vmatpush.bf16.msra.mxu0 %v5940_v0  ;;  %v7156_v29 = vor.u32 %v8197_v11, %v7155_v22  ;;  %v6389_v52 = vld [vmem:[#allocation9 + $0x3f8] sm:$0xf0]  ;;  %v4132_v0 = vadd.f32 0.001143296, %v4131_v38 }
 0x225   :  { %v7957_v13 = vld [vmem:[#allocation9 + $0x274] sm:$0xf0]  ;;  %v6392_v31 = vor.u32 %v8001_v50, %v6389_v52  ;;  %v7913_v11 = vld [vmem:[#allocation9 + $0x11c] sm:$0xf] }
 0x226   :  { %v6707_v18 = vld [vmem:[#allocation9 + $0x658] sm:$0xf]  ;;  %3877 = vmatpush.bf16.msra.mxu1 %v6228_v4  ;;  %v6196_v32 = vor.u32 %v7957_v13, %v6195_v12  ;;  %3892 = vmatpush.bf16.msra.mxu2 %v6420_v10  ;;  %v6357_v10 = vld [vmem:[#allocation9 + $0x3b8] sm:$0xf0]  ;;  %v4042_v12 = vmul.f32 %v4041_v58, %v9106_v27  ;;  %v4094_v13 = vadd.f32 0.014752088, %v4093_v60  ;;  %v6040_v26 = vor.u32 %v7913_v11, %v6037_v20 }
 0x227   :  { %v8085_v15 = vld [vmem:[#allocation9 + $0x674] sm:$0xf0] }
 0x228   :  { %v7123_v25 = vld [vmem:[#allocation9 + $0x998] sm:$0xf]  ;;  %3903 = vmatpush.bf16.msra.mxu3 %v6740_v8  ;;  %v6708_v9 = vor.u32 %v8085_v15, %v6707_v18  ;;  %3866 = vmatpush.bf16.msra.mxu0 %v5908_v23  ;;  %v7993_v8 = vld [vmem:[#allocation9 + $0x39c] sm:$0xf]  ;;  %v4056_v18 = vadd.f32 0.112945676, %v4055_v62  ;;  %v4133_v15 = vmul.f32 %v4132_v0, %v9142_v14  ;;  %v3660_v62 = vpop.f32.mrf.mxu0 }
 0x229   :  { %v8189_v33 = vld [vmem:[#allocation9 + $0x9b4] sm:$0xf0]  ;;  %3893 = vmatmul.bf16.vlgmr.msra.gmra.mxu2 %v9004_v57  ;;  %v9154_v38 = vadd.f32 0.0036580483, %v4042_v12  ;;  %v6293_v0 = vld [vmem:[#allocation9 + $0x338] sm:$0xf0] }
 0x22a   :  { %v6163_v34 = vld [vmem:[#allocation9 + $0x218] sm:$0xf]  ;;  %3937 = vmatpush.bf16.msrb.mxu2 %v6136_v17  ;;  %3878 = vmatpush.bf16.msra.mxu1 %v6196_v32  ;;  %v7124_v61 = vor.u32 %v8189_v33, %v7123_v25  ;;  %v6360_v25 = vor.u32 %v7993_v8, %v6357_v10  ;;  %v7985_v32 = vld [vmem:[#allocation9 + $0x35c] sm:$0xf] }
 0x22b   :  { %v7949_v35 = vld [vmem:[#allocation9 + $0x234] sm:$0xf0]  ;;  %3867 = vmatmul.bf16.vlgmr.msra.gmra.mxu0 %v8982_v2  ;;  %v6325_v33 = vld [vmem:[#allocation9 + $0x378] sm:$0xf0] }
 0x22c   :  { %v6675_v46 = vld [vmem:[#allocation9 + $0x618] sm:$0xf]  ;;  %3911 = vmatpush.bf16.msrb.mxu0 %v7156_v29  ;;  %v6164_v51 = vor.u32 %v7949_v35, %v6163_v34  ;;  %3904 = vmatpush.bf16.msra.mxu3 %v6708_v9  ;;  %v7905_v34 = vld [vmem:[#allocation9 + $0xdc] sm:$0xf]  ;;  %v4095_v9 = vmul.f32 %v4094_v13, %v9119_v16  ;;  %v6328_v56 = vor.u32 %v7985_v32, %v6325_v33 }
 0x22d   :  { %v8077_v40 = vld [vmem:[#allocation9 + $0x634] sm:$0xf0]  ;;  %v6005_v35 = vld [vmem:[#allocation9 + $0xf8] sm:$0xf0] }
 0x22e   :  { %v7411_v45 = vld [vmem:[#allocation9 + $0xbd8] sm:$0xf]  ;;  %v6676_v1 = vor.u32 %v8077_v40, %v6675_v46  ;;  %3938 = vmatpush.bf16.msrb.mxu2 %v6104_v42  ;;  %3879 = vmatpush.bf16.msra.mxu1 %v6164_v51  ;;  %v9157_v46 = vld [vmem:[#allocation11] sm:$0xff]  ;;  %v6008_v58 = vor.u32 %v7905_v34, %v6005_v35  ;;  %v7977_v51 = vld [vmem:[#allocation9 + $0x31c] sm:$0xf] }
 0x22f   :  { %v8261_v47 = vld [vmem:[#allocation9 + $0xbf4] sm:$0xf0]  ;;  %v1458_v40 = vperm.slane %v9157_v46, 3  ;;  %v6296_v20 = vor.u32 %v7977_v51, %v6293_v0  ;;  %v7157_v51 = vld [vmem:[#allocation9 + $0x9f8] sm:$0xf0] }
 0x230   :  { %v7412_v3 = vor.u32 %v8261_v47, %v7411_v45  ;;  %v7091_v4 = vld [vmem:[#allocation9 + $0x958] sm:$0xf]  ;;  %3912 = vmatpush.bf16.msrb.mxu0 %v7124_v61  ;;  %3905 = vmatpush.bf16.msra.mxu3 %v6676_v1  ;;  %v4057_v45 = vmul.f32 %v4056_v18, %v9106_v27  ;;  %v4134_v47 = vadd.f32 0.014752088, %v4133_v15  ;;  %v5973_v1 = vld [vmem:[#allocation9 + $0xb8] sm:$0xf0] }
 0x231   :  { %v8181_v39 = vld [vmem:[#allocation9 + $0x974] sm:$0xf0]  ;;  %3880 = vmatmul.bf16.vlgmr.msra.gmra.mxu1 %v8989_v30  ;;  %v5976_v12 = vor.u32 %v7897_v48, %v5973_v1  ;;  %v7969_v18 = vld [vmem:[#allocation9 + $0x2dc] sm:$0xf] }
 0x232   :  { %v7379_v5 = vld [vmem:[#allocation9 + $0xb98] sm:$0xf]  ;;  %v7092_v17 = vor.u32 %v8181_v39, %v7091_v4  ;;  %3924 = vmatpush.bf16.msrb.mxu1 %v7412_v3  ;;  %3939 = vmatpush.bf16.msrb.mxu2 %v6072_v63  ;;  %v4080_v3 = vmul.f32 2.1237322e-06, %v9119_v16  ;;  %v4096_v4 = vadd.f32 0.112945676, %v4095_v9  ;;  %v3635_v39 = vadd.f32 %v9128_v36, %v1458_v40 }
 0x233   :  { %v8253_v22 = vld [vmem:[#allocation9 + $0xbb4] sm:$0xf0]  ;;  %3906 = vmatmul.bf16.vlgmr.msra.gmra.mxu3 %v9013_v59  ;;  %v9164_v63 = vadd.f32 0.4994258, %v4057_v45  ;;  %v6261_v36 = vld [vmem:[#allocation9 + $0x2f8] sm:$0xf0] }
 0x234   :  { %v7380_v49 = vor.u32 %v8253_v22, %v7379_v5  ;;  %v7059_v19 = vld [vmem:[#allocation9 + $0x918] sm:$0xf]  ;;  %3950 = vmatpush.bf16.msrb.mxu3 %v6392_v31  ;;  %3913 = vmatpush.bf16.msrb.mxu0 %v7092_v17  ;;  %v4135_v5 = vmul.f32 %v4134_v47, %v9142_v14  ;;  %v3648_v11 = vadd.f32 %v9140_v7, %v3635_v39  ;;  %v7889_v15 = vld [vmem:[#allocation9 + $0x5c] sm:$0xf] }
 0x235   :  { %v8173_v23 = vld [vmem:[#allocation9 + $0x934] sm:$0xf0]  ;;  %v6264_v9 = vor.u32 %v7969_v18, %v6261_v36  ;;  %v7961_v47 = vld [vmem:[#allocation9 + $0x29c] sm:$0xf] }
 0x236   :  { %v7347_v28 = vld [vmem:[#allocation9 + $0xb58] sm:$0xf]  ;;  %v7060_v42 = vor.u32 %v8173_v23, %v7059_v19  ;;  %3925 = vmatpush.bf16.msrb.mxu1 %v7380_v49  ;;  %3940 = vmatpush.bf16.msrb.mxu2 %v6040_v26  ;;  %v5941_v49 = vld [vmem:[#allocation9 + $0x78] sm:$0xf0]  ;;  %v9168_v19 = vadd.f32 0.00028619796, %v4080_v3  ;;  %v4097_v23 = vmul.f32 %v4096_v4, %v9119_v16  ;;  %v3673_v26 = vpop.f32.mrf.mxu1 }
 0x237   :  { %v8245_v29 = vld [vmem:[#allocation9 + $0xb74] sm:$0xf0]  ;;  %v4136_v7 = vadd.f32 0.112945676, %v4135_v5  ;;  %v5944_v40 = vor.u32 %v7889_v15, %v5941_v49  ;;  %v8065_v3 = vld [vmem:[#allocation9 + $0x5dc] sm:$0xf] }
 0x238   :  { %v7348_v50 = vor.u32 %v8245_v29, %v7347_v28  ;;  %v7027_v52 = vld [vmem:[#allocation9 + $0x8d8] sm:$0xf]  ;;  %3951 = vmatpush.bf16.msrb.mxu3 %v6360_v25  ;;  %3914 = vmatpush.bf16.msrb.mxu0 %v7060_v42  ;;  %v3661_v25 = vadd.f32 %v3660_v62, %v3648_v11  ;;  %v3686_v28 = vpop.f32.mrf.mxu2  ;;  %v6645_v5 = vld [vmem:[#allocation9 + $0x5f8] sm:$0xf0]  ;;  %v3699_v11 = vpop.f32.mrf.mxu3 }
 0x239   :  { %v8165_v53 = vld [vmem:[#allocation9 + $0x8f4] sm:$0xf0]  ;;  %v4137_v62 = vmul.f32 %v4136_v7, %v9142_v14  ;;  %v8057_v49 = vld [vmem:[#allocation9 + $0x59c] sm:$0xf] }
 0x23a   :  { %v7315_v60 = vld [vmem:[#allocation9 + $0xb18] sm:$0xf]  ;;  %v7028_v31 = vor.u32 %v8165_v53, %v7027_v52  ;;  %3926 = vmatpush.bf16.msrb.mxu1 %v7348_v50  ;;  %3941 = vmatpush.bf16.msrb.mxu2 %v6008_v58  ;;  %v3674_v35 = vadd.f32 %v3673_v26, %v3661_v25  ;;  %v3662_v50 = vpop.f32.mrf.mxu0  ;;  %v6229_v52 = vld [vmem:[#allocation9 + $0x2b8] sm:$0xf0]  ;;  %v9171_v58 = vadd.f32 0.4994258, %v4097_v23 }
 0x23b   :  { %v8237_v61 = vld [vmem:[#allocation9 + $0xb34] sm:$0xf0]  ;;  %v7881_v53 = vld [vmem:[#allocation9 + $0x1c] sm:$0xf]  ;;  %v6232_v39 = vor.u32 %v7961_v47, %v6229_v52  ;;  %v4138_v26 = vadd.f32 0.4994258, %v4137_v62 }
 0x23c   :  { %v7316_v22 = vor.u32 %v8237_v61, %v7315_v60  ;;  %v6995_v8 = vld [vmem:[#allocation9 + $0x898] sm:$0xf]  ;;  %3952 = vmatpush.bf16.msrb.mxu3 %v6328_v56  ;;  %3915 = vmatpush.bf16.msrb.mxu0 %v7028_v31  ;;  %v5909_v56 = vld [vmem:[#allocation9 + $0x38] sm:$0xf0]  ;;  %v3687_v4 = vadd.f32 %v3686_v28, %v3674_v35  ;;  %v6648_v28 = vor.u32 %v8065_v3, %v6645_v5 }
 0x23d   :  { %v8157_v10 = vld [vmem:[#allocation9 + $0x8b4] sm:$0xf0]  ;;  %v8193_v61 = vld [vmem:[#allocation9 + $0x9dc] sm:$0xf]  ;;  %v5912_v31 = vor.u32 %v7881_v53, %v5909_v56 }
 0x23e   :  { %v7283_v13 = vld [vmem:[#allocation9 + $0xad8] sm:$0xf]  ;;  %v6996_v29 = vor.u32 %v8157_v10, %v6995_v8  ;;  %3927 = vmatpush.bf16.msrb.mxu1 %v7316_v22  ;;  %3942 = vmatpush.bf16.msrb.mxu2 %v5976_v12  ;;  %v4120_v10 = vmul.f32 2.1237322e-06, %v9142_v14  ;;  %v7953_v12 = vld [vmem:[#allocation9 + $0x25c] sm:$0xf]  ;;  %v3675_v18 = vpop.f32.mrf.mxu1 }
 0x23f   :  { %v8229_v17 = vld [vmem:[#allocation9 + $0xaf4] sm:$0xf0]  ;;  %v8185_v23 = vld [vmem:[#allocation9 + $0x99c] sm:$0xf] }
 0x240   :  { %v7284_v32 = vor.u32 %v8229_v17, %v7283_v13  ;;  %v6963_v33 = vld [vmem:[#allocation9 + $0x858] sm:$0xf]  ;;  %3953 = vmatpush.bf16.msrb.mxu3 %v6296_v20  ;;  %3916 = vmatpush.bf16.msrb.mxu0 %v6996_v29  ;;  %v7160_v20 = vor.u32 %v8193_v61, %v7157_v51  ;;  %v6197_v13 = vld [vmem:[#allocation9 + $0x278] sm:$0xf0]  ;;  %v9175_v17 = vadd.f32 %v3699_v11, %v3687_v4  ;;  %v3688_v36 = vpop.f32.mrf.mxu2  ;;  %v4121_v61 = vadd.f32 0.00028619796, %v4120_v10 }
 0x241   :  { %v8149_v34 = vld [vmem:[#allocation9 + $0x874] sm:$0xf0]  ;;  %v7125_v25 = vld [vmem:[#allocation9 + $0x9b8] sm:$0xf0]  ;;  %v6200_v35 = vor.u32 %v7953_v12, %v6197_v13  ;;  %v4139_v51 = vmul.f32 %v4138_v26, %v9142_v14 }
 0x242   :  { %v7251_v42 = vld [vmem:[#allocation9 + $0xa98] sm:$0xf]  ;;  %v6964_v60 = vor.u32 %v8149_v34, %v6963_v33  ;;  %3928 = vmatpush.bf16.msrb.mxu1 %v7284_v32  ;;  %3943 = vmatpush.bf16.msrb.mxu2 %v5944_v40  ;;  %v6613_v7 = vld [vmem:[#allocation9 + $0x5b8] sm:$0xf0]  ;;  %v4059_v33 = vmul.f32 %v9164_v63, %v9106_v27  ;;  %v9181_v34 = vmul.f32 %v9090_v37, %v9175_v17 }
 0x243   :  { %v8221_v45 = vld [vmem:[#allocation9 + $0xab4] sm:$0xf0]  ;;  %v7945_v40 = vld [vmem:[#allocation9 + $0x21c] sm:$0xf]  ;;  %v6616_v62 = vor.u32 %v8057_v49, %v6613_v7  ;;  %v9196_v49 = vadd.f32 1.0, %v4139_v51 }
 0x244   :  { %v7252_v0 = vor.u32 %v8221_v45, %v7251_v42  ;;  %v6931_v48 = vld [vmem:[#allocation9 + $0x818] sm:$0xf]  ;;  %3954 = vmatpush.bf16.msrb.mxu3 %v6264_v9  ;;  %3917 = vmatpush.bf16.msrb.mxu0 %v6964_v60  ;;  %v6165_v42 = vld [vmem:[#allocation9 + $0x238] sm:$0xf0]  ;;  %v7128_v45 = vor.u32 %v8185_v23, %v7125_v25  ;;  %v4158_v53 = vmul.f32 %v9181_v34, %v9181_v34 }
 0x245   :  { %v8141_v1 = vld [vmem:[#allocation9 + $0x834] sm:$0xf0]  ;;  %v8129_v47 = vld [vmem:[#allocation9 + $0x7dc] sm:$0xf]  ;;  %v6168_v4 = vor.u32 %v7945_v40, %v6165_v42  ;;  %v4044_v40 = vmul.f32 %v9154_v38, %v9106_v27  ;;  %vm4146_vm5 = vweird.f32 %v9196_v49 }
 0x246   :  { %v7219_v22 = vld [vmem:[#allocation9 + $0xa58] sm:$0xf]  ;;  %v6932_v15 = vor.u32 %v8141_v1, %v6931_v48  ;;  %3929 = vmatpush.bf16.msrb.mxu1 %v7252_v0  ;;  %3944 = vmatpush.bf16.msrb.mxu2 %v5912_v31  ;;  %v6901_v50 = vld [vmem:[#allocation9 + $0x7f8] sm:$0xf0]  ;;  %v9186_v1 = vadd.f32 1.0, %v4059_v33  ;;  %v9188_v3 = vmin.f32 %v4158_v53, 16.0 }
 0x247   :  { %v8213_v8 = vld [vmem:[#allocation9 + $0xa74] sm:$0xf0]  ;;  %v8257_v52 = vld [vmem:[#allocation9 + $0xbdc] sm:$0xf] }
 0x248   :  { %v7220_v29 = vor.u32 %v8213_v8, %v7219_v22  ;;  %v7187_v32 = vld [vmem:[#allocation9 + $0xa18] sm:$0xf]  ;;  %3955 = vmatpush.bf16.msrb.mxu3 %v6232_v39  ;;  %3918 = vmatpush.bf16.msrb.mxu0 %v6932_v15  ;;  %v7413_v63 = vld [vmem:[#allocation9 + $0xbf8] sm:$0xf0]  ;;  %v6904_v39 = vor.u32 %v8129_v47, %v6901_v50  ;;  %v3701_v22 = vpop.f32.mrf.mxu3  ;;  %v4171_v13 = vmul.f32 3.8918573e-05, %v9188_v3  ;;  %v4122_v15 = vmul.f32 %v4121_v61, %v9142_v14 }
 0x249   :  { %v8205_v9 = vld [vmem:[#allocation9 + $0xa34] sm:$0xf0]  ;;  %v8177_v56 = vld [vmem:[#allocation9 + $0x95c] sm:$0xf]  ;;  %3945 = vmatmul.bf16.vlgmr.msrb.gmra.mxu2 %v8982_v2  ;;  %v7416_v8 = vor.u32 %v8257_v52, %v7413_v63  ;;  %v4099_v2 = vmul.f32 %v9171_v58, %v9119_v16  ;;  %8392 = vrcp.f32 %v9186_v1  ;;  %vm4066_vm3 = vweird.f32 %v9186_v1 }
 0x24a   :  { %3989 = vmatpush.bf16.msra.mxu2 %v7160_v20  ;;  %v7093_v60 = vld [vmem:[#allocation9 + $0x978] sm:$0xf0]  ;;  %3930 = vmatpush.bf16.msrb.mxu1 %v7220_v29  ;;  %v7188_v0 = vor.u32 %v8205_v9, %v7187_v32  ;;  %v4172_v26 = vadd.f32 0.001143296, %v4171_v13  ;;  %v4160_v32 = vmul.f32 2.1237322e-06, %v9188_v3  ;;  %8394 = vrcp.f32 %v9196_v49 }
 0x24b   :  { %v8049_v48 = vld [vmem:[#allocation9 + $0x55c] sm:$0xf]  ;;  %3919 = vmatmul.bf16.vlgmr.msrb.gmra.mxu0 %v9027_v55  ;;  %v7096_v10 = vor.u32 %v8177_v56, %v7093_v60  ;;  %v9204_v52 = vadd.f32 1.0, %v4099_v2  ;;  %v4123_v53 = vadd.f32 0.0036580483, %v4122_v15 }
 0x24c   :  { %3963 = vmatpush.bf16.msra.mxu0 %v6648_v28  ;;  %3956 = vmatpush.bf16.msrb.mxu3 %v6200_v35  ;;  %v6581_v31 = vld [vmem:[#allocation9 + $0x578] sm:$0xf0]  ;;  %v4173_v42 = vmul.f32 %v4172_v26, %v9188_v3 }
 0x24d   :  { %v8121_v5 = vld [vmem:[#allocation9 + $0x79c] sm:$0xf]  ;;  %v6584_v23 = vor.u32 %v8049_v48, %v6581_v31  ;;  %8396 = vrcp.f32 %v9204_v52  ;;  %vm4106_vm11 = vweird.f32 %v9204_v52 }
 0x24e   :  { %3990 = vmatpush.bf16.msra.mxu2 %v7128_v45  ;;  %v6869_v11 = vld [vmem:[#allocation9 + $0x7b8] sm:$0xf0]  ;;  %3931 = vmatpush.bf16.msrb.mxu1 %v7188_v0  ;;  %v4174_v38 = vadd.f32 0.014752088, %v4173_v42 }
 0x24f   :  { %v8249_v20 = vld [vmem:[#allocation9 + $0xb9c] sm:$0xf]  ;;  %v6872_v28 = vor.u32 %v8121_v5, %v6869_v11  ;;  %v9209_v5 = vpop.f32.mrf.mxu0  ;;  %v4082_v11 = vmul.f32 %v9168_v19, %v9119_v16  ;;  %v9214_v13 = vpop.eup %8392 }
 0x250   :  { %v7381_v12 = vld [vmem:[#allocation9 + $0xbb8] sm:$0xf0]  ;;  %3964 = vmatpush.bf16.msra.mxu0 %v6616_v62  ;;  %3957 = vmatpush.bf16.msrb.mxu3 %v6168_v4  ;;  %v4161_v62 = vadd.f32 0.00028619796, %v4160_v32  ;;  %v4175_v31 = vmul.f32 %v4174_v38, %v9188_v3  ;;  %vm4067_vm1 = vweird.f32 %v9214_v13 }
 0x251   :  { %v8169_v18 = vld [vmem:[#allocation9 + $0x91c] sm:$0xf]  ;;  %v7384_v33 = vor.u32 %v8249_v20, %v7381_v12  ;;  %3932 = vmatmul.bf16.vlgmr.msrb.gmra.mxu1 %v9032_v21  ;;  %v4124_v20 = vmul.f32 %v4123_v53, %v9142_v14  ;;  %vm9266_vm4 = vmor %vm4066_vm3, %vm4067_vm1 }
 0x252   :  { %v7061_v36 = vld [vmem:[#allocation9 + $0x938] sm:$0xf0]  ;;  %3976 = vmatpush.bf16.msra.mxu1 %v6904_v39  ;;  %3991 = vmatpush.bf16.msra.mxu2 %v7096_v10  ;;  %v4045_v10 = vadd.f32 0.05243302, %v4044_v40  ;;  %v4083_v40 = vadd.f32 0.0036580483, %v4082_v11 }
 0x253   :  { %v8041_v25 = vld [vmem:[#allocation9 + $0x51c] sm:$0xf]  ;;  %v7064_v58 = vor.u32 %v8169_v18, %v7061_v36  ;;  %3958 = vmatmul.bf16.vlgmr.msrb.gmra.mxu3 %v8989_v30  ;;  %v4176_v18 = vadd.f32 0.112945676, %v4175_v31  ;;  %v4125_v42 = vadd.f32 0.05243302, %v4124_v20 }
 0x254   :  { %v6549_v29 = vld [vmem:[#allocation9 + $0x538] sm:$0xf0]  ;;  %4002 = vmatpush.bf16.msra.mxu3 %v7416_v8  ;;  %3965 = vmatpush.bf16.msra.mxu0 %v6584_v23  ;;  %v9216_v23 = vpop.eup %8394  ;;  %v4046_v11 = vmul.f32 %v4045_v10, %v9106_v27 }
 0x255   :  { %v8113_v7 = vld [vmem:[#allocation9 + $0x75c] sm:$0xf]  ;;  %v6552_v63 = vor.u32 %v8041_v25, %v6549_v29  ;;  %v4162_v25 = vmul.f32 %v4161_v62, %v9188_v3  ;;  %v4177_v32 = vmul.f32 %v4176_v18, %v9188_v3  ;;  %vm4147_vm2 = vweird.f32 %v9216_v23 }
 0x256   :  { %v6837_v35 = vld [vmem:[#allocation9 + $0x778] sm:$0xf0]  ;;  %3977 = vmatpush.bf16.msra.mxu1 %v6872_v28  ;;  %3992 = vmatpush.bf16.msra.mxu2 %v7064_v58  ;;  %vm9278_vm6 = vmor %vm4146_vm5, %vm4147_vm2 }
 0x257   :  { %v8241_v9 = vld [vmem:[#allocation9 + $0xb5c] sm:$0xf]  ;;  %v6840_v60 = vor.u32 %v8113_v7, %v6837_v35  ;;  %v3714_v31 = vpop.f32.mrf.mxu0 }
 0x258   :  { %v7349_v45 = vld [vmem:[#allocation9 + $0xb78] sm:$0xf0]  ;;  %4003 = vmatpush.bf16.msra.mxu3 %v7384_v33  ;;  %3966 = vmatpush.bf16.msra.mxu0 %v6552_v63  ;;  %v4142_v63 = vmul.f32 %v9216_v23, %v9196_v49 }
 0x259   :  { %v8161_v47 = vld [vmem:[#allocation9 + $0x8dc] sm:$0xf]  ;;  %v7352_v0 = vor.u32 %v8241_v9, %v7349_v45  ;;  %v4062_v9 = vmul.f32 %v9214_v13, %v9186_v1  ;;  %v9223_v45 = vpop.f32.mrf.mxu1 }
 0x25a   :  { %v7029_v50 = vld [vmem:[#allocation9 + $0x8f8] sm:$0xf0]  ;;  %3978 = vmatpush.bf16.msra.mxu1 %v6840_v60 }
 0x25b   :  { %v8033_v56 = vld [vmem:[#allocation9 + $0x4dc] sm:$0xf]  ;;  %v7032_v48 = vor.u32 %v8161_v47, %v7029_v50  ;;  %v9225_v47 = vpop.f32.mrf.mxu2  ;;  %v4063_v20 = vsub.f32 1.0, %v4062_v9 }
 0x25c   :  { %v6517_v61 = vld [vmem:[#allocation9 + $0x4f8] sm:$0xf0]  ;;  %4004 = vmatpush.bf16.msra.mxu3 %v7352_v0 }
 0x25d   :  { %v8105_v51 = vld [vmem:[#allocation9 + $0x71c] sm:$0xf]  ;;  %v6520_v12 = vor.u32 %v8033_v56, %v6517_v61  ;;  %3993 = vmatpush.bf16.msra.mxu2 %v7032_v48  ;;  %v4178_v56 = vadd.f32 0.4994258, %v4177_v32 }
 0x25e   :  { %v6805_v4 = vld [vmem:[#allocation9 + $0x738] sm:$0xf0] }
 0x25f   :  { %v8233_v39 = vld [vmem:[#allocation9 + $0xb1c] sm:$0xf]  ;;  %v6808_v36 = vor.u32 %v8105_v51, %v6805_v4  ;;  %3967 = vmatpush.bf16.msra.mxu0 %v6520_v12  ;;  %v4163_v51 = vadd.f32 0.0036580483, %v4162_v25  ;;  %v4084_v12 = vmul.f32 %v4083_v40, %v9119_v16 }
 0x260   :  { %v7317_v30 = vld [vmem:[#allocation9 + $0xb38] sm:$0xf0] }
 0x261   :  { %v8153_v22 = vld [vmem:[#allocation9 + $0x89c] sm:$0xf]  ;;  %v7320_v26 = vor.u32 %v8233_v39, %v7317_v30  ;;  %3979 = vmatpush.bf16.msra.mxu1 %v6808_v36  ;;  %v4179_v39 = vmul.f32 %v4178_v56, %v9188_v3  ;;  %v9232_v36 = vpop.eup %8396 }
 0x262   :  { %v6997_v8 = vld [vmem:[#allocation9 + $0x8b8] sm:$0xf0]  ;;  %vm4107_vm9 = vweird.f32 %v9232_v36 }
 0x263   :  { %v8025_v2 = vld [vmem:[#allocation9 + $0x49c] sm:$0xf]  ;;  %v7000_v28 = vor.u32 %v8153_v22, %v6997_v8  ;;  %4005 = vmatpush.bf16.msra.mxu3 %v7320_v26  ;;  %v9235_v25 = vadd.f32 1.0, %v4179_v39  ;;  %v3740_v56 = vpop.f32.mrf.mxu2  ;;  %vm9304_vm12 = vmor %vm4106_vm11, %vm4107_vm9 }
 0x264   :  { %v6485_v15 = vld [vmem:[#allocation9 + $0x4b8] sm:$0xf0] }
 0x265   :  { %v8097_v19 = vld [vmem:[#allocation9 + $0x6dc] sm:$0xf]  ;;  %v6488_v50 = vor.u32 %v8025_v2, %v6485_v15  ;;  %3994 = vmatpush.bf16.msra.mxu2 %v7000_v28  ;;  %v4126_v2 = vmul.f32 %v4125_v42, %v9142_v14  ;;  %v4143_v15 = vsub.f32 1.0, %v4142_v63  ;;  %8398 = vrcp.f32 %v9235_v25  ;;  %v3727_v63 = vpop.f32.mrf.mxu1 }
 0x266   :  { %v6773_v29 = vld [vmem:[#allocation9 + $0x6f8] sm:$0xf0]  ;;  %v4064_v42 = vmul.f32 %v9214_v13, %v4063_v20  ;;  %vm4186_vm13 = vweird.f32 %v9235_v25 }
 0x267   :  { %v8225_v7 = vld [vmem:[#allocation9 + $0xadc] sm:$0xf]  ;;  %v6776_v38 = vor.u32 %v8097_v19, %v6773_v29  ;;  %3968 = vmatpush.bf16.msra.mxu0 %v6488_v50  ;;  %v4164_v29 = vmul.f32 %v4163_v51, %v9188_v3  ;;  %v4085_v50 = vadd.f32 0.05243302, %v4084_v12  ;;  %v4144_v51 = vmul.f32 %v9216_v23, %v4143_v15 }
 0x268   :  { %v7285_v33 = vld [vmem:[#allocation9 + $0xaf8] sm:$0xf0] }
 0x269   :  { %v8145_v58 = vld [vmem:[#allocation9 + $0x85c] sm:$0xf]  ;;  %v7288_v62 = vor.u32 %v8225_v7, %v7285_v33  ;;  %3980 = vmatpush.bf16.msra.mxu1 %v6776_v38  ;;  %v4086_v12 = vmul.f32 %v4085_v50, %v9119_v16  ;;  %v8283_v50 = vld [vmem:[#allocation12 + $0xa8] sm:$0xff] }
 0x26a   :  { %v6965_v35 = vld [vmem:[#allocation9 + $0x878] sm:$0xf0] }
 0x26b   :  { %v8017_v53 = vld [vmem:[#allocation9 + $0x45c] sm:$0xf]  ;;  %v6968_v0 = vor.u32 %v8145_v58, %v6965_v35  ;;  %4006 = vmatpush.bf16.msra.mxu3 %v7288_v62  ;;  %v9239_v58 = vpop.f32.mrf.mxu3  ;;  %v8285_v35 = vld [vmem:[#allocation12 + $0xb8] sm:$0xff] }
 0x26c   :  { %v6453_v60 = vld [vmem:[#allocation9 + $0x478] sm:$0xf0]  ;;  %v8269_v62 = vld [vmem:[#allocation12 + $0x38] sm:$0xff] }
 0x26d   :  { %v8089_v61 = vld [vmem:[#allocation9 + $0x69c] sm:$0xf]  ;;  %v6456_v18 = vor.u32 %v8017_v53, %v6453_v60  ;;  %3995 = vmatpush.bf16.msra.mxu2 %v6968_v0  ;;  %v4102_v53 = vmul.f32 %v9232_v36, %v9204_v52  ;;  %v4047_v60 = vadd.f32 0.18741608, %v4046_v11  ;;  %v4065_v11 = vadd.f32 %v9214_v13, %v4064_v42  ;;  %v8293_v42 = vld [vmem:[#allocation12 + $0xf8] sm:$0xff] }
 0x26e   :  { %v6741_v48 = vld [vmem:[#allocation9 + $0x6b8] sm:$0xf0] }
 0x26f   :  { %v8217_v4 = vld [vmem:[#allocation9 + $0xa9c] sm:$0xf]  ;;  %v6744_v26 = vor.u32 %v8089_v61, %v6741_v48  ;;  %3969 = vmatpush.bf16.msra.mxu0 %v6456_v18  ;;  %v4127_v61 = vadd.f32 0.18741608, %v4126_v2  ;;  %v4165_v48 = vadd.f32 0.05243302, %v4164_v29  ;;  %v9249_v2 = vpop.eup %8398  ;;  %v4069_v63 = vsel %vm9266_vm4, %v9214_v13, %v4065_v11 }
 0x270   :  { %v7253_v30 = vld [vmem:[#allocation9 + $0xab8] sm:$0xf0]  ;;  %v4103_v18 = vsub.f32 1.0, %v4102_v53  ;;  %v4087_v53 = vadd.f32 0.18741608, %v4086_v12  ;;  %v8266_v11 = vld [vmem:[#allocation12 + $0x20] sm:$0xff]  ;;  %vm4187_vm10 = vweird.f32 %v9249_v2 }
 0x271   :  { %v8137_v22 = vld [vmem:[#allocation9 + $0x81c] sm:$0xf]  ;;  %v7256_v10 = vor.u32 %v8217_v4, %v7253_v30  ;;  %3981 = vmatpush.bf16.msra.mxu1 %v6744_v26  ;;  %v4072_v30 = vand.u32 2147483648, %v9186_v1  ;;  %v4128_v15 = vmul.f32 %v4127_v61, %v9142_v14  ;;  %v4145_v26 = vadd.f32 %v9216_v23, %v4144_v51  ;;  %v8277_v14 = vld [vmem:[#allocation12 + $0x78] sm:$0xff]  ;;  %v8267_v61 = vld [vmem:[#allocation12 + $0x28] sm:$0xff] }
 0x272   :  { %v6933_v8 = vld [vmem:[#allocation9 + $0x838] sm:$0xf0]  ;;  %v4104_v56 = vmul.f32 %v9232_v36, %v4103_v18  ;;  %vm9316_vm14 = vmor %vm4186_vm13, %vm4187_vm10 }
 0x273   :  { %v8009_v28 = vld [vmem:[#allocation9 + $0x41c] sm:$0xf]  ;;  %v6936_v7 = vor.u32 %v8137_v22, %v6933_v8  ;;  %4007 = vmatpush.bf16.msra.mxu3 %v7256_v10  ;;  %v4166_v10 = vmul.f32 %v4165_v48, %v9188_v3 }
 0x274   :  { %v6421_v19 = vld [vmem:[#allocation9 + $0x438] sm:$0xf0] }
 0x275   :  { %v8081_v32 = vld [vmem:[#allocation9 + $0x65c] sm:$0xf]  ;;  %v6424_v38 = vor.u32 %v8009_v28, %v6421_v19  ;;  %3996 = vmatpush.bf16.msra.mxu2 %v6936_v7  ;;  %v1459_v28 = vperm.slane %v9157_v46, 4  ;;  %v4182_v7 = vmul.f32 %v9249_v2, %v9235_v25  ;;  %v4167_v51 = vadd.f32 0.18741608, %v4166_v10 }
 0x276   :  { %v6709_v33 = vld [vmem:[#allocation9 + $0x678] sm:$0xf0] }
 0x277   :  { %v8209_v9 = vld [vmem:[#allocation9 + $0xa5c] sm:$0xf]  ;;  %v6712_v0 = vor.u32 %v8081_v32, %v6709_v33  ;;  %3970 = vmatpush.bf16.msra.mxu0 %v6424_v38  ;;  %v4048_v33 = vmul.f32 %v4047_v60, %v9106_v27  ;;  %v4150_v27 = vand.u32 2147483647, %v9196_v49  ;;  %v4129_v38 = vadd.f32 1.1283791, %v4128_v15 }
 0x278   :  { %v7221_v40 = vld [vmem:[#allocation9 + $0xa78] sm:$0xf0]  ;;  %3997 = vmatmul.bf16.vlgmr.msra.gmra.mxu2 %v9027_v55  ;;  %v4110_v15 = vand.u32 2147483647, %v9204_v52  ;;  %v8273_v60 = vld [vmem:[#allocation12 + $0x58] sm:$0xff] }
 0x279   :  { %v7224_v4 = vor.u32 %v8209_v9, %v7221_v40  ;;  %v8073_v39 = vld [vmem:[#allocation9 + $0x61c] sm:$0xf]  ;;  %4924 = vmatpush.bf16.msrb.mxu2 %v8285_v35  ;;  %3982 = vmatpush.bf16.msra.mxu1 %v6712_v0  ;;  %v4070_v35 = vand.u32 2147483647, %v9186_v1  ;;  %v4152_v9 = vand.u32 2147483648, %v9196_v49  ;;  %v3753_v40 = vpop.f32.mrf.mxu3  ;;  %v4183_v1 = vsub.f32 1.0, %v4182_v7 }
 0x27a   :  { %v6677_v31 = vld [vmem:[#allocation9 + $0x638] sm:$0xf0]  ;;  %3971 = vmatmul.bf16.vlgmr.msra.gmra.mxu0 %v9004_v57  ;;  %v4073_v57 = vor.u32 1.1754944e-38, %v4072_v30  ;;  %v4149_v49 = vsel %vm9278_vm6, %v9216_v23, %v4145_v26  ;;  %v4049_v48 = vadd.f32 1.1283791, %v4048_v33  ;;  %vm4151_vm8 = vcmp.eq.f32.partialorder %v4150_v27, 8.507059e+37 }
 0x27b   :  { %v8284_v22 = vld [vmem:[#allocation12 + $0xb0] sm:$0xff]  ;;  %4898 = vmatpush.bf16.msrb.mxu0 %v8269_v62  ;;  %v6680_v29 = vor.u32 %v8073_v39, %v6677_v31  ;;  %4008 = vmatpush.bf16.msra.mxu3 %v7224_v4  ;;  %v4184_v13 = vmul.f32 %v9249_v2, %v4183_v1  ;;  %v3713_v62 = vadd.f32 %v9209_v5, %v1459_v28  ;;  %vm4071_vm7 = vcmp.eq.f32.partialorder %v4070_v35, 8.507059e+37  ;;  %v8282_v31 = vld [vmem:[#allocation12 + $0xa0] sm:$0xff]  ;;  %v8291_v26 = vld [vmem:[#allocation12 + $0xe8] sm:$0xff] }
 0x27c   :  { %v8201_v8 = vld [vmem:[#allocation9 + $0xa1c] sm:$0xf]  ;;  %v4153_v4 = vor.u32 1.1754944e-38, %v4152_v9  ;;  %v4074_v30 = vsel %vm4071_vm7, %v4073_v57, %v4069_v63  ;;  %v4105_v5 = vadd.f32 %v9232_v36, %v4104_v56  ;;  %v4130_v12 = vmul.f32 %v4129_v38, %v9136_v6  ;;  %v8281_v6 = vld [vmem:[#allocation12 + $0x98] sm:$0xff]  ;;  %v8274_v9 = vld [vmem:[#allocation12 + $0x60] sm:$0xff]  ;;  %v3777_v63 = vpop.f32.mrf.mxu1 }
 0x27d   :  { %v7189_v20 = vld [vmem:[#allocation9 + $0xa38] sm:$0xf0]  ;;  %4925 = vmatpush.bf16.msrb.mxu2 %v8284_v22  ;;  %3983 = vmatpush.bf16.msra.mxu1 %v6680_v29  ;;  %v4088_v22 = vmul.f32 %v4087_v53, %v9119_v16  ;;  %v3726_v23 = vadd.f32 %v9223_v45, %v3713_v62  ;;  %v4168_v16 = vmul.f32 %v4167_v51, %v9188_v3  ;;  %vm4111_vm15 = vcmp.eq.f32.partialorder %v4110_v15, 8.507059e+37  ;;  %v8290_v40 = vld [vmem:[#allocation12 + $0xe0] sm:$0xff]  ;;  %v8279_v51 = vld [vmem:[#allocation12 + $0x88] sm:$0xff] }
 0x27e   :  { %v8268_v19 = vld [vmem:[#allocation12 + $0x30] sm:$0xff]  ;;  %v7192_v32 = vor.u32 %v8201_v8, %v7189_v20  ;;  %v4112_v8 = vand.u32 2147483648, %v9204_v52  ;;  %v4154_v20 = vsel %vm4151_vm8, %v4153_v4, %v4149_v49  ;;  %v4185_v18 = vadd.f32 %v9249_v2, %v4184_v13  ;;  %v3764_v52 = vpop.f32.mrf.mxu0  ;;  %v8289_v49 = vld [vmem:[#allocation12 + $0xd8] sm:$0xff] }
 0x27f   :  { %4899 = vmatpush.bf16.msrb.mxu0 %v8268_v19  ;;  %v8276_v0 = vld [vmem:[#allocation12 + $0x70] sm:$0xff]  ;;  %v4050_v45 = vmul.f32 %v4049_v48, %v9096_v54  ;;  %v4155_v28 = vmul.f32 %v4154_v20, %v4130_v12  ;;  %v4190_v54 = vand.u32 2147483647, %v9235_v25  ;;  %v3739_v19 = vadd.f32 %v9225_v47, %v3726_v23  ;;  %v8263_v48 = vld [vmem:[#allocation12 + $0x8] sm:$0xff]  ;;  %v8278_v23 = vld [vmem:[#allocation12 + $0x80] sm:$0xff] }
 0x280   :  { %4009 = vmatpush.bf16.msra.mxu3 %v7192_v32  ;;  %v8292_v39 = vld [vmem:[#allocation12 + $0xf0] sm:$0xff]  ;;  %3984 = vmatmul.bf16.vlgmr.msra.gmra.mxu1 %v9013_v59  ;;  %v8275_v59 = vld [vmem:[#allocation12 + $0x68] sm:$0xff]  ;;  %v4089_v10 = vadd.f32 1.1283791, %v4088_v22  ;;  %v4109_v7 = vsel %vm9304_vm12, %v9232_v36, %v4105_v5  ;;  %v4113_v33 = vor.u32 1.1754944e-38, %v4112_v8  ;;  %v4189_v47 = vsel %vm9316_vm14, %v9249_v2, %v4185_v18  ;;  %v9325_v2 = vpop.f32.mrf.mxu2  ;;  %v8262_v18 = vld [vmem:[#allocation12] sm:$0xff] }
 0x281   :  { %4911 = vmatpush.bf16.msrb.mxu1 %v8277_v14  ;;  %4926 = vmatpush.bf16.msrb.mxu2 %v8283_v50  ;;  %v4075_v29 = vmul.f32 %v4074_v30, %v4050_v45  ;;  %v8265_v14 = vld [vmem:[#allocation12 + $0x18] sm:$0xff]  ;;  %v4169_v35 = vadd.f32 1.1283791, %v4168_v16  ;;  %v7419_v55 = vclamps-f32 %v4155_v28, 1.0  ;;  %vm4191_vm0 = vcmp.eq.f32.partialorder %v4190_v54, 8.507059e+37  ;;  %v8288_v22 = vld [vmem:[#allocation12 + $0xd0] sm:$0xff]  ;;  %v3803_v12 = vpop.f32.mrf.mxu3 }
 0x282   :  { %v4114_v50 = vsel %vm4111_vm15, %v4113_v33, %v4109_v7  ;;  %v4090_v27 = vmul.f32 %v4089_v10, %v9112_v43  ;;  %v4015_v5 = vmul.f32 0.5, %v9066_v44  ;;  %v8287_v44 = vld [vmem:[#allocation12 + $0xc8] sm:$0xff]  ;;  %v4018_v10 = vmul.f32 0.5, %v9175_v17 }
 0x283   :  { %4010 = vmatmul.bf16.vlgmr.msra.gmra.mxu3 %v9032_v21  ;;  %4900 = vmatpush.bf16.msrb.mxu0 %v8267_v61  ;;  %v4192_v21 = vand.u32 2147483648, %v9235_v25  ;;  %v3752_v25 = vadd.f32 %v9239_v58, %v3739_v19  ;;  %v8264_v58 = vld [vmem:[#allocation12 + $0x10] sm:$0xff]  ;;  %v7417_v57 = vclamps-f32 %v4075_v29, 1.0  ;;  %v4170_v56 = vmul.f32 %v4169_v35, %v9181_v34  ;;  %v8286_v35 = vld [vmem:[#allocation12 + $0xc0] sm:$0xff] }
 0x284   :  { %4937 = vmatpush.bf16.msrb.mxu3 %v8293_v42  ;;  %v8280_v42 = vld [vmem:[#allocation12 + $0x90] sm:$0xff]  ;;  %v4115_v61 = vmul.f32 %v4114_v50, %v4090_v27  ;;  %v4360_v13 = vadd.f32 1.0, %v7419_v55  ;;  %v4017_v34 = vmul.f32 0.5, %v9132_v41  ;;  %v3779_v16 = vpop.f32.mrf.mxu1 }
 0x285   :  { %4912 = vmatpush.bf16.msrb.mxu1 %v8276_v0  ;;  %4927 = vmatpush.bf16.msrb.mxu2 %v8282_v31  ;;  %v4193_v36 = vor.u32 1.1754944e-38, %v4192_v21  ;;  %v3765_v53 = vadd.f32 %v3764_v52, %v3752_v25  ;;  %v4358_v4 = vadd.f32 1.0, %v7417_v57  ;;  %v8272_v31 = vld [vmem:[#allocation12 + $0x50] sm:$0xff]  ;;  %v8271_v21 = vld [vmem:[#allocation12 + $0x48] sm:$0xff]  ;;  %v4016_v52 = vmul.f32 0.5, %v9104_v24 }
 0x286   :  { %v3766_v0 = vpop.f32.mrf.mxu0  ;;  %v7418_v30 = vclamps-f32 %v4115_v61, 1.0  ;;  %v4368_v8 = vmul.f32 %v4360_v13, %v4017_v34  ;;  %v8296_v34 = vld [vmem:[#allocation12 + $0x110] sm:$0xff]  ;;  %v8307_v16 = vld [vmem:[#allocation12 + $0x168] sm:$0xff] }
 0x287   :  { %4901 = vmatpush.bf16.msrb.mxu0 %v8266_v11  ;;  %v4194_v1 = vsel %vm4191_vm0, %v4193_v36, %v4189_v47  ;;  %v9328_v38 = vadd.f32 %v3777_v63, %v3765_v53  ;;  %v8300_v47 = vld [vmem:[#allocation12 + $0x130] sm:$0xff]  ;;  %v8298_v63 = vld [vmem:[#allocation12 + $0x120] sm:$0xff]  ;;  %v8309_v0 = vld [vmem:[#allocation12 + $0x178] sm:$0xff] }
 0x288   :  { %4938 = vmatpush.bf16.msrb.mxu3 %v8292_v39  ;;  %v4195_v43 = vmul.f32 %v4194_v1, %v4170_v56  ;;  %v3792_v41 = vpop.f32.mrf.mxu2  ;;  %v4376_v3 = vpack.c.bf16 %v4368_v8, %v4368_v8  ;;  %v1460_v1 = vperm.slane %v9157_v46, 5 }
 0x289   :  { %4913 = vmatpush.bf16.msrb.mxu1 %v8275_v59  ;;  %4928 = vmatpush.bf16.msrb.mxu2 %v8281_v6  ;;  %v9332_v62 = vmul.f32 %v9090_v37, %v9328_v38  ;;  %v4366_v59 = vmul.f32 %v4358_v4, %v4015_v5  ;;  %v8301_v6 = vld [vmem:[#allocation12 + $0x138] sm:$0xff]  ;;  %v3805_v36 = vpop.f32.mrf.mxu3 }
 0x28a   :  { %v7420_v20 = vclamps-f32 %v4195_v43, 1.0  ;;  %v3791_v61 = vadd.f32 %v9325_v2, %v1460_v1  ;;  %v8295_v2 = vld [vmem:[#allocation12 + $0x108] sm:$0xff] }
 0x28b   :  { %4902 = vmatpush.bf16.msrb.mxu0 %v8265_v14  ;;  %v4198_v39 = vmul.f32 %v9332_v62, %v9332_v62  ;;  %v4374_v29 = vpack.c.bf16 %v4366_v59, %v4366_v59  ;;  %v8270_v14 = vld [vmem:[#allocation12 + $0x40] sm:$0xff] }
 0x28c   :  { %4939 = vmatpush.bf16.msrb.mxu3 %v8291_v26  ;;  %v4359_v26 = vadd.f32 1.0, %v7418_v30  ;;  %v4361_v28 = vadd.f32 1.0, %v7420_v20  ;;  %v3804_v13 = vadd.f32 %v3803_v12, %v3791_v61 }
 0x28d   :  { %4914 = vmatpush.bf16.msrb.mxu1 %v8274_v9  ;;  %4929 = vmatpush.bf16.msrb.mxu2 %v8280_v42  ;;  %v9338_v11 = vmin.f32 %v4198_v39, 16.0  ;;  %v8299_v42 = vld [vmem:[#allocation12 + $0x128] sm:$0xff] }
 0x28e   :  { %v4367_v33 = vmul.f32 %v4359_v26, %v4016_v52  ;;  %v4369_v25 = vmul.f32 %v4361_v28, %v4018_v10  ;;  %v3816_v56 = vpop.f32.mrf.mxu0  ;;  %v3829_v46 = vpop.f32.mrf.mxu1 }
 0x28f   :  { %4903 = vmatpush.bf16.msrb.mxu0 %v8264_v58  ;;  %v4200_v45 = vmul.f32 2.1237322e-06, %v9338_v11  ;;  %v4211_v15 = vmul.f32 3.8918573e-05, %v9338_v11 }
 0x290   :  { %4940 = vmatpush.bf16.msrb.mxu3 %v8290_v40  ;;  %v4375_v17 = vpack.c.bf16 %v4367_v33, %v4367_v33  ;;  %v4377_v50 = vpack.c.bf16 %v4369_v25, %v4369_v25  ;;  %v3842_v4 = vpop.f32.mrf.mxu2 }
 0x291   :  { %4915 = vmatpush.bf16.msrb.mxu1 %v8273_v60  ;;  %4930 = vmatpush.bf16.msrb.mxu2 %v8279_v51  ;;  %v4201_v54 = vadd.f32 0.00028619796, %v4200_v45  ;;  %v4212_v19 = vadd.f32 0.001143296, %v4211_v15  ;;  %v8294_v15 = vld [vmem:[#allocation12 + $0x100] sm:$0xff] }
 0x293   :  { %4904 = vmatpush.bf16.msrb.mxu0 %v8263_v48  ;;  %v4202_v7 = vmul.f32 %v4201_v54, %v9338_v11  ;;  %v4213_v32 = vmul.f32 %v4212_v19, %v9338_v11  ;;  %v3817_v48 = vadd.f32 %v3816_v56, %v3804_v13 }
 0x294   :  { %4941 = vmatpush.bf16.msrb.mxu3 %v8289_v49  ;;  %v8297_v49 = vld [vmem:[#allocation12 + $0x118] sm:$0xff] }
 0x295   :  { %4916 = vmatpush.bf16.msrb.mxu1 %v8272_v31  ;;  %4931 = vmatpush.bf16.msrb.mxu2 %v8278_v23  ;;  %v4214_v9 = vadd.f32 0.014752088, %v4213_v32  ;;  %v4203_v24 = vadd.f32 0.0036580483, %v4202_v7  ;;  %v3830_v39 = vadd.f32 %v3829_v46, %v3817_v48  ;;  %v8305_v32 = vld [vmem:[#allocation12 + $0x158] sm:$0xff] }
 0x296   :  { %v3818_v30 = vpop.f32.mrf.mxu0  ;;  %v3855_v12 = vpop.f32.mrf.mxu3 }
 0x297   :  { %4905 = vmatpush.bf16.msrb.mxu0 %v8262_v18  ;;  %v4215_v40 = vmul.f32 %v4214_v9, %v9338_v11  ;;  %v4204_v53 = vmul.f32 %v4203_v24, %v9338_v11  ;;  %v3843_v5 = vadd.f32 %v3842_v4, %v3830_v39  ;;  %v3831_v18 = vpop.f32.mrf.mxu1  ;;  %v8304_v24 = vld [vmem:[#allocation12 + $0x150] sm:$0xff] }
 0x298   :  { %4942 = vmatpush.bf16.msrb.mxu3 %v8288_v22  ;;  %4932 = vmatmul.bf16.vlgmr.msrb.gmra.mxu2 %v4376_v3  ;;  %v8308_v22 = vld [vmem:[#allocation12 + $0x170] sm:$0xff]  ;;  %v3844_v59 = vpop.f32.mrf.mxu2  ;;  %v8306_v3 = vld [vmem:[#allocation12 + $0x160] sm:$0xff] }
 0x299   :  { %4917 = vmatpush.bf16.msrb.mxu1 %v8271_v21  ;;  %v4216_v55 = vadd.f32 0.112945676, %v4215_v40  ;;  %v4205_v57 = vadd.f32 0.05243302, %v4204_v53  ;;  %v9354_v41 = vadd.f32 %v3855_v12, %v3843_v5 }
 0x29a   :  { %4906 = vmatmul.bf16.vlgmr.msrb.gmra.mxu0 %v4374_v29 }
 0x29b   :  { %4950 = vmatpush.bf16.msra.mxu0 %v8301_v6  ;;  %v4217_v27 = vmul.f32 %v4216_v55, %v9338_v11  ;;  %v4206_v43 = vmul.f32 %v4205_v57, %v9338_v11  ;;  %v9358_v26 = vmul.f32 %v9090_v37, %v9354_v41 }
 0x29c   :  { %4943 = vmatpush.bf16.msrb.mxu3 %v8287_v44 }
 0x29d   :  { %4918 = vmatpush.bf16.msrb.mxu1 %v8270_v14  ;;  %v4218_v58 = vadd.f32 0.4994258, %v4217_v27  ;;  %v4207_v31 = vadd.f32 0.18741608, %v4206_v43  ;;  %v4238_v28 = vmul.f32 %v9358_v26, %v9358_v26  ;;  %v8303_v27 = vld [vmem:[#allocation12 + $0x148] sm:$0xff] }
 0x29e   :  { %v3857_v7 = vpop.f32.mrf.mxu3 }
 0x29f   :  { %4951 = vmatpush.bf16.msra.mxu0 %v8300_v47  ;;  %v4219_v60 = vmul.f32 %v4218_v58, %v9338_v11  ;;  %v4208_v8 = vmul.f32 %v4207_v31, %v9338_v11  ;;  %v4239_v52 = vmin.f32 %v4238_v28, 16.0  ;;  %v8316_v7 = vld [vmem:[#allocation12 + $0x1b0] sm:$0xff] }
 0x2a0   :  { %4944 = vmatpush.bf16.msrb.mxu3 %v8286_v35  ;;  %4919 = vmatmul.bf16.vlgmr.msrb.gmra.mxu1 %v4375_v17 }
 0x2a1   :  { %v4220_v51 = vadd.f32 1.0, %v4219_v60  ;;  %4963 = vmatpush.bf16.msra.mxu1 %v8309_v0  ;;  %v4209_v44 = vadd.f32 1.1283791, %v4208_v8  ;;  %v4240_v33 = vmul.f32 2.1237322e-06, %v4239_v52  ;;  %v8302_v60 = vld [vmem:[#allocation12 + $0x140] sm:$0xff] }
 0x2a2   :  { %v4251_v35 = vmul.f32 3.8918573e-05, %v4239_v52 }
 0x2a3   :  { %4945 = vmatmul.bf16.vlgmr.msrb.gmra.mxu3 %v4377_v50  ;;  %4952 = vmatpush.bf16.msra.mxu0 %v8299_v42  ;;  %8400 = vrcp.f32 %v4220_v51  ;;  %v4232_v21 = vand.u32 2147483648, %v4220_v51  ;;  %v4230_v11 = vand.u32 2147483647, %v4220_v51  ;;  %vm4226_vm2 = vweird.f32 %v4220_v51 }
 0x2a4   :  { %v4210_v29 = vmul.f32 %v4209_v44, %v9332_v62  ;;  %v4241_v25 = vadd.f32 0.00028619796, %v4240_v33  ;;  %v4252_v9 = vadd.f32 0.001143296, %v4251_v35  ;;  %v4019_v42 = vmul.f32 0.5, %v9328_v38 }
 0x2a5   :  { %4964 = vmatpush.bf16.msra.mxu1 %v8308_v22  ;;  %v4233_v19 = vor.u32 1.1754944e-38, %v4232_v21  ;;  %vm4231_vm4 = vcmp.eq.f32.partialorder %v4230_v11, 8.507059e+37  ;;  %v9364_v22 = vld [vmem:[#allocation11] sm:$0xff] }
 0x2a6   :  { %v4242_v40 = vmul.f32 %v4241_v25, %v4239_v52  ;;  %v4253_v17 = vmul.f32 %v4252_v9, %v4239_v52  ;;  %v8315_v9 = vld [vmem:[#allocation12 + $0x1a8] sm:$0xff] }
 0x2a7   :  { %4953 = vmatpush.bf16.msra.mxu0 %v8298_v63 }
 0x2a8   :  { %v4254_v62 = vadd.f32 0.014752088, %v4253_v17  ;;  %v4243_v53 = vadd.f32 0.0036580483, %v4242_v40  ;;  %v3868_v63 = vpop.f32.mrf.mxu0 }
 0x2a9   :  { %v8401_v23 = vpop.eup %8400  ;;  %4965 = vmatpush.bf16.msra.mxu1 %v8307_v16 }
 0x2aa   :  { %v4222_v20 = vmul.f32 %v8401_v23, %v4220_v51  ;;  %vm4227_vm1 = vweird.f32 %v8401_v23  ;;  %v4255_v1 = vmul.f32 %v4254_v62, %v4239_v52  ;;  %v4244_v56 = vmul.f32 %v4243_v53, %v4239_v52 }
 0x2ab   :  { %4954 = vmatpush.bf16.msra.mxu0 %v8297_v49  ;;  %vm4228_vm3 = vmor %vm4226_vm2, %vm4227_vm1 }
 0x2ac   :  { %v4223_v45 = vsub.f32 1.0, %v4222_v20  ;;  %v4256_v57 = vadd.f32 0.112945676, %v4255_v1  ;;  %v3894_v51 = vpop.f32.mrf.mxu2  ;;  %v4245_v38 = vadd.f32 0.05243302, %v4244_v56  ;;  %v8313_v1 = vld [vmem:[#allocation12 + $0x198] sm:$0xff] }
 0x2ad   :  { %4966 = vmatpush.bf16.msra.mxu1 %v8306_v3  ;;  %v8317_v3 = vld [vmem:[#allocation12 + $0x1b8] sm:$0xff] }
 0x2ae   :  { %v4224_v6 = vmul.f32 %v8401_v23, %v4223_v45  ;;  %v4257_v61 = vmul.f32 %v4256_v57, %v4239_v52  ;;  %v3881_v49 = vpop.f32.mrf.mxu1  ;;  %v4246_v46 = vmul.f32 %v4245_v38, %v4239_v52  ;;  %4976 = vmatpush.bf16.msra.mxu2 %v8317_v3  ;;  %v8311_v38 = vld [vmem:[#allocation12 + $0x188] sm:$0xff] }
 0x2af   :  { %4955 = vmatpush.bf16.msra.mxu0 %v8296_v34 }
 0x2b0   :  { %v4225_v54 = vadd.f32 %v8401_v23, %v4224_v6  ;;  %v4258_v13 = vadd.f32 0.4994258, %v4257_v61  ;;  %v3870_v0 = vpop.f32.mrf.mxu0  ;;  %v4247_v31 = vadd.f32 0.18741608, %v4246_v46  ;;  %v1462_v46 = vperm.slane %v9364_v22, 7 }
 0x2b1   :  { %4967 = vmatpush.bf16.msra.mxu1 %v8305_v32  ;;  %v4020_v32 = vmul.f32 0.5, %v9354_v41  ;;  %v8314_v41 = vld [vmem:[#allocation12 + $0x1a0] sm:$0xff] }
 0x2b2   :  { %v4229_v10 = vsel %vm4228_vm3, %v8401_v23, %v4225_v54  ;;  %v4259_v43 = vmul.f32 %v4258_v13, %v4239_v52  ;;  %v4248_v23 = vmul.f32 %v4247_v31, %v4239_v52  ;;  %4977 = vmatpush.bf16.msra.mxu2 %v8316_v7 }
 0x2b3   :  { %4956 = vmatpush.bf16.msra.mxu0 %v8295_v2  ;;  %v4234_v14 = vsel %vm4231_vm4, %v4233_v19, %v4229_v10  ;;  %v1461_v2 = vperm.slane %v9364_v22, 6  ;;  %v8324_v22 = vld [vmem:[#allocation12 + $0x1f0] sm:$0xff] }
 0x2b4   :  { %v4235_v47 = vmul.f32 %v4234_v14, %v4210_v29  ;;  %v4260_v48 = vadd.f32 1.0, %v4259_v43  ;;  %v3896_v39 = vpop.f32.mrf.mxu2  ;;  %v4249_v18 = vadd.f32 1.1283791, %v4248_v23 }
 0x2b5   :  { %4968 = vmatpush.bf16.msra.mxu1 %v8304_v24  ;;  %v3869_v16 = vadd.f32 %v3868_v63, %v1461_v2 }
 0x2b6   :  { %v7421_v36 = vclamps-f32 %v4235_v47, 1.0  ;;  %8402 = vrcp.f32 %v4260_v48  ;;  %v3907_v4 = vpop.f32.mrf.mxu3  ;;  %v3883_v34 = vpop.f32.mrf.mxu1  ;;  %v4272_v12 = vand.u32 2147483648, %v4260_v48  ;;  %v4270_v45 = vand.u32 2147483647, %v4260_v48  ;;  %4978 = vmatpush.bf16.msra.mxu2 %v8315_v9 }
 0x2b7   :  { %4957 = vmatpush.bf16.msra.mxu0 %v8294_v15  ;;  %vm4266_vm6 = vweird.f32 %v4260_v48  ;;  %v3882_v21 = vadd.f32 %v3881_v49, %v3869_v16  ;;  %v4250_v6 = vmul.f32 %v4249_v18, %v9358_v26 }
 0x2b8   :  { %v4362_v50 = vadd.f32 1.0, %v7421_v36  ;;  %v4273_v44 = vor.u32 1.1754944e-38, %v4272_v12  ;;  %vm4271_vm8 = vcmp.eq.f32.partialorder %v4270_v45, 8.507059e+37 }
 0x2b9   :  { %4969 = vmatpush.bf16.msra.mxu1 %v8303_v27  ;;  %v3895_v19 = vadd.f32 %v3894_v51, %v3882_v21 }
 0x2ba   :  { %v4370_v55 = vmul.f32 %v4362_v50, %v4019_v42  ;;  %4979 = vmatpush.bf16.msra.mxu2 %v8314_v41 }
 0x2bb   :  { %v3908_v10 = vadd.f32 %v3907_v4, %v3895_v19  ;;  %v8310_v4 = vld [vmem:[#allocation12 + $0x180] sm:$0xff] }
 0x2bc   :  { %v4378_v58 = vpack.c.bf16 %v4370_v55, %v4370_v55  ;;  %v8403_v30 = vpop.eup %8402 }
 0x2bd   :  { %4970 = vmatpush.bf16.msra.mxu1 %v8302_v60  ;;  %v4262_v5 = vmul.f32 %v8403_v30, %v4260_v48  ;;  %vm4267_vm5 = vweird.f32 %v8403_v30  ;;  %v8312_v60 = vld [vmem:[#allocation12 + $0x190] sm:$0xff] }
 0x2be   :  { %4958 = vmatmul.bf16.vlgmr.msra.gmra.mxu0 %v4378_v58  ;;  %v3909_v8 = vpop.f32.mrf.mxu3  ;;  %vm4268_vm7 = vmor %vm4266_vm6, %vm4267_vm5  ;;  %4980 = vmatpush.bf16.msra.mxu2 %v8313_v1 }
 0x2bf   :  { %v4263_v20 = vsub.f32 1.0, %v4262_v5 }
 0x2c1   :  { %v4264_v59 = vmul.f32 %v8403_v30, %v4263_v20  ;;  %v8325_v20 = vld [vmem:[#allocation12 + $0x1f8] sm:$0xff] }
 0x2c2   :  { %4981 = vmatpush.bf16.msra.mxu2 %v8312_v60  ;;  %4989 = vmatpush.bf16.msra.mxu3 %v8325_v20 }
 0x2c3   :  { %v4265_v15 = vadd.f32 %v8403_v30, %v4264_v59 }
 0x2c5   :  { %v4269_v11 = vsel %vm4268_vm7, %v8403_v30, %v4265_v15 }
 0x2c6   :  { %v4274_v28 = vsel %vm4271_vm8, %v4273_v44, %v4269_v11  ;;  %4982 = vmatpush.bf16.msra.mxu2 %v8311_v38  ;;  %4990 = vmatpush.bf16.msra.mxu3 %v8324_v22 }
 0x2c7   :  { %v4275_v54 = vmul.f32 %v4274_v28, %v4250_v6  ;;  %v8323_v28 = vld [vmem:[#allocation12 + $0x1e8] sm:$0xff] }
 0x2c8   :  { %v3920_v52 = vpop.f32.mrf.mxu0 }
 0x2c9   :  { %v7422_v29 = vclamps-f32 %v4275_v54, 1.0  ;;  %v3921_v33 = vadd.f32 %v3920_v52, %v3908_v10 }
 0x2ca   :  { %4983 = vmatpush.bf16.msra.mxu2 %v8310_v4  ;;  %4991 = vmatpush.bf16.msra.mxu3 %v8323_v28 }
 0x2cb   :  { %v4363_v14 = vadd.f32 1.0, %v7422_v29 }
 0x2cc   :  { %v3946_v47 = vpop.f32.mrf.mxu2 }
 0x2cd   :  { %v4371_v25 = vmul.f32 %v4363_v14, %v4020_v32  ;;  %v3947_v2 = vadd.f32 %v3946_v47, %v1462_v46 }
 0x2ce   :  { %v3933_v35 = vpop.f32.mrf.mxu1 }
 0x2cf   :  { %v9369_v26 = vadd.f32 %v3933_v35, %v3921_v33  ;;  %v4379_v36 = vpack.c.bf16 %v4371_v25, %v4371_v25  ;;  %v8322_v35 = vld [vmem:[#allocation12 + $0x1e0] sm:$0xff] }
 0x2d0   :  { %v3922_v40 = vpop.f32.mrf.mxu0  ;;  %4992 = vmatpush.bf16.msra.mxu3 %v8322_v35 }
 0x2d1   :  { %v9373_v24 = vmul.f32 %v9090_v37, %v9369_v26  ;;  %4971 = vmatmul.bf16.vlgmr.msra.gmra.mxu1 %v4379_v36  ;;  %v4021_v60 = vmul.f32 0.5, %v9369_v26 }
 0x2d3   :  { %v4278_v17 = vmul.f32 %v9373_v24, %v9373_v24 }
 0x2d4   :  { %v3948_v55 = vpop.f32.mrf.mxu2 }
 0x2d5   :  { %v4279_v42 = vmin.f32 %v4278_v17, 16.0 }
 0x2d6   :  { %v3959_v50 = vpop.f32.mrf.mxu3  ;;  %v3935_v62 = vpop.f32.mrf.mxu1 }
 0x2d7   :  { %v4280_v53 = vmul.f32 2.1237322e-06, %v4279_v42  ;;  %v4291_v27 = vmul.f32 3.8918573e-05, %v4279_v42  ;;  %v3960_v5 = vadd.f32 %v3959_v50, %v3947_v2 }
 0x2d9   :  { %v4281_v63 = vadd.f32 0.00028619796, %v4280_v53  ;;  %v4292_v58 = vadd.f32 0.001143296, %v4291_v27 }
 0x2db   :  { %v4282_v57 = vmul.f32 %v4281_v63, %v4279_v42  ;;  %v4293_v56 = vmul.f32 %v4292_v58, %v4279_v42  ;;  %v8320_v58 = vld [vmem:[#allocation12 + $0x1d0] sm:$0xff] }
 0x2dd   :  { %v4294_v61 = vadd.f32 0.014752088, %v4293_v56  ;;  %v4283_v51 = vadd.f32 0.0036580483, %v4282_v57 }
 0x2de   :  { %v3961_v49 = vpop.f32.mrf.mxu3 }
 0x2df   :  { %v4295_v13 = vmul.f32 %v4294_v61, %v4279_v42  ;;  %v4284_v0 = vmul.f32 %v4283_v51, %v4279_v42 }
 0x2e1   :  { %v4296_v43 = vadd.f32 0.112945676, %v4295_v13  ;;  %v4285_v39 = vadd.f32 0.05243302, %v4284_v0  ;;  %v8319_v13 = vld [vmem:[#allocation12 + $0x1c8] sm:$0xff] }
 0x2e3   :  { %v4297_v48 = vmul.f32 %v4296_v43, %v4279_v42  ;;  %v4286_v8 = vmul.f32 %v4285_v39, %v4279_v42  ;;  %v8374_v43 = vld [vmem:[#allocation14] ss:$0 sm:$0xff] }
 0x2e5   :  { %v4298_v34 = vadd.f32 0.4994258, %v4297_v48  ;;  %v4287_v45 = vadd.f32 0.18741608, %v4286_v8 }
 0x2e7   :  { %v4299_v30 = vmul.f32 %v4298_v34, %v4279_v42  ;;  %v4288_v6 = vmul.f32 %v4287_v45, %v4279_v42  ;;  %v8321_v42 = vld [vmem:[#allocation12 + $0x1d8] sm:$0xff]  ;;  %v8318_v34 = vld [vmem:[#allocation12 + $0x1c0] sm:$0xff] }
 0x2e8   :  { %4993 = vmatpush.bf16.msra.mxu3 %v8321_v42 }
 0x2e9   :  { %v4300_v23 = vadd.f32 1.0, %v4299_v30  ;;  %v4289_v32 = vadd.f32 1.1283791, %v4288_v6 }
 0x2eb   :  { %8404 = vrcp.f32 %v4300_v23  ;;  %v4312_v10 = vand.u32 2147483648, %v4300_v23  ;;  %v4310_v33 = vand.u32 2147483647, %v4300_v23  ;;  %vm4306_vm10 = vweird.f32 %v4300_v23 }
 0x2ec   :  { %v4290_v40 = vmul.f32 %v4289_v32, %v9373_v24  ;;  %4994 = vmatpush.bf16.msra.mxu3 %v8320_v58  ;;  %v8332_v58 = vld [vmem:[#allocation15 + $0x30] sm:$0xff] }
 0x2ed   :  { %v4313_v9 = vor.u32 1.1754944e-38, %v4312_v10  ;;  %vm4311_vm12 = vcmp.eq.f32.partialorder %v4310_v33, 8.507059e+37 }
 0x2f0   :  { %4995 = vmatpush.bf16.msra.mxu3 %v8319_v13 }
 0x2f1   :  { %v8405_v21 = vpop.eup %8404 }
 0x2f2   :  { %v4302_v11 = vmul.f32 %v8405_v21, %v4300_v23  ;;  %vm4307_vm9 = vweird.f32 %v8405_v21 }
 0x2f3   :  { %vm4308_vm11 = vmor %vm4306_vm10, %vm4307_vm9 }
 0x2f4   :  { %v4303_v29 = vsub.f32 1.0, %v4302_v11  ;;  %4996 = vmatpush.bf16.msra.mxu3 %v8318_v34 }
 0x2f6   :  { %v4304_v14 = vmul.f32 %v8405_v21, %v4303_v29 }
 0x2f7   :  { %v3972_v31 = vpop.f32.mrf.mxu0 }
 0x2f8   :  { %v3973_v12 = vadd.f32 %v3972_v31, %v3960_v5  ;;  %v4305_v25 = vadd.f32 %v8405_v21, %v4304_v14 }
 0x2fa   :  { %v4309_v17 = vsel %vm4308_vm11, %v8405_v21, %v4305_v25 }
 0x2fb   :  { %v3998_v18 = vpop.f32.mrf.mxu2  ;;  %v4314_v50 = vsel %vm4311_vm12, %v4313_v9, %v4309_v17 }
 0x2fc   :  { %v4315_v53 = vmul.f32 %v4314_v50, %v4290_v40 }
 0x2fd   :  { %v3985_v16 = vpop.f32.mrf.mxu1 }
 0x2fe   :  { %v3986_v59 = vadd.f32 %v3985_v16, %v3973_v12  ;;  %v7423_v63 = vclamps-f32 %v4315_v53, 1.0 }
 0x2ff   :  { %v3974_v15 = vpop.f32.mrf.mxu0 }
 0x300   :  { %v3999_v44 = vadd.f32 %v3998_v18, %v3986_v59  ;;  %v4364_v61 = vadd.f32 1.0, %v7423_v63 }
 0x302   :  { %v4372_v49 = vmul.f32 %v4364_v61, %v4021_v60  ;;  %v8331_v60 = vld [vmem:[#allocation15 + $0x28] sm:$0xff] }
 0x303   :  { %v4000_v52 = vpop.f32.mrf.mxu2 }
 0x304   :  { %v4380_v48 = vpack.c.bf16 %v4372_v49, %v4372_v49 }
 0x305   :  { %v3987_v19 = vpop.f32.mrf.mxu1 }
 0x306   :  { %v4011_v3 = vpop.f32.mrf.mxu3  ;;  %4984 = vmatmul.bf16.vlgmr.msra.gmra.mxu2 %v4380_v48 }
 0x307   :  { %v9378_v54 = vadd.f32 %v4011_v3, %v3999_v44 }
 0x309   :  { %v9382_v7 = vmul.f32 %v9090_v37, %v9378_v54 }
 0x30b   :  { %v4318_v47 = vmul.f32 %v9382_v7, %v9382_v7 }
 0x30d   :  { %v4319_v36 = vmin.f32 %v4318_v47, 16.0 }
 0x30e   :  { %v4013_v41 = vpop.f32.mrf.mxu3 }
 0x30f   :  { %v4320_v62 = vmul.f32 2.1237322e-06, %v4319_v36  ;;  %v4331_v55 = vmul.f32 3.8918573e-05, %v4319_v36 }
 0x311   :  { %v4321_v27 = vadd.f32 0.00028619796, %v4320_v62  ;;  %v4332_v1 = vadd.f32 0.001143296, %v4331_v55 }
 0x313   :  { %v4322_v57 = vmul.f32 %v4321_v27, %v4319_v36  ;;  %v4333_v56 = vmul.f32 %v4332_v1, %v4319_v36 }
 0x315   :  { %v4334_v24 = vadd.f32 0.014752088, %v4333_v56  ;;  %v4323_v51 = vadd.f32 0.0036580483, %v4322_v57 }
 0x317   :  { %v4335_v38 = vmul.f32 %v4334_v24, %v4319_v36  ;;  %v4907_v0 = vpop.f32.mrf.mxu0  ;;  %v4324_v4 = vmul.f32 %v4323_v51, %v4319_v36  ;;  %v8330_v24 = vld [vmem:[#allocation15 + $0x20] sm:$0xff] }
 0x318   :  { %v4908_v31 = vadd.f32 %v8374_v43, %v4907_v0 }
 0x319   :  { %v4336_v46 = vadd.f32 0.112945676, %v4335_v38  ;;  %v4325_v5 = vadd.f32 0.05243302, %v4324_v4  ;;  %v8329_v38 = vld [vmem:[#allocation15 + $0x18] sm:$0xff]  ;;  %v8328_v4 = vld [vmem:[#allocation15 + $0x10] sm:$0xff] }
 0x31b   :  { %v4337_v39 = vmul.f32 %v4336_v46, %v4319_v36  ;;  %v4933_v30 = vpop.f32.mrf.mxu2  ;;  %v4326_v18 = vmul.f32 %v4325_v5, %v4319_v36 }
 0x31d   :  { %v4920_v2 = vpop.f32.mrf.mxu1  ;;  %v4338_v26 = vadd.f32 0.4994258, %v4337_v39  ;;  %v4327_v21 = vadd.f32 0.18741608, %v4326_v18 }
 0x31e   :  { %v4921_v23 = vadd.f32 %v4920_v2, %v4908_v31  ;;  %v8327_v2 = vld [vmem:[#allocation15 + $0x8] sm:$0xff] }
 0x31f   :  { %v4339_v8 = vmul.f32 %v4338_v26, %v4319_v36  ;;  %v4909_v12 = vpop.f32.mrf.mxu0  ;;  %v4328_v6 = vmul.f32 %v4327_v21, %v4319_v36  ;;  %v4022_v36 = vmul.f32 0.5, %v9378_v54 }
 0x320   :  { %v4934_v20 = vadd.f32 %v4933_v30, %v4921_v23 }
 0x321   :  { %v4340_v16 = vadd.f32 1.0, %v4339_v8  ;;  %v4329_v52 = vadd.f32 1.1283791, %v4328_v6  ;;  %v8326_v8 = vld [vmem:[#allocation15] sm:$0xff] }
 0x323   :  { %8406 = vrcp.f32 %v4340_v16  ;;  %v4935_v45 = vpop.f32.mrf.mxu2  ;;  %v4352_v19 = vand.u32 2147483648, %v4340_v16  ;;  %v4350_v10 = vand.u32 2147483647, %v4340_v16  ;;  %vm4346_vm14 = vweird.f32 %v4340_v16 }
 0x324   :  { %v4330_v33 = vmul.f32 %v4329_v52, %v9382_v7  ;;  %v8333_v7 = vld [vmem:[#allocation15 + $0x38] sm:$0xff] }
 0x325   :  { %v4922_v22 = vpop.f32.mrf.mxu1  ;;  %v4353_v14 = vor.u32 1.1754944e-38, %v4352_v19  ;;  %vm4351_vm0 = vcmp.eq.f32.partialorder %v4350_v10, 8.507059e+37  ;;  %5115 = vmatpush.bf16.msrb.mxu0 %v8333_v7  ;;  %v8337_v7 = vld [vmem:[#allocation18 + $0x18] sm:$0xff] }
 0x326   :  { %v4946_v59 = vpop.f32.mrf.mxu3 }
 0x327   :  { %v4947_v15 = vadd.f32 %v4946_v59, %v4934_v20 }
 0x329   :  { %v8407_v44 = vpop.eup %8406  ;;  %5116 = vmatpush.bf16.msrb.mxu0 %v8332_v58 }
 0x32a   :  { %v4342_v11 = vmul.f32 %v8407_v44, %v4340_v16  ;;  %vm4347_vm13 = vweird.f32 %v8407_v44 }
 0x32b   :  { %vm4348_vm15 = vmor %vm4346_vm14, %vm4347_vm13 }
 0x32c   :  { %v4343_v28 = vsub.f32 1.0, %v4342_v11 }
 0x32d   :  { %5117 = vmatpush.bf16.msrb.mxu0 %v8331_v60 }
 0x32e   :  { %v4948_v3 = vpop.f32.mrf.mxu3  ;;  %v4344_v29 = vmul.f32 %v8407_v44, %v4343_v28 }
 0x330   :  { %v4345_v32 = vadd.f32 %v8407_v44, %v4344_v29 }
 0x331   :  { %5118 = vmatpush.bf16.msrb.mxu0 %v8330_v24 }
 0x332   :  { %v4349_v35 = vsel %vm4348_vm15, %v8407_v44, %v4345_v32 }
 0x333   :  { %v4354_v47 = vsel %vm4351_vm0, %v4353_v14, %v4349_v35 }
 0x334   :  { %v4355_v25 = vmul.f32 %v4354_v47, %v4330_v33 }
 0x335   :  { %5119 = vmatpush.bf16.msrb.mxu0 %v8329_v38 }
 0x336   :  { %v7424_v9 = vclamps-f32 %v4355_v25, 1.0 }
 0x338   :  { %v4365_v40 = vadd.f32 1.0, %v7424_v9 }
 0x339   :  { %5120 = vmatpush.bf16.msrb.mxu0 %v8328_v4 }
 0x33a   :  { %v4373_v17 = vmul.f32 %v4365_v40, %v4022_v36  ;;  %v8341_v40 = vld [vmem:[#allocation18 + $0x38] sm:$0xff] }
 0x33b   :  { %v4959_v42 = vpop.f32.mrf.mxu0  ;;  %5241 = vmatpush.bf16.msrb.mxu1 %v8341_v40  ;;  %v8345_v40 = vld [vmem:[#allocation21 + $0x18] sm:$0xff] }
 0x33c   :  { %v4381_v41 = vpack.c.bf16 %v4373_v17, %v4373_v17  ;;  %v4960_v50 = vadd.f32 %v4959_v42, %v4947_v15  ;;  %v8340_v17 = vld [vmem:[#allocation18 + $0x30] sm:$0xff] }
 0x33d   :  { %5121 = vmatpush.bf16.msrb.mxu0 %v8327_v2 }
 0x33e   :  { %4997 = vmatmul.bf16.vlgmr.msra.gmra.mxu3 %v4381_v41  ;;  %v8375_v41 = vld [vmem:[#allocation17] ss:$0 sm:$0xff] }
 0x33f   :  { %5242 = vmatpush.bf16.msrb.mxu1 %v8340_v17 }
 0x341   :  { %5122 = vmatpush.bf16.msrb.mxu0 %v8326_v8 }
 0x343   :  { %v4961_v62 = vpop.f32.mrf.mxu0 }
 0x34e   :  { %v4972_v55 = vpop.f32.mrf.mxu1 }
 0x34f   :  { %v4973_v53 = vadd.f32 %v4972_v55, %v4960_v50  ;;  %v8339_v50 = vld [vmem:[#allocation18 + $0x28] sm:$0xff] }
 0x350   :  { %5243 = vmatpush.bf16.msrb.mxu1 %v8339_v50 }
 0x356   :  { %v4974_v27 = vpop.f32.mrf.mxu1 }
 0x389   :  { %v4985_v1 = vpop.f32.mrf.mxu2 }
 0x38a   :  { %v4986_v57 = vadd.f32 %v4985_v1, %v4973_v53  ;;  %v8338_v53 = vld [vmem:[#allocation18 + $0x20] sm:$0xff] }
 0x38b   :  { %5244 = vmatpush.bf16.msrb.mxu1 %v8338_v53 }
 0x38f   :  { %5245 = vmatpush.bf16.msrb.mxu1 %v8337_v7 }
 0x391   :  { %v4987_v63 = vpop.f32.mrf.mxu2 }
 0x3c1   :  { %v4998_v56 = vpop.f32.mrf.mxu3 }
 0x3c2   :  { %v4999_v54 = vadd.f32 %v4998_v56, %v4986_v57 }
 0x3c4   :  { %v5003_v61 = vmul.f32 %v4999_v54, %v9090_v37  ;;  %v5002_v47 = vmul.f32 0.5, %v4999_v54  ;;  %v8336_v54 = vld [vmem:[#allocation18 + $0x10] sm:$0xff] }
 0x3c5   :  { %5246 = vmatpush.bf16.msrb.mxu1 %v8336_v54 }
 0x3c6   :  { %v5004_v49 = vmul.f32 %v5003_v61, %v5003_v61 }
 0x3c8   :  { %v5005_v51 = vmin.f32 %v5004_v49, 16.0 }
 0x3c9   :  { %v5000_v13 = vpop.f32.mrf.mxu3 }
 0x3ca   :  { %v5006_v43 = vmul.f32 2.1237322e-06, %v5005_v51  ;;  %v5017_v0 = vmul.f32 3.8918573e-05, %v5005_v51  ;;  %v8335_v13 = vld [vmem:[#allocation18 + $0x8] sm:$0xff] }
 0x3cb   :  { %5247 = vmatpush.bf16.msrb.mxu1 %v8335_v13 }
 0x3cc   :  { %v5007_v48 = vadd.f32 0.00028619796, %v5006_v43  ;;  %v5018_v46 = vadd.f32 0.001143296, %v5017_v0 }
 0x3ce   :  { %v5008_v34 = vmul.f32 %v5007_v48, %v5005_v51  ;;  %v5019_v39 = vmul.f32 %v5018_v46, %v5005_v51  ;;  %v8334_v48 = vld [vmem:[#allocation18] sm:$0xff] }
 0x3cf   :  { %5248 = vmatpush.bf16.msrb.mxu1 %v8334_v48 }
 0x3d0   :  { %v5020_v31 = vadd.f32 0.014752088, %v5019_v39  ;;  %v5009_v30 = vadd.f32 0.0036580483, %v5008_v34 }
 0x3d2   :  { %v5021_v26 = vmul.f32 %v5020_v31, %v5005_v51  ;;  %v5010_v5 = vmul.f32 %v5009_v30, %v5005_v51 }
 0x3d4   :  { %v5022_v23 = vadd.f32 0.112945676, %v5021_v26  ;;  %v5011_v16 = vadd.f32 0.05243302, %v5010_v5 }
 0x3d6   :  { %v5023_v20 = vmul.f32 %v5022_v23, %v5005_v51  ;;  %v5012_v45 = vmul.f32 %v5011_v16, %v5005_v51 }
 0x3d8   :  { %v5024_v12 = vadd.f32 0.4994258, %v5023_v20  ;;  %v5013_v15 = vadd.f32 0.18741608, %v5012_v45 }
 0x3da   :  { %v5025_v18 = vmul.f32 %v5024_v12, %v5005_v51  ;;  %v5014_v21 = vmul.f32 %v5013_v15, %v5005_v51 }
 0x3dc   :  { %v5026_v59 = vadd.f32 1.0, %v5025_v18  ;;  %v5015_v3 = vadd.f32 1.1283791, %v5014_v21 }
 0x3de   :  { %8408 = vrcp.f32 %v5026_v59  ;;  %v5038_v11 = vand.u32 2147483648, %v5026_v59  ;;  %v5036_v19 = vand.u32 2147483647, %v5026_v59  ;;  %vm5032_vm2 = vweird.f32 %v5026_v59 }
 0x3df   :  { %v5016_v10 = vmul.f32 %v5015_v3, %v5003_v61 }
 0x3e0   :  { %v5039_v29 = vor.u32 1.1754944e-38, %v5038_v11  ;;  %vm5037_vm4 = vcmp.eq.f32.partialorder %v5036_v19, 8.507059e+37 }
 0x3e4   :  { %v8409_v22 = vpop.eup %8408 }
 0x3e5   :  { %v5028_v44 = vmul.f32 %v8409_v22, %v5026_v59  ;;  %vm5033_vm1 = vweird.f32 %v8409_v22 }
 0x3e6   :  { %vm5034_vm3 = vmor %vm5032_vm2, %vm5033_vm1 }
 0x3e7   :  { %v5029_v6 = vsub.f32 1.0, %v5028_v44 }
 0x3e9   :  { %v5030_v28 = vmul.f32 %v8409_v22, %v5029_v6 }
 0x3eb   :  { %v5031_v52 = vadd.f32 %v8409_v22, %v5030_v28 }
 0x3ed   :  { %v5035_v32 = vsel %vm5034_vm3, %v8409_v22, %v5031_v52  ;;  %v8349_v52 = vld [vmem:[#allocation21 + $0x38] sm:$0xff] }
 0x3ee   :  { %v5040_v14 = vsel %vm5037_vm4, %v5039_v29, %v5035_v32  ;;  %5367 = vmatpush.bf16.msrb.mxu2 %v8349_v52  ;;  %v8348_v29 = vld [vmem:[#allocation21 + $0x30] sm:$0xff]  ;;  %vm5471_vm4 = vcmask 57344  }
 0x3ef   :  { %v5041_v33 = vmul.f32 %v5040_v14, %v5016_v10  ;;  %v8376_v10 = vld [vmem:[#allocation20] ss:$0 sm:$0xff]  ;;  %v8347_v14 = vld [vmem:[#allocation21 + $0x28] sm:$0xff] }
 0x3f1   :  { %v7681_v35 = vclamps-f32 %v5041_v33, 1.0 }
 0x3f2   :  { %5368 = vmatpush.bf16.msrb.mxu2 %v8348_v29 }
 0x3f3   :  { %v5044_v25 = vadd.f32 1.0, %v7681_v35 }
 0x3f5   :  { %v5045_v9 = vmul.f32 %v5044_v25, %v5002_v47  ;;  %v8346_v47 = vld [vmem:[#allocation21 + $0x20] sm:$0xff] }
 0x3f6   :  { %5369 = vmatpush.bf16.msrb.mxu2 %v8347_v14 }
 0x3f7   :  { %v5046_v36 = vpack.c.bf16 %v5045_v9, %v5045_v9 }
 0x3f9   :  { %5123 = vmatmul.bf16.vlgmr.msrb.gmra.mxu0 %v5046_v36 }
 0x3fa   :  { %5370 = vmatpush.bf16.msrb.mxu2 %v8346_v47 }
 0x3fe   :  { %5371 = vmatpush.bf16.msrb.mxu2 %v8345_v40  ;;  %v5425_v40 = vld [vmem:[#allocation2] sm:$0x1] }
 0x476   :  { %v5124_v42 = vpop.f32.mrf.mxu0 }
 0x477   :  { %v5125_v62 = vadd.f32 %v8375_v41, %v5124_v42 }
 0x479   :  { %v5129_v55 = vmul.f32 %v5125_v62, %v9090_v37  ;;  %v5128_v11 = vmul.f32 0.5, %v5125_v62  ;;  %v8344_v62 = vld [vmem:[#allocation21 + $0x10] sm:$0xff] }
 0x47a   :  { %5372 = vmatpush.bf16.msrb.mxu2 %v8344_v62 }
 0x47b   :  { %v5130_v27 = vmul.f32 %v5129_v55, %v5129_v55 }
 0x47d   :  { %v5131_v1 = vmin.f32 %v5130_v27, 16.0 }
 0x47e   :  { %v5126_v63 = vpop.f32.mrf.mxu0 }
 0x47f   :  { %v5132_v58 = vmul.f32 2.1237322e-06, %v5131_v1  ;;  %v5143_v57 = vmul.f32 3.8918573e-05, %v5131_v1  ;;  %v8343_v63 = vld [vmem:[#allocation21 + $0x8] sm:$0xff] }
 0x480   :  { %5373 = vmatpush.bf16.msrb.mxu2 %v8343_v63 }
 0x481   :  { %v5133_v56 = vadd.f32 0.00028619796, %v5132_v58  ;;  %v5144_v60 = vadd.f32 0.001143296, %v5143_v57 }
 0x483   :  { %v5134_v61 = vmul.f32 %v5133_v56, %v5131_v1  ;;  %v5145_v24 = vmul.f32 %v5144_v60, %v5131_v1  ;;  %v8342_v56 = vld [vmem:[#allocation21] sm:$0xff] }
 0x484   :  { %5374 = vmatpush.bf16.msrb.mxu2 %v8342_v56 }
 0x485   :  { %v5146_v49 = vadd.f32 0.014752088, %v5145_v24  ;;  %v5135_v51 = vadd.f32 0.0036580483, %v5134_v61 }
 0x487   :  { %v5147_v38 = vmul.f32 %v5146_v49, %v5131_v1  ;;  %v5136_v0 = vmul.f32 %v5135_v51, %v5131_v1 }
 0x489   :  { %v5148_v43 = vadd.f32 0.112945676, %v5147_v38  ;;  %v5137_v34 = vadd.f32 0.05243302, %v5136_v0 }
 0x48b   :  { %v5149_v46 = vmul.f32 %v5148_v43, %v5131_v1  ;;  %v5138_v30 = vmul.f32 %v5137_v34, %v5131_v1 }
 0x48d   :  { %v5150_v4 = vadd.f32 0.4994258, %v5149_v46  ;;  %v5139_v2 = vadd.f32 0.18741608, %v5138_v30 }
 0x48f   :  { %v5151_v39 = vmul.f32 %v5150_v4, %v5131_v1  ;;  %v5140_v23 = vmul.f32 %v5139_v2, %v5131_v1 }
 0x491   :  { %v5152_v31 = vadd.f32 1.0, %v5151_v39  ;;  %v5141_v12 = vadd.f32 1.1283791, %v5140_v23 }
 0x493   :  { %8410 = vrcp.f32 %v5152_v31  ;;  %v5164_v20 = vand.u32 2147483648, %v5152_v31  ;;  %v5162_v18 = vand.u32 2147483647, %v5152_v31  ;;  %vm5158_vm6 = vweird.f32 %v5152_v31 }
 0x494   :  { %v5142_v15 = vmul.f32 %v5141_v12, %v5129_v55 }
 0x495   :  { %v5165_v45 = vor.u32 1.1754944e-38, %v5164_v20  ;;  %vm5163_vm8 = vcmp.eq.f32.partialorder %v5162_v18, 8.507059e+37 }
 0x499   :  { %v8411_v26 = vpop.eup %8410 }
 0x49a   :  { %v5154_v5 = vmul.f32 %v8411_v26, %v5152_v31  ;;  %vm5159_vm5 = vweird.f32 %v8411_v26 }
 0x49b   :  { %vm5160_vm7 = vmor %vm5158_vm6, %vm5159_vm5 }
 0x49c   :  { %v5155_v8 = vsub.f32 1.0, %v5154_v5 }
 0x49e   :  { %v5156_v16 = vmul.f32 %v8411_v26, %v5155_v8 }
 0x4a0   :  { %v5157_v59 = vadd.f32 %v8411_v26, %v5156_v16 }
 0x4a2   :  { %v5161_v22 = vsel %vm5160_vm7, %v8411_v26, %v5157_v59  ;;  %v8377_v59 = vld [vmem:[#allocation23] ss:$0 sm:$0xff] }
 0x4a3   :  { %v5166_v21 = vsel %vm5163_vm8, %v5165_v45, %v5161_v22 }
 0x4a4   :  { %v5167_v44 = vmul.f32 %v5166_v21, %v5142_v15 }
 0x4a6   :  { %v7714_v6 = vclamps-f32 %v5167_v44, 1.0 }
 0x4a8   :  { %v5170_v3 = vadd.f32 1.0, %v7714_v6 }
 0x4aa   :  { %v5171_v28 = vmul.f32 %v5170_v3, %v5128_v11 }
 0x4ac   :  { %v5172_v19 = vpack.c.bf16 %v5171_v28, %v5171_v28 }
 0x4ae   :  { %5249 = vmatmul.bf16.vlgmr.msrb.gmra.mxu1 %v5172_v19 }
 0x52b   :  { %v5250_v32 = vpop.f32.mrf.mxu1 }
 0x52c   :  { %v5251_v33 = vadd.f32 %v8376_v10, %v5250_v32 }
 0x52e   :  { %v5255_v35 = vmul.f32 %v5251_v33, %v9090_v37  ;;  %v5254_v20 = vmul.f32 0.5, %v5251_v33 }
 0x530   :  { %v5256_v25 = vmul.f32 %v5255_v35, %v5255_v35 }
 0x532   :  { %v5257_v9 = vmin.f32 %v5256_v25, 16.0 }
 0x533   :  { %v5252_v36 = vpop.f32.mrf.mxu1 }
 0x534   :  { %v5258_v17 = vmul.f32 2.1237322e-06, %v5257_v9  ;;  %v5269_v41 = vmul.f32 3.8918573e-05, %v5257_v9 }
 0x536   :  { %v5259_v42 = vadd.f32 0.00028619796, %v5258_v17  ;;  %v5270_v50 = vadd.f32 0.001143296, %v5269_v41 }
 0x538   :  { %v5260_v55 = vmul.f32 %v5259_v42, %v5257_v9  ;;  %v5271_v53 = vmul.f32 %v5270_v50, %v5257_v9 }
 0x53a   :  { %v5272_v27 = vadd.f32 0.014752088, %v5271_v53  ;;  %v5261_v1 = vadd.f32 0.0036580483, %v5260_v55 }
 0x53c   :  { %v5273_v7 = vmul.f32 %v5272_v27, %v5257_v9  ;;  %v5262_v57 = vmul.f32 %v5261_v1, %v5257_v9 }
 0x53e   :  { %v5274_v58 = vadd.f32 0.112945676, %v5273_v7  ;;  %v5263_v61 = vadd.f32 0.05243302, %v5262_v57 }
 0x540   :  { %v5275_v60 = vmul.f32 %v5274_v58, %v5257_v9  ;;  %v5264_v51 = vmul.f32 %v5263_v61, %v5257_v9 }
 0x542   :  { %v5276_v54 = vadd.f32 0.4994258, %v5275_v60  ;;  %v5265_v13 = vadd.f32 0.18741608, %v5264_v51 }
 0x544   :  { %v5277_v24 = vmul.f32 %v5276_v54, %v5257_v9  ;;  %v5266_v43 = vmul.f32 %v5265_v13, %v5257_v9 }
 0x546   :  { %v5278_v49 = vadd.f32 1.0, %v5277_v24  ;;  %v5267_v4 = vadd.f32 1.1283791, %v5266_v43 }
 0x548   :  { %8412 = vrcp.f32 %v5278_v49  ;;  %v5290_v46 = vand.u32 2147483648, %v5278_v49  ;;  %v5288_v39 = vand.u32 2147483647, %v5278_v49  ;;  %vm5284_vm10 = vweird.f32 %v5278_v49 }
 0x549   :  { %v5268_v2 = vmul.f32 %v5267_v4, %v5255_v35 }
 0x54a   :  { %v5291_v30 = vor.u32 1.1754944e-38, %v5290_v46  ;;  %vm5289_vm12 = vcmp.eq.f32.partialorder %v5288_v39, 8.507059e+37 }
 0x54e   :  { %v8413_v38 = vpop.eup %8412 }
 0x54f   :  { %v5280_v0 = vmul.f32 %v8413_v38, %v5278_v49  ;;  %vm5285_vm9 = vweird.f32 %v8413_v38 }
 0x550   :  { %vm5286_vm11 = vmor %vm5284_vm10, %vm5285_vm9 }
 0x551   :  { %v5281_v48 = vsub.f32 1.0, %v5280_v0 }
 0x553   :  { %v5282_v34 = vmul.f32 %v8413_v38, %v5281_v48 }
 0x555   :  { %v5283_v31 = vadd.f32 %v8413_v38, %v5282_v34 }
 0x557   :  { %v5287_v26 = vsel %vm5286_vm11, %v8413_v38, %v5283_v31  ;;  %v5424_v38 = vld [vmem:[#allocation24] sm:$0x1] }
 0x558   :  { %v5292_v23 = vsel %vm5289_vm12, %v5291_v30, %v5287_v26 }
 0x559   :  { %v5293_v5 = vmul.f32 %v5292_v23, %v5268_v2 }
 0x55b   :  { %v7747_v8 = vclamps-f32 %v5293_v5, 1.0 }
 0x55d   :  { %v5296_v12 = vadd.f32 1.0, %v7747_v8 }
 0x55f   :  { %v5297_v16 = vmul.f32 %v5296_v12, %v5254_v20 }
 0x561   :  { %v5298_v18 = vpack.c.bf16 %v5297_v16, %v5297_v16 }
 0x563   :  { %5375 = vmatmul.bf16.vlgmr.msrb.gmra.mxu2 %v5298_v18 }
 0x5e6   :  { %v5376_v45 = vpop.f32.mrf.mxu2 }
 0x5e7   :  { %v5377_v15 = vadd.f32 %v8377_v59, %v5376_v45 }
 0x5e9   :  { %v5381_v22 = vmul.f32 %v5377_v15, %v9090_v37  ;;  %v8821_v37 = vmov 0   ;;  %v5380_v49 = vmul.f32 0.5, %v5377_v15 }
 0x5ea   :  { %8373 = vset.pattern.permute.xlu0 %v8821_v37 }
 0x5eb   :  { %v5382_v21 = vmul.f32 %v5381_v22, %v5381_v22  ;;  %5428 = vperm.xlu0 %8373, %v5425_v40  }
 0x5ed   :  { %v5383_v44 = vmin.f32 %v5382_v21, 16.0 }
 0x5ee   :  { %v5378_v6 = vpop.f32.mrf.mxu2 }
 0x5ef   :  { %v5384_v11 = vmul.f32 2.1237322e-06, %v5383_v44  ;;  %v5395_v3 = vmul.f32 3.8918573e-05, %v5383_v44 }
 0x5f1   :  { %v5385_v28 = vadd.f32 0.00028619796, %v5384_v11  ;;  %v5396_v19 = vadd.f32 0.001143296, %v5395_v3 }
 0x5f3   :  { %v5386_v52 = vmul.f32 %v5385_v28, %v5383_v44  ;;  %v5397_v29 = vmul.f32 %v5396_v19, %v5383_v44 }
 0x5f5   :  { %v5398_v10 = vadd.f32 0.014752088, %v5397_v29  ;;  %v5387_v32 = vadd.f32 0.0036580483, %v5386_v52 }
 0x5f7   :  { %v5399_v14 = vmul.f32 %v5398_v10, %v5383_v44  ;;  %v5388_v35 = vmul.f32 %v5387_v32, %v5383_v44 }
 0x5f9   :  { %v5400_v33 = vadd.f32 0.112945676, %v5399_v14  ;;  %v5389_v9 = vadd.f32 0.05243302, %v5388_v35 }
 0x5fb   :  { %v5401_v47 = vmul.f32 %v5400_v33, %v5383_v44  ;;  %v5390_v41 = vmul.f32 %v5389_v9, %v5383_v44 }
 0x5fd   :  { %v5402_v25 = vadd.f32 0.4994258, %v5401_v47  ;;  %v5391_v42 = vadd.f32 0.18741608, %v5390_v41 }
 0x5ff   :  { %v5403_v36 = vmul.f32 %v5402_v25, %v5383_v44  ;;  %v5392_v62 = vmul.f32 %v5391_v42, %v5383_v44 }
 0x601   :  { %v5404_v17 = vadd.f32 1.0, %v5403_v36  ;;  %v5393_v1 = vadd.f32 1.1283791, %v5392_v62 }
 0x603   :  { %8414 = vrcp.f32 %v5404_v17  ;;  %v5416_v27 = vand.u32 2147483648, %v5404_v17  ;;  %v5414_v7 = vand.u32 2147483647, %v5404_v17  ;;  %vm5410_vm14 = vweird.f32 %v5404_v17 }
 0x604   :  { %v5394_v56 = vmul.f32 %v5393_v1, %v5381_v22 }
 0x605   :  { %v5417_v57 = vor.u32 1.1754944e-38, %v5416_v27  ;;  %vm5415_vm0 = vcmp.eq.f32.partialorder %v5414_v7, 8.507059e+37 }
 0x609   :  { %v8415_v50 = vpop.eup %8414 }
 0x60a   :  { %v5406_v55 = vmul.f32 %v8415_v50, %v5404_v17  ;;  %vm5411_vm13 = vweird.f32 %v8415_v50 }
 0x60b   :  { %vm5412_vm15 = vmor %vm5410_vm14, %vm5411_vm13 }
 0x60c   :  { %v5407_v53 = vsub.f32 1.0, %v5406_v55 }
 0x60e   :  { %v5408_v63 = vmul.f32 %v8415_v50, %v5407_v53 }
 0x610   :  { %v5409_v58 = vadd.f32 %v8415_v50, %v5408_v63 }
 0x612   :  { %v5413_v60 = vsel %vm5412_vm15, %v8415_v50, %v5409_v58 }
 0x613   :  { %v5418_v54 = vsel %vm5415_vm0, %v5417_v57, %v5413_v60 }
 0x614   :  { %v5419_v61 = vmul.f32 %v5418_v54, %v5394_v56 }
 0x616   :  { %v7780_v24 = vclamps-f32 %v5419_v61, 1.0 }
 0x618   :  { %v5422_v51 = vadd.f32 1.0, %v7780_v24 }
 0x61a   :  { %v5423_v13 = vmul.f32 %v5422_v51, %v5380_v49 }
 0x61c   :  { %5447 = vmatpush.xpose.msrb.mxu3 %v5423_v13 }
 0x61f   :  { %5448 = vmatmul.f32.vlgmr.msrb.gmra.mxu3 %v5424_v38 }
 0x65d   :  { %v5429_v43 = vpop.permute.xlu0 %5428 }
 0x65e   :  { %v5431_v0 = vperm.slane %v5429_v43, 0 }
 0x6a2   :  { %v5449_v48 = vpop.f32.mrf.mxu3 }
 0x6a3   :  { %v5450_v46 = vadd.f32 %v5449_v48, %v5431_v0 }
 0x6a5   :  { %v7781_v4 = vmul.f32 -1.442695, %v5450_v46 }
 0x6a7   :  { %8416 = vpow2.f32 %v7781_v4 }
 0x6ad   :  { %v8417_v34 = vpop.eup %8416 }
 0x6ae   :  { %v5455_v39 = vadd.f32 1.0, %v8417_v34 }
 0x6b0   :  { %8418 = vrcp.f32 %v5455_v39  ;;  %v5467_v26 = vand.u32 2147483648, %v5455_v39  ;;  %v5465_v5 = vand.u32 2147483647, %v5455_v39  ;;  %vm5461_vm2 = vweird.f32 %v5455_v39 }
 0x6b2   :  { %v5468_v20 = vor.u32 1.1754944e-38, %v5467_v26  ;;  %vm5466_vm5 = vcmp.eq.f32.partialorder %v5465_v5, 8.507059e+37 }
 0x6b6   :  { %v8419_v31 = vpop.eup %8418 }
 0x6b7   :  { %v5457_v30 = vmul.f32 %v8419_v31, %v5455_v39  ;;  %vm5462_vm1 = vweird.f32 %v8419_v31 }
 0x6b8   :  { %vm5463_vm3 = vmor %vm5461_vm2, %vm5462_vm1 }
 0x6b9   :  { %v5458_v2 = vsub.f32 1.0, %v5457_v30 }
 0x6bb   :  { %v5459_v23 = vmul.f32 %v8419_v31, %v5458_v2 }
 0x6bd   :  { %v5460_v8 = vadd.f32 %v8419_v31, %v5459_v23 }
 0x6bf   :  { %v5464_v12 = vsel %vm5463_vm3, %v8419_v31, %v5460_v8 }
 0x6c0   :  { %v5469_v16 = vsel %vm5466_vm5, %v5468_v20, %v5464_v12 }
 0x6c1   :  { %5472 = vst.msk [vmem:[#allocation26] sm:$0x1] %vm5471_vm4, %v5469_v16 }
 0x6c2   :  { %5483 = dma.vmem_to_hbm [thread:$0]  %s5479_s13, 16, %s5481_s22, [#allocation5]  }
 0x6c3   :  { %8798 = dma.done.wait [#allocation5], 16  }
 0x6c4   :  { %8799 = vsyncadd [#allocation5], 4294967280 }
 0x6c5   :  { %5488 = vsyncpa [#allocation4], 1 }
 0x6c6   :  { %5489 = vsyncpa [#allocation7], 1 }
 0x6c7   :  { %5490 = vsyncpa [#allocation10], 1 }
 0x6c8   :  { %5491 = vsyncpa [#allocation13], 1 }
 0x6c9   :  { %5492 = vsyncpa [#allocation16], 1 }
 0x6ca   :  { %5493 = vsyncpa [#allocation19], 1 }
 0x6cb   :  { %5494 = vsyncpa [#allocation22], 1 }
 0x6cc   :  { %5495 = vsyncpa [#allocation25], 1 }
 0x6cd   :  { %5496 = vsyncpa [#allocation5], 1 }

// kernel: tpu_custom_call.1
= control target key start
LH: loop header
LB: loop body
LE: loop exit
PB: predicated region body
PF: predicated region fallthrough
CT: control target
= control target key end

     0   :  { %s9397_s0 = inlined_call_operand.hbm [shape: bf16[8,256], index: 0, kind: input, shape index: {}]   ;;  %s9398_s1 = inlined_call_operand.hbm [shape: bf16[256,768], index: 1, kind: input, shape index: {}]   ;;  %s9399_s2 = inlined_call_operand.hbm [shape: f32[1,768], index: 2, kind: input, shape index: {}]   ;;  %s9400_s3 = inlined_call_operand.hbm [shape: bf16[768,1024], index: 3, kind: input, shape index: {}]   ;;  %s9401_s4 = inlined_call_operand.hbm [shape: f32[1,1024], index: 4, kind: input, shape index: {}]   ;;  %s9402_s5 = inlined_call_operand.hbm [shape: bf16[1024,128], index: 5, kind: input, shape index: {}]   ;;  %s9403_s6 = inlined_call_operand.hbm [shape: f32[1,128], index: 6, kind: input, shape index: {}]   ;;  %s9404_s7 = inlined_call_operand.hbm [shape: bf16[128,128], index: 7, kind: input, shape index: {}]   ;;  %s9405_s8 = inlined_call_operand.hbm [shape: f32[1,128], index: 8, kind: input, shape index: {}]   ;;  %s9406_s9 = inlined_call_operand.hbm [shape: bf16[128,128], index: 9, kind: input, shape index: {}]   ;;  %s9407_s10 = inlined_call_operand.hbm [shape: f32[1,128], index: 10, kind: input, shape index: {}]   ;;  %s9408_s11 = inlined_call_operand.hbm [shape: bf16[128,128], index: 11, kind: input, shape index: {}]   ;;  %s9409_s12 = inlined_call_operand.hbm [shape: f32[1,128], index: 12, kind: input, shape index: {}]   ;;  %s9410_s13 = inlined_call_operand.hbm [shape: f32[1,128], index: 13, kind: input, shape index: {}]   ;;  %s9411_s14 = inlined_call_operand.<no memory space> [shape: f32[1,1], index: 14, kind: input, shape index: {}]   ;;  %s9412_s15 = inlined_call_operand.hbm [shape: f32[1,1,8], index: 15, kind: output, shape index: {}]  }
   0x1   :  { %v20_v0 = vstv %s9411_s14 }
   0x2   :  { %21 = vst [vmem:[#allocation2] sm:$0x1] %v20_v0 }
   0x3   :  { %22 = vsyncpa [#allocation4], 0 }
   0x4   :  { %23 = vsyncpa [#allocation7], 0 }
   0x5   :  { %24 = vsyncpa [#allocation10], 0 }
   0x6   :  { %25 = vsyncpa [#allocation13], 0 }
   0x7   :  { %26 = vsyncpa [#allocation16], 0 }
   0x8   :  { %27 = vsyncpa [#allocation19], 0 }
   0x9   :  { %28 = vsyncpa [#allocation22], 0 }
   0xa   :  { %29 = vsyncpa [#allocation25], 0  ;;  %s46_s22 = sshll.u32 %s9398_s1, 4  ;;  %s47_s22 = int_to_ptr.hbm [resolvable:$true] %s46_s22 }
   0xb   :  { %30 = vsyncpa [#allocation5], 0  ;;  %s8800_s23 = smov [#allocation6]   ;;  %s70_s26 = sshll.u32 %s9400_s3, 4  ;;  %s71_s26 = int_to_ptr.hbm [resolvable:$true] %s70_s26 }
   0xc   :  { %s48_s24 = sshll.u32 %s8800_s23, 4  ;;  %s8801_s27 = smov 384   ;;  %s49_s24 = int_to_ptr.vmem [resolvable:$true] %s48_s24 }
   0xd   :  { %s8802_s28 = smov 24   ;;  %s8803_s29 = smov [#allocation9]  }
   0xe   :  { %54 = dma.hbm_to_vmem [thread:$0]  %s47_s22, 12288, %s49_s24, [#allocation7], %s8801_s27, %s8801_s27, %s8802_s28  }
   0xf   :  { %s72_s30 = sshll.u32 %s8803_s29, 4  ;;  %s8804_s16 = smov 512   ;;  %s73_s30 = int_to_ptr.vmem [resolvable:$true] %s72_s30 }
  0x10   :  { %s8805_s17 = smov 32   ;;  %s94_s19 = sshll.u32 %s9402_s5, 4  ;;  %s95_s19 = int_to_ptr.hbm [resolvable:$true] %s94_s19 }
  0x11   :  { %78 = dma.hbm_to_vmem [thread:$0]  %s71_s26, 49152, %s73_s30, [#allocation10], %s8804_s16, %s8804_s16, %s8805_s17  }
  0x12   :  { %s8806_s20 = smov [#allocation12]   ;;  %s118_s25 = sshll.u32 %s9404_s7, 4  ;;  %s119_s25 = int_to_ptr.hbm [resolvable:$true] %s118_s25 }
  0x13   :  { %s96_s21 = sshll.u32 %s8806_s20, 4  ;;  %s8807_s22 = smov 64   ;;  %s97_s21 = int_to_ptr.vmem [resolvable:$true] %s96_s21 }
  0x14   :  { %s8808_s24 = smov 4   ;;  %s8809_s14 = smov [#allocation15]  }
  0x15   :  { %102 = dma.hbm_to_vmem [thread:$0]  %s95_s19, 8192, %s97_s21, [#allocation13], %s8807_s22, %s8807_s22, %s8808_s24  }
  0x16   :  { %s120_s27 = sshll.u32 %s8809_s14, 4  ;;  %s142_s29 = sshll.u32 %s9406_s9, 4  ;;  %s121_s27 = int_to_ptr.vmem [resolvable:$true] %s120_s27  ;;  %s143_s29 = int_to_ptr.hbm [resolvable:$true] %s142_s29 }
  0x17   :  { %126 = dma.hbm_to_vmem [thread:$0]  %s119_s25, 1024, %s121_s27, [#allocation16], %s8807_s22, %s8807_s22, %s8808_s24  }
  0x18   :  { %s166_s16 = sshll.u32 %s9408_s11, 4  ;;  %s8810_s17 = smov [#allocation18]   ;;  %s167_s16 = int_to_ptr.hbm [resolvable:$true] %s166_s16 }
  0x19   :  { %s144_s1 = sshll.u32 %s8810_s17, 4  ;;  %s8811_s7 = smov [#allocation21]   ;;  %s145_s1 = int_to_ptr.vmem [resolvable:$true] %s144_s1 }
  0x1a   :  { %150 = dma.hbm_to_vmem [thread:$0]  %s143_s29, 1024, %s145_s1, [#allocation19], %s8807_s22, %s8807_s22, %s8808_s24  }
  0x1b   :  { %s168_s18 = sshll.u32 %s8811_s7, 4  ;;  %s36_s21 = sshll.u32 %s9397_s0, 4  ;;  %s169_s18 = int_to_ptr.vmem [resolvable:$true] %s168_s18  ;;  %s37_s21 = int_to_ptr.hbm [resolvable:$true] %s36_s21 }
  0x1c   :  { %174 = dma.hbm_to_vmem [thread:$0]  %s167_s16, 1024, %s169_s18, [#allocation22], %s8807_s22, %s8807_s22, %s8808_s24  }
  0x1d   :  { %s60_s3 = sshll.u32 %s9399_s2, 4  ;;  %s8812_s25 = smov [#allocation3]   ;;  %s61_s3 = int_to_ptr.hbm [resolvable:$true] %s60_s3 }
  0x1e   :  { %s38_s11 = sshll.u32 %s8812_s25, 4  ;;  %s8813_s14 = smov [#allocation8]   ;;  %s39_s11 = int_to_ptr.vmem [resolvable:$true] %s38_s11 }
  0x1f   :  { %41 = dma.hbm_to_vmem [thread:$0]  %s37_s21, 128, %s39_s11, [#allocation4]  }
  0x20   :  { %s62_s27 = sshll.u32 %s8813_s14, 4  ;;  %s84_s29 = sshll.u32 %s9401_s4, 4  ;;  %s63_s27 = int_to_ptr.vmem [resolvable:$true] %s62_s27  ;;  %s85_s29 = int_to_ptr.hbm [resolvable:$true] %s84_s29 }
  0x21   :  { %65 = dma.hbm_to_vmem [thread:$0]  %s61_s3, 96, %s63_s27, [#allocation7]  }
  0x22   :  { %s108_s24 = sshll.u32 %s9403_s6, 4  ;;  %s8814_s5 = smov [#allocation11]   ;;  %s109_s24 = int_to_ptr.hbm [resolvable:$true] %s108_s24 }
  0x23   :  { %s86_s2 = sshll.u32 %s8814_s5, 4  ;;  %s8815_s30 = smov [#allocation14]   ;;  %s87_s2 = int_to_ptr.vmem [resolvable:$true] %s86_s2 }
  0x24   :  { %89 = dma.hbm_to_vmem [thread:$0]  %s85_s29, 128, %s87_s2, [#allocation10]  }
  0x25   :  { %s110_s16 = sshll.u32 %s8815_s30, 4  ;;  %s132_s7 = sshll.u32 %s9405_s8, 4  ;;  %s111_s16 = int_to_ptr.vmem [resolvable:$true] %s110_s16  ;;  %s133_s7 = int_to_ptr.hbm [resolvable:$true] %s132_s7 }
  0x26   :  { %113 = dma.hbm_to_vmem [thread:$0]  %s109_s24, 16, %s111_s16, [#allocation13]  }
  0x27   :  { %s156_s19 = sshll.u32 %s9407_s10, 4  ;;  %s8816_s20 = smov [#allocation17]   ;;  %s157_s19 = int_to_ptr.hbm [resolvable:$true] %s156_s19 }
  0x28   :  { %s134_s6 = sshll.u32 %s8816_s20, 4  ;;  %s8817_s21 = smov [#allocation20]   ;;  %s135_s6 = int_to_ptr.vmem [resolvable:$true] %s134_s6 }
  0x29   :  { %137 = dma.hbm_to_vmem [thread:$0]  %s133_s7, 16, %s135_s6, [#allocation16]  }
  0x2a   :  { %s158_s9 = sshll.u32 %s8817_s21, 4  ;;  %s180_s25 = sshll.u32 %s9409_s12, 4  ;;  %s159_s9 = int_to_ptr.vmem [resolvable:$true] %s158_s9  ;;  %s181_s25 = int_to_ptr.hbm [resolvable:$true] %s180_s25 }
  0x2b   :  { %161 = dma.hbm_to_vmem [thread:$0]  %s157_s19, 16, %s159_s9, [#allocation19]  }
  0x2c   :  { %s191_s14 = sshll.u32 %s9410_s13, 4  ;;  %s8818_s27 = smov [#allocation23]   ;;  %s192_s14 = int_to_ptr.hbm [resolvable:$true] %s191_s14 }
  0x2d   :  { %s182_s10 = sshll.u32 %s8818_s27, 4  ;;  %s8819_s28 = smov [#allocation24]   ;;  %s183_s10 = int_to_ptr.vmem [resolvable:$true] %s182_s10 }
  0x2e   :  { %185 = dma.hbm_to_vmem [thread:$0]  %s181_s25, 16, %s183_s10, [#allocation22]  }
  0x2f   :  { %s193_s26 = sshll.u32 %s8819_s28, 4  ;;  %s194_s26 = int_to_ptr.vmem [resolvable:$true] %s193_s26 }
  0x30   :  { %196 = dma.hbm_to_vmem [thread:$0]  %s192_s14, 16, %s194_s26, [#allocation25]  }
  0x31   :  { %8782 = dma.done.wait [#allocation4], 128  }
  0x32   :  { %8783 = vsyncadd [#allocation4], 4294967168 }
  0x33   :  { %8784 = dma.done.wait [#allocation7], 12384  }
  0x34   :  { %8785 = vsyncadd [#allocation7], 4294954912 }
  0x35   :  { %8786 = dma.done.wait [#allocation10], 49280  }
  0x36   :  { %8787 = vsyncadd [#allocation10], 4294918016 }
  0x37   :  { %8788 = dma.done.wait [#allocation13], 8208  }
  0x38   :  { %8789 = vsyncadd [#allocation13], 4294959088 }
  0x39   :  { %8790 = dma.done.wait [#allocation16], 1040  }
  0x3a   :  { %8791 = vsyncadd [#allocation16], 4294966256 }
  0x3b   :  { %8792 = dma.done.wait [#allocation19], 1040  }
  0x3c   :  { %8793 = vsyncadd [#allocation19], 4294966256 }
  0x3d   :  { %8794 = dma.done.wait [#allocation22], 1040  }
  0x3e   :  { %8795 = vsyncadd [#allocation22], 4294966256 }
  0x3f   :  { %8796 = dma.done.wait [#allocation25], 16  }
  0x40   :  { %8797 = vsyncadd [#allocation25], 4294967280  ;;  %v5667_v1 = vld [vmem:[#allocation6 + $0x150] sm:$0xf]  ;;  %v7827_v2 = vld [vmem:[#allocation6 + $0x164] sm:$0xf0] }
  0x41   :  { %v5859_v3 = vld [vmem:[#allocation6 + $0x2d0] sm:$0xf]  ;;  %v5668_v4 = vor.u32 %v7827_v2, %v5667_v1  ;;  %v7875_v5 = vld [vmem:[#allocation6 + $0x2e4] sm:$0xf0]  ;;  %v7824_v6 = vld [vmem:[#allocation6 + $0x154] sm:$0xf] }
  0x42   :  { %v5669_v7 = vld [vmem:[#allocation6 + $0x168] sm:$0xf0]  ;;  %v5860_v8 = vor.u32 %v7875_v5, %v5859_v3  ;;  %v7872_v10 = vld [vmem:[#allocation6 + $0x2d4] sm:$0xf]  ;;  %v5643_v12 = vld [vmem:[#allocation6 + $0x120] sm:$0xf] }
  0x43   :  { %v5672_v9 = vor.u32 %v7824_v6, %v5669_v7  ;;  %v5861_v11 = vld [vmem:[#allocation6 + $0x2e8] sm:$0xf0]  ;;  %853 = vmatpush.bf16.msra.mxu0 %v5668_v4  ;;  %v7821_v14 = vld [vmem:[#allocation6 + $0x134] sm:$0xf0]  ;;  %v5835_v15 = vld [vmem:[#allocation6 + $0x2a0] sm:$0xf] }
  0x44   :  { %v5864_v13 = vor.u32 %v7872_v10, %v5861_v11  ;;  %v7869_v16 = vld [vmem:[#allocation6 + $0x2b4] sm:$0xf0]  ;;  %866 = vmatpush.bf16.msra.mxu1 %v5860_v8  ;;  %v5644_v17 = vor.u32 %v7821_v14, %v5643_v12  ;;  %v7818_v19 = vld [vmem:[#allocation6 + $0x124] sm:$0xf]  ;;  %v5645_v20 = vld [vmem:[#allocation6 + $0x138] sm:$0xf0] }
  0x45   :  { %879 = vmatpush.bf16.msra.mxu2 %v5672_v9  ;;  %v5836_v18 = vor.u32 %v7869_v16, %v5835_v15  ;;  %v7866_v21 = vld [vmem:[#allocation6 + $0x2a4] sm:$0xf]  ;;  %v5648_v22 = vor.u32 %v7818_v19, %v5645_v20  ;;  %v5837_v23 = vld [vmem:[#allocation6 + $0x2b8] sm:$0xf0]  ;;  %v5619_v24 = vld [vmem:[#allocation6 + $0xf0] sm:$0xf] }
  0x46   :  { %892 = vmatpush.bf16.msra.mxu3 %v5864_v13  ;;  %v7815_v25 = vld [vmem:[#allocation6 + $0x104] sm:$0xf0]  ;;  %v5840_v26 = vor.u32 %v7866_v21, %v5837_v23  ;;  %v5811_v27 = vld [vmem:[#allocation6 + $0x270] sm:$0xf]  ;;  %v7812_v29 = vld [vmem:[#allocation6 + $0xf4] sm:$0xf] }
  0x47   :  { %v7863_v28 = vld [vmem:[#allocation6 + $0x284] sm:$0xf0]  ;;  %854 = vmatpush.bf16.msra.mxu0 %v5644_v17  ;;  %v5620_v30 = vor.u32 %v7815_v25, %v5619_v24  ;;  %v5621_v31 = vld [vmem:[#allocation6 + $0x108] sm:$0xf0]  ;;  %v7860_v32 = vld [vmem:[#allocation6 + $0x274] sm:$0xf] }
  0x48   :  { %v5813_v33 = vld [vmem:[#allocation6 + $0x288] sm:$0xf0]  ;;  %867 = vmatpush.bf16.msra.mxu1 %v5836_v18  ;;  %v5812_v34 = vor.u32 %v7863_v28, %v5811_v27  ;;  %v5624_v35 = vor.u32 %v7812_v29, %v5621_v31  ;;  %v5595_v36 = vld [vmem:[#allocation6 + $0xc0] sm:$0xf]  ;;  %v7809_v37 = vld [vmem:[#allocation6 + $0xd4] sm:$0xf0] }
  0x49   :  { %880 = vmatpush.bf16.msra.mxu2 %v5648_v22  ;;  %v5787_v38 = vld [vmem:[#allocation6 + $0x240] sm:$0xf]  ;;  %v5816_v39 = vor.u32 %v7860_v32, %v5813_v33  ;;  %v7857_v40 = vld [vmem:[#allocation6 + $0x254] sm:$0xf0]  ;;  %v7806_v41 = vld [vmem:[#allocation6 + $0xc4] sm:$0xf]  ;;  %v5596_v45 = vor.u32 %v7809_v37, %v5595_v36 }
  0x4a   :  { %893 = vmatpush.bf16.msra.mxu3 %v5840_v26  ;;  %v5597_v42 = vld [vmem:[#allocation6 + $0xd8] sm:$0xf0]  ;;  %v7854_v43 = vld [vmem:[#allocation6 + $0x244] sm:$0xf]  ;;  %v5788_v46 = vor.u32 %v7857_v40, %v5787_v38  ;;  %v5571_v48 = vld [vmem:[#allocation6 + $0x90] sm:$0xf] }
  0x4b   :  { %v5789_v44 = vld [vmem:[#allocation6 + $0x258] sm:$0xf0]  ;;  %855 = vmatpush.bf16.msra.mxu0 %v5620_v30  ;;  %v5600_v47 = vor.u32 %v7806_v41, %v5597_v42  ;;  %v7803_v49 = vld [vmem:[#allocation6 + $0xa4] sm:$0xf0]  ;;  %v5763_v50 = vld [vmem:[#allocation6 + $0x210] sm:$0xf] }
  0x4c   :  { %868 = vmatpush.bf16.msra.mxu1 %v5812_v34  ;;  %v5792_v51 = vor.u32 %v7854_v43, %v5789_v44  ;;  %v7851_v52 = vld [vmem:[#allocation6 + $0x224] sm:$0xf0]  ;;  %v7800_v53 = vld [vmem:[#allocation6 + $0x94] sm:$0xf]  ;;  %v5573_v54 = vld [vmem:[#allocation6 + $0xa8] sm:$0xf0]  ;;  %v5572_v57 = vor.u32 %v7803_v49, %v5571_v48 }
  0x4d   :  { %881 = vmatpush.bf16.msra.mxu2 %v5624_v35  ;;  %v7848_v55 = vld [vmem:[#allocation6 + $0x214] sm:$0xf]  ;;  %v5765_v56 = vld [vmem:[#allocation6 + $0x228] sm:$0xf0]  ;;  %v5764_v58 = vor.u32 %v7851_v52, %v5763_v50  ;;  %v5576_v59 = vor.u32 %v7800_v53, %v5573_v54  ;;  %v5547_v60 = vld [vmem:[#allocation6 + $0x60] sm:$0xf] }
  0x4e   :  { %894 = vmatpush.bf16.msra.mxu3 %v5816_v39  ;;  %v7797_v61 = vld [vmem:[#allocation6 + $0x74] sm:$0xf0]  ;;  %v5739_v62 = vld [vmem:[#allocation6 + $0x1e0] sm:$0xf]  ;;  %v5768_v63 = vor.u32 %v7848_v55, %v5765_v56  ;;  %v7794_v1 = vld [vmem:[#allocation6 + $0x64] sm:$0xf] }
  0x4f   :  { %856 = vmatpush.bf16.msra.mxu0 %v5596_v45  ;;  %v7845_v0 = vld [vmem:[#allocation6 + $0x1f4] sm:$0xf0]  ;;  %v5549_v2 = vld [vmem:[#allocation6 + $0x78] sm:$0xf0]  ;;  %v7842_v3 = vld [vmem:[#allocation6 + $0x1e4] sm:$0xf]  ;;  %v5548_v5 = vor.u32 %v7797_v61, %v5547_v60 }
  0x50   :  { %869 = vmatpush.bf16.msra.mxu1 %v5788_v46  ;;  %v5741_v4 = vld [vmem:[#allocation6 + $0x1f8] sm:$0xf0]  ;;  %v5740_v6 = vor.u32 %v7845_v0, %v5739_v62  ;;  %v5552_v7 = vor.u32 %v7794_v1, %v5549_v2  ;;  %v5523_v8 = vld [vmem:[#allocation6 + $0x30] sm:$0xf]  ;;  %v7791_v9 = vld [vmem:[#allocation6 + $0x44] sm:$0xf0] }
  0x51   :  { %882 = vmatpush.bf16.msra.mxu2 %v5600_v47  ;;  %v5715_v10 = vld [vmem:[#allocation6 + $0x1b0] sm:$0xf]  ;;  %v5744_v11 = vor.u32 %v7842_v3, %v5741_v4  ;;  %v7839_v12 = vld [vmem:[#allocation6 + $0x1c4] sm:$0xf0]  ;;  %v7788_v13 = vld [vmem:[#allocation6 + $0x34] sm:$0xf]  ;;  %v5524_v17 = vor.u32 %v7791_v9, %v5523_v8 }
  0x52   :  { %895 = vmatpush.bf16.msra.mxu3 %v5792_v51  ;;  %v5525_v14 = vld [vmem:[#allocation6 + $0x48] sm:$0xf0]  ;;  %v7836_v15 = vld [vmem:[#allocation6 + $0x1b4] sm:$0xf]  ;;  %v5499_v18 = vld [vmem:[#allocation6] sm:$0xf]  ;;  %v5716_v21 = vor.u32 %v7839_v12, %v5715_v10 }
  0x53   :  { %857 = vmatpush.bf16.msra.mxu0 %v5572_v57  ;;  %v5717_v16 = vld [vmem:[#allocation6 + $0x1c8] sm:$0xf0]  ;;  %v7785_v19 = vld [vmem:[#allocation6 + $0x14] sm:$0xf0]  ;;  %v5691_v20 = vld [vmem:[#allocation6 + $0x180] sm:$0xf]  ;;  %v5528_v22 = vor.u32 %v7788_v13, %v5525_v14 }
  0x54   :  { %870 = vmatpush.bf16.msra.mxu1 %v5764_v58  ;;  %v7833_v23 = vld [vmem:[#allocation6 + $0x194] sm:$0xf0]  ;;  %v7782_v24 = vld [vmem:[#allocation6 + $0x4] sm:$0xf]  ;;  %v5720_v26 = vor.u32 %v7836_v15, %v5717_v16  ;;  %v5501_v27 = vld [vmem:[#allocation6 + $0x18] sm:$0xf0]  ;;  %v5500_v33 = vor.u32 %v7785_v19, %v5499_v18 }
  0x55   :  { %883 = vmatpush.bf16.msra.mxu2 %v5576_v59  ;;  %v255_v25 = vld [vmem:[#allocation3] sm:$0xff]  ;;  %v7830_v28 = vld [vmem:[#allocation6 + $0x184] sm:$0xf]  ;;  %v7828_v31 = vld [vmem:[#allocation6 + $0x16c] sm:$0xf0]  ;;  %v5692_v38 = vor.u32 %v7833_v23, %v5691_v20  ;;  %v5504_v39 = vor.u32 %v7782_v24, %v5501_v27  ;;  %s8822_s12 = smov [#allocation26]  }
  0x56   :  { %896 = vmatpush.bf16.msra.mxu3 %v5768_v63  ;;  %v5693_v29 = vld [vmem:[#allocation6 + $0x198] sm:$0xf0]  ;;  %v5675_v30 = vld [vmem:[#allocation6 + $0x158] sm:$0xf]  ;;  %v7876_v34 = vld [vmem:[#allocation6 + $0x2ec] sm:$0xf0]  ;;  %v367_v37 = vunpack.c.l.b16 %v255_v25  ;;  %v368_v42 = vunpack.c.h.b16 %v255_v25 }
  0x57   :  { %858 = vmatpush.bf16.msra.mxu0 %v5548_v5  ;;  %v5867_v32 = vld [vmem:[#allocation6 + $0x2d8] sm:$0xf]  ;;  %v7825_v35 = vld [vmem:[#allocation6 + $0x15c] sm:$0xf]  ;;  %v5677_v36 = vld [vmem:[#allocation6 + $0x170] sm:$0xf0]  ;;  %v5696_v43 = vor.u32 %v7830_v28, %v5693_v29  ;;  %v5676_v44 = vor.u32 %v7828_v31, %v5675_v30 }
  0x58   :  { %871 = vmatpush.bf16.msra.mxu1 %v5740_v6  ;;  %v7873_v40 = vld [vmem:[#allocation6 + $0x2dc] sm:$0xf]  ;;  %v5869_v41 = vld [vmem:[#allocation6 + $0x2f0] sm:$0xf0]  ;;  %v5868_v45 = vor.u32 %v7876_v34, %v5867_v32  ;;  %v5680_v46 = vor.u32 %v7825_v35, %v5677_v36  ;;  %v5651_v47 = vld [vmem:[#allocation6 + $0x128] sm:$0xf]  ;;  %v8948_v51 = vpack.c.b16 %v367_v37, %v367_v37  ;;  %v8950_v55 = vpack.c.b16 %v368_v42, %v368_v42 }
  0x59   :  { %884 = vmatpush.bf16.msra.mxu2 %v5552_v7  ;;  %v7822_v48 = vld [vmem:[#allocation6 + $0x13c] sm:$0xf0]  ;;  %v5843_v49 = vld [vmem:[#allocation6 + $0x2a8] sm:$0xf]  ;;  %v5872_v50 = vor.u32 %v7873_v40, %v5869_v41  ;;  %v7819_v53 = vld [vmem:[#allocation6 + $0x12c] sm:$0xf] }
  0x5a   :  { %897 = vmatpush.bf16.msra.mxu3 %v5744_v11  ;;  %v7870_v52 = vld [vmem:[#allocation6 + $0x2bc] sm:$0xf0]  ;;  %v5653_v54 = vld [vmem:[#allocation6 + $0x140] sm:$0xf0]  ;;  %v7867_v56 = vld [vmem:[#allocation6 + $0x2ac] sm:$0xf]  ;;  %v5652_v58 = vor.u32 %v7822_v48, %v5651_v47 }
  0x5b   :  { %859 = vmatpush.bf16.msra.mxu0 %v5524_v17  ;;  %v5845_v57 = vld [vmem:[#allocation6 + $0x2c0] sm:$0xf0]  ;;  %v5844_v59 = vor.u32 %v7870_v52, %v5843_v49  ;;  %v5656_v60 = vor.u32 %v7819_v53, %v5653_v54  ;;  %v5627_v61 = vld [vmem:[#allocation6 + $0xf8] sm:$0xf]  ;;  %v7816_v62 = vld [vmem:[#allocation6 + $0x10c] sm:$0xf0] }
  0x5c   :  { %872 = vmatpush.bf16.msra.mxu1 %v5716_v21  ;;  %v5819_v63 = vld [vmem:[#allocation6 + $0x278] sm:$0xf]  ;;  %v5848_v0 = vor.u32 %v7867_v56, %v5845_v57  ;;  %v7864_v1 = vld [vmem:[#allocation6 + $0x28c] sm:$0xf0]  ;;  %v7813_v2 = vld [vmem:[#allocation6 + $0xfc] sm:$0xf]  ;;  %v5628_v6 = vor.u32 %v7816_v62, %v5627_v61 }
  0x5d   :  { %885 = vmatpush.bf16.msra.mxu2 %v5528_v22  ;;  %v5629_v3 = vld [vmem:[#allocation6 + $0x110] sm:$0xf0]  ;;  %v7861_v4 = vld [vmem:[#allocation6 + $0x27c] sm:$0xf]  ;;  %v5820_v7 = vor.u32 %v7864_v1, %v5819_v63  ;;  %v5603_v9 = vld [vmem:[#allocation6 + $0xc8] sm:$0xf] }
  0x5e   :  { %898 = vmatpush.bf16.msra.mxu3 %v5720_v26  ;;  %v5821_v5 = vld [vmem:[#allocation6 + $0x290] sm:$0xf0]  ;;  %v5632_v8 = vor.u32 %v7813_v2, %v5629_v3  ;;  %v7810_v10 = vld [vmem:[#allocation6 + $0xdc] sm:$0xf0]  ;;  %v5795_v11 = vld [vmem:[#allocation6 + $0x248] sm:$0xf] }
  0x5f   :  { %860 = vmatpush.bf16.msra.mxu0 %v5500_v33  ;;  %v5824_v12 = vor.u32 %v7861_v4, %v5821_v5  ;;  %v7858_v13 = vld [vmem:[#allocation6 + $0x25c] sm:$0xf0]  ;;  %v7807_v14 = vld [vmem:[#allocation6 + $0xcc] sm:$0xf]  ;;  %v5605_v15 = vld [vmem:[#allocation6 + $0xe0] sm:$0xf0]  ;;  %v5604_v18 = vor.u32 %v7810_v10, %v5603_v9 }
  0x60   :  { %873 = vmatpush.bf16.msra.mxu1 %v5692_v38  ;;  %v7855_v16 = vld [vmem:[#allocation6 + $0x24c] sm:$0xf]  ;;  %v5797_v17 = vld [vmem:[#allocation6 + $0x260] sm:$0xf0]  ;;  %v5796_v19 = vor.u32 %v7858_v13, %v5795_v11  ;;  %v5608_v20 = vor.u32 %v7807_v14, %v5605_v15  ;;  %v5579_v21 = vld [vmem:[#allocation6 + $0x98] sm:$0xf] }
  0x61   :  { %886 = vmatpush.bf16.msra.mxu2 %v5504_v39  ;;  %v7804_v22 = vld [vmem:[#allocation6 + $0xac] sm:$0xf0]  ;;  %v5771_v23 = vld [vmem:[#allocation6 + $0x218] sm:$0xf]  ;;  %v5800_v24 = vor.u32 %v7855_v16, %v5797_v17  ;;  %v7801_v26 = vld [vmem:[#allocation6 + $0x9c] sm:$0xf] }
  0x62   :  { %899 = vmatpush.bf16.msra.mxu3 %v5696_v43  ;;  %861 = vmatmul.bf16.vlgmr.msra.gmra.mxu0 %v8948_v51  ;;  %v7852_v25 = vld [vmem:[#allocation6 + $0x22c] sm:$0xf0]  ;;  %v5581_v27 = vld [vmem:[#allocation6 + $0xb0] sm:$0xf0]  ;;  %v7849_v28 = vld [vmem:[#allocation6 + $0x21c] sm:$0xf]  ;;  %v5580_v30 = vor.u32 %v7804_v22, %v5579_v21 }
  0x63   :  { %905 = vmatpush.bf16.msrb.mxu0 %v5676_v44  ;;  %874 = vmatmul.bf16.vlgmr.msra.gmra.mxu1 %v8950_v55  ;;  %v5773_v29 = vld [vmem:[#allocation6 + $0x230] sm:$0xf0]  ;;  %v5772_v31 = vor.u32 %v7852_v25, %v5771_v23  ;;  %v5584_v32 = vor.u32 %v7801_v26, %v5581_v27  ;;  %v5555_v33 = vld [vmem:[#allocation6 + $0x68] sm:$0xf]  ;;  %v7798_v34 = vld [vmem:[#allocation6 + $0x7c] sm:$0xf0] }
  0x64   :  { %918 = vmatpush.bf16.msrb.mxu1 %v5868_v45  ;;  %887 = vmatmul.bf16.vlgmr.msra.gmra.mxu2 %v8948_v51  ;;  %v5747_v35 = vld [vmem:[#allocation6 + $0x1e8] sm:$0xf]  ;;  %v5776_v36 = vor.u32 %v7849_v28, %v5773_v29  ;;  %v7846_v37 = vld [vmem:[#allocation6 + $0x1fc] sm:$0xf0]  ;;  %v7795_v38 = vld [vmem:[#allocation6 + $0x6c] sm:$0xf]  ;;  %v5556_v42 = vor.u32 %v7798_v34, %v5555_v33 }
  0x65   :  { %931 = vmatpush.bf16.msrb.mxu2 %v5680_v46  ;;  %900 = vmatmul.bf16.vlgmr.msra.gmra.mxu3 %v8950_v55  ;;  %v5557_v39 = vld [vmem:[#allocation6 + $0x80] sm:$0xf0]  ;;  %v7843_v40 = vld [vmem:[#allocation6 + $0x1ec] sm:$0xf]  ;;  %v5748_v43 = vor.u32 %v7846_v37, %v5747_v35  ;;  %v5531_v45 = vld [vmem:[#allocation6 + $0x38] sm:$0xf] }
  0x66   :  { %944 = vmatpush.bf16.msrb.mxu3 %v5872_v50  ;;  %v5749_v41 = vld [vmem:[#allocation6 + $0x200] sm:$0xf0]  ;;  %v5560_v44 = vor.u32 %v7795_v38, %v5557_v39  ;;  %v7792_v46 = vld [vmem:[#allocation6 + $0x4c] sm:$0xf0]  ;;  %v5723_v47 = vld [vmem:[#allocation6 + $0x1b8] sm:$0xf] }
  0x67   :  { %906 = vmatpush.bf16.msrb.mxu0 %v5652_v58  ;;  %v5752_v48 = vor.u32 %v7843_v40, %v5749_v41  ;;  %v7840_v49 = vld [vmem:[#allocation6 + $0x1cc] sm:$0xf0]  ;;  %v7789_v50 = vld [vmem:[#allocation6 + $0x3c] sm:$0xf]  ;;  %v5533_v52 = vld [vmem:[#allocation6 + $0x50] sm:$0xf0]  ;;  %v5532_v56 = vor.u32 %v7792_v46, %v5531_v45 }
  0x68   :  { %919 = vmatpush.bf16.msrb.mxu1 %v5844_v59  ;;  %v7837_v53 = vld [vmem:[#allocation6 + $0x1bc] sm:$0xf]  ;;  %v5725_v54 = vld [vmem:[#allocation6 + $0x1d0] sm:$0xf0]  ;;  %v5507_v57 = vld [vmem:[#allocation6 + $0x8] sm:$0xf]  ;;  %v5724_v59 = vor.u32 %v7840_v49, %v5723_v47 }
  0x69   :  { %932 = vmatpush.bf16.msrb.mxu2 %v5656_v60  ;;  %v7786_v58 = vld [vmem:[#allocation6 + $0x1c] sm:$0xf0]  ;;  %v5536_v60 = vor.u32 %v7789_v50, %v5533_v52  ;;  %v5699_v61 = vld [vmem:[#allocation6 + $0x188] sm:$0xf]  ;;  %v7783_v63 = vld [vmem:[#allocation6 + $0xc] sm:$0xf] }
  0x6a   :  { %945 = vmatpush.bf16.msrb.mxu3 %v5848_v0  ;;  %v7834_v62 = vld [vmem:[#allocation6 + $0x19c] sm:$0xf0]  ;;  %v5728_v0 = vor.u32 %v7837_v53, %v5725_v54  ;;  %v5509_v1 = vld [vmem:[#allocation6 + $0x20] sm:$0xf0]  ;;  %v7831_v2 = vld [vmem:[#allocation6 + $0x18c] sm:$0xf] }
  0x6b   :  { %907 = vmatpush.bf16.msrb.mxu0 %v5628_v6  ;;  %v5701_v3 = vld [vmem:[#allocation6 + $0x1a0] sm:$0xf0]  ;;  %v5683_v4 = vld [vmem:[#allocation6 + $0x160] sm:$0xf]  ;;  %v7829_v5 = vld [vmem:[#allocation6 + $0x174] sm:$0xf0]  ;;  %v5700_v11 = vor.u32 %v7834_v62, %v5699_v61 }
  0x6c   :  { %920 = vmatpush.bf16.msrb.mxu1 %v5820_v7  ;;  %v5875_v6 = vld [vmem:[#allocation6 + $0x2e0] sm:$0xf]  ;;  %v5508_v7 = vor.u32 %v7786_v58, %v5507_v57  ;;  %v7826_v9 = vld [vmem:[#allocation6 + $0x164] sm:$0xf]  ;;  %v5685_v10 = vld [vmem:[#allocation6 + $0x178] sm:$0xf0]  ;;  %v5704_v15 = vor.u32 %v7831_v2, %v5701_v3  ;;  %v5684_v16 = vor.u32 %v7829_v5, %v5683_v4 }
  0x6d   :  { %933 = vmatpush.bf16.msrb.mxu2 %v5632_v8  ;;  %v7877_v8 = vld [vmem:[#allocation6 + $0x2f4] sm:$0xf0]  ;;  %v7874_v13 = vld [vmem:[#allocation6 + $0x2e4] sm:$0xf]  ;;  %v5877_v14 = vld [vmem:[#allocation6 + $0x2f8] sm:$0xf0] }
  0x6e   :  { %946 = vmatpush.bf16.msrb.mxu3 %v5824_v12  ;;  %v5512_v12 = vor.u32 %v7783_v63, %v5509_v1  ;;  %v5876_v17 = vor.u32 %v7877_v8, %v5875_v6  ;;  %v5851_v21 = vld [vmem:[#allocation6 + $0x2b0] sm:$0xf]  ;;  %v5880_v22 = vor.u32 %v7874_v13, %v5877_v14  ;;  %v7871_v23 = vld [vmem:[#allocation6 + $0x2c4] sm:$0xf0]  ;;  %v5661_v25 = vld [vmem:[#allocation6 + $0x148] sm:$0xf0] }
  0x6f   :  { %908 = vmatpush.bf16.msrb.mxu0 %v5604_v18  ;;  %v5688_v18 = vor.u32 %v7826_v9, %v5685_v10  ;;  %v7868_v26 = vld [vmem:[#allocation6 + $0x2b4] sm:$0xf]  ;;  %v5853_v27 = vld [vmem:[#allocation6 + $0x2c8] sm:$0xf0]  ;;  %v5635_v29 = vld [vmem:[#allocation6 + $0x100] sm:$0xf] }
  0x70   :  { %921 = vmatpush.bf16.msrb.mxu1 %v5796_v19  ;;  %v5659_v19 = vld [vmem:[#allocation6 + $0x130] sm:$0xf]  ;;  %v7865_v34 = vld [vmem:[#allocation6 + $0x294] sm:$0xf0]  ;;  %v7814_v35 = vld [vmem:[#allocation6 + $0x104] sm:$0xf]  ;;  %v5856_v37 = vor.u32 %v7868_v26, %v5853_v27 }
  0x71   :  { %934 = vmatpush.bf16.msrb.mxu2 %v5608_v20  ;;  %v7823_v20 = vld [vmem:[#allocation6 + $0x144] sm:$0xf0]  ;;  %v7862_v38 = vld [vmem:[#allocation6 + $0x284] sm:$0xf]  ;;  %v5829_v39 = vld [vmem:[#allocation6 + $0x298] sm:$0xf0] }
  0x72   :  { %947 = vmatpush.bf16.msrb.mxu3 %v5800_v24  ;;  %v7820_v24 = vld [vmem:[#allocation6 + $0x134] sm:$0xf]  ;;  %v5660_v28 = vor.u32 %v7823_v20, %v5659_v19  ;;  %v5803_v45 = vld [vmem:[#allocation6 + $0x250] sm:$0xf]  ;;  %v5832_v46 = vor.u32 %v7862_v38, %v5829_v39  ;;  %v7859_v47 = vld [vmem:[#allocation6 + $0x264] sm:$0xf0] }
  0x73   :  { %909 = vmatpush.bf16.msrb.mxu0 %v5580_v30  ;;  %v7817_v30 = vld [vmem:[#allocation6 + $0x114] sm:$0xf0]  ;;  %v5664_v33 = vor.u32 %v7820_v24, %v5661_v25  ;;  %v5613_v49 = vld [vmem:[#allocation6 + $0xe8] sm:$0xf0]  ;;  %v7856_v50 = vld [vmem:[#allocation6 + $0x254] sm:$0xf]  ;;  %v5804_v54 = vor.u32 %v7859_v47, %v5803_v45 }
  0x74   :  { %922 = vmatpush.bf16.msrb.mxu1 %v5772_v31  ;;  %v5827_v31 = vld [vmem:[#allocation6 + $0x280] sm:$0xf]  ;;  %v5636_v40 = vor.u32 %v7817_v30, %v5635_v29  ;;  %v5805_v52 = vld [vmem:[#allocation6 + $0x268] sm:$0xf0]  ;;  %v7805_v58 = vld [vmem:[#allocation6 + $0xb4] sm:$0xf0] }
  0x75   :  { %935 = vmatpush.bf16.msrb.mxu2 %v5584_v32  ;;  %v5852_v32 = vor.u32 %v7871_v23, %v5851_v21  ;;  %v5828_v41 = vor.u32 %v7865_v34, %v5827_v31  ;;  %v5587_v57 = vld [vmem:[#allocation6 + $0xa0] sm:$0xf]  ;;  %v7853_v61 = vld [vmem:[#allocation6 + $0x234] sm:$0xf0]  ;;  %v7802_v62 = vld [vmem:[#allocation6 + $0xa4] sm:$0xf] }
  0x76   :  { %948 = vmatpush.bf16.msrb.mxu3 %v5776_v36  ;;  %v5637_v36 = vld [vmem:[#allocation6 + $0x118] sm:$0xf0]  ;;  %v5588_v2 = vor.u32 %v7805_v58, %v5587_v57  ;;  %v5563_v5 = vld [vmem:[#allocation6 + $0x70] sm:$0xf]  ;;  %v7799_v6 = vld [vmem:[#allocation6 + $0x84] sm:$0xf0] }
  0x77   :  { %910 = vmatpush.bf16.msrb.mxu0 %v5556_v42  ;;  %v5640_v42 = vor.u32 %v7814_v35, %v5637_v36  ;;  %v5589_v63 = vld [vmem:[#allocation6 + $0xb8] sm:$0xf0]  ;;  %v7847_v9 = vld [vmem:[#allocation6 + $0x204] sm:$0xf0]  ;;  %v7796_v10 = vld [vmem:[#allocation6 + $0x74] sm:$0xf]  ;;  %v5564_v14 = vor.u32 %v7799_v6, %v5563_v5 }
  0x78   :  { %923 = vmatpush.bf16.msrb.mxu1 %v5748_v43  ;;  %v5611_v43 = vld [vmem:[#allocation6 + $0xd0] sm:$0xf]  ;;  %v5781_v1 = vld [vmem:[#allocation6 + $0x238] sm:$0xf0]  ;;  %v5592_v4 = vor.u32 %v7802_v62, %v5589_v63  ;;  %v5757_v13 = vld [vmem:[#allocation6 + $0x208] sm:$0xf0] }
  0x79   :  { %936 = vmatpush.bf16.msrb.mxu2 %v5560_v44  ;;  %v7811_v44 = vld [vmem:[#allocation6 + $0xe4] sm:$0xf0]  ;;  %v5731_v19 = vld [vmem:[#allocation6 + $0x1c0] sm:$0xf]  ;;  %v7841_v21 = vld [vmem:[#allocation6 + $0x1d4] sm:$0xf0] }
  0x7a   :  { %949 = vmatpush.bf16.msrb.mxu3 %v5752_v48  ;;  %v7808_v48 = vld [vmem:[#allocation6 + $0xd4] sm:$0xf]  ;;  %v5612_v53 = vor.u32 %v7811_v44, %v5611_v43  ;;  %v5541_v23 = vld [vmem:[#allocation6 + $0x58] sm:$0xf0]  ;;  %v7838_v24 = vld [vmem:[#allocation6 + $0x1c4] sm:$0xf] }
  0x7b   :  { %911 = vmatpush.bf16.msrb.mxu0 %v5532_v56  ;;  %v5616_v56 = vor.u32 %v7808_v48, %v5613_v49  ;;  %v5733_v25 = vld [vmem:[#allocation6 + $0x1d8] sm:$0xf0]  ;;  %v5515_v27 = vld [vmem:[#allocation6 + $0x10] sm:$0xf]  ;;  %v7787_v30 = vld [vmem:[#allocation6 + $0x24] sm:$0xf0] }
  0x7c   :  { %924 = vmatpush.bf16.msrb.mxu1 %v5724_v59  ;;  %v5779_v59 = vld [vmem:[#allocation6 + $0x220] sm:$0xf]  ;;  %v5707_v31 = vld [vmem:[#allocation6 + $0x190] sm:$0xf]  ;;  %v7784_v34 = vld [vmem:[#allocation6 + $0x14] sm:$0xf] }
  0x7d   :  { %937 = vmatpush.bf16.msrb.mxu2 %v5536_v60  ;;  %v5808_v60 = vor.u32 %v7856_v50, %v5805_v52  ;;  %v5780_v3 = vor.u32 %v7853_v61, %v5779_v59  ;;  %v5517_v35 = vld [vmem:[#allocation6 + $0x28] sm:$0xf0]  ;;  %v7832_v36 = vld [vmem:[#allocation6 + $0x194] sm:$0xf]  ;;  %v6107_v38 = vld [vmem:[#allocation9 + $0x1c0] sm:$0xf] }
  0x7e   :  { %950 = vmatpush.bf16.msrb.mxu3 %v5728_v0  ;;  %v7850_v0 = vld [vmem:[#allocation6 + $0x224] sm:$0xf]  ;;  %s5478_s13 = sshll.u32 %s8822_s12, 4  ;;  %s5480_s22 = sshll.u32 %s9412_s15, 4  ;;  %s5479_s13 = int_to_ptr.vmem [resolvable:$true] %s5478_s13  ;;  %s5481_s22 = int_to_ptr.hbm [resolvable:$true] %s5480_s22 }
  0x7f   :  { %912 = vmatpush.bf16.msrb.mxu0 %v5508_v7  ;;  %v5755_v7 = vld [vmem:[#allocation6 + $0x1f0] sm:$0xf]  ;;  %v5784_v8 = vor.u32 %v7850_v0, %v5781_v1  ;;  %v7938_v39 = vld [vmem:[#allocation9 + $0x1dc] sm:$0xf0] }
  0x80   :  { %925 = vmatpush.bf16.msrb.mxu1 %v5700_v11  ;;  %v5565_v11 = vld [vmem:[#allocation6 + $0x88] sm:$0xf0]  ;;  %v6108_v44 = vor.u32 %v7938_v39, %v6107_v38  ;;  %v6619_v45 = vld [vmem:[#allocation9 + $0x5c0] sm:$0xf] }
  0x81   :  { %938 = vmatpush.bf16.msrb.mxu2 %v5512_v12  ;;  %v7844_v12 = vld [vmem:[#allocation6 + $0x1f4] sm:$0xf]  ;;  %v6075_v48 = vld [vmem:[#allocation9 + $0x180] sm:$0xf] }
  0x82   :  { %951 = vmatpush.bf16.msrb.mxu3 %v5704_v15  ;;  %913 = vmatmul.bf16.vlgmr.msrb.gmra.mxu0 %v8948_v51  ;;  %v5756_v15 = vor.u32 %v7847_v9, %v5755_v7  ;;  %v5760_v20 = vor.u32 %v7844_v12, %v5757_v13  ;;  %v7930_v49 = vld [vmem:[#allocation9 + $0x19c] sm:$0xf0] }
  0x83   :  { %957 = vmatpush.bf16.msra.mxu0 %v5684_v16  ;;  %926 = vmatmul.bf16.vlgmr.msrb.gmra.mxu1 %v8950_v55  ;;  %v5568_v16 = vor.u32 %v7796_v10, %v5565_v11  ;;  %v6076_v50 = vor.u32 %v7930_v49, %v6075_v48  ;;  %v6363_v52 = vld [vmem:[#allocation9 + $0x3c0] sm:$0xf] }
  0x84   :  { %970 = vmatpush.bf16.msra.mxu1 %v5876_v17  ;;  %939 = vmatmul.bf16.vlgmr.msrb.gmra.mxu2 %v8948_v51  ;;  %v5539_v17 = vld [vmem:[#allocation6 + $0x40] sm:$0xf]  ;;  %v8058_v57 = vld [vmem:[#allocation9 + $0x59c] sm:$0xf0] }
  0x85   :  { %983 = vmatpush.bf16.msra.mxu2 %v5688_v18  ;;  %952 = vmatmul.bf16.vlgmr.msrb.gmra.mxu3 %v8950_v55  ;;  %v7793_v18 = vld [vmem:[#allocation6 + $0x54] sm:$0xf0]  ;;  %v6043_v59 = vld [vmem:[#allocation9 + $0x140] sm:$0xf] }
  0x86   :  { %996 = vmatpush.bf16.msra.mxu3 %v5880_v22  ;;  %v7790_v22 = vld [vmem:[#allocation6 + $0x44] sm:$0xf]  ;;  %v5540_v26 = vor.u32 %v7793_v18, %v5539_v17 }
  0x87   :  { %958 = vmatpush.bf16.msra.mxu0 %v5660_v28  ;;  %v5732_v28 = vor.u32 %v7841_v21, %v5731_v19  ;;  %v5544_v29 = vor.u32 %v7790_v22, %v5541_v23  ;;  %v6875_v61 = vld [vmem:[#allocation9 + $0x7c0] sm:$0xf] }
  0x88   :  { %971 = vmatpush.bf16.msra.mxu1 %v5852_v32  ;;  %v7835_v32 = vld [vmem:[#allocation6 + $0x1a4] sm:$0xf0] }
  0x89   :  { %984 = vmatpush.bf16.msra.mxu2 %v5664_v33  ;;  %v5736_v33 = vor.u32 %v7838_v24, %v5733_v25  ;;  %v6331_v63 = vld [vmem:[#allocation9 + $0x380] sm:$0xf] }
  0x8a   :  { %997 = vmatpush.bf16.msra.mxu3 %v5856_v37  ;;  %v5709_v37 = vld [vmem:[#allocation6 + $0x1a8] sm:$0xf0]  ;;  %v7994_v0 = vld [vmem:[#allocation9 + $0x39c] sm:$0xf0] }
  0x8b   :  { %959 = vmatpush.bf16.msra.mxu0 %v5636_v40  ;;  %v5516_v40 = vor.u32 %v7787_v30, %v5515_v27  ;;  %v5712_v43 = vor.u32 %v7832_v36, %v5709_v37  ;;  %v6555_v1 = vld [vmem:[#allocation9 + $0x540] sm:$0xf] }
  0x8c   :  { %972 = vmatpush.bf16.msra.mxu1 %v5828_v41  ;;  %v5708_v41 = vor.u32 %v7835_v32, %v5707_v31  ;;  %v6011_v5 = vld [vmem:[#allocation9 + $0x100] sm:$0xf] }
  0x8d   :  { %985 = vmatpush.bf16.msra.mxu2 %v5640_v42  ;;  %v5520_v42 = vor.u32 %v7784_v34, %v5517_v35  ;;  %v7914_v6 = vld [vmem:[#allocation9 + $0x11c] sm:$0xf0] }
  0x8e   :  { %998 = vmatpush.bf16.msra.mxu3 %v5832_v46  ;;  %v8066_v46 = vld [vmem:[#allocation9 + $0x5dc] sm:$0xf0] }
  0x8f   :  { %960 = vmatpush.bf16.msra.mxu0 %v5612_v53  ;;  %v6620_v47 = vor.u32 %v8066_v46, %v6619_v45  ;;  %v8002_v53 = vld [vmem:[#allocation9 + $0x3dc] sm:$0xf0] }
  0x90   :  { %973 = vmatpush.bf16.msra.mxu1 %v5804_v54  ;;  %v6587_v54 = vld [vmem:[#allocation9 + $0x580] sm:$0xf] }
  0x91   :  { %986 = vmatpush.bf16.msra.mxu2 %v5616_v56  ;;  %v6364_v56 = vor.u32 %v8002_v53, %v6363_v52  ;;  %v6588_v58 = vor.u32 %v8058_v57, %v6587_v54  ;;  %v6843_v7 = vld [vmem:[#allocation9 + $0x780] sm:$0xf] }
  0x92   :  { %999 = vmatpush.bf16.msra.mxu3 %v5808_v60  ;;  %v7922_v60 = vld [vmem:[#allocation9 + $0x15c] sm:$0xf0] }
  0x93   :  { %961 = vmatpush.bf16.msra.mxu0 %v5588_v2  ;;  %v6332_v2 = vor.u32 %v7994_v0, %v6331_v63  ;;  %v8122_v9 = vld [vmem:[#allocation9 + $0x79c] sm:$0xf0] }
  0x94   :  { %974 = vmatpush.bf16.msra.mxu1 %v5780_v3  ;;  %v8050_v3 = vld [vmem:[#allocation9 + $0x55c] sm:$0xf0]  ;;  %v6844_v10 = vor.u32 %v8122_v9, %v6843_v7  ;;  %v6109_v7 = vld [vmem:[#allocation9 + $0x1e0] sm:$0xf0] }
  0x95   :  { %987 = vmatpush.bf16.msra.mxu2 %v5592_v4  ;;  %v6556_v4 = vor.u32 %v8050_v3, %v6555_v1  ;;  %v6299_v11 = vld [vmem:[#allocation9 + $0x340] sm:$0xf] }
  0x96   :  { %1000 = vmatpush.bf16.msra.mxu3 %v5784_v8  ;;  %v6012_v8 = vor.u32 %v7914_v6, %v6011_v5  ;;  %v7986_v12 = vld [vmem:[#allocation9 + $0x35c] sm:$0xf0]  ;;  %v7934_v6 = vld [vmem:[#allocation9 + $0x1c4] sm:$0xf] }
  0x97   :  { %962 = vmatpush.bf16.msra.mxu0 %v5564_v14  ;;  %v6523_v13 = vld [vmem:[#allocation9 + $0x500] sm:$0xf]  ;;  %v6300_v14 = vor.u32 %v7986_v12, %v6299_v11  ;;  %v6112_v9 = vor.u32 %v7934_v6, %v6109_v7  ;;  %v6301_v6 = vld [vmem:[#allocation9 + $0x360] sm:$0xf0] }
  0x98   :  { %975 = vmatpush.bf16.msra.mxu1 %v5756_v15  ;;  %v8042_v15 = vld [vmem:[#allocation9 + $0x51c] sm:$0xf0] }
  0x99   :  { %988 = vmatpush.bf16.msra.mxu2 %v5568_v16  ;;  %v6524_v16 = vor.u32 %v8042_v15, %v6523_v13  ;;  %v5979_v17 = vld [vmem:[#allocation9 + $0xc0] sm:$0xf] }
  0x9a   :  { %1001 = vmatpush.bf16.msra.mxu3 %v5760_v20  ;;  %v7906_v18 = vld [vmem:[#allocation9 + $0xdc] sm:$0xf0] }
  0x9b   :  { %963 = vmatpush.bf16.msra.mxu0 %v5540_v26  ;;  %v6811_v19 = vld [vmem:[#allocation9 + $0x740] sm:$0xf]  ;;  %v5980_v20 = vor.u32 %v7906_v18, %v5979_v17 }
  0x9c   :  { %976 = vmatpush.bf16.msra.mxu1 %v5732_v28  ;;  %v8114_v21 = vld [vmem:[#allocation9 + $0x75c] sm:$0xf0] }
  0x9d   :  { %989 = vmatpush.bf16.msra.mxu2 %v5544_v29  ;;  %v6812_v22 = vor.u32 %v8114_v21, %v6811_v19  ;;  %v6267_v23 = vld [vmem:[#allocation9 + $0x300] sm:$0xf]  ;;  %v7926_v21 = vld [vmem:[#allocation9 + $0x184] sm:$0xf] }
  0x9e   :  { %1002 = vmatpush.bf16.msra.mxu3 %v5736_v33  ;;  %v7978_v24 = vld [vmem:[#allocation9 + $0x31c] sm:$0xf0] }
  0x9f   :  { %964 = vmatpush.bf16.msra.mxu0 %v5516_v40  ;;  %v6491_v25 = vld [vmem:[#allocation9 + $0x4c0] sm:$0xf]  ;;  %v6268_v26 = vor.u32 %v7978_v24, %v6267_v23  ;;  %v6077_v24 = vld [vmem:[#allocation9 + $0x1a0] sm:$0xf0] }
  0xa0   :  { %977 = vmatpush.bf16.msra.mxu1 %v5708_v41  ;;  %v8034_v27 = vld [vmem:[#allocation9 + $0x4dc] sm:$0xf0] }
  0xa1   :  { %990 = vmatpush.bf16.msra.mxu2 %v5520_v42  ;;  %v6492_v28 = vor.u32 %v8034_v27, %v6491_v25  ;;  %v5947_v29 = vld [vmem:[#allocation9 + $0x80] sm:$0xf]  ;;  %v6080_v27 = vor.u32 %v7926_v21, %v6077_v24  ;;  %v7974_v21 = vld [vmem:[#allocation9 + $0x304] sm:$0xf] }
  0xa2   :  { %1003 = vmatpush.bf16.msra.mxu3 %v5712_v43  ;;  %965 = vmatmul.bf16.vlgmr.msra.gmra.mxu0 %v8948_v51  ;;  %v7898_v30 = vld [vmem:[#allocation9 + $0x9c] sm:$0xf0] }
  0xa3   :  { %3391 = vmatpush.bf16.msrb.mxu0 %v6108_v44  ;;  %978 = vmatmul.bf16.vlgmr.msra.gmra.mxu1 %v8950_v55  ;;  %v6779_v31 = vld [vmem:[#allocation9 + $0x700] sm:$0xf]  ;;  %v5948_v32 = vor.u32 %v7898_v30, %v5947_v29  ;;  %v8964_v44 = vld [vmem:[#allocation8] sm:$0x3f] }
  0xa4   :  { %991 = vmatmul.bf16.vlgmr.msra.gmra.mxu2 %v8948_v51  ;;  %3404 = vmatpush.bf16.msrb.mxu1 %v6364_v56  ;;  %v6044_v51 = vor.u32 %v7922_v60, %v6043_v59  ;;  %v8106_v33 = vld [vmem:[#allocation9 + $0x71c] sm:$0xf0]  ;;  %v354_v59 = vperm.slane %v8964_v44, 0 }
  0xa5   :  { %1004 = vmatmul.bf16.vlgmr.msra.gmra.mxu3 %v8950_v55  ;;  %3417 = vmatpush.bf16.msrb.mxu2 %v6620_v47  ;;  %v8130_v55 = vld [vmem:[#allocation9 + $0x7dc] sm:$0xf0]  ;;  %v6780_v34 = vor.u32 %v8106_v33, %v6779_v31  ;;  %v7998_v31 = vld [vmem:[#allocation9 + $0x3c4] sm:$0xf] }
  0xa6   :  { %v6876_v62 = vor.u32 %v8130_v55, %v6875_v61  ;;  %v6235_v35 = vld [vmem:[#allocation9 + $0x2c0] sm:$0xf] }
  0xa7   :  { %3392 = vmatpush.bf16.msrb.mxu0 %v6076_v50  ;;  %v7970_v36 = vld [vmem:[#allocation9 + $0x2dc] sm:$0xf0] }
  0xa8   :  { %3430 = vmatpush.bf16.msrb.mxu3 %v6876_v62  ;;  %3405 = vmatpush.bf16.msrb.mxu1 %v6332_v2  ;;  %v6459_v37 = vld [vmem:[#allocation9 + $0x480] sm:$0xf]  ;;  %v6236_v38 = vor.u32 %v7970_v36, %v6235_v35 }
  0xa9   :  { %3418 = vmatpush.bf16.msrb.mxu2 %v6588_v58  ;;  %v8026_v39 = vld [vmem:[#allocation9 + $0x49c] sm:$0xf0] }
  0xaa   :  { %v6460_v40 = vor.u32 %v8026_v39, %v6459_v37  ;;  %v5915_v41 = vld [vmem:[#allocation9 + $0x40] sm:$0xf] }
  0xab   :  { %3393 = vmatpush.bf16.msrb.mxu0 %v6044_v51  ;;  %v7890_v42 = vld [vmem:[#allocation9 + $0x5c] sm:$0xf0] }
  0xac   :  { %3431 = vmatpush.bf16.msrb.mxu3 %v6844_v10  ;;  %3406 = vmatpush.bf16.msrb.mxu1 %v6300_v14  ;;  %v6747_v43 = vld [vmem:[#allocation9 + $0x6c0] sm:$0xf]  ;;  %v5916_v45 = vor.u32 %v7890_v42, %v5915_v41  ;;  %v355_v14 = vperm.slane %v8964_v44, 1  ;;  %v6045_v42 = vld [vmem:[#allocation9 + $0x160] sm:$0xf0] }
  0xad   :  { %3419 = vmatpush.bf16.msrb.mxu2 %v6556_v4  ;;  %v8098_v46 = vld [vmem:[#allocation9 + $0x6dc] sm:$0xf0] }
  0xae   :  { %v6748_v47 = vor.u32 %v8098_v46, %v6747_v43  ;;  %v6203_v48 = vld [vmem:[#allocation9 + $0x280] sm:$0xf] }
  0xaf   :  { %3394 = vmatpush.bf16.msrb.mxu0 %v6012_v8  ;;  %v7962_v49 = vld [vmem:[#allocation9 + $0x29c] sm:$0xf0] }
  0xb0   :  { %3432 = vmatpush.bf16.msrb.mxu3 %v6812_v22  ;;  %3407 = vmatpush.bf16.msrb.mxu1 %v6268_v26  ;;  %v6427_v50 = vld [vmem:[#allocation9 + $0x440] sm:$0xf]  ;;  %v6204_v52 = vor.u32 %v7962_v49, %v6203_v48 }
  0xb1   :  { %3420 = vmatpush.bf16.msrb.mxu2 %v6524_v16  ;;  %v8018_v53 = vld [vmem:[#allocation9 + $0x45c] sm:$0xf0] }
  0xb2   :  { %v6428_v54 = vor.u32 %v8018_v53, %v6427_v50  ;;  %v5883_v56 = vld [vmem:[#allocation9] sm:$0xf]  ;;  %v7990_v50 = vld [vmem:[#allocation9 + $0x384] sm:$0xf] }
  0xb3   :  { %3395 = vmatpush.bf16.msrb.mxu0 %v5980_v20  ;;  %v7882_v57 = vld [vmem:[#allocation9 + $0x1c] sm:$0xf0] }
  0xb4   :  { %3433 = vmatpush.bf16.msrb.mxu3 %v6780_v34  ;;  %3408 = vmatpush.bf16.msrb.mxu1 %v6236_v38  ;;  %v6715_v58 = vld [vmem:[#allocation9 + $0x680] sm:$0xf]  ;;  %v5884_v60 = vor.u32 %v7882_v57, %v5883_v56  ;;  %v6365_v34 = vld [vmem:[#allocation9 + $0x3e0] sm:$0xf0] }
  0xb5   :  { %3421 = vmatpush.bf16.msrb.mxu2 %v6492_v28  ;;  %v8090_v61 = vld [vmem:[#allocation9 + $0x69c] sm:$0xf0]  ;;  %v6368_v35 = vor.u32 %v7998_v31, %v6365_v34  ;;  %v7918_v38 = vld [vmem:[#allocation9 + $0x144] sm:$0xf] }
  0xb6   :  { %v6716_v51 = vor.u32 %v8090_v61, %v6715_v58  ;;  %v6171_v55 = vld [vmem:[#allocation9 + $0x240] sm:$0xf]  ;;  %v6333_v56 = vld [vmem:[#allocation9 + $0x3a0] sm:$0xf0] }
  0xb7   :  { %3396 = vmatpush.bf16.msrb.mxu0 %v5948_v32  ;;  %v7954_v62 = vld [vmem:[#allocation9 + $0x25c] sm:$0xf0]  ;;  %v6336_v58 = vor.u32 %v7990_v50, %v6333_v56  ;;  %v7910_v61 = vld [vmem:[#allocation9 + $0x104] sm:$0xf] }
  0xb8   :  { %3434 = vmatpush.bf16.msrb.mxu3 %v6748_v47  ;;  %3409 = vmatpush.bf16.msrb.mxu1 %v6204_v52  ;;  %v6395_v63 = vld [vmem:[#allocation9 + $0x400] sm:$0xf]  ;;  %v6172_v0 = vor.u32 %v7954_v62, %v6171_v55  ;;  %v6048_v47 = vor.u32 %v7918_v38, %v6045_v42  ;;  %v6013_v62 = vld [vmem:[#allocation9 + $0x120] sm:$0xf0] }
  0xb9   :  { %3422 = vmatpush.bf16.msrb.mxu2 %v6460_v40  ;;  %v8010_v1 = vld [vmem:[#allocation9 + $0x41c] sm:$0xf0]  ;;  %v6237_v38 = vld [vmem:[#allocation9 + $0x2e0] sm:$0xf0] }
  0xba   :  { %v7131_v2 = vld [vmem:[#allocation9 + $0x9c0] sm:$0xf]  ;;  %v6396_v4 = vor.u32 %v8010_v1, %v6395_v63  ;;  %v6205_v56 = vld [vmem:[#allocation9 + $0x2a0] sm:$0xf0] }
  0xbb   :  { %3397 = vmatpush.bf16.msrb.mxu0 %v5916_v45  ;;  %v8194_v3 = vld [vmem:[#allocation9 + $0x9dc] sm:$0xf0] }
  0xbc   :  { %3435 = vmatpush.bf16.msrb.mxu3 %v6716_v51  ;;  %v7132_v5 = vor.u32 %v8194_v3, %v7131_v2  ;;  %3410 = vmatpush.bf16.msrb.mxu1 %v6172_v0  ;;  %v6683_v10 = vld [vmem:[#allocation9 + $0x640] sm:$0xf]  ;;  %v6016_v0 = vor.u32 %v7910_v61, %v6013_v62  ;;  %v7982_v3 = vld [vmem:[#allocation9 + $0x344] sm:$0xf] }
  0xbd   :  { %3423 = vmatpush.bf16.msrb.mxu2 %v6428_v54  ;;  %v8082_v11 = vld [vmem:[#allocation9 + $0x65c] sm:$0xf0]  ;;  %v5885_v62 = vld [vmem:[#allocation9 + $0x20] sm:$0xf0] }
  0xbe   :  { %v6684_v15 = vor.u32 %v8082_v11, %v6683_v10  ;;  %v6139_v16 = vld [vmem:[#allocation9 + $0x200] sm:$0xf]  ;;  %v7902_v11 = vld [vmem:[#allocation9 + $0xc4] sm:$0xf] }
  0xbf   :  { %3398 = vmatpush.bf16.msrb.mxu0 %v5884_v60  ;;  %v7946_v17 = vld [vmem:[#allocation9 + $0x21c] sm:$0xf0] }
  0xc0   :  { %v6140_v18 = vor.u32 %v7946_v17, %v6139_v16  ;;  %v7099_v19 = vld [vmem:[#allocation9 + $0x980] sm:$0xf]  ;;  %3436 = vmatpush.bf16.msrb.mxu3 %v6684_v15 }
  0xc1   :  { %3424 = vmatpush.bf16.msrb.mxu2 %v6396_v4  ;;  %v8186_v20 = vld [vmem:[#allocation9 + $0x99c] sm:$0xf0] }
  0xc2   :  { %v7100_v23 = vor.u32 %v8186_v20, %v7099_v19  ;;  %v6651_v25 = vld [vmem:[#allocation9 + $0x600] sm:$0xf]  ;;  %3411 = vmatpush.bf16.msrb.mxu1 %v6140_v18 }
  0xc3   :  { %3443 = vmatpush.bf16.msra.mxu0 %v7132_v5  ;;  %v8074_v26 = vld [vmem:[#allocation9 + $0x61c] sm:$0xf0] }
  0xc4   :  { %v6652_v28 = vor.u32 %v8074_v26, %v6651_v25  ;;  %v7387_v29 = vld [vmem:[#allocation9 + $0xbc0] sm:$0xf] }
  0xc5   :  { %3469 = vmatpush.bf16.msra.mxu2 %v6112_v9  ;;  %v8258_v30 = vld [vmem:[#allocation9 + $0xbdc] sm:$0xf0] }
  0xc6   :  { %v7388_v33 = vor.u32 %v8258_v30, %v7387_v29  ;;  %v7067_v36 = vld [vmem:[#allocation9 + $0x940] sm:$0xf]  ;;  %3437 = vmatpush.bf16.msrb.mxu3 %v6652_v28  ;;  %v7894_v28 = vld [vmem:[#allocation9 + $0x84] sm:$0xf] }
  0xc7   :  { %3444 = vmatpush.bf16.msra.mxu0 %v7100_v23  ;;  %v8178_v37 = vld [vmem:[#allocation9 + $0x95c] sm:$0xf0]  ;;  %v6269_v23 = vld [vmem:[#allocation9 + $0x320] sm:$0xf0] }
  0xc8   :  { %3456 = vmatpush.bf16.msra.mxu1 %v7388_v33  ;;  %v7068_v41 = vor.u32 %v8178_v37, %v7067_v36  ;;  %v7355_v48 = vld [vmem:[#allocation9 + $0xb80] sm:$0xf]  ;;  %v6272_v25 = vor.u32 %v7974_v21, %v6269_v23  ;;  %v5949_v30 = vld [vmem:[#allocation9 + $0xa0] sm:$0xf0] }
  0xc9   :  { %3470 = vmatpush.bf16.msra.mxu2 %v6080_v27  ;;  %v8250_v49 = vld [vmem:[#allocation9 + $0xb9c] sm:$0xf0]  ;;  %v7966_v37 = vld [vmem:[#allocation9 + $0x2c4] sm:$0xf] }
  0xca   :  { %3482 = vmatpush.bf16.msra.mxu3 %v6368_v35  ;;  %v7356_v54 = vor.u32 %v8250_v49, %v7355_v48  ;;  %v8170_v60 = vld [vmem:[#allocation9 + $0x91c] sm:$0xf0]  ;;  %v7942_v23 = vld [vmem:[#allocation9 + $0x204] sm:$0xf] }
  0xcb   :  { %3445 = vmatpush.bf16.msra.mxu0 %v7068_v41  ;;  %v7323_v1 = vld [vmem:[#allocation9 + $0xb40] sm:$0xf] }
  0xcc   :  { %3457 = vmatpush.bf16.msra.mxu1 %v7356_v54  ;;  %v8242_v2 = vld [vmem:[#allocation9 + $0xb5c] sm:$0xf0]  ;;  %v7958_v54 = vld [vmem:[#allocation9 + $0x284] sm:$0xf] }
  0xcd   :  { %3471 = vmatpush.bf16.msra.mxu2 %v6048_v47  ;;  %v7324_v5 = vor.u32 %v8242_v2, %v7323_v1  ;;  %v7003_v9 = vld [vmem:[#allocation9 + $0x8c0] sm:$0xf] }
  0xce   :  { %3483 = vmatpush.bf16.msra.mxu3 %v6336_v58  ;;  %v8162_v10 = vld [vmem:[#allocation9 + $0x8dc] sm:$0xf0] }
  0xcf   :  { %v7291_v18 = vld [vmem:[#allocation9 + $0xb00] sm:$0xf] }
  0xd0   :  { %3458 = vmatpush.bf16.msra.mxu1 %v7324_v5  ;;  %v8234_v19 = vld [vmem:[#allocation9 + $0xb1c] sm:$0xf0] }
  0xd1   :  { %3472 = vmatpush.bf16.msra.mxu2 %v6016_v0  ;;  %v7292_v20 = vor.u32 %v8234_v19, %v7291_v18  ;;  %v6971_v26 = vld [vmem:[#allocation9 + $0x880] sm:$0xf]  ;;  %v6621_v0 = vld [vmem:[#allocation9 + $0x5e0] sm:$0xf0] }
  0xd2   :  { %v8154_v27 = vld [vmem:[#allocation9 + $0x89c] sm:$0xf0] }
  0xd3   :  { %v6972_v29 = vor.u32 %v8154_v27, %v6971_v26  ;;  %v7259_v33 = vld [vmem:[#allocation9 + $0xac0] sm:$0xf] }
  0xd4   :  { %3459 = vmatpush.bf16.msra.mxu1 %v7292_v20  ;;  %v8226_v34 = vld [vmem:[#allocation9 + $0xadc] sm:$0xf0] }
  0xd5   :  { %v7260_v36 = vor.u32 %v8226_v34, %v7259_v33  ;;  %v6939_v41 = vld [vmem:[#allocation9 + $0x840] sm:$0xf]  ;;  %v6557_v33 = vld [vmem:[#allocation9 + $0x560] sm:$0xf0] }
  0xd6   :  { %v8146_v42 = vld [vmem:[#allocation9 + $0x85c] sm:$0xf0] }
  0xd7   :  { %v7227_v49 = vld [vmem:[#allocation9 + $0xa80] sm:$0xf] }
  0xd8   :  { %3460 = vmatpush.bf16.msra.mxu1 %v7260_v36  ;;  %v8218_v50 = vld [vmem:[#allocation9 + $0xa9c] sm:$0xf0] }
  0xd9   :  { %v8138_v61 = vld [vmem:[#allocation9 + $0x81c] sm:$0xf0] }
  0xda   :  { %v7163_v18 = vld [vmem:[#allocation9 + $0xa00] sm:$0xf] }
  0xdb   :  { %v8202_v21 = vld [vmem:[#allocation9 + $0xa1c] sm:$0xf0] }
  0xdc   :  { %v7164_v26 = vor.u32 %v8202_v21, %v7163_v18  ;;  %v7133_v21 = vld [vmem:[#allocation9 + $0x9e0] sm:$0xf0] }
  0xdf   :  { %v862_v8 = vpop.f32.mrf.mxu0 }
  0xe0   :  { %v863_v12 = vadd.f32 %v862_v8, %v354_v59  ;;  %v875_v13 = vpop.f32.mrf.mxu1  ;;  %v7035_v59 = vld [vmem:[#allocation9 + $0x900] sm:$0xf]  ;;  %v6304_v8 = vor.u32 %v7982_v3, %v6301_v6 }
  0xe1   :  { %v7036_v55 = vor.u32 %v8170_v60, %v7035_v59  ;;  %v6208_v59 = vor.u32 %v7958_v54, %v6205_v56  ;;  %v6907_v60 = vld [vmem:[#allocation9 + $0x800] sm:$0xf] }
  0xe2   :  { %v8968_v22 = vadd.f32 %v875_v13, %v863_v12  ;;  %v7004_v13 = vor.u32 %v8162_v10, %v7003_v9  ;;  %3484 = vmatpush.bf16.msra.mxu3 %v6304_v8  ;;  %v7195_v6 = vld [vmem:[#allocation9 + $0xa40] sm:$0xf]  ;;  %v7950_v9 = vld [vmem:[#allocation9 + $0x244] sm:$0xf] }
  0xe3   :  { %3446 = vmatpush.bf16.msra.mxu0 %v7036_v55  ;;  %v6908_v55 = vor.u32 %v8138_v61, %v6907_v60  ;;  %v6173_v10 = vld [vmem:[#allocation9 + $0x260] sm:$0xf0] }
  0xe4   :  { %v1009_v32 = vmul.f32 %v8968_v22, %v8968_v22  ;;  %v6493_v60 = vld [vmem:[#allocation9 + $0x4e0] sm:$0xf0] }
  0xe6   :  { %v1015_v39 = vmul.f32 %v1009_v32, %v8968_v22  ;;  %3485 = vmatpush.bf16.msra.mxu3 %v6272_v25  ;;  %v5952_v32 = vor.u32 %v7894_v28, %v5949_v30  ;;  %v357_v25 = vperm.slane %v8964_v44, 3  ;;  %v8126_v28 = vld [vmem:[#allocation9 + $0x7c4] sm:$0xf] }
  0xe7   :  { %v888_v40 = vpop.f32.mrf.mxu2  ;;  %v864_v46 = vpop.f32.mrf.mxu0  ;;  %3447 = vmatpush.bf16.msra.mxu0 %v7004_v13 }
  0xe8   :  { %v889_v43 = vadd.f32 %v888_v40, %v355_v14  ;;  %v901_v45 = vpop.f32.mrf.mxu3  ;;  %v1021_v52 = vmul.f32 0.044715, %v1015_v39  ;;  %v877_v53 = vpop.f32.mrf.mxu1  ;;  %v5981_v14 = vld [vmem:[#allocation9 + $0xe0] sm:$0xf0]  ;;  %v6240_v40 = vor.u32 %v7966_v37, %v6237_v38 }
  0xe9   :  { %v5984_v17 = vor.u32 %v7902_v11, %v5981_v14  ;;  %v5917_v46 = vld [vmem:[#allocation9 + $0x60] sm:$0xf0]  ;;  %v7228_v53 = vor.u32 %v8218_v50, %v7227_v49  ;;  %v6176_v14 = vor.u32 %v7950_v9, %v6173_v10 }
  0xea   :  { %v8973_v57 = vadd.f32 %v901_v45, %v889_v43  ;;  %v1027_v51 = vadd.f32 %v1021_v52, %v8968_v22  ;;  %v6940_v43 = vor.u32 %v8146_v42, %v6939_v41  ;;  %v7886_v45 = vld [vmem:[#allocation9 + $0x44] sm:$0xf]  ;;  %3486 = vmatpush.bf16.msra.mxu3 %v6240_v40  ;;  %v356_v52 = vperm.slane %v8964_v44, 2 }
  0xeb   :  { %3473 = vmatpush.bf16.msra.mxu2 %v5984_v17  ;;  %3448 = vmatpush.bf16.msra.mxu0 %v6972_v29  ;;  %v5920_v48 = vor.u32 %v7886_v45, %v5917_v46  ;;  %v6877_v29 = vld [vmem:[#allocation9 + $0x7e0] sm:$0xf0] }
  0xec   :  { %v1010_v63 = vmul.f32 %v8973_v57, %v8973_v57  ;;  %v1033_v4 = vmul.f32 0.7978846, %v1027_v51  ;;  %v7878_v51 = vld [vmem:[#allocation9 + $0x4] sm:$0xf]  ;;  %3461 = vmatpush.bf16.msra.mxu1 %v7228_v53 }
  0xed   :  { %v5888_v3 = vor.u32 %v7878_v51, %v5885_v62  ;;  %v8118_v37 = vld [vmem:[#allocation9 + $0x784] sm:$0xf] }
  0xee   :  { %v1016_v7 = vmul.f32 %v1010_v63, %v8973_v57  ;;  %8378 = vtanh.f32 %v1033_v4  ;;  %v8062_v63 = vld [vmem:[#allocation9 + $0x5c4] sm:$0xf]  ;;  %3487 = vmatpush.bf16.msra.mxu3 %v6208_v59 }
  0xef   :  { %v890_v12 = vpop.f32.mrf.mxu2  ;;  %3474 = vmatpush.bf16.msra.mxu2 %v5952_v32  ;;  %3449 = vmatpush.bf16.msra.mxu0 %v6940_v43  ;;  %v6624_v4 = vor.u32 %v8062_v63, %v6621_v0  ;;  %v6880_v32 = vor.u32 %v8126_v28, %v6877_v29  ;;  %v6845_v38 = vld [vmem:[#allocation9 + $0x7a0] sm:$0xf0] }
  0xf0   :  { %v1022_v15 = vmul.f32 0.044715, %v1016_v7  ;;  %v903_v16 = vpop.f32.mrf.mxu3  ;;  %v6848_v42 = vor.u32 %v8118_v37, %v6845_v38  ;;  %v8038_v46 = vld [vmem:[#allocation9 + $0x504] sm:$0xf] }
  0xf1   :  { %v6589_v16 = vld [vmem:[#allocation9 + $0x5a0] sm:$0xf0] }
  0xf2   :  { %v1028_v24 = vadd.f32 %v1022_v15, %v8973_v57  ;;  %v8054_v15 = vld [vmem:[#allocation9 + $0x584] sm:$0xf]  ;;  %3488 = vmatpush.bf16.msra.mxu3 %v6176_v14 }
  0xf3   :  { %3475 = vmatpush.bf16.msra.mxu2 %v5920_v48  ;;  %3450 = vmatpush.bf16.msra.mxu0 %v6908_v55  ;;  %v6592_v17 = vor.u32 %v8054_v15, %v6589_v16  ;;  %v6813_v53 = vld [vmem:[#allocation9 + $0x760] sm:$0xf0] }
  0xf4   :  { %v1034_v31 = vmul.f32 0.7978846, %v1028_v24  ;;  %v8379_v35 = vpop.eup %8378  ;;  %v6141_v24 = vld [vmem:[#allocation9 + $0x220] sm:$0xf0] }
  0xf5   :  { %v1045_v39 = vadd.f32 1.0, %v8379_v35  ;;  %v6144_v27 = vor.u32 %v7942_v23, %v6141_v24  ;;  %v8030_v59 = vld [vmem:[#allocation9 + $0x4c4] sm:$0xf] }
  0xf6   :  { %8380 = vtanh.f32 %v1034_v31  ;;  %v6496_v51 = vor.u32 %v8030_v59, %v6493_v60  ;;  %v8102_v62 = vld [vmem:[#allocation9 + $0x704] sm:$0xf] }
  0xf7   :  { %v1051_v47 = vmul.f32 0.5, %v1045_v39  ;;  %3476 = vmatpush.bf16.msra.mxu2 %v5888_v3  ;;  %3489 = vmatpush.bf16.msra.mxu3 %v6144_v27  ;;  %v6781_v63 = vld [vmem:[#allocation9 + $0x720] sm:$0xf0]  ;;  %v358_v27 = vperm.slane %v8964_v44, 4 }
  0xf8   :  { %v6784_v3 = vor.u32 %v8102_v62, %v6781_v63  ;;  %v8086_v16 = vld [vmem:[#allocation9 + $0x684] sm:$0xf] }
  0xf9   :  { %v1057_v58 = vmul.f32 %v1051_v47, %v8968_v22  ;;  %v8210_v22 = vld [vmem:[#allocation9 + $0xa5c] sm:$0xf0]  ;;  %v6525_v47 = vld [vmem:[#allocation9 + $0x520] sm:$0xf0] }
  0xfa   :  { %v7196_v8 = vor.u32 %v8210_v22, %v7195_v6  ;;  %v6528_v49 = vor.u32 %v8038_v46, %v6525_v47  ;;  %v8006_v24 = vld [vmem:[#allocation9 + $0x404] sm:$0xf] }
  0xfb   :  { %v8982_v2 = vpack.c.bf16 %v1057_v58, %v1057_v58  ;;  %v8174_v47 = vld [vmem:[#allocation9 + $0x944] sm:$0xf] }
  0xfc   :  { %v8381_v1 = vpop.eup %8380  ;;  %3462 = vmatpush.bf16.msra.mxu1 %v7196_v8  ;;  %v6749_v8 = vld [vmem:[#allocation9 + $0x6e0] sm:$0xf0] }
  0xfd   :  { %v1046_v5 = vadd.f32 1.0, %v8381_v1  ;;  %3399 = vmatmul.bf16.vlgmr.msrb.gmra.mxu0 %v8982_v2  ;;  %v8166_v63 = vld [vmem:[#allocation9 + $0x904] sm:$0xf] }
  0xfe   :  { %3495 = vmatpush.bf16.msrb.mxu0 %v6624_v4  ;;  %v8022_v4 = vld [vmem:[#allocation9 + $0x484] sm:$0xf] }
  0xff   :  { %v914_v7 = vpop.f32.mrf.mxu0  ;;  %v1052_v11 = vmul.f32 0.5, %v1046_v5  ;;  %v6461_v5 = vld [vmem:[#allocation9 + $0x4a0] sm:$0xf0] }
 0x100   :  { %v915_v12 = vadd.f32 %v914_v7, %v356_v52  ;;  %v927_v13 = vpop.f32.mrf.mxu1  ;;  %3463 = vmatpush.bf16.msra.mxu1 %v7164_v26  ;;  %v8110_v52 = vld [vmem:[#allocation9 + $0x744] sm:$0xf]  ;;  %v6464_v22 = vor.u32 %v8022_v4, %v6461_v5 }
 0x101   :  { %v1058_v19 = vmul.f32 %v1052_v11, %v8973_v57  ;;  %v8046_v57 = vld [vmem:[#allocation9 + $0x544] sm:$0xf]  ;;  %v6816_v56 = vor.u32 %v8110_v52, %v6813_v53  ;;  %v359_v53 = vperm.slane %v8964_v44, 5 }
 0x102   :  { %v8986_v20 = vadd.f32 %v927_v13, %v915_v12  ;;  %3496 = vmatpush.bf16.msrb.mxu0 %v6592_v17  ;;  %v6560_v36 = vor.u32 %v8046_v57, %v6557_v33  ;;  %v8094_v7 = vld [vmem:[#allocation9 + $0x6c4] sm:$0xf] }
 0x103   :  { %v8989_v30 = vpack.c.bf16 %v1058_v19, %v1058_v19  ;;  %v6752_v10 = vor.u32 %v8094_v7, %v6749_v8  ;;  %v8014_v12 = vld [vmem:[#allocation9 + $0x444] sm:$0xf] }
 0x104   :  { %v1011_v31 = vmul.f32 %v8986_v20, %v8986_v20  ;;  %v6429_v13 = vld [vmem:[#allocation9 + $0x460] sm:$0xf0] }
 0x105   :  { %3412 = vmatmul.bf16.vlgmr.msrb.gmra.mxu1 %v8989_v30  ;;  %v6432_v15 = vor.u32 %v8014_v12, %v6429_v13  ;;  %v6717_v17 = vld [vmem:[#allocation9 + $0x6a0] sm:$0xf0] }
 0x106   :  { %v1017_v34 = vmul.f32 %v1011_v31, %v8986_v20  ;;  %3508 = vmatpush.bf16.msrb.mxu1 %v6880_v32  ;;  %3497 = vmatpush.bf16.msrb.mxu0 %v6560_v36  ;;  %v8190_v19 = vld [vmem:[#allocation9 + $0x9c4] sm:$0xf]  ;;  %v6720_v23 = vor.u32 %v8086_v16, %v6717_v17 }
 0x107   :  { %v940_v35 = vpop.f32.mrf.mxu2  ;;  %v916_v41 = vpop.f32.mrf.mxu0  ;;  %v7136_v29 = vor.u32 %v8190_v19, %v7133_v21  ;;  %v8078_v31 = vld [vmem:[#allocation9 + $0x644] sm:$0xf] }
 0x108   :  { %v941_v39 = vadd.f32 %v940_v35, %v357_v25  ;;  %v953_v40 = vpop.f32.mrf.mxu3  ;;  %v1023_v43 = vmul.f32 0.044715, %v1017_v34  ;;  %v929_v45 = vpop.f32.mrf.mxu1  ;;  %v6397_v25 = vld [vmem:[#allocation9 + $0x420] sm:$0xf0] }
 0x109   :  { %v6400_v28 = vor.u32 %v8006_v24, %v6397_v25  ;;  %v8182_v33 = vld [vmem:[#allocation9 + $0x984] sm:$0xf] }
 0x10a   :  { %v8995_v48 = vadd.f32 %v953_v40, %v941_v39  ;;  %v1029_v50 = vadd.f32 %v1023_v43, %v8986_v20  ;;  %3509 = vmatpush.bf16.msrb.mxu1 %v6848_v42  ;;  %3498 = vmatpush.bf16.msrb.mxu0 %v6528_v49  ;;  %v7101_v34 = vld [vmem:[#allocation9 + $0x9a0] sm:$0xf0] }
 0x10b   :  { %v6685_v35 = vld [vmem:[#allocation9 + $0x660] sm:$0xf0]  ;;  %v7104_v42 = vor.u32 %v8182_v33, %v7101_v34 }
 0x10c   :  { %v1012_v54 = vmul.f32 %v8995_v48, %v8995_v48  ;;  %v1035_v58 = vmul.f32 0.7978846, %v1029_v50  ;;  %v6688_v38 = vor.u32 %v8078_v31, %v6685_v35  ;;  %v7389_v43 = vld [vmem:[#allocation9 + $0xbe0] sm:$0xf0] }
 0x10d   :  { %v8070_v45 = vld [vmem:[#allocation9 + $0x604] sm:$0xf] }
 0x10e   :  { %v1018_v61 = vmul.f32 %v1012_v54, %v8995_v48  ;;  %8382 = vtanh.f32 %v1035_v58  ;;  %3510 = vmatpush.bf16.msrb.mxu1 %v6816_v56  ;;  %3499 = vmatpush.bf16.msrb.mxu0 %v6496_v51  ;;  %v7069_v49 = vld [vmem:[#allocation9 + $0x960] sm:$0xf0] }
 0x10f   :  { %v942_v55 = vpop.f32.mrf.mxu2  ;;  %v6653_v50 = vld [vmem:[#allocation9 + $0x620] sm:$0xf0]  ;;  %v7072_v60 = vor.u32 %v8174_v47, %v7069_v49  ;;  %v6627_v47 = vld [vmem:[#allocation9 + $0x5c8] sm:$0xf] }
 0x110   :  { %v1024_v0 = vmul.f32 0.044715, %v1018_v61  ;;  %v955_v1 = vpop.f32.mrf.mxu3  ;;  %v6656_v54 = vor.u32 %v8070_v45, %v6653_v50  ;;  %v8246_v61 = vld [vmem:[#allocation9 + $0xb84] sm:$0xf]  ;;  %v8067_v49 = vld [vmem:[#allocation9 + $0x5e4] sm:$0xf0] }
 0x111   :  { %v7357_v51 = vld [vmem:[#allocation9 + $0xba0] sm:$0xf0] }
 0x112   :  { %v1030_v6 = vadd.f32 %v1024_v0, %v8995_v48  ;;  %3511 = vmatpush.bf16.msrb.mxu1 %v6784_v3  ;;  %3500 = vmatpush.bf16.msrb.mxu0 %v6464_v22  ;;  %v7037_v0 = vld [vmem:[#allocation9 + $0x920] sm:$0xf0]  ;;  %v7360_v5 = vor.u32 %v8246_v61, %v7357_v51  ;;  %v6083_v61 = vld [vmem:[#allocation9 + $0x188] sm:$0xf] }
 0x113   :  { %v7040_v22 = vor.u32 %v8166_v63, %v7037_v0  ;;  %v8238_v7 = vld [vmem:[#allocation9 + $0xb44] sm:$0xf]  ;;  %v6595_v63 = vld [vmem:[#allocation9 + $0x588] sm:$0xf] }
 0x114   :  { %v1036_v9 = vmul.f32 0.7978846, %v1030_v6  ;;  %v8383_v11 = vpop.eup %8382  ;;  %v7325_v8 = vld [vmem:[#allocation9 + $0xb60] sm:$0xf0]  ;;  %v8059_v0 = vld [vmem:[#allocation9 + $0x5a4] sm:$0xf0] }
 0x115   :  { %v1047_v14 = vadd.f32 1.0, %v8383_v11  ;;  %v7005_v11 = vld [vmem:[#allocation9 + $0x8e0] sm:$0xf0] }
 0x116   :  { %8384 = vtanh.f32 %v1036_v9  ;;  %3512 = vmatpush.bf16.msrb.mxu1 %v6752_v10  ;;  %3501 = vmatpush.bf16.msrb.mxu0 %v6432_v15  ;;  %v8158_v10 = vld [vmem:[#allocation9 + $0x8c4] sm:$0xf] }
 0x117   :  { %v1053_v18 = vmul.f32 0.5, %v1047_v14  ;;  %v7328_v14 = vor.u32 %v8238_v7, %v7325_v8  ;;  %v7008_v16 = vor.u32 %v8158_v10, %v7005_v11  ;;  %v8230_v17 = vld [vmem:[#allocation9 + $0xb04] sm:$0xf]  ;;  %v6596_v8 = vor.u32 %v8059_v0, %v6595_v63  ;;  %v6051_v10 = vld [vmem:[#allocation9 + $0x148] sm:$0xf] }
 0x118   :  { %v8150_v21 = vld [vmem:[#allocation9 + $0x884] sm:$0xf]  ;;  %v7923_v11 = vld [vmem:[#allocation9 + $0x164] sm:$0xf0] }
 0x119   :  { %v1059_v26 = vmul.f32 %v1053_v18, %v8986_v20  ;;  %v8254_v20 = vld [vmem:[#allocation9 + $0xbc4] sm:$0xf]  ;;  %v7971_v0 = vld [vmem:[#allocation9 + $0x2e4] sm:$0xf0] }
 0x11a   :  { %3513 = vmatpush.bf16.msrb.mxu1 %v6720_v23  ;;  %3502 = vmatpush.bf16.msrb.mxu0 %v6400_v28  ;;  %v7392_v58 = vor.u32 %v8254_v20, %v7389_v43  ;;  %v7293_v18 = vld [vmem:[#allocation9 + $0xb20] sm:$0xf0]  ;;  %v7939_v43 = vld [vmem:[#allocation9 + $0x1e4] sm:$0xf0] }
 0x11b   :  { %v9004_v57 = vpack.c.bf16 %v1059_v26, %v1059_v26  ;;  %v6973_v23 = vld [vmem:[#allocation9 + $0x8a0] sm:$0xf0]  ;;  %v7296_v26 = vor.u32 %v8230_v17, %v7293_v18  ;;  %v6339_v18 = vld [vmem:[#allocation9 + $0x388] sm:$0xf] }
 0x11c   :  { %v8385_v32 = vpop.eup %8384  ;;  %v6976_v28 = vor.u32 %v8150_v21, %v6973_v23  ;;  %v7261_v31 = vld [vmem:[#allocation9 + $0xae0] sm:$0xf0]  ;;  %v6052_v23 = vor.u32 %v7923_v11, %v6051_v10  ;;  %v7963_v10 = vld [vmem:[#allocation9 + $0x2a4] sm:$0xf0] }
 0x11d   :  { %v1048_v36 = vadd.f32 1.0, %v8385_v32  ;;  %3425 = vmatmul.bf16.vlgmr.msrb.gmra.mxu2 %v9004_v57  ;;  %v8142_v32 = vld [vmem:[#allocation9 + $0x844] sm:$0xf]  ;;  %v6723_v11 = vld [vmem:[#allocation9 + $0x688] sm:$0xf] }
 0x11e   :  { %3521 = vmatpush.bf16.msrb.mxu2 %v7136_v29  ;;  %3514 = vmatpush.bf16.msrb.mxu1 %v6688_v38  ;;  %v8222_v29 = vld [vmem:[#allocation9 + $0xac4] sm:$0xf] }
 0x11f   :  { %v966_v37 = vpop.f32.mrf.mxu0  ;;  %v1054_v41 = vmul.f32 0.5, %v1048_v36  ;;  %v6941_v33 = vld [vmem:[#allocation9 + $0x860] sm:$0xf0]  ;;  %v7264_v36 = vor.u32 %v8222_v29, %v7261_v31  ;;  %v6531_v29 = vld [vmem:[#allocation9 + $0x508] sm:$0xf] }
 0x120   :  { %v967_v39 = vadd.f32 %v966_v37, %v358_v27  ;;  %v979_v40 = vpop.f32.mrf.mxu1  ;;  %v8214_v37 = vld [vmem:[#allocation9 + $0xa84] sm:$0xf] }
 0x121   :  { %v1060_v52 = vmul.f32 %v1054_v41, %v8995_v48  ;;  %v8134_v20 = vld [vmem:[#allocation9 + $0x804] sm:$0xf] }
 0x122   :  { %v9007_v46 = vadd.f32 %v979_v40, %v967_v39  ;;  %3522 = vmatpush.bf16.msrb.mxu2 %v7104_v42  ;;  %3515 = vmatpush.bf16.msrb.mxu1 %v6656_v54  ;;  %v6944_v39 = vor.u32 %v8142_v32, %v6941_v33  ;;  %v7229_v40 = vld [vmem:[#allocation9 + $0xaa0] sm:$0xf0]  ;;  %v6115_v42 = vld [vmem:[#allocation9 + $0x1c8] sm:$0xf] }
 0x123   :  { %v9013_v59 = vpack.c.bf16 %v1060_v52, %v1060_v52  ;;  %v6909_v41 = vld [vmem:[#allocation9 + $0x820] sm:$0xf0]  ;;  %v7232_v50 = vor.u32 %v8214_v37, %v7229_v40  ;;  %v6307_v33 = vld [vmem:[#allocation9 + $0x348] sm:$0xf] }
 0x124   :  { %v1013_v56 = vmul.f32 %v9007_v46, %v9007_v46  ;;  %v8206_v54 = vld [vmem:[#allocation9 + $0xa44] sm:$0xf]  ;;  %v6819_v37 = vld [vmem:[#allocation9 + $0x748] sm:$0xf] }
 0x125   :  { %3438 = vmatmul.bf16.vlgmr.msrb.gmra.mxu3 %v9013_v59  ;;  %v8035_v40 = vld [vmem:[#allocation9 + $0x4e4] sm:$0xf0] }
 0x126   :  { %v1019_v55 = vmul.f32 %v1013_v56, %v9007_v46  ;;  %3534 = vmatpush.bf16.msrb.mxu3 %v7392_v58  ;;  %3523 = vmatpush.bf16.msrb.mxu2 %v7072_v60  ;;  %v7197_v56 = vld [vmem:[#allocation9 + $0xa60] sm:$0xf0]  ;;  %v6116_v58 = vor.u32 %v7939_v43, %v6115_v42  ;;  %v6628_v60 = vor.u32 %v8067_v49, %v6627_v47  ;;  %v7979_v49 = vld [vmem:[#allocation9 + $0x324] sm:$0xf0] }
 0x127   :  { %v992_v62 = vpop.f32.mrf.mxu2  ;;  %v968_v44 = vpop.f32.mrf.mxu0 }
 0x128   :  { %v993_v48 = vadd.f32 %v992_v62, %v359_v53  ;;  %v1005_v1 = vpop.f32.mrf.mxu3  ;;  %v1025_v3 = vmul.f32 0.044715, %v1019_v55  ;;  %v981_v4 = vpop.f32.mrf.mxu1  ;;  %v6912_v53 = vor.u32 %v8134_v20, %v6909_v41  ;;  %v7931_v62 = vld [vmem:[#allocation9 + $0x1a4] sm:$0xf0]  ;;  %v8198_v44 = vld [vmem:[#allocation9 + $0xa04] sm:$0xf] }
 0x129   :  { %v8003_v4 = vld [vmem:[#allocation9 + $0x3e4] sm:$0xf0]  ;;  %v6084_v7 = vor.u32 %v7931_v62, %v6083_v61 }
 0x12a   :  { %v9017_v6 = vadd.f32 %v1005_v1, %v993_v48  ;;  %v1031_v9 = vadd.f32 %v1025_v3, %v9007_v46  ;;  %3535 = vmatpush.bf16.msrb.mxu3 %v7360_v5  ;;  %3524 = vmatpush.bf16.msrb.mxu2 %v7040_v22  ;;  %v7200_v1 = vor.u32 %v8206_v54, %v7197_v56  ;;  %v7165_v3 = vld [vmem:[#allocation9 + $0xa20] sm:$0xf0]  ;;  %v6883_v5 = vld [vmem:[#allocation9 + $0x7c8] sm:$0xf] }
 0x12b   :  { %v5987_v20 = vld [vmem:[#allocation9 + $0xc8] sm:$0xf] }
 0x12c   :  { %v1014_v12 = vmul.f32 %v9017_v6, %v9017_v6  ;;  %v1037_v13 = vmul.f32 0.7978846, %v1031_v9  ;;  %v8131_v9 = vld [vmem:[#allocation9 + $0x7e4] sm:$0xf0] }
 0x12d   :  { %3477 = vmatmul.bf16.vlgmr.msra.gmra.mxu2 %v8982_v2  ;;  %v6884_v17 = vor.u32 %v8131_v9, %v6883_v5  ;;  %v7907_v41 = vld [vmem:[#allocation9 + $0xe4] sm:$0xf0] }
 0x12e   :  { %v1020_v15 = vmul.f32 %v1014_v12, %v9017_v6  ;;  %8386 = vtanh.f32 %v1037_v13  ;;  %3536 = vmatpush.bf16.msrb.mxu3 %v7328_v14  ;;  %3525 = vmatpush.bf16.msrb.mxu2 %v7008_v16  ;;  %v6563_v12 = vld [vmem:[#allocation9 + $0x548] sm:$0xf] }
 0x12f   :  { %v994_v19 = vpop.f32.mrf.mxu2  ;;  %v8051_v13 = vld [vmem:[#allocation9 + $0x564] sm:$0xf0] }
 0x130   :  { %v1026_v24 = vmul.f32 0.044715, %v1020_v15  ;;  %v1007_v25 = vpop.f32.mrf.mxu3  ;;  %v7168_v15 = vor.u32 %v8198_v44, %v7165_v3  ;;  %v7995_v19 = vld [vmem:[#allocation9 + $0x3a4] sm:$0xf0] }
 0x131   :  { %v6851_v25 = vld [vmem:[#allocation9 + $0x788] sm:$0xf]  ;;  %v6340_v31 = vor.u32 %v7995_v19, %v6339_v18  ;;  %v7935_v18 = vld [vmem:[#allocation9 + $0x1cc] sm:$0xf] }
 0x132   :  { %v1032_v27 = vadd.f32 %v1026_v24, %v9017_v6  ;;  %3537 = vmatpush.bf16.msrb.mxu3 %v7296_v26  ;;  %3526 = vmatpush.bf16.msrb.mxu2 %v6976_v28  ;;  %v6564_v24 = vor.u32 %v8051_v13, %v6563_v12  ;;  %v8123_v26 = vld [vmem:[#allocation9 + $0x7a4] sm:$0xf0]  ;;  %v6117_v19 = vld [vmem:[#allocation9 + $0x1e8] sm:$0xf0] }
 0x133   :  { %v7915_v28 = vld [vmem:[#allocation9 + $0x124] sm:$0xf0]  ;;  %v6852_v32 = vor.u32 %v8123_v26, %v6851_v25 }
 0x134   :  { %v1038_v34 = vmul.f32 0.7978846, %v1032_v27  ;;  %v8387_v35 = vpop.eup %8386  ;;  %v6019_v27 = vld [vmem:[#allocation9 + $0x108] sm:$0xf] }
 0x135   :  { %v1049_v38 = vadd.f32 1.0, %v8387_v35  ;;  %3490 = vmatmul.bf16.vlgmr.msra.gmra.mxu3 %v8989_v30  ;;  %v6467_v54 = vld [vmem:[#allocation9 + $0x488] sm:$0xf] }
 0x136   :  { %8388 = vtanh.f32 %v1038_v34  ;;  %3538 = vmatpush.bf16.msrb.mxu3 %v7264_v36  ;;  %3527 = vmatpush.bf16.msrb.mxu2 %v6944_v39  ;;  %v6020_v34 = vor.u32 %v7915_v28, %v6019_v27  ;;  %v7987_v36 = vld [vmem:[#allocation9 + $0x364] sm:$0xf0] }
 0x137   :  { %v1055_v45 = vmul.f32 0.5, %v1049_v38  ;;  %v8115_v38 = vld [vmem:[#allocation9 + $0x764] sm:$0xf0]  ;;  %v6308_v42 = vor.u32 %v7987_v36, %v6307_v33  ;;  %v6120_v33 = vor.u32 %v7935_v18, %v6117_v19  ;;  %v7927_v36 = vld [vmem:[#allocation9 + $0x18c] sm:$0xf] }
 0x138   :  { %v6499_v39 = vld [vmem:[#allocation9 + $0x4c8] sm:$0xf]  ;;  %v6820_v43 = vor.u32 %v8115_v38, %v6819_v37  ;;  %v6085_v37 = vld [vmem:[#allocation9 + $0x1a8] sm:$0xf0] }
 0x139   :  { %v1061_v52 = vmul.f32 %v1055_v45, %v9007_v46  ;;  %v6371_v46 = vld [vmem:[#allocation9 + $0x3c8] sm:$0xf]  ;;  %v6500_v47 = vor.u32 %v8035_v40, %v6499_v39 }
 0x13a   :  { %3539 = vmatpush.bf16.msrb.mxu3 %v7232_v50  ;;  %3528 = vmatpush.bf16.msrb.mxu2 %v6912_v53  ;;  %v6372_v16 = vor.u32 %v8003_v4, %v6371_v46  ;;  %v6275_v45 = vld [vmem:[#allocation9 + $0x308] sm:$0xf]  ;;  %v5988_v53 = vor.u32 %v7907_v41, %v5987_v20 }
 0x13b   :  { %v9027_v55 = vpack.c.bf16 %v1061_v52, %v1061_v52  ;;  %v6787_v50 = vld [vmem:[#allocation9 + $0x708] sm:$0xf]  ;;  %v6276_v61 = vor.u32 %v7979_v49, %v6275_v45 }
 0x13c   :  { %v8389_v51 = vpop.eup %8388  ;;  %v8107_v52 = vld [vmem:[#allocation9 + $0x724] sm:$0xf0] }
 0x13d   :  { %v1050_v48 = vadd.f32 1.0, %v8389_v51  ;;  %3451 = vmatmul.bf16.vlgmr.msra.gmra.mxu0 %v9027_v55  ;;  %3529 = vmatmul.bf16.vlgmr.msrb.gmra.mxu2 %v9027_v55  ;;  %v8027_v56 = vld [vmem:[#allocation9 + $0x4a4] sm:$0xf0]  ;;  %v6788_v51 = vor.u32 %v8107_v52, %v6787_v50  ;;  %v7999_v50 = vld [vmem:[#allocation9 + $0x3cc] sm:$0xf] }
 0x13e   :  { %3547 = vmatpush.bf16.msra.mxu0 %v6116_v58  ;;  %3573 = vmatpush.bf16.msra.mxu2 %v6628_v60  ;;  %v5955_v58 = vld [vmem:[#allocation9 + $0x88] sm:$0xf]  ;;  %v6468_v63 = vor.u32 %v8027_v56, %v6467_v54  ;;  %v6373_v52 = vld [vmem:[#allocation9 + $0x3e8] sm:$0xf0] }
 0x13f   :  { %v1056_v22 = vmul.f32 0.5, %v1050_v48  ;;  %3540 = vmatpush.bf16.msrb.mxu3 %v7200_v1  ;;  %v7899_v60 = vld [vmem:[#allocation9 + $0xa4] sm:$0xf0]  ;;  %v7919_v54 = vld [vmem:[#allocation9 + $0x14c] sm:$0xf] }
 0x140   :  { %v6243_v62 = vld [vmem:[#allocation9 + $0x2c8] sm:$0xf]  ;;  %v5956_v44 = vor.u32 %v7899_v60, %v5955_v58  ;;  %v6053_v56 = vld [vmem:[#allocation9 + $0x168] sm:$0xf0] }
 0x141   :  { %v1062_v14 = vmul.f32 %v1056_v22, %v9017_v6  ;;  %v8043_v6 = vld [vmem:[#allocation9 + $0x524] sm:$0xf0]  ;;  %v6244_v22 = vor.u32 %v7971_v0, %v6243_v62 }
 0x142   :  { %3548 = vmatpush.bf16.msra.mxu0 %v6084_v7  ;;  %3574 = vmatpush.bf16.msra.mxu2 %v6596_v8  ;;  %v6532_v35 = vor.u32 %v8043_v6, %v6531_v29  ;;  %v6755_v48 = vld [vmem:[#allocation9 + $0x6c8] sm:$0xf] }
 0x143   :  { %v9032_v21 = vpack.c.bf16 %v1062_v14, %v1062_v14  ;;  %3541 = vmatpush.bf16.msrb.mxu3 %v7168_v15  ;;  %v8099_v1 = vld [vmem:[#allocation9 + $0x6e4] sm:$0xf0] }
 0x144   :  { %v6435_v3 = vld [vmem:[#allocation9 + $0x448] sm:$0xf]  ;;  %v6756_v7 = vor.u32 %v8099_v1, %v6755_v48  ;;  %v6056_v48 = vor.u32 %v7919_v54, %v6053_v56  ;;  %v7959_v56 = vld [vmem:[#allocation9 + $0x28c] sm:$0xf] }
 0x145   :  { %3464 = vmatmul.bf16.vlgmr.msra.gmra.mxu1 %v9032_v21  ;;  %v8019_v46 = vld [vmem:[#allocation9 + $0x464] sm:$0xf0] }
 0x146   :  { %3560 = vmatpush.bf16.msra.mxu1 %v6372_v16  ;;  %3549 = vmatpush.bf16.msra.mxu0 %v6052_v23  ;;  %v5923_v4 = vld [vmem:[#allocation9 + $0x48] sm:$0xf]  ;;  %v6436_v9 = vor.u32 %v8019_v46, %v6435_v3  ;;  %v6341_v3 = vld [vmem:[#allocation9 + $0x3a8] sm:$0xf0] }
 0x147   :  { %3586 = vmatpush.bf16.msra.mxu3 %v6884_v17  ;;  %3575 = vmatpush.bf16.msra.mxu2 %v6564_v24  ;;  %v7891_v5 = vld [vmem:[#allocation9 + $0x64] sm:$0xf0] }
 0x148   :  { %3542 = vmatmul.bf16.vlgmr.msrb.gmra.mxu3 %v9032_v21  ;;  %v6211_v8 = vld [vmem:[#allocation9 + $0x288] sm:$0xf]  ;;  %v5924_v13 = vor.u32 %v7891_v5, %v5923_v4  ;;  %v7911_v4 = vld [vmem:[#allocation9 + $0x10c] sm:$0xf] }
 0x149   :  { %v8091_v12 = vld [vmem:[#allocation9 + $0x6a4] sm:$0xf0]  ;;  %v6212_v23 = vor.u32 %v7963_v10, %v6211_v8  ;;  %v6021_v5 = vld [vmem:[#allocation9 + $0x128] sm:$0xf0] }
 0x14a   :  { %3561 = vmatpush.bf16.msra.mxu1 %v6340_v31  ;;  %3550 = vmatpush.bf16.msra.mxu0 %v6020_v34  ;;  %v5891_v14 = vld [vmem:[#allocation9 + $0x8] sm:$0xf]  ;;  %v6724_v24 = vor.u32 %v8091_v12, %v6723_v11  ;;  %v6024_v11 = vor.u32 %v7911_v4, %v6021_v5 }
 0x14b   :  { %3587 = vmatpush.bf16.msra.mxu3 %v6852_v32  ;;  %3576 = vmatpush.bf16.msra.mxu2 %v6532_v35  ;;  %v6403_v15 = vld [vmem:[#allocation9 + $0x408] sm:$0xf] }
 0x14c   :  { %v8011_v16 = vld [vmem:[#allocation9 + $0x424] sm:$0xf0] }
 0x14d   :  { %3503 = vmatmul.bf16.vlgmr.msrb.gmra.mxu0 %v9004_v57  ;;  %v7883_v17 = vld [vmem:[#allocation9 + $0x24] sm:$0xf0]  ;;  %v6404_v28 = vor.u32 %v8011_v16, %v6403_v15  ;;  %v7903_v16 = vld [vmem:[#allocation9 + $0xcc] sm:$0xf] }
 0x14e   :  { %3562 = vmatpush.bf16.msra.mxu1 %v6308_v42  ;;  %3551 = vmatpush.bf16.msra.mxu0 %v5988_v53  ;;  %v7139_v25 = vld [vmem:[#allocation9 + $0x9c8] sm:$0xf]  ;;  %v5892_v32 = vor.u32 %v7883_v17, %v5891_v14  ;;  %v6309_v14 = vld [vmem:[#allocation9 + $0x368] sm:$0xf0] }
 0x14f   :  { %3588 = vmatpush.bf16.msra.mxu3 %v6820_v43  ;;  %3577 = vmatpush.bf16.msra.mxu2 %v6500_v47  ;;  %v8195_v26 = vld [vmem:[#allocation9 + $0x9e4] sm:$0xf0]  ;;  %v6088_v47 = vor.u32 %v7927_v36, %v6085_v37  ;;  %v5989_v17 = vld [vmem:[#allocation9 + $0xe8] sm:$0xf0] }
 0x150   :  { %v6179_v27 = vld [vmem:[#allocation9 + $0x248] sm:$0xf]  ;;  %v7140_v34 = vor.u32 %v8195_v26, %v7139_v25  ;;  %v5992_v26 = vor.u32 %v7903_v16, %v5989_v17  ;;  %v6597_v17 = vld [vmem:[#allocation9 + $0x5a8] sm:$0xf0] }
 0x151   :  { %v7955_v29 = vld [vmem:[#allocation9 + $0x264] sm:$0xf0] }
 0x152   :  { %3563 = vmatpush.bf16.msra.mxu1 %v6276_v61  ;;  %3552 = vmatpush.bf16.msra.mxu0 %v5956_v44  ;;  %v6691_v6 = vld [vmem:[#allocation9 + $0x648] sm:$0xf]  ;;  %v6180_v38 = vor.u32 %v7955_v29, %v6179_v27  ;;  %v7991_v44 = vld [vmem:[#allocation9 + $0x38c] sm:$0xf] }
 0x153   :  { %3589 = vmatpush.bf16.msra.mxu3 %v6788_v51  ;;  %3578 = vmatpush.bf16.msra.mxu2 %v6468_v63  ;;  %v8083_v31 = vld [vmem:[#allocation9 + $0x664] sm:$0xf0]  ;;  %v6376_v63 = vor.u32 %v7999_v50, %v6373_v52  ;;  %v6277_v29 = vld [vmem:[#allocation9 + $0x328] sm:$0xf0] }
 0x154   :  { %v7107_v35 = vld [vmem:[#allocation9 + $0x988] sm:$0xf]  ;;  %v6692_v39 = vor.u32 %v8083_v31, %v6691_v6  ;;  %v7895_v31 = vld [vmem:[#allocation9 + $0x8c] sm:$0xf] }
 0x155   :  { %3516 = vmatmul.bf16.vlgmr.msrb.gmra.mxu1 %v9013_v59  ;;  %v8187_v40 = vld [vmem:[#allocation9 + $0x9a4] sm:$0xf0] }
 0x156   :  { %3564 = vmatpush.bf16.msra.mxu1 %v6244_v22  ;;  %3553 = vmatpush.bf16.msra.mxu0 %v5924_v13  ;;  %v6147_v20 = vld [vmem:[#allocation9 + $0x208] sm:$0xf]  ;;  %v7108_v53 = vor.u32 %v8187_v40, %v7107_v35  ;;  %v7983_v13 = vld [vmem:[#allocation9 + $0x34c] sm:$0xf] }
 0x157   :  { %3590 = vmatpush.bf16.msra.mxu3 %v6756_v7  ;;  %3579 = vmatpush.bf16.msra.mxu2 %v6436_v9  ;;  %v7947_v41 = vld [vmem:[#allocation9 + $0x224] sm:$0xf0]  ;;  %v6344_v9 = vor.u32 %v7991_v44, %v6341_v3  ;;  %v7967_v40 = vld [vmem:[#allocation9 + $0x2cc] sm:$0xf] }
 0x158   :  { %v6659_v42 = vld [vmem:[#allocation9 + $0x608] sm:$0xf]  ;;  %v6148_v58 = vor.u32 %v7947_v41, %v6147_v20  ;;  %v6245_v20 = vld [vmem:[#allocation9 + $0x2e8] sm:$0xf0] }
 0x159   :  { %v8075_v43 = vld [vmem:[#allocation9 + $0x624] sm:$0xf0]  ;;  %v6248_v50 = vor.u32 %v7967_v40, %v6245_v20  ;;  %v8063_v3 = vld [vmem:[#allocation9 + $0x5cc] sm:$0xf] }
 0x15a   :  { %3565 = vmatpush.bf16.msra.mxu1 %v6212_v23  ;;  %v7395_v45 = vld [vmem:[#allocation9 + $0xbc8] sm:$0xf]  ;;  %3554 = vmatpush.bf16.msra.mxu0 %v5892_v32  ;;  %v6660_v60 = vor.u32 %v8075_v43, %v6659_v42  ;;  %v5957_v32 = vld [vmem:[#allocation9 + $0xa8] sm:$0xf0] }
 0x15b   :  { %3591 = vmatpush.bf16.msra.mxu3 %v6724_v24  ;;  %3580 = vmatpush.bf16.msra.mxu2 %v6404_v28  ;;  %v8259_v49 = vld [vmem:[#allocation9 + $0xbe4] sm:$0xf0]  ;;  %v6312_v24 = vor.u32 %v7983_v13, %v6309_v14  ;;  %v7975_v28 = vld [vmem:[#allocation9 + $0x30c] sm:$0xf] }
 0x15c   :  { %v7075_v61 = vld [vmem:[#allocation9 + $0x948] sm:$0xf]  ;;  %v7396_v62 = vor.u32 %v8259_v49, %v7395_v45  ;;  %v6280_v36 = vor.u32 %v7975_v28, %v6277_v29  ;;  %v7887_v42 = vld [vmem:[#allocation9 + $0x4c] sm:$0xf] }
 0x15d   :  { %v8179_v51 = vld [vmem:[#allocation9 + $0x964] sm:$0xf0]  ;;  %3555 = vmatmul.bf16.vlgmr.msra.gmra.mxu0 %v8982_v2  ;;  %v5925_v43 = vld [vmem:[#allocation9 + $0x68] sm:$0xf0] }
 0x15e   :  { %3599 = vmatpush.bf16.msrb.mxu0 %v7140_v34  ;;  %3566 = vmatpush.bf16.msra.mxu1 %v6180_v38  ;;  %v7363_v0 = vld [vmem:[#allocation9 + $0xb88] sm:$0xf]  ;;  %v7076_v46 = vor.u32 %v8179_v51, %v7075_v61  ;;  %v5960_v38 = vor.u32 %v7895_v31, %v5957_v32  ;;  %v7879_v51 = vld [vmem:[#allocation9 + $0xc] sm:$0xf] }
 0x15f   :  { %3625 = vmatpush.bf16.msrb.mxu2 %v6120_v33  ;;  %3592 = vmatpush.bf16.msra.mxu3 %v6692_v39  ;;  %v8251_v1 = vld [vmem:[#allocation9 + $0xba4] sm:$0xf0]  ;;  %v8183_v13 = vld [vmem:[#allocation9 + $0x98c] sm:$0xf] }
 0x160   :  { %3581 = vmatmul.bf16.vlgmr.msra.gmra.mxu2 %v9004_v57  ;;  %v7043_v22 = vld [vmem:[#allocation9 + $0x908] sm:$0xf]  ;;  %v7364_v8 = vor.u32 %v8251_v1, %v7363_v0  ;;  %v8191_v0 = vld [vmem:[#allocation9 + $0x9cc] sm:$0xf] }
 0x161   :  { %v8171_v7 = vld [vmem:[#allocation9 + $0x924] sm:$0xf0]  ;;  %v7109_v14 = vld [vmem:[#allocation9 + $0x9a8] sm:$0xf0] }
 0x162   :  { %3600 = vmatpush.bf16.msrb.mxu0 %v7108_v53  ;;  %3567 = vmatpush.bf16.msra.mxu1 %v6148_v58  ;;  %v7331_v10 = vld [vmem:[#allocation9 + $0xb48] sm:$0xf]  ;;  %v7044_v15 = vor.u32 %v8171_v7, %v7043_v22  ;;  %v5928_v53 = vor.u32 %v7887_v42, %v5925_v43  ;;  %v6213_v58 = vld [vmem:[#allocation9 + $0x2a8] sm:$0xf0] }
 0x163   :  { %3626 = vmatpush.bf16.msrb.mxu2 %v6088_v47  ;;  %3593 = vmatpush.bf16.msra.mxu3 %v6660_v60  ;;  %v8243_v12 = vld [vmem:[#allocation9 + $0xb64] sm:$0xf0]  ;;  %v6216_v44 = vor.u32 %v7959_v56, %v6213_v58  ;;  %v7951_v7 = vld [vmem:[#allocation9 + $0x24c] sm:$0xf] }
 0x164   :  { %v7011_v18 = vld [vmem:[#allocation9 + $0x8c8] sm:$0xf]  ;;  %v7332_v23 = vor.u32 %v8243_v12, %v7331_v10  ;;  %v8055_v12 = vld [vmem:[#allocation9 + $0x58c] sm:$0xf] }
 0x165   :  { %3568 = vmatmul.bf16.vlgmr.msra.gmra.mxu1 %v8989_v30  ;;  %v8163_v19 = vld [vmem:[#allocation9 + $0x8e4] sm:$0xf0]  ;;  %v8255_v28 = vld [vmem:[#allocation9 + $0xbcc] sm:$0xf] }
 0x166   :  { %3612 = vmatpush.bf16.msrb.mxu1 %v7396_v62  ;;  %3594 = vmatmul.bf16.vlgmr.msra.gmra.mxu3 %v9013_v59  ;;  %v7299_v25 = vld [vmem:[#allocation9 + $0xb08] sm:$0xf]  ;;  %v7012_v6 = vor.u32 %v8163_v19, %v7011_v18  ;;  %v5893_v62 = vld [vmem:[#allocation9 + $0x28] sm:$0xf0] }
 0x167   :  { %3638 = vmatpush.bf16.msrb.mxu3 %v6376_v63  ;;  %3627 = vmatpush.bf16.msrb.mxu2 %v6056_v48  ;;  %v8235_v27 = vld [vmem:[#allocation9 + $0xb24] sm:$0xf0]  ;;  %v7141_v48 = vld [vmem:[#allocation9 + $0x9e8] sm:$0xf0]  ;;  %v5896_v5 = vor.u32 %v7879_v51, %v5893_v62 }
 0x168   :  { %3601 = vmatpush.bf16.msrb.mxu0 %v7076_v46  ;;  %v6979_v33 = vld [vmem:[#allocation9 + $0x888] sm:$0xf]  ;;  %v7300_v35 = vor.u32 %v8235_v27, %v7299_v25  ;;  %v6629_v46 = vld [vmem:[#allocation9 + $0x5e8] sm:$0xf0]  ;;  %v7144_v10 = vor.u32 %v8191_v0, %v7141_v48 }
 0x169   :  { %v8155_v34 = vld [vmem:[#allocation9 + $0x8a4] sm:$0xf0]  ;;  %v8127_v25 = vld [vmem:[#allocation9 + $0x7cc] sm:$0xf] }
 0x16a   :  { %3613 = vmatpush.bf16.msrb.mxu1 %v7364_v8  ;;  %v7267_v37 = vld [vmem:[#allocation9 + $0xac8] sm:$0xf]  ;;  %v6980_v41 = vor.u32 %v8155_v34, %v6979_v33  ;;  %v6181_v8 = vld [vmem:[#allocation9 + $0x268] sm:$0xf0] }
 0x16b   :  { %3639 = vmatpush.bf16.msrb.mxu3 %v6344_v9  ;;  %3628 = vmatpush.bf16.msrb.mxu2 %v6024_v11  ;;  %v8227_v39 = vld [vmem:[#allocation9 + $0xae4] sm:$0xf0]  ;;  %v6632_v11 = vor.u32 %v8063_v3, %v6629_v46  ;;  %v6184_v16 = vor.u32 %v7951_v7, %v6181_v8  ;;  %v6885_v27 = vld [vmem:[#allocation9 + $0x7e8] sm:$0xf0] }
 0x16c   :  { %3602 = vmatpush.bf16.msrb.mxu0 %v7044_v15  ;;  %v6947_v45 = vld [vmem:[#allocation9 + $0x848] sm:$0xf]  ;;  %v7268_v49 = vor.u32 %v8227_v39, %v7267_v37  ;;  %v7397_v29 = vld [vmem:[#allocation9 + $0xbe8] sm:$0xf0] }
 0x16d   :  { %v8147_v47 = vld [vmem:[#allocation9 + $0x864] sm:$0xf0]  ;;  %v8175_v31 = vld [vmem:[#allocation9 + $0x94c] sm:$0xf] }
 0x16e   :  { %3614 = vmatpush.bf16.msrb.mxu1 %v7332_v23  ;;  %v7235_v52 = vld [vmem:[#allocation9 + $0xa88] sm:$0xf]  ;;  %v6948_v60 = vor.u32 %v8147_v47, %v6947_v45  ;;  %v7943_v23 = vld [vmem:[#allocation9 + $0x20c] sm:$0xf] }
 0x16f   :  { %3640 = vmatpush.bf16.msrb.mxu3 %v6312_v24  ;;  %3629 = vmatpush.bf16.msrb.mxu2 %v5992_v26  ;;  %v8219_v54 = vld [vmem:[#allocation9 + $0xaa4] sm:$0xf0]  ;;  %v6149_v24 = vld [vmem:[#allocation9 + $0x228] sm:$0xf0]  ;;  %v7112_v26 = vor.u32 %v8183_v13, %v7109_v14 }
 0x170   :  { %3603 = vmatpush.bf16.msrb.mxu0 %v7012_v6  ;;  %v6915_v61 = vld [vmem:[#allocation9 + $0x808] sm:$0xf]  ;;  %v7236_v1 = vor.u32 %v8219_v54, %v7235_v52  ;;  %v6600_v6 = vor.u32 %v8055_v12, %v6597_v17  ;;  %v7077_v32 = vld [vmem:[#allocation9 + $0x968] sm:$0xf0]  ;;  %v6152_v34 = vor.u32 %v7943_v23, %v6149_v24 }
 0x171   :  { %v8139_v63 = vld [vmem:[#allocation9 + $0x824] sm:$0xf0]  ;;  %v8047_v37 = vld [vmem:[#allocation9 + $0x54c] sm:$0xf]  ;;  %v7080_v40 = vor.u32 %v8175_v31, %v7077_v32 }
 0x172   :  { %3615 = vmatpush.bf16.msrb.mxu1 %v7300_v35  ;;  %v7203_v4 = vld [vmem:[#allocation9 + $0xa48] sm:$0xf]  ;;  %v6916_v9 = vor.u32 %v8139_v63, %v6915_v61  ;;  %v6888_v35 = vor.u32 %v8127_v25, %v6885_v27  ;;  %v8119_v39 = vld [vmem:[#allocation9 + $0x78c] sm:$0xf] }
 0x173   :  { %3641 = vmatpush.bf16.msrb.mxu3 %v6280_v36  ;;  %3630 = vmatpush.bf16.msrb.mxu2 %v5960_v38  ;;  %v8211_v22 = vld [vmem:[#allocation9 + $0xa64] sm:$0xf0]  ;;  %v7400_v36 = vor.u32 %v8255_v28, %v7397_v29  ;;  %v6565_v38 = vld [vmem:[#allocation9 + $0x568] sm:$0xf0] }
 0x174   :  { %3604 = vmatpush.bf16.msrb.mxu0 %v6980_v41  ;;  %v7204_v15 = vor.u32 %v8211_v22, %v7203_v4  ;;  %v7171_v18 = vld [vmem:[#allocation9 + $0xa08] sm:$0xf]  ;;  %v6853_v20 = vld [vmem:[#allocation9 + $0x7a8] sm:$0xf0]  ;;  %v6568_v47 = vor.u32 %v8047_v37, %v6565_v38 }
 0x175   :  { %v8203_v19 = vld [vmem:[#allocation9 + $0xa24] sm:$0xf0]  ;;  %v8247_v41 = vld [vmem:[#allocation9 + $0xb8c] sm:$0xf]  ;;  %v6856_v52 = vor.u32 %v8119_v39, %v6853_v20 }
 0x176   :  { %3616 = vmatpush.bf16.msrb.mxu1 %v7268_v49  ;;  %v7172_v33 = vor.u32 %v8203_v19, %v7171_v18  ;;  %v7365_v42 = vld [vmem:[#allocation9 + $0xba8] sm:$0xf0]  ;;  %v9044_v49 = vld [vmem:[#allocation11] sm:$0xff] }
 0x177   :  { %3642 = vmatpush.bf16.msrb.mxu3 %v6248_v50  ;;  %3631 = vmatpush.bf16.msrb.mxu2 %v5928_v53  ;;  %v8167_v43 = vld [vmem:[#allocation9 + $0x90c] sm:$0xf]  ;;  %v7368_v53 = vor.u32 %v8247_v41, %v7365_v42  ;;  %v1455_v63 = vperm.slane %v9044_v49, 0 }
 0x178   :  { %3605 = vmatpush.bf16.msrb.mxu0 %v6948_v60  ;;  %v7045_v45 = vld [vmem:[#allocation9 + $0x928] sm:$0xf0] }
 0x179   :  { %v8039_v54 = vld [vmem:[#allocation9 + $0x50c] sm:$0xf]  ;;  %v7048_v60 = vor.u32 %v8167_v43, %v7045_v45  ;;  %v6635_v45 = vld [vmem:[#allocation9 + $0x5d0] sm:$0xf] }
 0x17a   :  { %3617 = vmatpush.bf16.msrb.mxu1 %v7236_v1  ;;  %v3400_v50 = vpop.f32.mrf.mxu0  ;;  %v6533_v56 = vld [vmem:[#allocation9 + $0x528] sm:$0xf0] }
 0x17b   :  { %3643 = vmatpush.bf16.msrb.mxu3 %v6216_v44  ;;  %3632 = vmatpush.bf16.msrb.mxu2 %v5896_v5  ;;  %v8111_v58 = vld [vmem:[#allocation9 + $0x74c] sm:$0xf]  ;;  %v6536_v1 = vor.u32 %v8039_v54, %v6533_v56  ;;  %v6123_v56 = vld [vmem:[#allocation9 + $0x1d0] sm:$0xf] }
 0x17c   :  { %3606 = vmatpush.bf16.msrb.mxu0 %v6916_v9  ;;  %v6821_v61 = vld [vmem:[#allocation9 + $0x768] sm:$0xf0] }
 0x17d   :  { %v8239_v51 = vld [vmem:[#allocation9 + $0xb4c] sm:$0xf]  ;;  %v6824_v44 = vor.u32 %v8111_v58, %v6821_v61 }
 0x17e   :  { %3618 = vmatpush.bf16.msrb.mxu1 %v7204_v15  ;;  %3633 = vmatmul.bf16.vlgmr.msrb.gmra.mxu2 %v8982_v2  ;;  %v7333_v62 = vld [vmem:[#allocation9 + $0xb68] sm:$0xf0] }
 0x17f   :  { %3677 = vmatpush.bf16.msra.mxu2 %v7144_v10  ;;  %3644 = vmatpush.bf16.msrb.mxu3 %v6184_v16  ;;  %v8159_v0 = vld [vmem:[#allocation9 + $0x8cc] sm:$0xf]  ;;  %v7336_v3 = vor.u32 %v8239_v51, %v7333_v62  ;;  %v3401_v10 = vadd.f32 %v3400_v50, %v1455_v63 }
 0x180   :  { %3651 = vmatpush.bf16.msra.mxu0 %v6632_v11  ;;  %v7013_v48 = vld [vmem:[#allocation9 + $0x8e8] sm:$0xf0] }
 0x181   :  { %3607 = vmatmul.bf16.vlgmr.msrb.gmra.mxu0 %v9027_v55  ;;  %v8031_v46 = vld [vmem:[#allocation9 + $0x4cc] sm:$0xf]  ;;  %v7016_v22 = vor.u32 %v8159_v0, %v7013_v48 }
 0x182   :  { %3619 = vmatpush.bf16.msrb.mxu1 %v7172_v33  ;;  %v6501_v4 = vld [vmem:[#allocation9 + $0x4e8] sm:$0xf0]  ;;  %v3413_v13 = vpop.f32.mrf.mxu1  ;;  %v3402_v16 = vpop.f32.mrf.mxu0 }
 0x183   :  { %3678 = vmatpush.bf16.msra.mxu2 %v7112_v26  ;;  %3645 = vmatpush.bf16.msrb.mxu3 %v6152_v34  ;;  %v8103_v5 = vld [vmem:[#allocation9 + $0x70c] sm:$0xf]  ;;  %v6504_v14 = vor.u32 %v8031_v46, %v6501_v4  ;;  %v9049_v15 = vadd.f32 %v3413_v13, %v3401_v10  ;;  %v6091_v4 = vld [vmem:[#allocation9 + $0x190] sm:$0xf] }
 0x184   :  { %3652 = vmatpush.bf16.msra.mxu0 %v6600_v6  ;;  %v6789_v7 = vld [vmem:[#allocation9 + $0x728] sm:$0xf0]  ;;  %v8004_v13 = vld [vmem:[#allocation9 + $0x3ec] sm:$0xf0] }
 0x185   :  { %3620 = vmatmul.bf16.vlgmr.msrb.gmra.mxu1 %v9032_v21  ;;  %v8231_v8 = vld [vmem:[#allocation9 + $0xb0c] sm:$0xf]  ;;  %v6792_v17 = vor.u32 %v8103_v5, %v6789_v7  ;;  %v7932_v5 = vld [vmem:[#allocation9 + $0x1ac] sm:$0xf0] }
 0x186   :  { %3664 = vmatpush.bf16.msra.mxu1 %v6888_v35  ;;  %3646 = vmatmul.bf16.vlgmr.msrb.gmra.mxu3 %v8989_v30  ;;  %v7301_v9 = vld [vmem:[#allocation9 + $0xb28] sm:$0xf0]  ;;  %v8132_v16 = vld [vmem:[#allocation9 + $0x7ec] sm:$0xf0] }
 0x187   :  { %3690 = vmatpush.bf16.msra.mxu3 %v7400_v36  ;;  %3679 = vmatpush.bf16.msra.mxu2 %v7080_v40  ;;  %v8151_v11 = vld [vmem:[#allocation9 + $0x88c] sm:$0xf]  ;;  %v7304_v18 = vor.u32 %v8231_v8, %v7301_v9 }
 0x188   :  { %3653 = vmatpush.bf16.msra.mxu0 %v6568_v47  ;;  %v6981_v12 = vld [vmem:[#allocation9 + $0x8a8] sm:$0xf0]  ;;  %v8068_v47 = vld [vmem:[#allocation9 + $0x5ec] sm:$0xf0] }
 0x189   :  { %v8023_v19 = vld [vmem:[#allocation9 + $0x48c] sm:$0xf]  ;;  %v6984_v25 = vor.u32 %v8151_v11, %v6981_v12  ;;  %v6636_v62 = vor.u32 %v8068_v47, %v6635_v45  ;;  %v6379_v12 = vld [vmem:[#allocation9 + $0x3d0] sm:$0xf] }
 0x18a   :  { %3665 = vmatpush.bf16.msra.mxu1 %v6856_v52  ;;  %v6469_v23 = vld [vmem:[#allocation9 + $0x4a8] sm:$0xf0]  ;;  %v3415_v42 = vpop.f32.mrf.mxu1  ;;  %v8116_v45 = vld [vmem:[#allocation9 + $0x76c] sm:$0xf0] }
 0x18b   :  { %3691 = vmatpush.bf16.msra.mxu3 %v7368_v53  ;;  %3680 = vmatpush.bf16.msra.mxu2 %v7048_v60  ;;  %v8095_v24 = vld [vmem:[#allocation9 + $0x6cc] sm:$0xf]  ;;  %v6472_v31 = vor.u32 %v8023_v19, %v6469_v23  ;;  %v7940_v60 = vld [vmem:[#allocation9 + $0x1ec] sm:$0xf0]  ;;  %v6092_v19 = vor.u32 %v7932_v5, %v6091_v4 }
 0x18c   :  { %3654 = vmatpush.bf16.msra.mxu0 %v6536_v1  ;;  %v6757_v26 = vld [vmem:[#allocation9 + $0x6e8] sm:$0xf0]  ;;  %v6603_v1 = vld [vmem:[#allocation9 + $0x590] sm:$0xf] }
 0x18d   :  { %v8223_v27 = vld [vmem:[#allocation9 + $0xacc] sm:$0xf]  ;;  %v6760_v32 = vor.u32 %v8095_v24, %v6757_v26  ;;  %v6059_v26 = vld [vmem:[#allocation9 + $0x150] sm:$0xf] }
 0x18e   :  { %3666 = vmatpush.bf16.msra.mxu1 %v6824_v44  ;;  %v7269_v28 = vld [vmem:[#allocation9 + $0xae8] sm:$0xf0]  ;;  %v8060_v44 = vld [vmem:[#allocation9 + $0x5ac] sm:$0xf0] }
 0x18f   :  { %3692 = vmatpush.bf16.msra.mxu3 %v7336_v3  ;;  %3681 = vmatpush.bf16.msra.mxu2 %v7016_v22  ;;  %v8143_v29 = vld [vmem:[#allocation9 + $0x84c] sm:$0xf]  ;;  %v7272_v33 = vor.u32 %v8223_v27, %v7269_v28  ;;  %v6124_v3 = vor.u32 %v7940_v60, %v6123_v56  ;;  %v6604_v11 = vor.u32 %v8060_v44, %v6603_v1  ;;  %v7924_v27 = vld [vmem:[#allocation9 + $0x16c] sm:$0xf0] }
 0x190   :  { %v6949_v6 = vld [vmem:[#allocation9 + $0x868] sm:$0xf0]  ;;  %3655 = vmatpush.bf16.msra.mxu0 %v6504_v14  ;;  %v6891_v14 = vld [vmem:[#allocation9 + $0x7d0] sm:$0xf] }
 0x191   :  { %v8015_v34 = vld [vmem:[#allocation9 + $0x44c] sm:$0xf]  ;;  %v6952_v37 = vor.u32 %v8143_v29, %v6949_v6  ;;  %v6892_v28 = vor.u32 %v8132_v16, %v6891_v14  ;;  %v6347_v6 = vld [vmem:[#allocation9 + $0x390] sm:$0xf] }
 0x192   :  { %3667 = vmatpush.bf16.msra.mxu1 %v6792_v17  ;;  %v6437_v35 = vld [vmem:[#allocation9 + $0x468] sm:$0xf0]  ;;  %v6571_v17 = vld [vmem:[#allocation9 + $0x550] sm:$0xf] }
 0x193   :  { %3693 = vmatpush.bf16.msra.mxu3 %v7304_v18  ;;  %v8087_v36 = vld [vmem:[#allocation9 + $0x68c] sm:$0xf]  ;;  %3682 = vmatpush.bf16.msra.mxu2 %v6984_v25  ;;  %v6440_v43 = vor.u32 %v8015_v34, %v6437_v35  ;;  %v8052_v18 = vld [vmem:[#allocation9 + $0x56c] sm:$0xf0]  ;;  %v6380_v25 = vor.u32 %v8004_v13, %v6379_v12 }
 0x194   :  { %v6725_v38 = vld [vmem:[#allocation9 + $0x6a8] sm:$0xf0]  ;;  %3656 = vmatpush.bf16.msra.mxu0 %v6472_v31  ;;  %v6572_v29 = vor.u32 %v8052_v18, %v6571_v17  ;;  %v7996_v31 = vld [vmem:[#allocation9 + $0x3ac] sm:$0xf0] }
 0x195   :  { %v8215_v39 = vld [vmem:[#allocation9 + $0xa8c] sm:$0xf]  ;;  %v6728_v50 = vor.u32 %v8087_v36, %v6725_v38  ;;  %v6539_v34 = vld [vmem:[#allocation9 + $0x510] sm:$0xf]  ;;  %v6060_v36 = vor.u32 %v7924_v27, %v6059_v26 }
 0x196   :  { %v7237_v40 = vld [vmem:[#allocation9 + $0xaa8] sm:$0xf0]  ;;  %3668 = vmatpush.bf16.msra.mxu1 %v6760_v32  ;;  %v6859_v32 = vld [vmem:[#allocation9 + $0x790] sm:$0xf] }
 0x197   :  { %v8135_v20 = vld [vmem:[#allocation9 + $0x80c] sm:$0xf]  ;;  %3694 = vmatpush.bf16.msra.mxu3 %v7272_v33  ;;  %v7240_v52 = vor.u32 %v8215_v39, %v7237_v40  ;;  %3683 = vmatpush.bf16.msra.mxu2 %v6952_v37  ;;  %v8124_v33 = vld [vmem:[#allocation9 + $0x7ac] sm:$0xf0]  ;;  %v6348_v37 = vor.u32 %v7996_v31, %v6347_v6 }
 0x198   :  { %v6917_v41 = vld [vmem:[#allocation9 + $0x828] sm:$0xf0]  ;;  %3657 = vmatpush.bf16.msra.mxu0 %v6440_v43  ;;  %v8044_v35 = vld [vmem:[#allocation9 + $0x52c] sm:$0xf0]  ;;  %v6860_v40 = vor.u32 %v8124_v33, %v6859_v32  ;;  %v7936_v33 = vld [vmem:[#allocation9 + $0x1d4] sm:$0xf] }
 0x199   :  { %v8007_v53 = vld [vmem:[#allocation9 + $0x40c] sm:$0xf]  ;;  %v6920_v58 = vor.u32 %v8135_v20, %v6917_v41  ;;  %v6027_v38 = vld [vmem:[#allocation9 + $0x110] sm:$0xf]  ;;  %v6540_v20 = vor.u32 %v8044_v35, %v6539_v34  ;;  %v6125_v34 = vld [vmem:[#allocation9 + $0x1f0] sm:$0xf0] }
 0x19a   :  { %v6405_v54 = vld [vmem:[#allocation9 + $0x428] sm:$0xf0]  ;;  %3669 = vmatpush.bf16.msra.mxu1 %v6728_v50  ;;  %v7916_v39 = vld [vmem:[#allocation9 + $0x12c] sm:$0xf0] }
 0x19b   :  { %v8079_v61 = vld [vmem:[#allocation9 + $0x64c] sm:$0xf]  ;;  %v6408_v48 = vor.u32 %v8007_v53, %v6405_v54  ;;  %3695 = vmatpush.bf16.msra.mxu3 %v7240_v52  ;;  %3684 = vmatpush.bf16.msra.mxu2 %v6920_v58  ;;  %v6315_v41 = vld [vmem:[#allocation9 + $0x350] sm:$0xf]  ;;  %v6028_v52 = vor.u32 %v7916_v39, %v6027_v38 }
 0x19c   :  { %v6693_v51 = vld [vmem:[#allocation9 + $0x668] sm:$0xf0]  ;;  %v7988_v42 = vld [vmem:[#allocation9 + $0x36c] sm:$0xf0] }
 0x19d   :  { %v8207_v63 = vld [vmem:[#allocation9 + $0xa4c] sm:$0xf]  ;;  %v6696_v46 = vor.u32 %v8079_v61, %v6693_v51  ;;  %3658 = vmatpush.bf16.msra.mxu0 %v6408_v48  ;;  %v6827_v43 = vld [vmem:[#allocation9 + $0x750] sm:$0xf]  ;;  %v6316_v53 = vor.u32 %v7988_v42, %v6315_v41 }
 0x19e   :  { %v7205_v0 = vld [vmem:[#allocation9 + $0xa68] sm:$0xf0]  ;;  %3685 = vmatmul.bf16.vlgmr.msra.gmra.mxu2 %v9027_v55  ;;  %v6507_v47 = vld [vmem:[#allocation9 + $0x4d0] sm:$0xf]  ;;  %v6828_v58 = vor.u32 %v8116_v45, %v6827_v43  ;;  %v6128_v43 = vor.u32 %v7936_v33, %v6125_v34 }
 0x19f   :  { %v8071_v22 = vld [vmem:[#allocation9 + $0x60c] sm:$0xf]  ;;  %v7208_v7 = vor.u32 %v8207_v63, %v7205_v0  ;;  %3729 = vmatpush.bf16.msrb.mxu2 %v6636_v62  ;;  %3670 = vmatpush.bf16.msra.mxu1 %v6696_v46  ;;  %v8036_v50 = vld [vmem:[#allocation9 + $0x4ec] sm:$0xf0] }
 0x1a0   :  { %v6661_v8 = vld [vmem:[#allocation9 + $0x628] sm:$0xf0]  ;;  %3659 = vmatmul.bf16.vlgmr.msra.gmra.mxu0 %v9004_v57  ;;  %v5995_v54 = vld [vmem:[#allocation9 + $0xd0] sm:$0xf]  ;;  %v6508_v60 = vor.u32 %v8036_v50, %v6507_v47  ;;  %v3426_v1 = vpop.f32.mrf.mxu2 }
 0x1a1   :  { %v8199_v9 = vld [vmem:[#allocation9 + $0xa0c] sm:$0xf]  ;;  %3703 = vmatpush.bf16.msrb.mxu0 %v6124_v3  ;;  %v6664_v23 = vor.u32 %v8071_v22, %v6661_v8  ;;  %3696 = vmatpush.bf16.msra.mxu3 %v7208_v7  ;;  %v7908_v56 = vld [vmem:[#allocation9 + $0xec] sm:$0xf0]  ;;  %v3427_v3 = vadd.f32 %v3426_v1, %v9049_v15 }
 0x1a2   :  { %v7173_v10 = vld [vmem:[#allocation9 + $0xa28] sm:$0xf0]  ;;  %v6283_v61 = vld [vmem:[#allocation9 + $0x310] sm:$0xf]  ;;  %v5996_v44 = vor.u32 %v7908_v56, %v5995_v54 }
 0x1a3   :  { %v7176_v24 = vor.u32 %v8199_v9, %v7173_v10  ;;  %3730 = vmatpush.bf16.msrb.mxu2 %v6604_v11  ;;  %3671 = vmatpush.bf16.msra.mxu1 %v6664_v23  ;;  %v7980_v51 = vld [vmem:[#allocation9 + $0x32c] sm:$0xf0] }
 0x1a4   :  { %v6795_v62 = vld [vmem:[#allocation9 + $0x710] sm:$0xf]  ;;  %v6284_v46 = vor.u32 %v7980_v51, %v6283_v61 }
 0x1a5   :  { %3704 = vmatpush.bf16.msrb.mxu0 %v6092_v19  ;;  %3697 = vmatpush.bf16.msra.mxu3 %v7176_v24  ;;  %v8108_v63 = vld [vmem:[#allocation9 + $0x72c] sm:$0xf0] }
 0x1a6   :  { %3672 = vmatmul.bf16.vlgmr.msra.gmra.mxu1 %v9013_v59  ;;  %v6475_v0 = vld [vmem:[#allocation9 + $0x490] sm:$0xf]  ;;  %v6796_v22 = vor.u32 %v8108_v63, %v6795_v62 }
 0x1a7   :  { %3716 = vmatpush.bf16.msrb.mxu1 %v6380_v25  ;;  %3731 = vmatpush.bf16.msrb.mxu2 %v6572_v29  ;;  %v8028_v48 = vld [vmem:[#allocation9 + $0x4ac] sm:$0xf0] }
 0x1a8   :  { %3698 = vmatmul.bf16.vlgmr.msra.gmra.mxu3 %v9032_v21  ;;  %v5963_v4 = vld [vmem:[#allocation9 + $0x90] sm:$0xf]  ;;  %v6476_v7 = vor.u32 %v8028_v48, %v6475_v0  ;;  %v3439_v26 = vpop.f32.mrf.mxu3  ;;  %v3428_v31 = vpop.f32.mrf.mxu2 }
 0x1a9   :  { %3742 = vmatpush.bf16.msrb.mxu3 %v6892_v28  ;;  %3705 = vmatpush.bf16.msrb.mxu0 %v6060_v36  ;;  %v7900_v5 = vld [vmem:[#allocation9 + $0xac] sm:$0xf0]  ;;  %v9056_v6 = vadd.f32 %v3439_v26, %v3427_v3 }
 0x1aa   :  { %v6251_v8 = vld [vmem:[#allocation9 + $0x2d0] sm:$0xf]  ;;  %v5964_v14 = vor.u32 %v7900_v5, %v5963_v4  ;;  %v6381_v5 = vld [vmem:[#allocation9 + $0x3f0] sm:$0xf0] }
 0x1ab   :  { %3717 = vmatpush.bf16.msrb.mxu1 %v6348_v37  ;;  %3732 = vmatpush.bf16.msrb.mxu2 %v6540_v20  ;;  %v7972_v9 = vld [vmem:[#allocation9 + $0x2ec] sm:$0xf0] }
 0x1ac   :  { %v6763_v10 = vld [vmem:[#allocation9 + $0x6d0] sm:$0xf]  ;;  %v6252_v16 = vor.u32 %v7972_v9, %v6251_v8 }
 0x1ad   :  { %3743 = vmatpush.bf16.msrb.mxu3 %v6860_v40  ;;  %3706 = vmatpush.bf16.msrb.mxu0 %v6028_v52  ;;  %v8100_v11 = vld [vmem:[#allocation9 + $0x6ec] sm:$0xf0]  ;;  %v7928_v52 = vld [vmem:[#allocation9 + $0x194] sm:$0xf] }
 0x1ae   :  { %v6443_v12 = vld [vmem:[#allocation9 + $0x450] sm:$0xf]  ;;  %v6764_v15 = vor.u32 %v8100_v11, %v6763_v10  ;;  %v1456_v10 = vperm.slane %v9044_v49, 1 }
 0x1af   :  { %3718 = vmatpush.bf16.msrb.mxu1 %v6316_v53  ;;  %3733 = vmatpush.bf16.msrb.mxu2 %v6508_v60  ;;  %v8020_v13 = vld [vmem:[#allocation9 + $0x46c] sm:$0xf0]  ;;  %v6093_v53 = vld [vmem:[#allocation9 + $0x1b0] sm:$0xf0] }
 0x1b0   :  { %v5931_v17 = vld [vmem:[#allocation9 + $0x50] sm:$0xf]  ;;  %v6444_v19 = vor.u32 %v8020_v13, %v6443_v12  ;;  %v3441_v48 = vpop.f32.mrf.mxu3  ;;  %v6096_v1 = vor.u32 %v7928_v52, %v6093_v53  ;;  %v3478_v4 = vpop.f32.mrf.mxu2 }
 0x1b1   :  { %3744 = vmatpush.bf16.msrb.mxu3 %v6828_v58  ;;  %3707 = vmatpush.bf16.msrb.mxu0 %v5996_v44  ;;  %v7892_v18 = vld [vmem:[#allocation9 + $0x6c] sm:$0xf0] }
 0x1b2   :  { %v6219_v23 = vld [vmem:[#allocation9 + $0x290] sm:$0xf]  ;;  %v5932_v32 = vor.u32 %v7892_v18, %v5931_v17 }
 0x1b3   :  { %3719 = vmatpush.bf16.msrb.mxu1 %v6284_v46  ;;  %3734 = vmatpush.bf16.msrb.mxu2 %v6476_v7  ;;  %v7964_v24 = vld [vmem:[#allocation9 + $0x2ac] sm:$0xf0]  ;;  %v8000_v46 = vld [vmem:[#allocation9 + $0x3d4] sm:$0xf] }
 0x1b4   :  { %v6731_v25 = vld [vmem:[#allocation9 + $0x690] sm:$0xf]  ;;  %v6220_v35 = vor.u32 %v7964_v24, %v6219_v23  ;;  %v6061_v7 = vld [vmem:[#allocation9 + $0x170] sm:$0xf0] }
 0x1b5   :  { %3745 = vmatpush.bf16.msrb.mxu3 %v6796_v22  ;;  %v8092_v27 = vld [vmem:[#allocation9 + $0x6ac] sm:$0xf0]  ;;  %3708 = vmatpush.bf16.msrb.mxu0 %v5964_v14  ;;  %v7920_v22 = vld [vmem:[#allocation9 + $0x154] sm:$0xf] }
 0x1b6   :  { %v6411_v28 = vld [vmem:[#allocation9 + $0x410] sm:$0xf]  ;;  %v6732_v39 = vor.u32 %v8092_v27, %v6731_v25  ;;  %v6064_v17 = vor.u32 %v7920_v22, %v6061_v7  ;;  %v6349_v23 = vld [vmem:[#allocation9 + $0x3b0] sm:$0xf0]  ;;  %v3479_v27 = vadd.f32 %v3478_v4, %v1456_v10 }
 0x1b7   :  { %v8012_v29 = vld [vmem:[#allocation9 + $0x42c] sm:$0xf0]  ;;  %3720 = vmatpush.bf16.msrb.mxu1 %v6252_v16  ;;  %3735 = vmatpush.bf16.msrb.mxu2 %v6444_v19  ;;  %v6384_v16 = vor.u32 %v8000_v46, %v6381_v5  ;;  %v7992_v19 = vld [vmem:[#allocation9 + $0x394] sm:$0xf] }
 0x1b8   :  { %v5899_v36 = vld [vmem:[#allocation9 + $0x10] sm:$0xf]  ;;  %v6412_v40 = vor.u32 %v8012_v29, %v6411_v28  ;;  %v7912_v24 = vld [vmem:[#allocation9 + $0x114] sm:$0xf]  ;;  %v6352_v34 = vor.u32 %v7992_v19, %v6349_v23 }
 0x1b9   :  { %v7884_v37 = vld [vmem:[#allocation9 + $0x2c] sm:$0xf0]  ;;  %3746 = vmatpush.bf16.msrb.mxu3 %v6764_v15  ;;  %3709 = vmatpush.bf16.msrb.mxu0 %v5932_v32  ;;  %v6029_v25 = vld [vmem:[#allocation9 + $0x130] sm:$0xf0]  ;;  %v3491_v32 = vpop.f32.mrf.mxu3 }
 0x1ba   :  { %v7147_v38 = vld [vmem:[#allocation9 + $0x9d0] sm:$0xf]  ;;  %v5900_v50 = vor.u32 %v7884_v37, %v5899_v36  ;;  %v3452_v33 = vpop.f32.mrf.mxu0  ;;  %v6253_v10 = vld [vmem:[#allocation9 + $0x2f0] sm:$0xf0] }
 0x1bb   :  { %v8196_v20 = vld [vmem:[#allocation9 + $0x9ec] sm:$0xf0]  ;;  %3721 = vmatpush.bf16.msrb.mxu1 %v6220_v35  ;;  %3736 = vmatpush.bf16.msrb.mxu2 %v6412_v40  ;;  %v6032_v35 = vor.u32 %v7912_v24, %v6029_v25  ;;  %v3453_v40 = vadd.f32 %v3452_v33, %v9056_v6  ;;  %v6285_v6 = vld [vmem:[#allocation9 + $0x330] sm:$0xf0] }
 0x1bc   :  { %v6187_v41 = vld [vmem:[#allocation9 + $0x250] sm:$0xf]  ;;  %v7148_v54 = vor.u32 %v8196_v20, %v7147_v38  ;;  %v7984_v38 = vld [vmem:[#allocation9 + $0x354] sm:$0xf]  ;;  %v3480_v20 = vpop.f32.mrf.mxu2 }
 0x1bd   :  { %v7956_v42 = vld [vmem:[#allocation9 + $0x26c] sm:$0xf0]  ;;  %3747 = vmatpush.bf16.msrb.mxu3 %v6732_v39  ;;  %3710 = vmatpush.bf16.msrb.mxu0 %v5900_v50  ;;  %v9061_v39 = vadd.f32 %v3491_v32, %v3479_v27  ;;  %v7960_v24 = vld [vmem:[#allocation9 + $0x294] sm:$0xf]  ;;  %v8820_v32 = vmov 1.4142135  }
 0x1be   :  { %v6699_v45 = vld [vmem:[#allocation9 + $0x650] sm:$0xf]  ;;  %v6188_v56 = vor.u32 %v7956_v42, %v6187_v41  ;;  %3737 = vmatmul.bf16.vlgmr.msrb.gmra.mxu2 %v9004_v57  ;;  %v6317_v41 = vld [vmem:[#allocation9 + $0x370] sm:$0xf0]  ;;  %8390 = vrcp.f32 %v8820_v32 }
 0x1bf   :  { %v8084_v47 = vld [vmem:[#allocation9 + $0x66c] sm:$0xf0]  ;;  %3781 = vmatpush.bf16.msra.mxu2 %v6128_v43  ;;  %v7904_v42 = vld [vmem:[#allocation9 + $0xd4] sm:$0xf]  ;;  %v6320_v53 = vor.u32 %v7984_v38, %v6317_v41 }
 0x1c0   :  { %v7115_v58 = vld [vmem:[#allocation9 + $0x990] sm:$0xf]  ;;  %v6700_v51 = vor.u32 %v8084_v47, %v6699_v45  ;;  %3722 = vmatpush.bf16.msrb.mxu1 %v6188_v56  ;;  %3711 = vmatmul.bf16.vlgmr.msrb.gmra.mxu0 %v8982_v2  ;;  %v5997_v43 = vld [vmem:[#allocation9 + $0xf0] sm:$0xf0] }
 0x1c1   :  { %v8188_v60 = vld [vmem:[#allocation9 + $0x9ac] sm:$0xf0]  ;;  %3755 = vmatpush.bf16.msra.mxu0 %v7148_v54  ;;  %v6000_v54 = vor.u32 %v7904_v42, %v5997_v43  ;;  %v6221_v25 = vld [vmem:[#allocation9 + $0x2b0] sm:$0xf0] }
 0x1c2   :  { %v6155_v61 = vld [vmem:[#allocation9 + $0x210] sm:$0xf]  ;;  %v7116_v8 = vor.u32 %v8188_v60, %v7115_v58  ;;  %3748 = vmatpush.bf16.msrb.mxu3 %v6700_v51  ;;  %v7976_v60 = vld [vmem:[#allocation9 + $0x314] sm:$0xf]  ;;  %v3454_v46 = vpop.f32.mrf.mxu0 }
 0x1c3   :  { %v7948_v62 = vld [vmem:[#allocation9 + $0x22c] sm:$0xf0]  ;;  %3782 = vmatpush.bf16.msra.mxu2 %v6096_v1  ;;  %v5965_v51 = vld [vmem:[#allocation9 + $0xb0] sm:$0xf0]  ;;  %v6288_v4 = vor.u32 %v7976_v60, %v6285_v6 }
 0x1c4   :  { %v6667_v63 = vld [vmem:[#allocation9 + $0x610] sm:$0xf]  ;;  %v6156_v9 = vor.u32 %v7948_v62, %v6155_v61  ;;  %v7896_v61 = vld [vmem:[#allocation9 + $0x94] sm:$0xf]  ;;  %v9073_v46 = vpop.eup %8390 }
 0x1c5   :  { %v8076_v0 = vld [vmem:[#allocation9 + $0x62c] sm:$0xf0]  ;;  %3756 = vmatpush.bf16.msra.mxu0 %v7116_v8  ;;  %v5968_v5 = vor.u32 %v7896_v61, %v5965_v51  ;;  %v7968_v8 = vld [vmem:[#allocation9 + $0x2d4] sm:$0xf]  ;;  %vm4028_vm0 = vweird.f32 %v9073_v46 }
 0x1c6   :  { %v7403_v44 = vld [vmem:[#allocation9 + $0xbd0] sm:$0xf]  ;;  %v6668_v11 = vor.u32 %v8076_v0, %v6667_v63  ;;  %3723 = vmatpush.bf16.msrb.mxu1 %v6156_v9  ;;  %v3465_v63 = vpop.f32.mrf.mxu1  ;;  %v9068_v9 = vpop.f32.mrf.mxu2  ;;  %v5901_v27 = vld [vmem:[#allocation9 + $0x30] sm:$0xf0] }
 0x1c7   :  { %v8260_v3 = vld [vmem:[#allocation9 + $0xbec] sm:$0xf0]  ;;  %3783 = vmatpush.bf16.msra.mxu2 %v6064_v17  ;;  %v6637_v41 = vld [vmem:[#allocation9 + $0x5f0] sm:$0xf0] }
 0x1c8   :  { %v7404_v12 = vor.u32 %v8260_v3, %v7403_v44  ;;  %v7083_v13 = vld [vmem:[#allocation9 + $0x950] sm:$0xf]  ;;  %3749 = vmatpush.bf16.msrb.mxu3 %v6668_v11  ;;  %v9066_v44 = vadd.f32 %v3465_v63, %v3453_v40  ;;  %v3493_v3 = vpop.f32.mrf.mxu3  ;;  %v7888_v11 = vld [vmem:[#allocation9 + $0x54] sm:$0xf]  ;;  %v6224_v40 = vor.u32 %v7960_v24, %v6221_v25 }
 0x1c9   :  { %v8180_v14 = vld [vmem:[#allocation9 + $0x96c] sm:$0xf0]  ;;  %3724 = vmatmul.bf16.vlgmr.msrb.gmra.mxu1 %v8989_v30  ;;  %v7117_v60 = vld [vmem:[#allocation9 + $0x9b0] sm:$0xf0] }
 0x1ca   :  { %v7371_v18 = vld [vmem:[#allocation9 + $0xb90] sm:$0xf]  ;;  %v7084_v26 = vor.u32 %v8180_v14, %v7083_v13  ;;  %3768 = vmatpush.bf16.msra.mxu1 %v7404_v12  ;;  %v5933_v12 = vld [vmem:[#allocation9 + $0x70] sm:$0xf0] }
 0x1cb   :  { %v8252_v15 = vld [vmem:[#allocation9 + $0xbac] sm:$0xf0]  ;;  %3750 = vmatmul.bf16.vlgmr.msrb.gmra.mxu3 %v9013_v59  ;;  %3784 = vmatpush.bf16.msra.mxu2 %v6032_v35  ;;  %v8056_v51 = vld [vmem:[#allocation9 + $0x594] sm:$0xf] }
 0x1cc   :  { %v7372_v28 = vor.u32 %v8252_v15, %v7371_v18  ;;  %v7051_v29 = vld [vmem:[#allocation9 + $0x910] sm:$0xf]  ;;  %3794 = vmatpush.bf16.msra.mxu3 %v6384_v16  ;;  %3757 = vmatpush.bf16.msra.mxu0 %v7084_v26  ;;  %v6256_v18 = vor.u32 %v7968_v8, %v6253_v10  ;;  %v5936_v15 = vor.u32 %v7888_v11, %v5933_v12  ;;  %v7880_v26 = vld [vmem:[#allocation9 + $0x14] sm:$0xf] }
 0x1cd   :  { %v8172_v31 = vld [vmem:[#allocation9 + $0x92c] sm:$0xf0]  ;;  %v5904_v20 = vor.u32 %v7880_v26, %v5901_v27  ;;  %v6157_v3 = vld [vmem:[#allocation9 + $0x230] sm:$0xf0] }
 0x1ce   :  { %v7339_v36 = vld [vmem:[#allocation9 + $0xb50] sm:$0xf]  ;;  %v7052_v45 = vor.u32 %v8172_v31, %v7051_v29  ;;  %3769 = vmatpush.bf16.msra.mxu1 %v7372_v28  ;;  %v8192_v29 = vld [vmem:[#allocation9 + $0x9d4] sm:$0xf]  ;;  %v3467_v33 = vpop.f32.mrf.mxu1 }
 0x1cf   :  { %v8244_v37 = vld [vmem:[#allocation9 + $0xb6c] sm:$0xf0]  ;;  %3785 = vmatpush.bf16.msra.mxu2 %v6000_v54  ;;  %v7149_v31 = vld [vmem:[#allocation9 + $0x9f0] sm:$0xf0] }
 0x1d0   :  { %v7340_v47 = vor.u32 %v8244_v37, %v7339_v36  ;;  %v7019_v50 = vld [vmem:[#allocation9 + $0x8d0] sm:$0xf]  ;;  %3795 = vmatpush.bf16.msra.mxu3 %v6352_v34  ;;  %3758 = vmatpush.bf16.msra.mxu0 %v7052_v45  ;;  %v8064_v37 = vld [vmem:[#allocation9 + $0x5d4] sm:$0xf]  ;;  %v9070_v38 = vpop.f32.mrf.mxu3  ;;  %v3504_v45 = vpop.f32.mrf.mxu0 }
 0x1d1   :  { %v8164_v52 = vld [vmem:[#allocation9 + $0x8ec] sm:$0xf0]  ;;  %v3505_v54 = vadd.f32 %v3504_v45, %v9061_v39  ;;  %v6640_v6 = vor.u32 %v8064_v37, %v6637_v41  ;;  %v8128_v39 = vld [vmem:[#allocation9 + $0x7d4] sm:$0xf] }
 0x1d2   :  { %v7307_v56 = vld [vmem:[#allocation9 + $0xb10] sm:$0xf]  ;;  %v7020_v62 = vor.u32 %v8164_v52, %v7019_v50  ;;  %3770 = vmatpush.bf16.msra.mxu1 %v7340_v47  ;;  %v3532_v47 = vpop.f32.mrf.mxu2  ;;  %v7152_v50 = vor.u32 %v8192_v29, %v7149_v31  ;;  %v7952_v52 = vld [vmem:[#allocation9 + $0x254] sm:$0xf] }
 0x1d3   :  { %v8236_v58 = vld [vmem:[#allocation9 + $0xb2c] sm:$0xf0]  ;;  %3786 = vmatpush.bf16.msra.mxu2 %v5968_v5  ;;  %v6893_v5 = vld [vmem:[#allocation9 + $0x7f0] sm:$0xf0] }
 0x1d4   :  { %v7308_v0 = vor.u32 %v8236_v58, %v7307_v56  ;;  %v6987_v48 = vld [vmem:[#allocation9 + $0x890] sm:$0xf]  ;;  %3796 = vmatpush.bf16.msra.mxu3 %v6320_v53  ;;  %3759 = vmatpush.bf16.msra.mxu0 %v7020_v62  ;;  %v6189_v53 = vld [vmem:[#allocation9 + $0x270] sm:$0xf0] }
 0x1d5   :  { %v8156_v1 = vld [vmem:[#allocation9 + $0x8ac] sm:$0xf0]  ;;  %v8184_v58 = vld [vmem:[#allocation9 + $0x994] sm:$0xf] }
 0x1d6   :  { %v7275_v22 = vld [vmem:[#allocation9 + $0xad0] sm:$0xf]  ;;  %v6988_v13 = vor.u32 %v8156_v1, %v6987_v48  ;;  %3771 = vmatpush.bf16.msra.mxu1 %v7308_v0  ;;  %v6605_v62 = vld [vmem:[#allocation9 + $0x5b0] sm:$0xf0]  ;;  %v6192_v0 = vor.u32 %v7952_v52, %v6189_v53  ;;  %v3517_v11 = vpop.f32.mrf.mxu1 }
 0x1d7   :  { %v8228_v7 = vld [vmem:[#allocation9 + $0xaec] sm:$0xf0]  ;;  %3787 = vmatpush.bf16.msra.mxu2 %v5936_v15  ;;  %v7944_v1 = vld [vmem:[#allocation9 + $0x214] sm:$0xf]  ;;  %v6608_v12 = vor.u32 %v8056_v51, %v6605_v62  ;;  %v6896_v15 = vor.u32 %v8128_v39, %v6893_v5  ;;  %v1457_v39 = vperm.slane %v9044_v49, 2 }
 0x1d8   :  { %v7276_v14 = vor.u32 %v8228_v7, %v7275_v22  ;;  %v6955_v16 = vld [vmem:[#allocation9 + $0x850] sm:$0xf]  ;;  %3797 = vmatpush.bf16.msra.mxu3 %v6288_v4  ;;  %3760 = vmatpush.bf16.msra.mxu0 %v6988_v13  ;;  %v7120_v4 = vor.u32 %v8184_v58, %v7117_v60  ;;  %v8256_v22 = vld [vmem:[#allocation9 + $0xbd4] sm:$0xf]  ;;  %v3506_v24 = vpop.f32.mrf.mxu0 }
 0x1d9   :  { %v8148_v17 = vld [vmem:[#allocation9 + $0x86c] sm:$0xf0]  ;;  %v7405_v7 = vld [vmem:[#allocation9 + $0xbf0] sm:$0xf0] }
 0x1da   :  { %v7243_v19 = vld [vmem:[#allocation9 + $0xa90] sm:$0xf]  ;;  %v6956_v28 = vor.u32 %v8148_v17, %v6955_v16  ;;  %3772 = vmatpush.bf16.msra.mxu1 %v7276_v14  ;;  %v8176_v8 = vld [vmem:[#allocation9 + $0x954] sm:$0xf]  ;;  %v4024_v14 = vmul.f32 1.4142135, %v9073_v46  ;;  %v3518_v16 = vadd.f32 %v3517_v11, %v3505_v54  ;;  %v3545_v17 = vpop.f32.mrf.mxu3  ;;  %v7408_v25 = vor.u32 %v8256_v22, %v7405_v7 }
 0x1db   :  { %v8220_v23 = vld [vmem:[#allocation9 + $0xaac] sm:$0xf0]  ;;  %3788 = vmatpush.bf16.msra.mxu2 %v5904_v20  ;;  %v7085_v10 = vld [vmem:[#allocation9 + $0x970] sm:$0xf0] }
 0x1dc   :  { %v7244_v34 = vor.u32 %v8220_v23, %v7243_v19  ;;  %v6923_v35 = vld [vmem:[#allocation9 + $0x810] sm:$0xf]  ;;  %3798 = vmatpush.bf16.msra.mxu3 %v6256_v18  ;;  %3761 = vmatpush.bf16.msra.mxu0 %v6956_v28  ;;  %v6160_v18 = vor.u32 %v7944_v1, %v6157_v3  ;;  %v8048_v19 = vld [vmem:[#allocation9 + $0x554] sm:$0xf]  ;;  %v7088_v26 = vor.u32 %v8176_v8, %v7085_v10 }
 0x1dd   :  { %v8140_v36 = vld [vmem:[#allocation9 + $0x82c] sm:$0xf0]  ;;  %v6573_v23 = vld [vmem:[#allocation9 + $0x570] sm:$0xf0]  ;;  %v9079_v31 = vadd.f32 %v9068_v9, %v3518_v16 }
 0x1de   :  { %v7211_v42 = vld [vmem:[#allocation9 + $0xa50] sm:$0xf]  ;;  %v6924_v56 = vor.u32 %v8140_v36, %v6923_v35  ;;  %3773 = vmatpush.bf16.msra.mxu1 %v7244_v34  ;;  %3789 = vmatmul.bf16.vlgmr.msra.gmra.mxu2 %v8982_v2  ;;  %v8120_v27 = vld [vmem:[#allocation9 + $0x794] sm:$0xf]  ;;  %v6576_v35 = vor.u32 %v8048_v19, %v6573_v23  ;;  %v4025_v36 = vsub.f32 1.0, %v4024_v14  ;;  %v3519_v53 = vpop.f32.mrf.mxu1 }
 0x1df   :  { %v8212_v43 = vld [vmem:[#allocation9 + $0xa6c] sm:$0xf0]  ;;  %3833 = vmatpush.bf16.msrb.mxu2 %v7152_v50  ;;  %v6861_v28 = vld [vmem:[#allocation9 + $0x7b0] sm:$0xf0]  ;;  %v6131_v53 = vld [vmem:[#allocation9 + $0x1d8] sm:$0xf] }
 0x1e0   :  { %v7212_v61 = vor.u32 %v8212_v43, %v7211_v42  ;;  %v7179_v63 = vld [vmem:[#allocation9 + $0xa10] sm:$0xf]  ;;  %3799 = vmatpush.bf16.msra.mxu3 %v6224_v40  ;;  %3762 = vmatpush.bf16.msra.mxu0 %v6924_v56  ;;  %v8248_v29 = vld [vmem:[#allocation9 + $0xb94] sm:$0xf]  ;;  %v6864_v37 = vor.u32 %v8120_v27, %v6861_v28 }
 0x1e1   :  { %v8204_v48 = vld [vmem:[#allocation9 + $0xa2c] sm:$0xf0]  ;;  %v7373_v32 = vld [vmem:[#allocation9 + $0xbb0] sm:$0xf0] }
 0x1e2   :  { %3774 = vmatpush.bf16.msra.mxu1 %v7212_v61  ;;  %v7180_v13 = vor.u32 %v8204_v48, %v7179_v63  ;;  %v8168_v33 = vld [vmem:[#allocation9 + $0x914] sm:$0xf]  ;;  %v7376_v41 = vor.u32 %v8248_v29, %v7373_v32  ;;  %v4026_v48 = vmul.f32 %v9073_v46, %v4025_v36 }
 0x1e3   :  { %3763 = vmatmul.bf16.vlgmr.msra.gmra.mxu0 %v9027_v55  ;;  %3834 = vmatpush.bf16.msrb.mxu2 %v7120_v4  ;;  %v7053_v34 = vld [vmem:[#allocation9 + $0x930] sm:$0xf0]  ;;  %v3582_v19 = vpop.f32.mrf.mxu2 }
 0x1e4   :  { %3807 = vmatpush.bf16.msrb.mxu0 %v6640_v6  ;;  %3800 = vmatpush.bf16.msra.mxu3 %v6192_v0  ;;  %v8040_v40 = vld [vmem:[#allocation9 + $0x514] sm:$0xf]  ;;  %v7056_v42 = vor.u32 %v8168_v33, %v7053_v34  ;;  %v3556_v6 = vpop.f32.mrf.mxu0  ;;  %v4027_v16 = vadd.f32 %v9073_v46, %v4026_v48 }
 0x1e5   :  { %v6541_v20 = vld [vmem:[#allocation9 + $0x530] sm:$0xf0]  ;;  %v3557_v49 = vadd.f32 %v3556_v6, %v1457_v39 }
 0x1e6   :  { %3775 = vmatpush.bf16.msra.mxu1 %v7180_v13  ;;  %v8112_v43 = vld [vmem:[#allocation9 + $0x754] sm:$0xf]  ;;  %v6544_v54 = vor.u32 %v8040_v40, %v6541_v20  ;;  %v3569_v24 = vpop.f32.mrf.mxu1 }
 0x1e7   :  { %3835 = vmatpush.bf16.msrb.mxu2 %v7088_v26  ;;  %v6829_v45 = vld [vmem:[#allocation9 + $0x770] sm:$0xf0]  ;;  %v3570_v28 = vadd.f32 %v3569_v24, %v3557_v49  ;;  %v8133_v49 = vld [vmem:[#allocation9 + $0x7f4] sm:$0xf0]  ;;  %v9104_v24 = vadd.f32 %v9070_v38, %v9079_v31 }
 0x1e8   :  { %3808 = vmatpush.bf16.msrb.mxu0 %v6608_v12  ;;  %3801 = vmatpush.bf16.msra.mxu3 %v6160_v18  ;;  %v8240_v9 = vld [vmem:[#allocation9 + $0xb54] sm:$0xf]  ;;  %v6832_v56 = vor.u32 %v8112_v43, %v6829_v45  ;;  %v6643_v43 = vld [vmem:[#allocation9 + $0x5d8] sm:$0xf] }
 0x1e9   :  { %3776 = vmatmul.bf16.vlgmr.msra.gmra.mxu1 %v9032_v21  ;;  %v7341_v47 = vld [vmem:[#allocation9 + $0xb70] sm:$0xf0]  ;;  %v8069_v45 = vld [vmem:[#allocation9 + $0x5f4] sm:$0xf0] }
 0x1ea   :  { %3820 = vmatpush.bf16.msrb.mxu1 %v6896_v15  ;;  %v8160_v50 = vld [vmem:[#allocation9 + $0x8d4] sm:$0xf]  ;;  %v7344_v61 = vor.u32 %v8240_v9, %v7341_v47  ;;  %v9092_v9 = vadd.f32 %v3582_v19, %v3570_v28  ;;  %v6579_v19 = vld [vmem:[#allocation9 + $0x558] sm:$0xf] }
 0x1eb   :  { %v7021_v52 = vld [vmem:[#allocation9 + $0x8f0] sm:$0xf0]  ;;  %3802 = vmatmul.bf16.vlgmr.msra.gmra.mxu3 %v8989_v30  ;;  %3836 = vmatpush.bf16.msrb.mxu2 %v7056_v42  ;;  %v6355_v31 = vld [vmem:[#allocation9 + $0x398] sm:$0xf] }
 0x1ec   :  { %3846 = vmatpush.bf16.msrb.mxu3 %v7408_v25  ;;  %3809 = vmatpush.bf16.msrb.mxu0 %v6576_v35  ;;  %v8032_v58 = vld [vmem:[#allocation9 + $0x4d4] sm:$0xf]  ;;  %v7024_v51 = vor.u32 %v8160_v50, %v7021_v52  ;;  %v3558_v29 = vpop.f32.mrf.mxu0 }
 0x1ed   :  { %v6509_v60 = vld [vmem:[#allocation9 + $0x4f0] sm:$0xf0] }
 0x1ee   :  { %3821 = vmatpush.bf16.msrb.mxu1 %v6864_v37  ;;  %v8104_v62 = vld [vmem:[#allocation9 + $0x714] sm:$0xf]  ;;  %v6512_v5 = vor.u32 %v8032_v58, %v6509_v60  ;;  %v9090_v37 = vsel %vm4028_vm0, %v9073_v46, %v4027_v16  ;;  %v9098_v46 = vpop.f32.mrf.mxu3  ;;  %v7941_v60 = vld [vmem:[#allocation9 + $0x1f4] sm:$0xf0] }
 0x1ef   :  { %v6797_v63 = vld [vmem:[#allocation9 + $0x730] sm:$0xf0]  ;;  %3837 = vmatpush.bf16.msrb.mxu2 %v7024_v51  ;;  %v6644_v51 = vor.u32 %v8069_v45, %v6643_v43  ;;  %v6132_v39 = vor.u32 %v7941_v60, %v6131_v53  ;;  %v9112_v43 = vmul.f32 %v9090_v37, %v9104_v24  ;;  %v7917_v53 = vld [vmem:[#allocation9 + $0x134] sm:$0xf0] }
 0x1f0   :  { %3847 = vmatpush.bf16.msrb.mxu3 %v7376_v41  ;;  %v8232_v0 = vld [vmem:[#allocation9 + $0xb14] sm:$0xf]  ;;  %3810 = vmatpush.bf16.msrb.mxu0 %v6544_v54  ;;  %v6800_v22 = vor.u32 %v8104_v62, %v6797_v63  ;;  %v9096_v54 = vmul.f32 %v9090_v37, %v9066_v44  ;;  %v6323_v60 = vld [vmem:[#allocation9 + $0x358] sm:$0xf] }
 0x1f1   :  { %v7309_v1 = vld [vmem:[#allocation9 + $0xb30] sm:$0xf0] }
 0x1f2   :  { %v8152_v3 = vld [vmem:[#allocation9 + $0x894] sm:$0xf]  ;;  %3822 = vmatpush.bf16.msrb.mxu1 %v6832_v56  ;;  %v7312_v10 = vor.u32 %v8232_v0, %v7309_v1  ;;  %v3584_v0 = vpop.f32.mrf.mxu2  ;;  %v6611_v1 = vld [vmem:[#allocation9 + $0x598] sm:$0xf] }
 0x1f3   :  { %v6989_v4 = vld [vmem:[#allocation9 + $0x8b0] sm:$0xf0]  ;;  %v4078_v0 = vmul.f32 %v9112_v43, %v9112_v43 }
 0x1f4   :  { %v8024_v7 = vld [vmem:[#allocation9 + $0x494] sm:$0xf]  ;;  %3848 = vmatpush.bf16.msrb.mxu3 %v7344_v61  ;;  %v6992_v11 = vor.u32 %v8152_v3, %v6989_v4  ;;  %3811 = vmatpush.bf16.msrb.mxu0 %v6512_v5  ;;  %v8061_v3 = vld [vmem:[#allocation9 + $0x5b4] sm:$0xf0]  ;;  %v3571_v4 = vpop.f32.mrf.mxu1 }
 0x1f5   :  { %v6477_v8 = vld [vmem:[#allocation9 + $0x4b0] sm:$0xf0]  ;;  %v6612_v16 = vor.u32 %v8061_v3, %v6611_v1  ;;  %v6003_v4 = vld [vmem:[#allocation9 + $0xd8] sm:$0xf] }
 0x1f6   :  { %v8096_v12 = vld [vmem:[#allocation9 + $0x6d4] sm:$0xf]  ;;  %v6480_v23 = vor.u32 %v8024_v7, %v6477_v8  ;;  %3823 = vmatpush.bf16.msrb.mxu1 %v6800_v22  ;;  %3838 = vmatpush.bf16.msrb.mxu2 %v6992_v11  ;;  %v6099_v22 = vld [vmem:[#allocation9 + $0x198] sm:$0xf]  ;;  %v3597_v28 = vpop.f32.mrf.mxu3 }
 0x1f7   :  { %v6765_v13 = vld [vmem:[#allocation9 + $0x6f0] sm:$0xf0]  ;;  %v7933_v7 = vld [vmem:[#allocation9 + $0x1b4] sm:$0xf0] }
 0x1f8   :  { %v8224_v14 = vld [vmem:[#allocation9 + $0xad4] sm:$0xf]  ;;  %v6768_v25 = vor.u32 %v8096_v12, %v6765_v13  ;;  %3849 = vmatpush.bf16.msrb.mxu3 %v7312_v10  ;;  %3812 = vmatpush.bf16.msrb.mxu0 %v6480_v23  ;;  %v4038_v10 = vmul.f32 %v9096_v54, %v9096_v54  ;;  %v8053_v23 = vld [vmem:[#allocation9 + $0x574] sm:$0xf0] }
 0x1f9   :  { %v7277_v17 = vld [vmem:[#allocation9 + $0xaf0] sm:$0xf0]  ;;  %v6580_v38 = vor.u32 %v8053_v23, %v6579_v19  ;;  %v5971_v19 = vld [vmem:[#allocation9 + $0x98] sm:$0xf] }
 0x1fa   :  { %v8144_v18 = vld [vmem:[#allocation9 + $0x854] sm:$0xf]  ;;  %v7280_v32 = vor.u32 %v8224_v14, %v7277_v17  ;;  %3824 = vmatpush.bf16.msrb.mxu1 %v6768_v25  ;;  %v6387_v17 = vld [vmem:[#allocation9 + $0x3d8] sm:$0xf]  ;;  %v6100_v25 = vor.u32 %v7933_v7, %v6099_v22 }
 0x1fb   :  { %v6957_v15 = vld [vmem:[#allocation9 + $0x870] sm:$0xf0]  ;;  %v7901_v23 = vld [vmem:[#allocation9 + $0xb4] sm:$0xf0] }
 0x1fc   :  { %v8016_v26 = vld [vmem:[#allocation9 + $0x454] sm:$0xf]  ;;  %v6960_v33 = vor.u32 %v8144_v18, %v6957_v15  ;;  %3850 = vmatpush.bf16.msrb.mxu3 %v7280_v32  ;;  %v8005_v18 = vld [vmem:[#allocation9 + $0x3f4] sm:$0xf0] }
 0x1fd   :  { %v6445_v27 = vld [vmem:[#allocation9 + $0x470] sm:$0xf0]  ;;  %v6899_v15 = vld [vmem:[#allocation9 + $0x7d8] sm:$0xf]  ;;  %v6388_v32 = vor.u32 %v8005_v18, %v6387_v17 }
 0x1fe   :  { %v8088_v34 = vld [vmem:[#allocation9 + $0x694] sm:$0xf]  ;;  %v6448_v42 = vor.u32 %v8016_v26, %v6445_v27  ;;  %3839 = vmatpush.bf16.msrb.mxu2 %v6960_v33  ;;  %v9106_v27 = vmin.f32 %v4038_v10, 16.0  ;;  %v6067_v33 = vld [vmem:[#allocation9 + $0x158] sm:$0xf] }
 0x1ff   :  { %v6733_v35 = vld [vmem:[#allocation9 + $0x6b0] sm:$0xf0]  ;;  %v7981_v10 = vld [vmem:[#allocation9 + $0x334] sm:$0xf0] }
 0x200   :  { %v8216_v36 = vld [vmem:[#allocation9 + $0xa94] sm:$0xf]  ;;  %v6736_v47 = vor.u32 %v8088_v34, %v6733_v35  ;;  %3813 = vmatpush.bf16.msrb.mxu0 %v6448_v42  ;;  %v7925_v34 = vld [vmem:[#allocation9 + $0x174] sm:$0xf0]  ;;  %v6900_v35 = vor.u32 %v8133_v49, %v6899_v15  ;;  %v3596_v15 = vadd.f32 %v9098_v46, %v9092_v9 }
 0x201   :  { %v7245_v40 = vld [vmem:[#allocation9 + $0xab0] sm:$0xf0]  ;;  %v8045_v42 = vld [vmem:[#allocation9 + $0x534] sm:$0xf0]  ;;  %v6068_v45 = vor.u32 %v7925_v34, %v6067_v33 }
 0x202   :  { %v8136_v20 = vld [vmem:[#allocation9 + $0x814] sm:$0xf]  ;;  %v7248_v56 = vor.u32 %v8216_v36, %v7245_v40  ;;  %3825 = vmatpush.bf16.msrb.mxu1 %v6736_v47  ;;  %v7997_v36 = vld [vmem:[#allocation9 + $0x3b4] sm:$0xf0]  ;;  %v4051_v47 = vmul.f32 3.8918573e-05, %v9106_v27  ;;  %v3621_v46 = vpop.f32.mrf.mxu1 }
 0x203   :  { %v6925_v41 = vld [vmem:[#allocation9 + $0x830] sm:$0xf0]  ;;  %v6867_v40 = vld [vmem:[#allocation9 + $0x798] sm:$0xf] }
 0x204   :  { %v8008_v50 = vld [vmem:[#allocation9 + $0x414] sm:$0xf]  ;;  %v6928_v58 = vor.u32 %v8136_v20, %v6925_v41  ;;  %3851 = vmatpush.bf16.msrb.mxu3 %v7248_v56  ;;  %v8125_v20 = vld [vmem:[#allocation9 + $0x7b4] sm:$0xf0]  ;;  %v4052_v1 = vadd.f32 0.001143296, %v4051_v47 }
 0x205   :  { %v6413_v52 = vld [vmem:[#allocation9 + $0x430] sm:$0xf0]  ;;  %v6547_v41 = vld [vmem:[#allocation9 + $0x518] sm:$0xf]  ;;  %v6868_v56 = vor.u32 %v8125_v20, %v6867_v40  ;;  %v5972_v40 = vor.u32 %v7901_v23, %v5971_v19 }
 0x206   :  { %v8080_v6 = vld [vmem:[#allocation9 + $0x654] sm:$0xf]  ;;  %v6416_v48 = vor.u32 %v8008_v50, %v6413_v52  ;;  %3840 = vmatpush.bf16.msrb.mxu2 %v6928_v58  ;;  %v6356_v50 = vor.u32 %v7997_v36, %v6355_v31  ;;  %v6035_v52 = vld [vmem:[#allocation9 + $0x118] sm:$0xf]  ;;  %v6548_v58 = vor.u32 %v8045_v42, %v6547_v41  ;;  %v4053_v18 = vmul.f32 %v4052_v1, %v9106_v27  ;;  %v9128_v36 = vpop.f32.mrf.mxu2  ;;  %v6133_v1 = vld [vmem:[#allocation9 + $0x1f8] sm:$0xf0] }
 0x207   :  { %v6701_v61 = vld [vmem:[#allocation9 + $0x670] sm:$0xf0]  ;;  %v6259_v28 = vld [vmem:[#allocation9 + $0x2d8] sm:$0xf]  ;;  %v9125_v31 = vmul.f32 2.1237322e-06, %v9106_v27 }
 0x208   :  { %v8208_v62 = vld [vmem:[#allocation9 + $0xa54] sm:$0xf]  ;;  %v6704_v5 = vor.u32 %v8080_v6, %v6701_v61  ;;  %3814 = vmatpush.bf16.msrb.mxu0 %v6416_v48  ;;  %v7989_v6 = vld [vmem:[#allocation9 + $0x374] sm:$0xf0]  ;;  %v6036_v48 = vor.u32 %v7917_v53, %v6035_v52  ;;  %v9130_v20 = vadd.f32 0.014752088, %v4053_v18 }
 0x209   :  { %v7213_v63 = vld [vmem:[#allocation9 + $0xa70] sm:$0xf0]  ;;  %3841 = vmatmul.bf16.vlgmr.msrb.gmra.mxu2 %v9027_v55  ;;  %v6835_v61 = vld [vmem:[#allocation9 + $0x758] sm:$0xf]  ;;  %v6324_v3 = vor.u32 %v7989_v6, %v6323_v60 }
 0x20a   :  { %v8072_v8 = vld [vmem:[#allocation9 + $0x614] sm:$0xf]  ;;  %v7216_v11 = vor.u32 %v8208_v62, %v7213_v63  ;;  %3885 = vmatpush.bf16.msra.mxu2 %v6644_v51  ;;  %3826 = vmatpush.bf16.msrb.mxu1 %v6704_v5  ;;  %v8117_v51 = vld [vmem:[#allocation9 + $0x774] sm:$0xf0]  ;;  %v3608_v5 = vpop.f32.mrf.mxu0 }
 0x20b   :  { %v6669_v12 = vld [vmem:[#allocation9 + $0x630] sm:$0xf0]  ;;  %3815 = vmatmul.bf16.vlgmr.msrb.gmra.mxu0 %v9004_v57  ;;  %v6515_v62 = vld [vmem:[#allocation9 + $0x4d8] sm:$0xf]  ;;  %v6836_v22 = vor.u32 %v8117_v51, %v6835_v61  ;;  %v3609_v33 = vadd.f32 %v3608_v5, %v3596_v15 }
 0x20c   :  { %v8200_v13 = vld [vmem:[#allocation9 + $0xa14] sm:$0xf]  ;;  %3859 = vmatpush.bf16.msra.mxu0 %v6132_v39  ;;  %v6672_v26 = vor.u32 %v8072_v8, %v6669_v12  ;;  %3852 = vmatpush.bf16.msrb.mxu3 %v7216_v11  ;;  %v8037_v63 = vld [vmem:[#allocation9 + $0x4f4] sm:$0xf0] }
 0x20d   :  { %v7181_v14 = vld [vmem:[#allocation9 + $0xa30] sm:$0xf0]  ;;  %v7909_v39 = vld [vmem:[#allocation9 + $0xf4] sm:$0xf0]  ;;  %v6516_v7 = vor.u32 %v8037_v63, %v6515_v62  ;;  %v9132_v41 = vadd.f32 %v3621_v46, %v3609_v33 }
 0x20e   :  { %v7184_v29 = vor.u32 %v8200_v13, %v7181_v14  ;;  %3886 = vmatpush.bf16.msra.mxu2 %v6612_v16  ;;  %3827 = vmatpush.bf16.msrb.mxu1 %v6672_v26  ;;  %v6291_v8 = vld [vmem:[#allocation9 + $0x318] sm:$0xf]  ;;  %v9119_v16 = vmin.f32 %v4078_v0, 16.0  ;;  %v6004_v17 = vor.u32 %v7909_v39, %v6003_v4  ;;  %v3636_v19 = vpop.f32.mrf.mxu2 }
 0x20f   :  { %v6803_v11 = vld [vmem:[#allocation9 + $0x718] sm:$0xf]  ;;  %v6292_v49 = vor.u32 %v7981_v10, %v6291_v8  ;;  %v9136_v6 = vmul.f32 %v9090_v37, %v9132_v41 }
 0x210   :  { %3860 = vmatpush.bf16.msra.mxu0 %v6100_v25  ;;  %3853 = vmatpush.bf16.msrb.mxu3 %v7184_v29  ;;  %v8109_v12 = vld [vmem:[#allocation9 + $0x734] sm:$0xf0]  ;;  %v4091_v9 = vmul.f32 3.8918573e-05, %v9119_v16 }
 0x211   :  { %3828 = vmatmul.bf16.vlgmr.msrb.gmra.mxu1 %v9013_v59  ;;  %v6483_v13 = vld [vmem:[#allocation9 + $0x498] sm:$0xf]  ;;  %v6804_v25 = vor.u32 %v8109_v12, %v6803_v11 }
 0x212   :  { %3872 = vmatpush.bf16.msra.mxu1 %v6388_v32  ;;  %3887 = vmatpush.bf16.msra.mxu2 %v6580_v38  ;;  %v8029_v14 = vld [vmem:[#allocation9 + $0x4b4] sm:$0xf0]  ;;  %v4092_v63 = vadd.f32 0.001143296, %v4091_v9 }
 0x213   :  { %3854 = vmatmul.bf16.vlgmr.msrb.gmra.mxu3 %v9032_v21  ;;  %v6484_v26 = vor.u32 %v8029_v14, %v6483_v13  ;;  %v7973_v29 = vld [vmem:[#allocation9 + $0x2f4] sm:$0xf0] }
 0x214   :  { %3898 = vmatpush.bf16.msra.mxu3 %v6900_v35  ;;  %3861 = vmatpush.bf16.msra.mxu0 %v6068_v45  ;;  %v6771_v32 = vld [vmem:[#allocation9 + $0x6d8] sm:$0xf]  ;;  %v6260_v42 = vor.u32 %v7973_v29, %v6259_v28  ;;  %v6101_v28 = vld [vmem:[#allocation9 + $0x1b8] sm:$0xf0] }
 0x215   :  { %v8101_v34 = vld [vmem:[#allocation9 + $0x6f4] sm:$0xf0] }
 0x216   :  { %3873 = vmatpush.bf16.msra.mxu1 %v6356_v50  ;;  %3888 = vmatpush.bf16.msra.mxu2 %v6548_v58  ;;  %v6451_v35 = vld [vmem:[#allocation9 + $0x458] sm:$0xf]  ;;  %v3610_v50 = vpop.f32.mrf.mxu0  ;;  %v6772_v52 = vor.u32 %v8101_v34, %v6771_v32 }
 0x217   :  { %v8021_v38 = vld [vmem:[#allocation9 + $0x474] sm:$0xf0]  ;;  %v8001_v50 = vld [vmem:[#allocation9 + $0x3dc] sm:$0xf] }
 0x218   :  { %3899 = vmatpush.bf16.msra.mxu3 %v6868_v56  ;;  %3862 = vmatpush.bf16.msra.mxu0 %v6036_v48  ;;  %v5939_v45 = vld [vmem:[#allocation9 + $0x58] sm:$0xf]  ;;  %v6452_v53 = vor.u32 %v8021_v38, %v6451_v35  ;;  %v7937_v48 = vld [vmem:[#allocation9 + $0x1dc] sm:$0xf] }
 0x219   :  { %v7893_v47 = vld [vmem:[#allocation9 + $0x74] sm:$0xf0] }
 0x21a   :  { %3874 = vmatpush.bf16.msra.mxu1 %v6324_v3  ;;  %3889 = vmatpush.bf16.msra.mxu2 %v6516_v7  ;;  %v6227_v56 = vld [vmem:[#allocation9 + $0x298] sm:$0xf]  ;;  %v5940_v0 = vor.u32 %v7893_v47, %v5939_v45  ;;  %v4118_v3 = vmul.f32 %v9136_v6, %v9136_v6  ;;  %v9140_v7 = vpop.f32.mrf.mxu3 }
 0x21b   :  { %v7965_v58 = vld [vmem:[#allocation9 + $0x2b4] sm:$0xf0] }
 0x21c   :  { %3900 = vmatpush.bf16.msra.mxu3 %v6836_v22  ;;  %3863 = vmatpush.bf16.msra.mxu0 %v6004_v17  ;;  %v6739_v60 = vld [vmem:[#allocation9 + $0x698] sm:$0xf]  ;;  %v6228_v4 = vor.u32 %v7965_v58, %v6227_v56  ;;  %v9142_v14 = vmin.f32 %v4118_v3, 16.0  ;;  %v6136_v17 = vor.u32 %v7937_v48, %v6133_v1  ;;  %v6069_v56 = vld [vmem:[#allocation9 + $0x178] sm:$0xf0] }
 0x21d   :  { %v8093_v61 = vld [vmem:[#allocation9 + $0x6b4] sm:$0xf0]  ;;  %v4041_v58 = vadd.f32 0.00028619796, %v9125_v31 }
 0x21e   :  { %3875 = vmatpush.bf16.msra.mxu1 %v6292_v49  ;;  %3890 = vmatpush.bf16.msra.mxu2 %v6484_v26  ;;  %v6419_v51 = vld [vmem:[#allocation9 + $0x418] sm:$0xf]  ;;  %v6740_v8 = vor.u32 %v8093_v61, %v6739_v60  ;;  %v3623_v49 = vpop.f32.mrf.mxu1  ;;  %v7929_v26 = vld [vmem:[#allocation9 + $0x19c] sm:$0xf]  ;;  %v4131_v38 = vmul.f32 3.8918573e-05, %v9142_v14  ;;  %v4093_v60 = vmul.f32 %v4092_v63, %v9119_v16 }
 0x21f   :  { %v8013_v62 = vld [vmem:[#allocation9 + $0x434] sm:$0xf0] }
 0x220   :  { %3901 = vmatpush.bf16.msra.mxu3 %v6804_v25  ;;  %3864 = vmatpush.bf16.msra.mxu0 %v5972_v40  ;;  %v5907_v39 = vld [vmem:[#allocation9 + $0x18] sm:$0xf]  ;;  %v6420_v10 = vor.u32 %v8013_v62, %v6419_v51  ;;  %v4055_v62 = vmul.f32 %v9130_v20, %v9106_v27  ;;  %v6037_v20 = vld [vmem:[#allocation9 + $0x138] sm:$0xf0] }
 0x221   :  { %v7885_v5 = vld [vmem:[#allocation9 + $0x34] sm:$0xf0] }
 0x222   :  { %3876 = vmatpush.bf16.msra.mxu1 %v6260_v42  ;;  %v7155_v22 = vld [vmem:[#allocation9 + $0x9d8] sm:$0xf]  ;;  %3891 = vmatpush.bf16.msra.mxu2 %v6452_v53  ;;  %v5908_v23 = vor.u32 %v7885_v5, %v5907_v39  ;;  %v6104_v42 = vor.u32 %v7929_v26, %v6101_v28  ;;  %v7921_v53 = vld [vmem:[#allocation9 + $0x15c] sm:$0xf]  ;;  %v3649_v48 = vpop.f32.mrf.mxu3 }
 0x223   :  { %v8197_v11 = vld [vmem:[#allocation9 + $0x9f4] sm:$0xf0]  ;;  %v6072_v63 = vor.u32 %v7921_v53, %v6069_v56  ;;  %v7897_v48 = vld [vmem:[#allocation9 + $0x9c] sm:$0xf] }
 0x224   :  { %3902 = vmatpush.bf16.msra.mxu3 %v6772_v52  ;;  %v6195_v12 = vld [vmem:[#allocation9 + $0x258] sm:$0xf]  ;;  %3865 = vmatpush.bf16.msra.mxu0 %v5940_v0  ;;  %v7156_v29 = vor.u32 %v8197_v11, %v7155_v22  ;;  %v6389_v52 = vld [vmem:[#allocation9 + $0x3f8] sm:$0xf0]  ;;  %v4132_v0 = vadd.f32 0.001143296, %v4131_v38 }
 0x225   :  { %v7957_v13 = vld [vmem:[#allocation9 + $0x274] sm:$0xf0]  ;;  %v6392_v31 = vor.u32 %v8001_v50, %v6389_v52  ;;  %v7913_v11 = vld [vmem:[#allocation9 + $0x11c] sm:$0xf] }
 0x226   :  { %v6707_v18 = vld [vmem:[#allocation9 + $0x658] sm:$0xf]  ;;  %3877 = vmatpush.bf16.msra.mxu1 %v6228_v4  ;;  %v6196_v32 = vor.u32 %v7957_v13, %v6195_v12  ;;  %3892 = vmatpush.bf16.msra.mxu2 %v6420_v10  ;;  %v6357_v10 = vld [vmem:[#allocation9 + $0x3b8] sm:$0xf0]  ;;  %v4042_v12 = vmul.f32 %v4041_v58, %v9106_v27  ;;  %v4094_v13 = vadd.f32 0.014752088, %v4093_v60  ;;  %v6040_v26 = vor.u32 %v7913_v11, %v6037_v20 }
 0x227   :  { %v8085_v15 = vld [vmem:[#allocation9 + $0x674] sm:$0xf0] }
 0x228   :  { %v7123_v25 = vld [vmem:[#allocation9 + $0x998] sm:$0xf]  ;;  %3903 = vmatpush.bf16.msra.mxu3 %v6740_v8  ;;  %v6708_v9 = vor.u32 %v8085_v15, %v6707_v18  ;;  %3866 = vmatpush.bf16.msra.mxu0 %v5908_v23  ;;  %v7993_v8 = vld [vmem:[#allocation9 + $0x39c] sm:$0xf]  ;;  %v4056_v18 = vadd.f32 0.112945676, %v4055_v62  ;;  %v4133_v15 = vmul.f32 %v4132_v0, %v9142_v14  ;;  %v3660_v62 = vpop.f32.mrf.mxu0 }
 0x229   :  { %v8189_v33 = vld [vmem:[#allocation9 + $0x9b4] sm:$0xf0]  ;;  %3893 = vmatmul.bf16.vlgmr.msra.gmra.mxu2 %v9004_v57  ;;  %v9154_v38 = vadd.f32 0.0036580483, %v4042_v12  ;;  %v6293_v0 = vld [vmem:[#allocation9 + $0x338] sm:$0xf0] }
 0x22a   :  { %v6163_v34 = vld [vmem:[#allocation9 + $0x218] sm:$0xf]  ;;  %3937 = vmatpush.bf16.msrb.mxu2 %v6136_v17  ;;  %3878 = vmatpush.bf16.msra.mxu1 %v6196_v32  ;;  %v7124_v61 = vor.u32 %v8189_v33, %v7123_v25  ;;  %v6360_v25 = vor.u32 %v7993_v8, %v6357_v10  ;;  %v7985_v32 = vld [vmem:[#allocation9 + $0x35c] sm:$0xf] }
 0x22b   :  { %v7949_v35 = vld [vmem:[#allocation9 + $0x234] sm:$0xf0]  ;;  %3867 = vmatmul.bf16.vlgmr.msra.gmra.mxu0 %v8982_v2  ;;  %v6325_v33 = vld [vmem:[#allocation9 + $0x378] sm:$0xf0] }
 0x22c   :  { %v6675_v46 = vld [vmem:[#allocation9 + $0x618] sm:$0xf]  ;;  %3911 = vmatpush.bf16.msrb.mxu0 %v7156_v29  ;;  %v6164_v51 = vor.u32 %v7949_v35, %v6163_v34  ;;  %3904 = vmatpush.bf16.msra.mxu3 %v6708_v9  ;;  %v7905_v34 = vld [vmem:[#allocation9 + $0xdc] sm:$0xf]  ;;  %v4095_v9 = vmul.f32 %v4094_v13, %v9119_v16  ;;  %v6328_v56 = vor.u32 %v7985_v32, %v6325_v33 }
 0x22d   :  { %v8077_v40 = vld [vmem:[#allocation9 + $0x634] sm:$0xf0]  ;;  %v6005_v35 = vld [vmem:[#allocation9 + $0xf8] sm:$0xf0] }
 0x22e   :  { %v7411_v45 = vld [vmem:[#allocation9 + $0xbd8] sm:$0xf]  ;;  %v6676_v1 = vor.u32 %v8077_v40, %v6675_v46  ;;  %3938 = vmatpush.bf16.msrb.mxu2 %v6104_v42  ;;  %3879 = vmatpush.bf16.msra.mxu1 %v6164_v51  ;;  %v9157_v46 = vld [vmem:[#allocation11] sm:$0xff]  ;;  %v6008_v58 = vor.u32 %v7905_v34, %v6005_v35  ;;  %v7977_v51 = vld [vmem:[#allocation9 + $0x31c] sm:$0xf] }
 0x22f   :  { %v8261_v47 = vld [vmem:[#allocation9 + $0xbf4] sm:$0xf0]  ;;  %v1458_v40 = vperm.slane %v9157_v46, 3  ;;  %v6296_v20 = vor.u32 %v7977_v51, %v6293_v0  ;;  %v7157_v51 = vld [vmem:[#allocation9 + $0x9f8] sm:$0xf0] }
 0x230   :  { %v7412_v3 = vor.u32 %v8261_v47, %v7411_v45  ;;  %v7091_v4 = vld [vmem:[#allocation9 + $0x958] sm:$0xf]  ;;  %3912 = vmatpush.bf16.msrb.mxu0 %v7124_v61  ;;  %3905 = vmatpush.bf16.msra.mxu3 %v6676_v1  ;;  %v4057_v45 = vmul.f32 %v4056_v18, %v9106_v27  ;;  %v4134_v47 = vadd.f32 0.014752088, %v4133_v15  ;;  %v5973_v1 = vld [vmem:[#allocation9 + $0xb8] sm:$0xf0] }
 0x231   :  { %v8181_v39 = vld [vmem:[#allocation9 + $0x974] sm:$0xf0]  ;;  %3880 = vmatmul.bf16.vlgmr.msra.gmra.mxu1 %v8989_v30  ;;  %v5976_v12 = vor.u32 %v7897_v48, %v5973_v1  ;;  %v7969_v18 = vld [vmem:[#allocation9 + $0x2dc] sm:$0xf] }
 0x232   :  { %v7379_v5 = vld [vmem:[#allocation9 + $0xb98] sm:$0xf]  ;;  %v7092_v17 = vor.u32 %v8181_v39, %v7091_v4  ;;  %3924 = vmatpush.bf16.msrb.mxu1 %v7412_v3  ;;  %3939 = vmatpush.bf16.msrb.mxu2 %v6072_v63  ;;  %v4080_v3 = vmul.f32 2.1237322e-06, %v9119_v16  ;;  %v4096_v4 = vadd.f32 0.112945676, %v4095_v9  ;;  %v3635_v39 = vadd.f32 %v9128_v36, %v1458_v40 }
 0x233   :  { %v8253_v22 = vld [vmem:[#allocation9 + $0xbb4] sm:$0xf0]  ;;  %3906 = vmatmul.bf16.vlgmr.msra.gmra.mxu3 %v9013_v59  ;;  %v9164_v63 = vadd.f32 0.4994258, %v4057_v45  ;;  %v6261_v36 = vld [vmem:[#allocation9 + $0x2f8] sm:$0xf0] }
 0x234   :  { %v7380_v49 = vor.u32 %v8253_v22, %v7379_v5  ;;  %v7059_v19 = vld [vmem:[#allocation9 + $0x918] sm:$0xf]  ;;  %3950 = vmatpush.bf16.msrb.mxu3 %v6392_v31  ;;  %3913 = vmatpush.bf16.msrb.mxu0 %v7092_v17  ;;  %v4135_v5 = vmul.f32 %v4134_v47, %v9142_v14  ;;  %v3648_v11 = vadd.f32 %v9140_v7, %v3635_v39  ;;  %v7889_v15 = vld [vmem:[#allocation9 + $0x5c] sm:$0xf] }
 0x235   :  { %v8173_v23 = vld [vmem:[#allocation9 + $0x934] sm:$0xf0]  ;;  %v6264_v9 = vor.u32 %v7969_v18, %v6261_v36  ;;  %v7961_v47 = vld [vmem:[#allocation9 + $0x29c] sm:$0xf] }
 0x236   :  { %v7347_v28 = vld [vmem:[#allocation9 + $0xb58] sm:$0xf]  ;;  %v7060_v42 = vor.u32 %v8173_v23, %v7059_v19  ;;  %3925 = vmatpush.bf16.msrb.mxu1 %v7380_v49  ;;  %3940 = vmatpush.bf16.msrb.mxu2 %v6040_v26  ;;  %v5941_v49 = vld [vmem:[#allocation9 + $0x78] sm:$0xf0]  ;;  %v9168_v19 = vadd.f32 0.00028619796, %v4080_v3  ;;  %v4097_v23 = vmul.f32 %v4096_v4, %v9119_v16  ;;  %v3673_v26 = vpop.f32.mrf.mxu1 }
 0x237   :  { %v8245_v29 = vld [vmem:[#allocation9 + $0xb74] sm:$0xf0]  ;;  %v4136_v7 = vadd.f32 0.112945676, %v4135_v5  ;;  %v5944_v40 = vor.u32 %v7889_v15, %v5941_v49  ;;  %v8065_v3 = vld [vmem:[#allocation9 + $0x5dc] sm:$0xf] }
 0x238   :  { %v7348_v50 = vor.u32 %v8245_v29, %v7347_v28  ;;  %v7027_v52 = vld [vmem:[#allocation9 + $0x8d8] sm:$0xf]  ;;  %3951 = vmatpush.bf16.msrb.mxu3 %v6360_v25  ;;  %3914 = vmatpush.bf16.msrb.mxu0 %v7060_v42  ;;  %v3661_v25 = vadd.f32 %v3660_v62, %v3648_v11  ;;  %v3686_v28 = vpop.f32.mrf.mxu2  ;;  %v6645_v5 = vld [vmem:[#allocation9 + $0x5f8] sm:$0xf0]  ;;  %v3699_v11 = vpop.f32.mrf.mxu3 }
 0x239   :  { %v8165_v53 = vld [vmem:[#allocation9 + $0x8f4] sm:$0xf0]  ;;  %v4137_v62 = vmul.f32 %v4136_v7, %v9142_v14  ;;  %v8057_v49 = vld [vmem:[#allocation9 + $0x59c] sm:$0xf] }
 0x23a   :  { %v7315_v60 = vld [vmem:[#allocation9 + $0xb18] sm:$0xf]  ;;  %v7028_v31 = vor.u32 %v8165_v53, %v7027_v52  ;;  %3926 = vmatpush.bf16.msrb.mxu1 %v7348_v50  ;;  %3941 = vmatpush.bf16.msrb.mxu2 %v6008_v58  ;;  %v3674_v35 = vadd.f32 %v3673_v26, %v3661_v25  ;;  %v3662_v50 = vpop.f32.mrf.mxu0  ;;  %v6229_v52 = vld [vmem:[#allocation9 + $0x2b8] sm:$0xf0]  ;;  %v9171_v58 = vadd.f32 0.4994258, %v4097_v23 }
 0x23b   :  { %v8237_v61 = vld [vmem:[#allocation9 + $0xb34] sm:$0xf0]  ;;  %v7881_v53 = vld [vmem:[#allocation9 + $0x1c] sm:$0xf]  ;;  %v6232_v39 = vor.u32 %v7961_v47, %v6229_v52  ;;  %v4138_v26 = vadd.f32 0.4994258, %v4137_v62 }
 0x23c   :  { %v7316_v22 = vor.u32 %v8237_v61, %v7315_v60  ;;  %v6995_v8 = vld [vmem:[#allocation9 + $0x898] sm:$0xf]  ;;  %3952 = vmatpush.bf16.msrb.mxu3 %v6328_v56  ;;  %3915 = vmatpush.bf16.msrb.mxu0 %v7028_v31  ;;  %v5909_v56 = vld [vmem:[#allocation9 + $0x38] sm:$0xf0]  ;;  %v3687_v4 = vadd.f32 %v3686_v28, %v3674_v35  ;;  %v6648_v28 = vor.u32 %v8065_v3, %v6645_v5 }
 0x23d   :  { %v8157_v10 = vld [vmem:[#allocation9 + $0x8b4] sm:$0xf0]  ;;  %v8193_v61 = vld [vmem:[#allocation9 + $0x9dc] sm:$0xf]  ;;  %v5912_v31 = vor.u32 %v7881_v53, %v5909_v56 }
 0x23e   :  { %v7283_v13 = vld [vmem:[#allocation9 + $0xad8] sm:$0xf]  ;;  %v6996_v29 = vor.u32 %v8157_v10, %v6995_v8  ;;  %3927 = vmatpush.bf16.msrb.mxu1 %v7316_v22  ;;  %3942 = vmatpush.bf16.msrb.mxu2 %v5976_v12  ;;  %v4120_v10 = vmul.f32 2.1237322e-06, %v9142_v14  ;;  %v7953_v12 = vld [vmem:[#allocation9 + $0x25c] sm:$0xf]  ;;  %v3675_v18 = vpop.f32.mrf.mxu1 }
 0x23f   :  { %v8229_v17 = vld [vmem:[#allocation9 + $0xaf4] sm:$0xf0]  ;;  %v8185_v23 = vld [vmem:[#allocation9 + $0x99c] sm:$0xf] }
 0x240   :  { %v7284_v32 = vor.u32 %v8229_v17, %v7283_v13  ;;  %v6963_v33 = vld [vmem:[#allocation9 + $0x858] sm:$0xf]  ;;  %3953 = vmatpush.bf16.msrb.mxu3 %v6296_v20  ;;  %3916 = vmatpush.bf16.msrb.mxu0 %v6996_v29  ;;  %v7160_v20 = vor.u32 %v8193_v61, %v7157_v51  ;;  %v6197_v13 = vld [vmem:[#allocation9 + $0x278] sm:$0xf0]  ;;  %v9175_v17 = vadd.f32 %v3699_v11, %v3687_v4  ;;  %v3688_v36 = vpop.f32.mrf.mxu2  ;;  %v4121_v61 = vadd.f32 0.00028619796, %v4120_v10 }
 0x241   :  { %v8149_v34 = vld [vmem:[#allocation9 + $0x874] sm:$0xf0]  ;;  %v7125_v25 = vld [vmem:[#allocation9 + $0x9b8] sm:$0xf0]  ;;  %v6200_v35 = vor.u32 %v7953_v12, %v6197_v13  ;;  %v4139_v51 = vmul.f32 %v4138_v26, %v9142_v14 }
 0x242   :  { %v7251_v42 = vld [vmem:[#allocation9 + $0xa98] sm:$0xf]  ;;  %v6964_v60 = vor.u32 %v8149_v34, %v6963_v33  ;;  %3928 = vmatpush.bf16.msrb.mxu1 %v7284_v32  ;;  %3943 = vmatpush.bf16.msrb.mxu2 %v5944_v40  ;;  %v6613_v7 = vld [vmem:[#allocation9 + $0x5b8] sm:$0xf0]  ;;  %v4059_v33 = vmul.f32 %v9164_v63, %v9106_v27  ;;  %v9181_v34 = vmul.f32 %v9090_v37, %v9175_v17 }
 0x243   :  { %v8221_v45 = vld [vmem:[#allocation9 + $0xab4] sm:$0xf0]  ;;  %v7945_v40 = vld [vmem:[#allocation9 + $0x21c] sm:$0xf]  ;;  %v6616_v62 = vor.u32 %v8057_v49, %v6613_v7  ;;  %v9196_v49 = vadd.f32 1.0, %v4139_v51 }
 0x244   :  { %v7252_v0 = vor.u32 %v8221_v45, %v7251_v42  ;;  %v6931_v48 = vld [vmem:[#allocation9 + $0x818] sm:$0xf]  ;;  %3954 = vmatpush.bf16.msrb.mxu3 %v6264_v9  ;;  %3917 = vmatpush.bf16.msrb.mxu0 %v6964_v60  ;;  %v6165_v42 = vld [vmem:[#allocation9 + $0x238] sm:$0xf0]  ;;  %v7128_v45 = vor.u32 %v8185_v23, %v7125_v25  ;;  %v4158_v53 = vmul.f32 %v9181_v34, %v9181_v34 }
 0x245   :  { %v8141_v1 = vld [vmem:[#allocation9 + $0x834] sm:$0xf0]  ;;  %v8129_v47 = vld [vmem:[#allocation9 + $0x7dc] sm:$0xf]  ;;  %v6168_v4 = vor.u32 %v7945_v40, %v6165_v42  ;;  %v4044_v40 = vmul.f32 %v9154_v38, %v9106_v27  ;;  %vm4146_vm5 = vweird.f32 %v9196_v49 }
 0x246   :  { %v7219_v22 = vld [vmem:[#allocation9 + $0xa58] sm:$0xf]  ;;  %v6932_v15 = vor.u32 %v8141_v1, %v6931_v48  ;;  %3929 = vmatpush.bf16.msrb.mxu1 %v7252_v0  ;;  %3944 = vmatpush.bf16.msrb.mxu2 %v5912_v31  ;;  %v6901_v50 = vld [vmem:[#allocation9 + $0x7f8] sm:$0xf0]  ;;  %v9186_v1 = vadd.f32 1.0, %v4059_v33  ;;  %v9188_v3 = vmin.f32 %v4158_v53, 16.0 }
 0x247   :  { %v8213_v8 = vld [vmem:[#allocation9 + $0xa74] sm:$0xf0]  ;;  %v8257_v52 = vld [vmem:[#allocation9 + $0xbdc] sm:$0xf] }
 0x248   :  { %v7220_v29 = vor.u32 %v8213_v8, %v7219_v22  ;;  %v7187_v32 = vld [vmem:[#allocation9 + $0xa18] sm:$0xf]  ;;  %3955 = vmatpush.bf16.msrb.mxu3 %v6232_v39  ;;  %3918 = vmatpush.bf16.msrb.mxu0 %v6932_v15  ;;  %v7413_v63 = vld [vmem:[#allocation9 + $0xbf8] sm:$0xf0]  ;;  %v6904_v39 = vor.u32 %v8129_v47, %v6901_v50  ;;  %v3701_v22 = vpop.f32.mrf.mxu3  ;;  %v4171_v13 = vmul.f32 3.8918573e-05, %v9188_v3  ;;  %v4122_v15 = vmul.f32 %v4121_v61, %v9142_v14 }
 0x249   :  { %v8205_v9 = vld [vmem:[#allocation9 + $0xa34] sm:$0xf0]  ;;  %v8177_v56 = vld [vmem:[#allocation9 + $0x95c] sm:$0xf]  ;;  %3945 = vmatmul.bf16.vlgmr.msrb.gmra.mxu2 %v8982_v2  ;;  %v7416_v8 = vor.u32 %v8257_v52, %v7413_v63  ;;  %v4099_v2 = vmul.f32 %v9171_v58, %v9119_v16  ;;  %8392 = vrcp.f32 %v9186_v1  ;;  %vm4066_vm3 = vweird.f32 %v9186_v1 }
 0x24a   :  { %3989 = vmatpush.bf16.msra.mxu2 %v7160_v20  ;;  %v7093_v60 = vld [vmem:[#allocation9 + $0x978] sm:$0xf0]  ;;  %3930 = vmatpush.bf16.msrb.mxu1 %v7220_v29  ;;  %v7188_v0 = vor.u32 %v8205_v9, %v7187_v32  ;;  %v4172_v26 = vadd.f32 0.001143296, %v4171_v13  ;;  %v4160_v32 = vmul.f32 2.1237322e-06, %v9188_v3  ;;  %8394 = vrcp.f32 %v9196_v49 }
 0x24b   :  { %v8049_v48 = vld [vmem:[#allocation9 + $0x55c] sm:$0xf]  ;;  %3919 = vmatmul.bf16.vlgmr.msrb.gmra.mxu0 %v9027_v55  ;;  %v7096_v10 = vor.u32 %v8177_v56, %v7093_v60  ;;  %v9204_v52 = vadd.f32 1.0, %v4099_v2  ;;  %v4123_v53 = vadd.f32 0.0036580483, %v4122_v15 }
 0x24c   :  { %3963 = vmatpush.bf16.msra.mxu0 %v6648_v28  ;;  %3956 = vmatpush.bf16.msrb.mxu3 %v6200_v35  ;;  %v6581_v31 = vld [vmem:[#allocation9 + $0x578] sm:$0xf0]  ;;  %v4173_v42 = vmul.f32 %v4172_v26, %v9188_v3 }
 0x24d   :  { %v8121_v5 = vld [vmem:[#allocation9 + $0x79c] sm:$0xf]  ;;  %v6584_v23 = vor.u32 %v8049_v48, %v6581_v31  ;;  %8396 = vrcp.f32 %v9204_v52  ;;  %vm4106_vm11 = vweird.f32 %v9204_v52 }
 0x24e   :  { %3990 = vmatpush.bf16.msra.mxu2 %v7128_v45  ;;  %v6869_v11 = vld [vmem:[#allocation9 + $0x7b8] sm:$0xf0]  ;;  %3931 = vmatpush.bf16.msrb.mxu1 %v7188_v0  ;;  %v4174_v38 = vadd.f32 0.014752088, %v4173_v42 }
 0x24f   :  { %v8249_v20 = vld [vmem:[#allocation9 + $0xb9c] sm:$0xf]  ;;  %v6872_v28 = vor.u32 %v8121_v5, %v6869_v11  ;;  %v9209_v5 = vpop.f32.mrf.mxu0  ;;  %v4082_v11 = vmul.f32 %v9168_v19, %v9119_v16  ;;  %v9214_v13 = vpop.eup %8392 }
 0x250   :  { %v7381_v12 = vld [vmem:[#allocation9 + $0xbb8] sm:$0xf0]  ;;  %3964 = vmatpush.bf16.msra.mxu0 %v6616_v62  ;;  %3957 = vmatpush.bf16.msrb.mxu3 %v6168_v4  ;;  %v4161_v62 = vadd.f32 0.00028619796, %v4160_v32  ;;  %v4175_v31 = vmul.f32 %v4174_v38, %v9188_v3  ;;  %vm4067_vm1 = vweird.f32 %v9214_v13 }
 0x251   :  { %v8169_v18 = vld [vmem:[#allocation9 + $0x91c] sm:$0xf]  ;;  %v7384_v33 = vor.u32 %v8249_v20, %v7381_v12  ;;  %3932 = vmatmul.bf16.vlgmr.msrb.gmra.mxu1 %v9032_v21  ;;  %v4124_v20 = vmul.f32 %v4123_v53, %v9142_v14  ;;  %vm9266_vm4 = vmor %vm4066_vm3, %vm4067_vm1 }
 0x252   :  { %v7061_v36 = vld [vmem:[#allocation9 + $0x938] sm:$0xf0]  ;;  %3976 = vmatpush.bf16.msra.mxu1 %v6904_v39  ;;  %3991 = vmatpush.bf16.msra.mxu2 %v7096_v10  ;;  %v4045_v10 = vadd.f32 0.05243302, %v4044_v40  ;;  %v4083_v40 = vadd.f32 0.0036580483, %v4082_v11 }
 0x253   :  { %v8041_v25 = vld [vmem:[#allocation9 + $0x51c] sm:$0xf]  ;;  %v7064_v58 = vor.u32 %v8169_v18, %v7061_v36  ;;  %3958 = vmatmul.bf16.vlgmr.msrb.gmra.mxu3 %v8989_v30  ;;  %v4176_v18 = vadd.f32 0.112945676, %v4175_v31  ;;  %v4125_v42 = vadd.f32 0.05243302, %v4124_v20 }
 0x254   :  { %v6549_v29 = vld [vmem:[#allocation9 + $0x538] sm:$0xf0]  ;;  %4002 = vmatpush.bf16.msra.mxu3 %v7416_v8  ;;  %3965 = vmatpush.bf16.msra.mxu0 %v6584_v23  ;;  %v9216_v23 = vpop.eup %8394  ;;  %v4046_v11 = vmul.f32 %v4045_v10, %v9106_v27 }
 0x255   :  { %v8113_v7 = vld [vmem:[#allocation9 + $0x75c] sm:$0xf]  ;;  %v6552_v63 = vor.u32 %v8041_v25, %v6549_v29  ;;  %v4162_v25 = vmul.f32 %v4161_v62, %v9188_v3  ;;  %v4177_v32 = vmul.f32 %v4176_v18, %v9188_v3  ;;  %vm4147_vm2 = vweird.f32 %v9216_v23 }
 0x256   :  { %v6837_v35 = vld [vmem:[#allocation9 + $0x778] sm:$0xf0]  ;;  %3977 = vmatpush.bf16.msra.mxu1 %v6872_v28  ;;  %3992 = vmatpush.bf16.msra.mxu2 %v7064_v58  ;;  %vm9278_vm6 = vmor %vm4146_vm5, %vm4147_vm2 }
 0x257   :  { %v8241_v9 = vld [vmem:[#allocation9 + $0xb5c] sm:$0xf]  ;;  %v6840_v60 = vor.u32 %v8113_v7, %v6837_v35  ;;  %v3714_v31 = vpop.f32.mrf.mxu0 }
 0x258   :  { %v7349_v45 = vld [vmem:[#allocation9 + $0xb78] sm:$0xf0]  ;;  %4003 = vmatpush.bf16.msra.mxu3 %v7384_v33  ;;  %3966 = vmatpush.bf16.msra.mxu0 %v6552_v63  ;;  %v4142_v63 = vmul.f32 %v9216_v23, %v9196_v49 }
 0x259   :  { %v8161_v47 = vld [vmem:[#allocation9 + $0x8dc] sm:$0xf]  ;;  %v7352_v0 = vor.u32 %v8241_v9, %v7349_v45  ;;  %v4062_v9 = vmul.f32 %v9214_v13, %v9186_v1  ;;  %v9223_v45 = vpop.f32.mrf.mxu1 }
 0x25a   :  { %v7029_v50 = vld [vmem:[#allocation9 + $0x8f8] sm:$0xf0]  ;;  %3978 = vmatpush.bf16.msra.mxu1 %v6840_v60 }
 0x25b   :  { %v8033_v56 = vld [vmem:[#allocation9 + $0x4dc] sm:$0xf]  ;;  %v7032_v48 = vor.u32 %v8161_v47, %v7029_v50  ;;  %v9225_v47 = vpop.f32.mrf.mxu2  ;;  %v4063_v20 = vsub.f32 1.0, %v4062_v9 }
 0x25c   :  { %v6517_v61 = vld [vmem:[#allocation9 + $0x4f8] sm:$0xf0]  ;;  %4004 = vmatpush.bf16.msra.mxu3 %v7352_v0 }
 0x25d   :  { %v8105_v51 = vld [vmem:[#allocation9 + $0x71c] sm:$0xf]  ;;  %v6520_v12 = vor.u32 %v8033_v56, %v6517_v61  ;;  %3993 = vmatpush.bf16.msra.mxu2 %v7032_v48  ;;  %v4178_v56 = vadd.f32 0.4994258, %v4177_v32 }
 0x25e   :  { %v6805_v4 = vld [vmem:[#allocation9 + $0x738] sm:$0xf0] }
 0x25f   :  { %v8233_v39 = vld [vmem:[#allocation9 + $0xb1c] sm:$0xf]  ;;  %v6808_v36 = vor.u32 %v8105_v51, %v6805_v4  ;;  %3967 = vmatpush.bf16.msra.mxu0 %v6520_v12  ;;  %v4163_v51 = vadd.f32 0.0036580483, %v4162_v25  ;;  %v4084_v12 = vmul.f32 %v4083_v40, %v9119_v16 }
 0x260   :  { %v7317_v30 = vld [vmem:[#allocation9 + $0xb38] sm:$0xf0] }
 0x261   :  { %v8153_v22 = vld [vmem:[#allocation9 + $0x89c] sm:$0xf]  ;;  %v7320_v26 = vor.u32 %v8233_v39, %v7317_v30  ;;  %3979 = vmatpush.bf16.msra.mxu1 %v6808_v36  ;;  %v4179_v39 = vmul.f32 %v4178_v56, %v9188_v3  ;;  %v9232_v36 = vpop.eup %8396 }
 0x262   :  { %v6997_v8 = vld [vmem:[#allocation9 + $0x8b8] sm:$0xf0]  ;;  %vm4107_vm9 = vweird.f32 %v9232_v36 }
 0x263   :  { %v8025_v2 = vld [vmem:[#allocation9 + $0x49c] sm:$0xf]  ;;  %v7000_v28 = vor.u32 %v8153_v22, %v6997_v8  ;;  %4005 = vmatpush.bf16.msra.mxu3 %v7320_v26  ;;  %v9235_v25 = vadd.f32 1.0, %v4179_v39  ;;  %v3740_v56 = vpop.f32.mrf.mxu2  ;;  %vm9304_vm12 = vmor %vm4106_vm11, %vm4107_vm9 }
 0x264   :  { %v6485_v15 = vld [vmem:[#allocation9 + $0x4b8] sm:$0xf0] }
 0x265   :  { %v8097_v19 = vld [vmem:[#allocation9 + $0x6dc] sm:$0xf]  ;;  %v6488_v50 = vor.u32 %v8025_v2, %v6485_v15  ;;  %3994 = vmatpush.bf16.msra.mxu2 %v7000_v28  ;;  %v4126_v2 = vmul.f32 %v4125_v42, %v9142_v14  ;;  %v4143_v15 = vsub.f32 1.0, %v4142_v63  ;;  %8398 = vrcp.f32 %v9235_v25  ;;  %v3727_v63 = vpop.f32.mrf.mxu1 }
 0x266   :  { %v6773_v29 = vld [vmem:[#allocation9 + $0x6f8] sm:$0xf0]  ;;  %v4064_v42 = vmul.f32 %v9214_v13, %v4063_v20  ;;  %vm4186_vm13 = vweird.f32 %v9235_v25 }
 0x267   :  { %v8225_v7 = vld [vmem:[#allocation9 + $0xadc] sm:$0xf]  ;;  %v6776_v38 = vor.u32 %v8097_v19, %v6773_v29  ;;  %3968 = vmatpush.bf16.msra.mxu0 %v6488_v50  ;;  %v4164_v29 = vmul.f32 %v4163_v51, %v9188_v3  ;;  %v4085_v50 = vadd.f32 0.05243302, %v4084_v12  ;;  %v4144_v51 = vmul.f32 %v9216_v23, %v4143_v15 }
 0x268   :  { %v7285_v33 = vld [vmem:[#allocation9 + $0xaf8] sm:$0xf0] }
 0x269   :  { %v8145_v58 = vld [vmem:[#allocation9 + $0x85c] sm:$0xf]  ;;  %v7288_v62 = vor.u32 %v8225_v7, %v7285_v33  ;;  %3980 = vmatpush.bf16.msra.mxu1 %v6776_v38  ;;  %v4086_v12 = vmul.f32 %v4085_v50, %v9119_v16  ;;  %v8283_v50 = vld [vmem:[#allocation12 + $0xa8] sm:$0xff] }
 0x26a   :  { %v6965_v35 = vld [vmem:[#allocation9 + $0x878] sm:$0xf0] }
 0x26b   :  { %v8017_v53 = vld [vmem:[#allocation9 + $0x45c] sm:$0xf]  ;;  %v6968_v0 = vor.u32 %v8145_v58, %v6965_v35  ;;  %4006 = vmatpush.bf16.msra.mxu3 %v7288_v62  ;;  %v9239_v58 = vpop.f32.mrf.mxu3  ;;  %v8285_v35 = vld [vmem:[#allocation12 + $0xb8] sm:$0xff] }
 0x26c   :  { %v6453_v60 = vld [vmem:[#allocation9 + $0x478] sm:$0xf0]  ;;  %v8269_v62 = vld [vmem:[#allocation12 + $0x38] sm:$0xff] }
 0x26d   :  { %v8089_v61 = vld [vmem:[#allocation9 + $0x69c] sm:$0xf]  ;;  %v6456_v18 = vor.u32 %v8017_v53, %v6453_v60  ;;  %3995 = vmatpush.bf16.msra.mxu2 %v6968_v0  ;;  %v4102_v53 = vmul.f32 %v9232_v36, %v9204_v52  ;;  %v4047_v60 = vadd.f32 0.18741608, %v4046_v11  ;;  %v4065_v11 = vadd.f32 %v9214_v13, %v4064_v42  ;;  %v8293_v42 = vld [vmem:[#allocation12 + $0xf8] sm:$0xff] }
 0x26e   :  { %v6741_v48 = vld [vmem:[#allocation9 + $0x6b8] sm:$0xf0] }
 0x26f   :  { %v8217_v4 = vld [vmem:[#allocation9 + $0xa9c] sm:$0xf]  ;;  %v6744_v26 = vor.u32 %v8089_v61, %v6741_v48  ;;  %3969 = vmatpush.bf16.msra.mxu0 %v6456_v18  ;;  %v4127_v61 = vadd.f32 0.18741608, %v4126_v2  ;;  %v4165_v48 = vadd.f32 0.05243302, %v4164_v29  ;;  %v9249_v2 = vpop.eup %8398  ;;  %v4069_v63 = vsel %vm9266_vm4, %v9214_v13, %v4065_v11 }
 0x270   :  { %v7253_v30 = vld [vmem:[#allocation9 + $0xab8] sm:$0xf0]  ;;  %v4103_v18 = vsub.f32 1.0, %v4102_v53  ;;  %v4087_v53 = vadd.f32 0.18741608, %v4086_v12  ;;  %v8266_v11 = vld [vmem:[#allocation12 + $0x20] sm:$0xff]  ;;  %vm4187_vm10 = vweird.f32 %v9249_v2 }
 0x271   :  { %v8137_v22 = vld [vmem:[#allocation9 + $0x81c] sm:$0xf]  ;;  %v7256_v10 = vor.u32 %v8217_v4, %v7253_v30  ;;  %3981 = vmatpush.bf16.msra.mxu1 %v6744_v26  ;;  %v4072_v30 = vand.u32 2147483648, %v9186_v1  ;;  %v4128_v15 = vmul.f32 %v4127_v61, %v9142_v14  ;;  %v4145_v26 = vadd.f32 %v9216_v23, %v4144_v51  ;;  %v8277_v14 = vld [vmem:[#allocation12 + $0x78] sm:$0xff]  ;;  %v8267_v61 = vld [vmem:[#allocation12 + $0x28] sm:$0xff] }
 0x272   :  { %v6933_v8 = vld [vmem:[#allocation9 + $0x838] sm:$0xf0]  ;;  %v4104_v56 = vmul.f32 %v9232_v36, %v4103_v18  ;;  %vm9316_vm14 = vmor %vm4186_vm13, %vm4187_vm10 }
 0x273   :  { %v8009_v28 = vld [vmem:[#allocation9 + $0x41c] sm:$0xf]  ;;  %v6936_v7 = vor.u32 %v8137_v22, %v6933_v8  ;;  %4007 = vmatpush.bf16.msra.mxu3 %v7256_v10  ;;  %v4166_v10 = vmul.f32 %v4165_v48, %v9188_v3 }
 0x274   :  { %v6421_v19 = vld [vmem:[#allocation9 + $0x438] sm:$0xf0] }
 0x275   :  { %v8081_v32 = vld [vmem:[#allocation9 + $0x65c] sm:$0xf]  ;;  %v6424_v38 = vor.u32 %v8009_v28, %v6421_v19  ;;  %3996 = vmatpush.bf16.msra.mxu2 %v6936_v7  ;;  %v1459_v28 = vperm.slane %v9157_v46, 4  ;;  %v4182_v7 = vmul.f32 %v9249_v2, %v9235_v25  ;;  %v4167_v51 = vadd.f32 0.18741608, %v4166_v10 }
 0x276   :  { %v6709_v33 = vld [vmem:[#allocation9 + $0x678] sm:$0xf0] }
 0x277   :  { %v8209_v9 = vld [vmem:[#allocation9 + $0xa5c] sm:$0xf]  ;;  %v6712_v0 = vor.u32 %v8081_v32, %v6709_v33  ;;  %3970 = vmatpush.bf16.msra.mxu0 %v6424_v38  ;;  %v4048_v33 = vmul.f32 %v4047_v60, %v9106_v27  ;;  %v4150_v27 = vand.u32 2147483647, %v9196_v49  ;;  %v4129_v38 = vadd.f32 1.1283791, %v4128_v15 }
 0x278   :  { %v7221_v40 = vld [vmem:[#allocation9 + $0xa78] sm:$0xf0]  ;;  %3997 = vmatmul.bf16.vlgmr.msra.gmra.mxu2 %v9027_v55  ;;  %v4110_v15 = vand.u32 2147483647, %v9204_v52  ;;  %v8273_v60 = vld [vmem:[#allocation12 + $0x58] sm:$0xff] }
 0x279   :  { %v7224_v4 = vor.u32 %v8209_v9, %v7221_v40  ;;  %v8073_v39 = vld [vmem:[#allocation9 + $0x61c] sm:$0xf]  ;;  %4924 = vmatpush.bf16.msrb.mxu2 %v8285_v35  ;;  %3982 = vmatpush.bf16.msra.mxu1 %v6712_v0  ;;  %v4070_v35 = vand.u32 2147483647, %v9186_v1  ;;  %v4152_v9 = vand.u32 2147483648, %v9196_v49  ;;  %v3753_v40 = vpop.f32.mrf.mxu3  ;;  %v4183_v1 = vsub.f32 1.0, %v4182_v7 }
 0x27a   :  { %v6677_v31 = vld [vmem:[#allocation9 + $0x638] sm:$0xf0]  ;;  %3971 = vmatmul.bf16.vlgmr.msra.gmra.mxu0 %v9004_v57  ;;  %v4073_v57 = vor.u32 1.1754944e-38, %v4072_v30  ;;  %v4149_v49 = vsel %vm9278_vm6, %v9216_v23, %v4145_v26  ;;  %v4049_v48 = vadd.f32 1.1283791, %v4048_v33  ;;  %vm4151_vm8 = vcmp.eq.f32.partialorder %v4150_v27, 8.507059e+37 }
 0x27b   :  { %v8284_v22 = vld [vmem:[#allocation12 + $0xb0] sm:$0xff]  ;;  %4898 = vmatpush.bf16.msrb.mxu0 %v8269_v62  ;;  %v6680_v29 = vor.u32 %v8073_v39, %v6677_v31  ;;  %4008 = vmatpush.bf16.msra.mxu3 %v7224_v4  ;;  %v4184_v13 = vmul.f32 %v9249_v2, %v4183_v1  ;;  %v3713_v62 = vadd.f32 %v9209_v5, %v1459_v28  ;;  %vm4071_vm7 = vcmp.eq.f32.partialorder %v4070_v35, 8.507059e+37  ;;  %v8282_v31 = vld [vmem:[#allocation12 + $0xa0] sm:$0xff]  ;;  %v8291_v26 = vld [vmem:[#allocation12 + $0xe8] sm:$0xff] }
 0x27c   :  { %v8201_v8 = vld [vmem:[#allocation9 + $0xa1c] sm:$0xf]  ;;  %v4153_v4 = vor.u32 1.1754944e-38, %v4152_v9  ;;  %v4074_v30 = vsel %vm4071_vm7, %v4073_v57, %v4069_v63  ;;  %v4105_v5 = vadd.f32 %v9232_v36, %v4104_v56  ;;  %v4130_v12 = vmul.f32 %v4129_v38, %v9136_v6  ;;  %v8281_v6 = vld [vmem:[#allocation12 + $0x98] sm:$0xff]  ;;  %v8274_v9 = vld [vmem:[#allocation12 + $0x60] sm:$0xff]  ;;  %v3777_v63 = vpop.f32.mrf.mxu1 }
 0x27d   :  { %v7189_v20 = vld [vmem:[#allocation9 + $0xa38] sm:$0xf0]  ;;  %4925 = vmatpush.bf16.msrb.mxu2 %v8284_v22  ;;  %3983 = vmatpush.bf16.msra.mxu1 %v6680_v29  ;;  %v4088_v22 = vmul.f32 %v4087_v53, %v9119_v16  ;;  %v3726_v23 = vadd.f32 %v9223_v45, %v3713_v62  ;;  %v4168_v16 = vmul.f32 %v4167_v51, %v9188_v3  ;;  %vm4111_vm15 = vcmp.eq.f32.partialorder %v4110_v15, 8.507059e+37  ;;  %v8290_v40 = vld [vmem:[#allocation12 + $0xe0] sm:$0xff]  ;;  %v8279_v51 = vld [vmem:[#allocation12 + $0x88] sm:$0xff] }
 0x27e   :  { %v8268_v19 = vld [vmem:[#allocation12 + $0x30] sm:$0xff]  ;;  %v7192_v32 = vor.u32 %v8201_v8, %v7189_v20  ;;  %v4112_v8 = vand.u32 2147483648, %v9204_v52  ;;  %v4154_v20 = vsel %vm4151_vm8, %v4153_v4, %v4149_v49  ;;  %v4185_v18 = vadd.f32 %v9249_v2, %v4184_v13  ;;  %v3764_v52 = vpop.f32.mrf.mxu0  ;;  %v8289_v49 = vld [vmem:[#allocation12 + $0xd8] sm:$0xff] }
 0x27f   :  { %4899 = vmatpush.bf16.msrb.mxu0 %v8268_v19  ;;  %v8276_v0 = vld [vmem:[#allocation12 + $0x70] sm:$0xff]  ;;  %v4050_v45 = vmul.f32 %v4049_v48, %v9096_v54  ;;  %v4155_v28 = vmul.f32 %v4154_v20, %v4130_v12  ;;  %v4190_v54 = vand.u32 2147483647, %v9235_v25  ;;  %v3739_v19 = vadd.f32 %v9225_v47, %v3726_v23  ;;  %v8263_v48 = vld [vmem:[#allocation12 + $0x8] sm:$0xff]  ;;  %v8278_v23 = vld [vmem:[#allocation12 + $0x80] sm:$0xff] }
 0x280   :  { %4009 = vmatpush.bf16.msra.mxu3 %v7192_v32  ;;  %v8292_v39 = vld [vmem:[#allocation12 + $0xf0] sm:$0xff]  ;;  %3984 = vmatmul.bf16.vlgmr.msra.gmra.mxu1 %v9013_v59  ;;  %v8275_v59 = vld [vmem:[#allocation12 + $0x68] sm:$0xff]  ;;  %v4089_v10 = vadd.f32 1.1283791, %v4088_v22  ;;  %v4109_v7 = vsel %vm9304_vm12, %v9232_v36, %v4105_v5  ;;  %v4113_v33 = vor.u32 1.1754944e-38, %v4112_v8  ;;  %v4189_v47 = vsel %vm9316_vm14, %v9249_v2, %v4185_v18  ;;  %v9325_v2 = vpop.f32.mrf.mxu2  ;;  %v8262_v18 = vld [vmem:[#allocation12] sm:$0xff] }
 0x281   :  { %4911 = vmatpush.bf16.msrb.mxu1 %v8277_v14  ;;  %4926 = vmatpush.bf16.msrb.mxu2 %v8283_v50  ;;  %v4075_v29 = vmul.f32 %v4074_v30, %v4050_v45  ;;  %v8265_v14 = vld [vmem:[#allocation12 + $0x18] sm:$0xff]  ;;  %v4169_v35 = vadd.f32 1.1283791, %v4168_v16  ;;  %v7419_v55 = vclamps-f32 %v4155_v28, 1.0  ;;  %vm4191_vm0 = vcmp.eq.f32.partialorder %v4190_v54, 8.507059e+37  ;;  %v8288_v22 = vld [vmem:[#allocation12 + $0xd0] sm:$0xff]  ;;  %v3803_v12 = vpop.f32.mrf.mxu3 }
 0x282   :  { %v4114_v50 = vsel %vm4111_vm15, %v4113_v33, %v4109_v7  ;;  %v4090_v27 = vmul.f32 %v4089_v10, %v9112_v43  ;;  %v4015_v5 = vmul.f32 0.5, %v9066_v44  ;;  %v8287_v44 = vld [vmem:[#allocation12 + $0xc8] sm:$0xff]  ;;  %v4018_v10 = vmul.f32 0.5, %v9175_v17 }
 0x283   :  { %4010 = vmatmul.bf16.vlgmr.msra.gmra.mxu3 %v9032_v21  ;;  %4900 = vmatpush.bf16.msrb.mxu0 %v8267_v61  ;;  %v4192_v21 = vand.u32 2147483648, %v9235_v25  ;;  %v3752_v25 = vadd.f32 %v9239_v58, %v3739_v19  ;;  %v8264_v58 = vld [vmem:[#allocation12 + $0x10] sm:$0xff]  ;;  %v7417_v57 = vclamps-f32 %v4075_v29, 1.0  ;;  %v4170_v56 = vmul.f32 %v4169_v35, %v9181_v34  ;;  %v8286_v35 = vld [vmem:[#allocation12 + $0xc0] sm:$0xff] }
 0x284   :  { %4937 = vmatpush.bf16.msrb.mxu3 %v8293_v42  ;;  %v8280_v42 = vld [vmem:[#allocation12 + $0x90] sm:$0xff]  ;;  %v4115_v61 = vmul.f32 %v4114_v50, %v4090_v27  ;;  %v4360_v13 = vadd.f32 1.0, %v7419_v55  ;;  %v4017_v34 = vmul.f32 0.5, %v9132_v41  ;;  %v3779_v16 = vpop.f32.mrf.mxu1 }
 0x285   :  { %4912 = vmatpush.bf16.msrb.mxu1 %v8276_v0  ;;  %4927 = vmatpush.bf16.msrb.mxu2 %v8282_v31  ;;  %v4193_v36 = vor.u32 1.1754944e-38, %v4192_v21  ;;  %v3765_v53 = vadd.f32 %v3764_v52, %v3752_v25  ;;  %v4358_v4 = vadd.f32 1.0, %v7417_v57  ;;  %v8272_v31 = vld [vmem:[#allocation12 + $0x50] sm:$0xff]  ;;  %v8271_v21 = vld [vmem:[#allocation12 + $0x48] sm:$0xff]  ;;  %v4016_v52 = vmul.f32 0.5, %v9104_v24 }
 0x286   :  { %v3766_v0 = vpop.f32.mrf.mxu0  ;;  %v7418_v30 = vclamps-f32 %v4115_v61, 1.0  ;;  %v4368_v8 = vmul.f32 %v4360_v13, %v4017_v34  ;;  %v8296_v34 = vld [vmem:[#allocation12 + $0x110] sm:$0xff]  ;;  %v8307_v16 = vld [vmem:[#allocation12 + $0x168] sm:$0xff] }
 0x287   :  { %4901 = vmatpush.bf16.msrb.mxu0 %v8266_v11  ;;  %v4194_v1 = vsel %vm4191_vm0, %v4193_v36, %v4189_v47  ;;  %v9328_v38 = vadd.f32 %v3777_v63, %v3765_v53  ;;  %v8300_v47 = vld [vmem:[#allocation12 + $0x130] sm:$0xff]  ;;  %v8298_v63 = vld [vmem:[#allocation12 + $0x120] sm:$0xff]  ;;  %v8309_v0 = vld [vmem:[#allocation12 + $0x178] sm:$0xff] }
 0x288   :  { %4938 = vmatpush.bf16.msrb.mxu3 %v8292_v39  ;;  %v4195_v43 = vmul.f32 %v4194_v1, %v4170_v56  ;;  %v3792_v41 = vpop.f32.mrf.mxu2  ;;  %v4376_v3 = vpack.c.bf16 %v4368_v8, %v4368_v8  ;;  %v1460_v1 = vperm.slane %v9157_v46, 5 }
 0x289   :  { %4913 = vmatpush.bf16.msrb.mxu1 %v8275_v59  ;;  %4928 = vmatpush.bf16.msrb.mxu2 %v8281_v6  ;;  %v9332_v62 = vmul.f32 %v9090_v37, %v9328_v38  ;;  %v4366_v59 = vmul.f32 %v4358_v4, %v4015_v5  ;;  %v8301_v6 = vld [vmem:[#allocation12 + $0x138] sm:$0xff]  ;;  %v3805_v36 = vpop.f32.mrf.mxu3 }
 0x28a   :  { %v7420_v20 = vclamps-f32 %v4195_v43, 1.0  ;;  %v3791_v61 = vadd.f32 %v9325_v2, %v1460_v1  ;;  %v8295_v2 = vld [vmem:[#allocation12 + $0x108] sm:$0xff] }
 0x28b   :  { %4902 = vmatpush.bf16.msrb.mxu0 %v8265_v14  ;;  %v4198_v39 = vmul.f32 %v9332_v62, %v9332_v62  ;;  %v4374_v29 = vpack.c.bf16 %v4366_v59, %v4366_v59  ;;  %v8270_v14 = vld [vmem:[#allocation12 + $0x40] sm:$0xff] }
 0x28c   :  { %4939 = vmatpush.bf16.msrb.mxu3 %v8291_v26  ;;  %v4359_v26 = vadd.f32 1.0, %v7418_v30  ;;  %v4361_v28 = vadd.f32 1.0, %v7420_v20  ;;  %v3804_v13 = vadd.f32 %v3803_v12, %v3791_v61 }
 0x28d   :  { %4914 = vmatpush.bf16.msrb.mxu1 %v8274_v9  ;;  %4929 = vmatpush.bf16.msrb.mxu2 %v8280_v42  ;;  %v9338_v11 = vmin.f32 %v4198_v39, 16.0  ;;  %v8299_v42 = vld [vmem:[#allocation12 + $0x128] sm:$0xff] }
 0x28e   :  { %v4367_v33 = vmul.f32 %v4359_v26, %v4016_v52  ;;  %v4369_v25 = vmul.f32 %v4361_v28, %v4018_v10  ;;  %v3816_v56 = vpop.f32.mrf.mxu0  ;;  %v3829_v46 = vpop.f32.mrf.mxu1 }
 0x28f   :  { %4903 = vmatpush.bf16.msrb.mxu0 %v8264_v58  ;;  %v4200_v45 = vmul.f32 2.1237322e-06, %v9338_v11  ;;  %v4211_v15 = vmul.f32 3.8918573e-05, %v9338_v11 }
 0x290   :  { %4940 = vmatpush.bf16.msrb.mxu3 %v8290_v40  ;;  %v4375_v17 = vpack.c.bf16 %v4367_v33, %v4367_v33  ;;  %v4377_v50 = vpack.c.bf16 %v4369_v25, %v4369_v25  ;;  %v3842_v4 = vpop.f32.mrf.mxu2 }
 0x291   :  { %4915 = vmatpush.bf16.msrb.mxu1 %v8273_v60  ;;  %4930 = vmatpush.bf16.msrb.mxu2 %v8279_v51  ;;  %v4201_v54 = vadd.f32 0.00028619796, %v4200_v45  ;;  %v4212_v19 = vadd.f32 0.001143296, %v4211_v15  ;;  %v8294_v15 = vld [vmem:[#allocation12 + $0x100] sm:$0xff] }
 0x293   :  { %4904 = vmatpush.bf16.msrb.mxu0 %v8263_v48  ;;  %v4202_v7 = vmul.f32 %v4201_v54, %v9338_v11  ;;  %v4213_v32 = vmul.f32 %v4212_v19, %v9338_v11  ;;  %v3817_v48 = vadd.f32 %v3816_v56, %v3804_v13 }
 0x294   :  { %4941 = vmatpush.bf16.msrb.mxu3 %v8289_v49  ;;  %v8297_v49 = vld [vmem:[#allocation12 + $0x118] sm:$0xff] }
 0x295   :  { %4916 = vmatpush.bf16.msrb.mxu1 %v8272_v31  ;;  %4931 = vmatpush.bf16.msrb.mxu2 %v8278_v23  ;;  %v4214_v9 = vadd.f32 0.014752088, %v4213_v32  ;;  %v4203_v24 = vadd.f32 0.0036580483, %v4202_v7  ;;  %v3830_v39 = vadd.f32 %v3829_v46, %v3817_v48  ;;  %v8305_v32 = vld [vmem:[#allocation12 + $0x158] sm:$0xff] }
 0x296   :  { %v3818_v30 = vpop.f32.mrf.mxu0  ;;  %v3855_v12 = vpop.f32.mrf.mxu3 }
 0x297   :  { %4905 = vmatpush.bf16.msrb.mxu0 %v8262_v18  ;;  %v4215_v40 = vmul.f32 %v4214_v9, %v9338_v11  ;;  %v4204_v53 = vmul.f32 %v4203_v24, %v9338_v11  ;;  %v3843_v5 = vadd.f32 %v3842_v4, %v3830_v39  ;;  %v3831_v18 = vpop.f32.mrf.mxu1  ;;  %v8304_v24 = vld [vmem:[#allocation12 + $0x150] sm:$0xff] }
 0x298   :  { %4942 = vmatpush.bf16.msrb.mxu3 %v8288_v22  ;;  %4932 = vmatmul.bf16.vlgmr.msrb.gmra.mxu2 %v4376_v3  ;;  %v8308_v22 = vld [vmem:[#allocation12 + $0x170] sm:$0xff]  ;;  %v3844_v59 = vpop.f32.mrf.mxu2  ;;  %v8306_v3 = vld [vmem:[#allocation12 + $0x160] sm:$0xff] }
 0x299   :  { %4917 = vmatpush.bf16.msrb.mxu1 %v8271_v21  ;;  %v4216_v55 = vadd.f32 0.112945676, %v4215_v40  ;;  %v4205_v57 = vadd.f32 0.05243302, %v4204_v53  ;;  %v9354_v41 = vadd.f32 %v3855_v12, %v3843_v5 }
 0x29a   :  { %4906 = vmatmul.bf16.vlgmr.msrb.gmra.mxu0 %v4374_v29 }
 0x29b   :  { %4950 = vmatpush.bf16.msra.mxu0 %v8301_v6  ;;  %v4217_v27 = vmul.f32 %v4216_v55, %v9338_v11  ;;  %v4206_v43 = vmul.f32 %v4205_v57, %v9338_v11  ;;  %v9358_v26 = vmul.f32 %v9090_v37, %v9354_v41 }
 0x29c   :  { %4943 = vmatpush.bf16.msrb.mxu3 %v8287_v44 }
 0x29d   :  { %4918 = vmatpush.bf16.msrb.mxu1 %v8270_v14  ;;  %v4218_v58 = vadd.f32 0.4994258, %v4217_v27  ;;  %v4207_v31 = vadd.f32 0.18741608, %v4206_v43  ;;  %v4238_v28 = vmul.f32 %v9358_v26, %v9358_v26  ;;  %v8303_v27 = vld [vmem:[#allocation12 + $0x148] sm:$0xff] }
 0x29e   :  { %v3857_v7 = vpop.f32.mrf.mxu3 }
 0x29f   :  { %4951 = vmatpush.bf16.msra.mxu0 %v8300_v47  ;;  %v4219_v60 = vmul.f32 %v4218_v58, %v9338_v11  ;;  %v4208_v8 = vmul.f32 %v4207_v31, %v9338_v11  ;;  %v4239_v52 = vmin.f32 %v4238_v28, 16.0  ;;  %v8316_v7 = vld [vmem:[#allocation12 + $0x1b0] sm:$0xff] }
 0x2a0   :  { %4944 = vmatpush.bf16.msrb.mxu3 %v8286_v35  ;;  %4919 = vmatmul.bf16.vlgmr.msrb.gmra.mxu1 %v4375_v17 }
 0x2a1   :  { %v4220_v51 = vadd.f32 1.0, %v4219_v60  ;;  %4963 = vmatpush.bf16.msra.mxu1 %v8309_v0  ;;  %v4209_v44 = vadd.f32 1.1283791, %v4208_v8  ;;  %v4240_v33 = vmul.f32 2.1237322e-06, %v4239_v52  ;;  %v8302_v60 = vld [vmem:[#allocation12 + $0x140] sm:$0xff] }
 0x2a2   :  { %v4251_v35 = vmul.f32 3.8918573e-05, %v4239_v52 }
 0x2a3   :  { %4945 = vmatmul.bf16.vlgmr.msrb.gmra.mxu3 %v4377_v50  ;;  %4952 = vmatpush.bf16.msra.mxu0 %v8299_v42  ;;  %8400 = vrcp.f32 %v4220_v51  ;;  %v4232_v21 = vand.u32 2147483648, %v4220_v51  ;;  %v4230_v11 = vand.u32 2147483647, %v4220_v51  ;;  %vm4226_vm2 = vweird.f32 %v4220_v51 }
 0x2a4   :  { %v4210_v29 = vmul.f32 %v4209_v44, %v9332_v62  ;;  %v4241_v25 = vadd.f32 0.00028619796, %v4240_v33  ;;  %v4252_v9 = vadd.f32 0.001143296, %v4251_v35  ;;  %v4019_v42 = vmul.f32 0.5, %v9328_v38 }
 0x2a5   :  { %4964 = vmatpush.bf16.msra.mxu1 %v8308_v22  ;;  %v4233_v19 = vor.u32 1.1754944e-38, %v4232_v21  ;;  %vm4231_vm4 = vcmp.eq.f32.partialorder %v4230_v11, 8.507059e+37  ;;  %v9364_v22 = vld [vmem:[#allocation11] sm:$0xff] }
 0x2a6   :  { %v4242_v40 = vmul.f32 %v4241_v25, %v4239_v52  ;;  %v4253_v17 = vmul.f32 %v4252_v9, %v4239_v52  ;;  %v8315_v9 = vld [vmem:[#allocation12 + $0x1a8] sm:$0xff] }
 0x2a7   :  { %4953 = vmatpush.bf16.msra.mxu0 %v8298_v63 }
 0x2a8   :  { %v4254_v62 = vadd.f32 0.014752088, %v4253_v17  ;;  %v4243_v53 = vadd.f32 0.0036580483, %v4242_v40  ;;  %v3868_v63 = vpop.f32.mrf.mxu0 }
 0x2a9   :  { %v8401_v23 = vpop.eup %8400  ;;  %4965 = vmatpush.bf16.msra.mxu1 %v8307_v16 }
 0x2aa   :  { %v4222_v20 = vmul.f32 %v8401_v23, %v4220_v51  ;;  %vm4227_vm1 = vweird.f32 %v8401_v23  ;;  %v4255_v1 = vmul.f32 %v4254_v62, %v4239_v52  ;;  %v4244_v56 = vmul.f32 %v4243_v53, %v4239_v52 }
 0x2ab   :  { %4954 = vmatpush.bf16.msra.mxu0 %v8297_v49  ;;  %vm4228_vm3 = vmor %vm4226_vm2, %vm4227_vm1 }
 0x2ac   :  { %v4223_v45 = vsub.f32 1.0, %v4222_v20  ;;  %v4256_v57 = vadd.f32 0.112945676, %v4255_v1  ;;  %v3894_v51 = vpop.f32.mrf.mxu2  ;;  %v4245_v38 = vadd.f32 0.05243302, %v4244_v56  ;;  %v8313_v1 = vld [vmem:[#allocation12 + $0x198] sm:$0xff] }
 0x2ad   :  { %4966 = vmatpush.bf16.msra.mxu1 %v8306_v3  ;;  %v8317_v3 = vld [vmem:[#allocation12 + $0x1b8] sm:$0xff] }
 0x2ae   :  { %v4224_v6 = vmul.f32 %v8401_v23, %v4223_v45  ;;  %v4257_v61 = vmul.f32 %v4256_v57, %v4239_v52  ;;  %v3881_v49 = vpop.f32.mrf.mxu1  ;;  %v4246_v46 = vmul.f32 %v4245_v38, %v4239_v52  ;;  %4976 = vmatpush.bf16.msra.mxu2 %v8317_v3  ;;  %v8311_v38 = vld [vmem:[#allocation12 + $0x188] sm:$0xff] }
 0x2af   :  { %4955 = vmatpush.bf16.msra.mxu0 %v8296_v34 }
 0x2b0   :  { %v4225_v54 = vadd.f32 %v8401_v23, %v4224_v6  ;;  %v4258_v13 = vadd.f32 0.4994258, %v4257_v61  ;;  %v3870_v0 = vpop.f32.mrf.mxu0  ;;  %v4247_v31 = vadd.f32 0.18741608, %v4246_v46  ;;  %v1462_v46 = vperm.slane %v9364_v22, 7 }
 0x2b1   :  { %4967 = vmatpush.bf16.msra.mxu1 %v8305_v32  ;;  %v4020_v32 = vmul.f32 0.5, %v9354_v41  ;;  %v8314_v41 = vld [vmem:[#allocation12 + $0x1a0] sm:$0xff] }
 0x2b2   :  { %v4229_v10 = vsel %vm4228_vm3, %v8401_v23, %v4225_v54  ;;  %v4259_v43 = vmul.f32 %v4258_v13, %v4239_v52  ;;  %v4248_v23 = vmul.f32 %v4247_v31, %v4239_v52  ;;  %4977 = vmatpush.bf16.msra.mxu2 %v8316_v7 }
 0x2b3   :  { %4956 = vmatpush.bf16.msra.mxu0 %v8295_v2  ;;  %v4234_v14 = vsel %vm4231_vm4, %v4233_v19, %v4229_v10  ;;  %v1461_v2 = vperm.slane %v9364_v22, 6  ;;  %v8324_v22 = vld [vmem:[#allocation12 + $0x1f0] sm:$0xff] }
 0x2b4   :  { %v4235_v47 = vmul.f32 %v4234_v14, %v4210_v29  ;;  %v4260_v48 = vadd.f32 1.0, %v4259_v43  ;;  %v3896_v39 = vpop.f32.mrf.mxu2  ;;  %v4249_v18 = vadd.f32 1.1283791, %v4248_v23 }
 0x2b5   :  { %4968 = vmatpush.bf16.msra.mxu1 %v8304_v24  ;;  %v3869_v16 = vadd.f32 %v3868_v63, %v1461_v2 }
 0x2b6   :  { %v7421_v36 = vclamps-f32 %v4235_v47, 1.0  ;;  %8402 = vrcp.f32 %v4260_v48  ;;  %v3907_v4 = vpop.f32.mrf.mxu3  ;;  %v3883_v34 = vpop.f32.mrf.mxu1  ;;  %v4272_v12 = vand.u32 2147483648, %v4260_v48  ;;  %v4270_v45 = vand.u32 2147483647, %v4260_v48  ;;  %4978 = vmatpush.bf16.msra.mxu2 %v8315_v9 }
 0x2b7   :  { %4957 = vmatpush.bf16.msra.mxu0 %v8294_v15  ;;  %vm4266_vm6 = vweird.f32 %v4260_v48  ;;  %v3882_v21 = vadd.f32 %v3881_v49, %v3869_v16  ;;  %v4250_v6 = vmul.f32 %v4249_v18, %v9358_v26 }
 0x2b8   :  { %v4362_v50 = vadd.f32 1.0, %v7421_v36  ;;  %v4273_v44 = vor.u32 1.1754944e-38, %v4272_v12  ;;  %vm4271_vm8 = vcmp.eq.f32.partialorder %v4270_v45, 8.507059e+37 }
 0x2b9   :  { %4969 = vmatpush.bf16.msra.mxu1 %v8303_v27  ;;  %v3895_v19 = vadd.f32 %v3894_v51, %v3882_v21 }
 0x2ba   :  { %v4370_v55 = vmul.f32 %v4362_v50, %v4019_v42  ;;  %4979 = vmatpush.bf16.msra.mxu2 %v8314_v41 }
 0x2bb   :  { %v3908_v10 = vadd.f32 %v3907_v4, %v3895_v19  ;;  %v8310_v4 = vld [vmem:[#allocation12 + $0x180] sm:$0xff] }
 0x2bc   :  { %v4378_v58 = vpack.c.bf16 %v4370_v55, %v4370_v55  ;;  %v8403_v30 = vpop.eup %8402 }
 0x2bd   :  { %4970 = vmatpush.bf16.msra.mxu1 %v8302_v60  ;;  %v4262_v5 = vmul.f32 %v8403_v30, %v4260_v48  ;;  %vm4267_vm5 = vweird.f32 %v8403_v30  ;;  %v8312_v60 = vld [vmem:[#allocation12 + $0x190] sm:$0xff] }
 0x2be   :  { %4958 = vmatmul.bf16.vlgmr.msra.gmra.mxu0 %v4378_v58  ;;  %v3909_v8 = vpop.f32.mrf.mxu3  ;;  %vm4268_vm7 = vmor %vm4266_vm6, %vm4267_vm5  ;;  %4980 = vmatpush.bf16.msra.mxu2 %v8313_v1 }
 0x2bf   :  { %v4263_v20 = vsub.f32 1.0, %v4262_v5 }
 0x2c1   :  { %v4264_v59 = vmul.f32 %v8403_v30, %v4263_v20  ;;  %v8325_v20 = vld [vmem:[#allocation12 + $0x1f8] sm:$0xff] }
 0x2c2   :  { %4981 = vmatpush.bf16.msra.mxu2 %v8312_v60  ;;  %4989 = vmatpush.bf16.msra.mxu3 %v8325_v20 }
 0x2c3   :  { %v4265_v15 = vadd.f32 %v8403_v30, %v4264_v59 }
 0x2c5   :  { %v4269_v11 = vsel %vm4268_vm7, %v8403_v30, %v4265_v15 }
 0x2c6   :  { %v4274_v28 = vsel %vm4271_vm8, %v4273_v44, %v4269_v11  ;;  %4982 = vmatpush.bf16.msra.mxu2 %v8311_v38  ;;  %4990 = vmatpush.bf16.msra.mxu3 %v8324_v22 }
 0x2c7   :  { %v4275_v54 = vmul.f32 %v4274_v28, %v4250_v6  ;;  %v8323_v28 = vld [vmem:[#allocation12 + $0x1e8] sm:$0xff] }
 0x2c8   :  { %v3920_v52 = vpop.f32.mrf.mxu0 }
 0x2c9   :  { %v7422_v29 = vclamps-f32 %v4275_v54, 1.0  ;;  %v3921_v33 = vadd.f32 %v3920_v52, %v3908_v10 }
 0x2ca   :  { %4983 = vmatpush.bf16.msra.mxu2 %v8310_v4  ;;  %4991 = vmatpush.bf16.msra.mxu3 %v8323_v28 }
 0x2cb   :  { %v4363_v14 = vadd.f32 1.0, %v7422_v29 }
 0x2cc   :  { %v3946_v47 = vpop.f32.mrf.mxu2 }
 0x2cd   :  { %v4371_v25 = vmul.f32 %v4363_v14, %v4020_v32  ;;  %v3947_v2 = vadd.f32 %v3946_v47, %v1462_v46 }
 0x2ce   :  { %v3933_v35 = vpop.f32.mrf.mxu1 }
 0x2cf   :  { %v9369_v26 = vadd.f32 %v3933_v35, %v3921_v33  ;;  %v4379_v36 = vpack.c.bf16 %v4371_v25, %v4371_v25  ;;  %v8322_v35 = vld [vmem:[#allocation12 + $0x1e0] sm:$0xff] }
 0x2d0   :  { %v3922_v40 = vpop.f32.mrf.mxu0  ;;  %4992 = vmatpush.bf16.msra.mxu3 %v8322_v35 }
 0x2d1   :  { %v9373_v24 = vmul.f32 %v9090_v37, %v9369_v26  ;;  %4971 = vmatmul.bf16.vlgmr.msra.gmra.mxu1 %v4379_v36  ;;  %v4021_v60 = vmul.f32 0.5, %v9369_v26 }
 0x2d3   :  { %v4278_v17 = vmul.f32 %v9373_v24, %v9373_v24 }
 0x2d4   :  { %v3948_v55 = vpop.f32.mrf.mxu2 }
 0x2d5   :  { %v4279_v42 = vmin.f32 %v4278_v17, 16.0 }
 0x2d6   :  { %v3959_v50 = vpop.f32.mrf.mxu3  ;;  %v3935_v62 = vpop.f32.mrf.mxu1 }
 0x2d7   :  { %v4280_v53 = vmul.f32 2.1237322e-06, %v4279_v42  ;;  %v4291_v27 = vmul.f32 3.8918573e-05, %v4279_v42  ;;  %v3960_v5 = vadd.f32 %v3959_v50, %v3947_v2 }
 0x2d9   :  { %v4281_v63 = vadd.f32 0.00028619796, %v4280_v53  ;;  %v4292_v58 = vadd.f32 0.001143296, %v4291_v27 }
 0x2db   :  { %v4282_v57 = vmul.f32 %v4281_v63, %v4279_v42  ;;  %v4293_v56 = vmul.f32 %v4292_v58, %v4279_v42  ;;  %v8320_v58 = vld [vmem:[#allocation12 + $0x1d0] sm:$0xff] }
 0x2dd   :  { %v4294_v61 = vadd.f32 0.014752088, %v4293_v56  ;;  %v4283_v51 = vadd.f32 0.0036580483, %v4282_v57 }
 0x2de   :  { %v3961_v49 = vpop.f32.mrf.mxu3 }
 0x2df   :  { %v4295_v13 = vmul.f32 %v4294_v61, %v4279_v42  ;;  %v4284_v0 = vmul.f32 %v4283_v51, %v4279_v42 }
 0x2e1   :  { %v4296_v43 = vadd.f32 0.112945676, %v4295_v13  ;;  %v4285_v39 = vadd.f32 0.05243302, %v4284_v0  ;;  %v8319_v13 = vld [vmem:[#allocation12 + $0x1c8] sm:$0xff] }
 0x2e3   :  { %v4297_v48 = vmul.f32 %v4296_v43, %v4279_v42  ;;  %v4286_v8 = vmul.f32 %v4285_v39, %v4279_v42  ;;  %v8374_v43 = vld [vmem:[#allocation14] ss:$0 sm:$0xff] }
 0x2e5   :  { %v4298_v34 = vadd.f32 0.4994258, %v4297_v48  ;;  %v4287_v45 = vadd.f32 0.18741608, %v4286_v8 }
 0x2e7   :  { %v4299_v30 = vmul.f32 %v4298_v34, %v4279_v42  ;;  %v4288_v6 = vmul.f32 %v4287_v45, %v4279_v42  ;;  %v8321_v42 = vld [vmem:[#allocation12 + $0x1d8] sm:$0xff]  ;;  %v8318_v34 = vld [vmem:[#allocation12 + $0x1c0] sm:$0xff] }
 0x2e8   :  { %4993 = vmatpush.bf16.msra.mxu3 %v8321_v42 }
 0x2e9   :  { %v4300_v23 = vadd.f32 1.0, %v4299_v30  ;;  %v4289_v32 = vadd.f32 1.1283791, %v4288_v6 }
 0x2eb   :  { %8404 = vrcp.f32 %v4300_v23  ;;  %v4312_v10 = vand.u32 2147483648, %v4300_v23  ;;  %v4310_v33 = vand.u32 2147483647, %v4300_v23  ;;  %vm4306_vm10 = vweird.f32 %v4300_v23 }
 0x2ec   :  { %v4290_v40 = vmul.f32 %v4289_v32, %v9373_v24  ;;  %4994 = vmatpush.bf16.msra.mxu3 %v8320_v58  ;;  %v8332_v58 = vld [vmem:[#allocation15 + $0x30] sm:$0xff] }
 0x2ed   :  { %v4313_v9 = vor.u32 1.1754944e-38, %v4312_v10  ;;  %vm4311_vm12 = vcmp.eq.f32.partialorder %v4310_v33, 8.507059e+37 }
 0x2f0   :  { %4995 = vmatpush.bf16.msra.mxu3 %v8319_v13 }
 0x2f1   :  { %v8405_v21 = vpop.eup %8404 }
 0x2f2   :  { %v4302_v11 = vmul.f32 %v8405_v21, %v4300_v23  ;;  %vm4307_vm9 = vweird.f32 %v8405_v21 }
 0x2f3   :  { %vm4308_vm11 = vmor %vm4306_vm10, %vm4307_vm9 }
 0x2f4   :  { %v4303_v29 = vsub.f32 1.0, %v4302_v11  ;;  %4996 = vmatpush.bf16.msra.mxu3 %v8318_v34 }
 0x2f6   :  { %v4304_v14 = vmul.f32 %v8405_v21, %v4303_v29 }
 0x2f7   :  { %v3972_v31 = vpop.f32.mrf.mxu0 }
 0x2f8   :  { %v3973_v12 = vadd.f32 %v3972_v31, %v3960_v5  ;;  %v4305_v25 = vadd.f32 %v8405_v21, %v4304_v14 }
 0x2fa   :  { %v4309_v17 = vsel %vm4308_vm11, %v8405_v21, %v4305_v25 }
 0x2fb   :  { %v3998_v18 = vpop.f32.mrf.mxu2  ;;  %v4314_v50 = vsel %vm4311_vm12, %v4313_v9, %v4309_v17 }
 0x2fc   :  { %v4315_v53 = vmul.f32 %v4314_v50, %v4290_v40 }
 0x2fd   :  { %v3985_v16 = vpop.f32.mrf.mxu1 }
 0x2fe   :  { %v3986_v59 = vadd.f32 %v3985_v16, %v3973_v12  ;;  %v7423_v63 = vclamps-f32 %v4315_v53, 1.0 }
 0x2ff   :  { %v3974_v15 = vpop.f32.mrf.mxu0 }
 0x300   :  { %v3999_v44 = vadd.f32 %v3998_v18, %v3986_v59  ;;  %v4364_v61 = vadd.f32 1.0, %v7423_v63 }
 0x302   :  { %v4372_v49 = vmul.f32 %v4364_v61, %v4021_v60  ;;  %v8331_v60 = vld [vmem:[#allocation15 + $0x28] sm:$0xff] }
 0x303   :  { %v4000_v52 = vpop.f32.mrf.mxu2 }
 0x304   :  { %v4380_v48 = vpack.c.bf16 %v4372_v49, %v4372_v49 }
 0x305   :  { %v3987_v19 = vpop.f32.mrf.mxu1 }
 0x306   :  { %v4011_v3 = vpop.f32.mrf.mxu3  ;;  %4984 = vmatmul.bf16.vlgmr.msra.gmra.mxu2 %v4380_v48 }
 0x307   :  { %v9378_v54 = vadd.f32 %v4011_v3, %v3999_v44 }
 0x309   :  { %v9382_v7 = vmul.f32 %v9090_v37, %v9378_v54 }
 0x30b   :  { %v4318_v47 = vmul.f32 %v9382_v7, %v9382_v7 }
 0x30d   :  { %v4319_v36 = vmin.f32 %v4318_v47, 16.0 }
 0x30e   :  { %v4013_v41 = vpop.f32.mrf.mxu3 }
 0x30f   :  { %v4320_v62 = vmul.f32 2.1237322e-06, %v4319_v36  ;;  %v4331_v55 = vmul.f32 3.8918573e-05, %v4319_v36 }
 0x311   :  { %v4321_v27 = vadd.f32 0.00028619796, %v4320_v62  ;;  %v4332_v1 = vadd.f32 0.001143296, %v4331_v55 }
 0x313   :  { %v4322_v57 = vmul.f32 %v4321_v27, %v4319_v36  ;;  %v4333_v56 = vmul.f32 %v4332_v1, %v4319_v36 }
 0x315   :  { %v4334_v24 = vadd.f32 0.014752088, %v4333_v56  ;;  %v4323_v51 = vadd.f32 0.0036580483, %v4322_v57 }
 0x317   :  { %v4335_v38 = vmul.f32 %v4334_v24, %v4319_v36  ;;  %v4907_v0 = vpop.f32.mrf.mxu0  ;;  %v4324_v4 = vmul.f32 %v4323_v51, %v4319_v36  ;;  %v8330_v24 = vld [vmem:[#allocation15 + $0x20] sm:$0xff] }
 0x318   :  { %v4908_v31 = vadd.f32 %v8374_v43, %v4907_v0 }
 0x319   :  { %v4336_v46 = vadd.f32 0.112945676, %v4335_v38  ;;  %v4325_v5 = vadd.f32 0.05243302, %v4324_v4  ;;  %v8329_v38 = vld [vmem:[#allocation15 + $0x18] sm:$0xff]  ;;  %v8328_v4 = vld [vmem:[#allocation15 + $0x10] sm:$0xff] }
 0x31b   :  { %v4337_v39 = vmul.f32 %v4336_v46, %v4319_v36  ;;  %v4933_v30 = vpop.f32.mrf.mxu2  ;;  %v4326_v18 = vmul.f32 %v4325_v5, %v4319_v36 }
 0x31d   :  { %v4920_v2 = vpop.f32.mrf.mxu1  ;;  %v4338_v26 = vadd.f32 0.4994258, %v4337_v39  ;;  %v4327_v21 = vadd.f32 0.18741608, %v4326_v18 }
 0x31e   :  { %v4921_v23 = vadd.f32 %v4920_v2, %v4908_v31  ;;  %v8327_v2 = vld [vmem:[#allocation15 + $0x8] sm:$0xff] }
 0x31f   :  { %v4339_v8 = vmul.f32 %v4338_v26, %v4319_v36  ;;  %v4909_v12 = vpop.f32.mrf.mxu0  ;;  %v4328_v6 = vmul.f32 %v4327_v21, %v4319_v36  ;;  %v4022_v36 = vmul.f32 0.5, %v9378_v54 }
 0x320   :  { %v4934_v20 = vadd.f32 %v4933_v30, %v4921_v23 }
 0x321   :  { %v4340_v16 = vadd.f32 1.0, %v4339_v8  ;;  %v4329_v52 = vadd.f32 1.1283791, %v4328_v6  ;;  %v8326_v8 = vld [vmem:[#allocation15] sm:$0xff] }
 0x323   :  { %8406 = vrcp.f32 %v4340_v16  ;;  %v4935_v45 = vpop.f32.mrf.mxu2  ;;  %v4352_v19 = vand.u32 2147483648, %v4340_v16  ;;  %v4350_v10 = vand.u32 2147483647, %v4340_v16  ;;  %vm4346_vm14 = vweird.f32 %v4340_v16 }
 0x324   :  { %v4330_v33 = vmul.f32 %v4329_v52, %v9382_v7  ;;  %v8333_v7 = vld [vmem:[#allocation15 + $0x38] sm:$0xff] }
 0x325   :  { %v4922_v22 = vpop.f32.mrf.mxu1  ;;  %v4353_v14 = vor.u32 1.1754944e-38, %v4352_v19  ;;  %vm4351_vm0 = vcmp.eq.f32.partialorder %v4350_v10, 8.507059e+37  ;;  %5115 = vmatpush.bf16.msrb.mxu0 %v8333_v7  ;;  %v8337_v7 = vld [vmem:[#allocation18 + $0x18] sm:$0xff] }
 0x326   :  { %v4946_v59 = vpop.f32.mrf.mxu3 }
 0x327   :  { %v4947_v15 = vadd.f32 %v4946_v59, %v4934_v20 }
 0x329   :  { %v8407_v44 = vpop.eup %8406  ;;  %5116 = vmatpush.bf16.msrb.mxu0 %v8332_v58 }
 0x32a   :  { %v4342_v11 = vmul.f32 %v8407_v44, %v4340_v16  ;;  %vm4347_vm13 = vweird.f32 %v8407_v44 }
 0x32b   :  { %vm4348_vm15 = vmor %vm4346_vm14, %vm4347_vm13 }
 0x32c   :  { %v4343_v28 = vsub.f32 1.0, %v4342_v11 }
 0x32d   :  { %5117 = vmatpush.bf16.msrb.mxu0 %v8331_v60 }
 0x32e   :  { %v4948_v3 = vpop.f32.mrf.mxu3  ;;  %v4344_v29 = vmul.f32 %v8407_v44, %v4343_v28 }
 0x330   :  { %v4345_v32 = vadd.f32 %v8407_v44, %v4344_v29 }
 0x331   :  { %5118 = vmatpush.bf16.msrb.mxu0 %v8330_v24 }
 0x332   :  { %v4349_v35 = vsel %vm4348_vm15, %v8407_v44, %v4345_v32 }
 0x333   :  { %v4354_v47 = vsel %vm4351_vm0, %v4353_v14, %v4349_v35 }
 0x334   :  { %v4355_v25 = vmul.f32 %v4354_v47, %v4330_v33 }
 0x335   :  { %5119 = vmatpush.bf16.msrb.mxu0 %v8329_v38 }
 0x336   :  { %v7424_v9 = vclamps-f32 %v4355_v25, 1.0 }
 0x338   :  { %v4365_v40 = vadd.f32 1.0, %v7424_v9 }
 0x339   :  { %5120 = vmatpush.bf16.msrb.mxu0 %v8328_v4 }
 0x33a   :  { %v4373_v17 = vmul.f32 %v4365_v40, %v4022_v36  ;;  %v8341_v40 = vld [vmem:[#allocation18 + $0x38] sm:$0xff] }
 0x33b   :  { %v4959_v42 = vpop.f32.mrf.mxu0  ;;  %5241 = vmatpush.bf16.msrb.mxu1 %v8341_v40  ;;  %v8345_v40 = vld [vmem:[#allocation21 + $0x18] sm:$0xff] }
 0x33c   :  { %v4381_v41 = vpack.c.bf16 %v4373_v17, %v4373_v17  ;;  %v4960_v50 = vadd.f32 %v4959_v42, %v4947_v15  ;;  %v8340_v17 = vld [vmem:[#allocation18 + $0x30] sm:$0xff] }
 0x33d   :  { %5121 = vmatpush.bf16.msrb.mxu0 %v8327_v2 }
 0x33e   :  { %4997 = vmatmul.bf16.vlgmr.msra.gmra.mxu3 %v4381_v41  ;;  %v8375_v41 = vld [vmem:[#allocation17] ss:$0 sm:$0xff] }
 0x33f   :  { %5242 = vmatpush.bf16.msrb.mxu1 %v8340_v17 }
 0x341   :  { %5122 = vmatpush.bf16.msrb.mxu0 %v8326_v8 }
 0x343   :  { %v4961_v62 = vpop.f32.mrf.mxu0 }
 0x34e   :  { %v4972_v55 = vpop.f32.mrf.mxu1 }
 0x34f   :  { %v4973_v53 = vadd.f32 %v4972_v55, %v4960_v50  ;;  %v8339_v50 = vld [vmem:[#allocation18 + $0x28] sm:$0xff] }
 0x350   :  { %5243 = vmatpush.bf16.msrb.mxu1 %v8339_v50 }
 0x356   :  { %v4974_v27 = vpop.f32.mrf.mxu1 }
 0x389   :  { %v4985_v1 = vpop.f32.mrf.mxu2 }
 0x38a   :  { %v4986_v57 = vadd.f32 %v4985_v1, %v4973_v53  ;;  %v8338_v53 = vld [vmem:[#allocation18 + $0x20] sm:$0xff] }
 0x38b   :  { %5244 = vmatpush.bf16.msrb.mxu1 %v8338_v53 }
 0x38f   :  { %5245 = vmatpush.bf16.msrb.mxu1 %v8337_v7 }
 0x391   :  { %v4987_v63 = vpop.f32.mrf.mxu2 }
 0x3c1   :  { %v4998_v56 = vpop.f32.mrf.mxu3 }
 0x3c2   :  { %v4999_v54 = vadd.f32 %v4998_v56, %v4986_v57 }
 0x3c4   :  { %v5003_v61 = vmul.f32 %v4999_v54, %v9090_v37  ;;  %v5002_v47 = vmul.f32 0.5, %v4999_v54  ;;  %v8336_v54 = vld [vmem:[#allocation18 + $0x10] sm:$0xff] }
 0x3c5   :  { %5246 = vmatpush.bf16.msrb.mxu1 %v8336_v54 }
 0x3c6   :  { %v5004_v49 = vmul.f32 %v5003_v61, %v5003_v61 }
 0x3c8   :  { %v5005_v51 = vmin.f32 %v5004_v49, 16.0 }
 0x3c9   :  { %v5000_v13 = vpop.f32.mrf.mxu3 }
 0x3ca   :  { %v5006_v43 = vmul.f32 2.1237322e-06, %v5005_v51  ;;  %v5017_v0 = vmul.f32 3.8918573e-05, %v5005_v51  ;;  %v8335_v13 = vld [vmem:[#allocation18 + $0x8] sm:$0xff] }
 0x3cb   :  { %5247 = vmatpush.bf16.msrb.mxu1 %v8335_v13 }
 0x3cc   :  { %v5007_v48 = vadd.f32 0.00028619796, %v5006_v43  ;;  %v5018_v46 = vadd.f32 0.001143296, %v5017_v0 }
 0x3ce   :  { %v5008_v34 = vmul.f32 %v5007_v48, %v5005_v51  ;;  %v5019_v39 = vmul.f32 %v5018_v46, %v5005_v51  ;;  %v8334_v48 = vld [vmem:[#allocation18] sm:$0xff] }
 0x3cf   :  { %5248 = vmatpush.bf16.msrb.mxu1 %v8334_v48 }
 0x3d0   :  { %v5020_v31 = vadd.f32 0.014752088, %v5019_v39  ;;  %v5009_v30 = vadd.f32 0.0036580483, %v5008_v34 }
 0x3d2   :  { %v5021_v26 = vmul.f32 %v5020_v31, %v5005_v51  ;;  %v5010_v5 = vmul.f32 %v5009_v30, %v5005_v51 }
 0x3d4   :  { %v5022_v23 = vadd.f32 0.112945676, %v5021_v26  ;;  %v5011_v16 = vadd.f32 0.05243302, %v5010_v5 }
 0x3d6   :  { %v5023_v20 = vmul.f32 %v5022_v23, %v5005_v51  ;;  %v5012_v45 = vmul.f32 %v5011_v16, %v5005_v51 }
 0x3d8   :  { %v5024_v12 = vadd.f32 0.4994258, %v5023_v20  ;;  %v5013_v15 = vadd.f32 0.18741608, %v5012_v45 }
 0x3da   :  { %v5025_v18 = vmul.f32 %v5024_v12, %v5005_v51  ;;  %v5014_v21 = vmul.f32 %v5013_v15, %v5005_v51 }
 0x3dc   :  { %v5026_v59 = vadd.f32 1.0, %v5025_v18  ;;  %v5015_v3 = vadd.f32 1.1283791, %v5014_v21 }
 0x3de   :  { %8408 = vrcp.f32 %v5026_v59  ;;  %v5038_v11 = vand.u32 2147483648, %v5026_v59  ;;  %v5036_v19 = vand.u32 2147483647, %v5026_v59  ;;  %vm5032_vm2 = vweird.f32 %v5026_v59 }
 0x3df   :  { %v5016_v10 = vmul.f32 %v5015_v3, %v5003_v61 }
 0x3e0   :  { %v5039_v29 = vor.u32 1.1754944e-38, %v5038_v11  ;;  %vm5037_vm4 = vcmp.eq.f32.partialorder %v5036_v19, 8.507059e+37 }
 0x3e4   :  { %v8409_v22 = vpop.eup %8408 }
 0x3e5   :  { %v5028_v44 = vmul.f32 %v8409_v22, %v5026_v59  ;;  %vm5033_vm1 = vweird.f32 %v8409_v22 }
 0x3e6   :  { %vm5034_vm3 = vmor %vm5032_vm2, %vm5033_vm1 }
 0x3e7   :  { %v5029_v6 = vsub.f32 1.0, %v5028_v44 }
 0x3e9   :  { %v5030_v28 = vmul.f32 %v8409_v22, %v5029_v6 }
 0x3eb   :  { %v5031_v52 = vadd.f32 %v8409_v22, %v5030_v28 }
 0x3ed   :  { %v5035_v32 = vsel %vm5034_vm3, %v8409_v22, %v5031_v52  ;;  %v8349_v52 = vld [vmem:[#allocation21 + $0x38] sm:$0xff] }
 0x3ee   :  { %v5040_v14 = vsel %vm5037_vm4, %v5039_v29, %v5035_v32  ;;  %5367 = vmatpush.bf16.msrb.mxu2 %v8349_v52  ;;  %v8348_v29 = vld [vmem:[#allocation21 + $0x30] sm:$0xff]  ;;  %vm5471_vm4 = vcmask 57344  }
 0x3ef   :  { %v5041_v33 = vmul.f32 %v5040_v14, %v5016_v10  ;;  %v8376_v10 = vld [vmem:[#allocation20] ss:$0 sm:$0xff]  ;;  %v8347_v14 = vld [vmem:[#allocation21 + $0x28] sm:$0xff] }
 0x3f1   :  { %v7681_v35 = vclamps-f32 %v5041_v33, 1.0 }
 0x3f2   :  { %5368 = vmatpush.bf16.msrb.mxu2 %v8348_v29 }
 0x3f3   :  { %v5044_v25 = vadd.f32 1.0, %v7681_v35 }
 0x3f5   :  { %v5045_v9 = vmul.f32 %v5044_v25, %v5002_v47  ;;  %v8346_v47 = vld [vmem:[#allocation21 + $0x20] sm:$0xff] }
 0x3f6   :  { %5369 = vmatpush.bf16.msrb.mxu2 %v8347_v14 }
 0x3f7   :  { %v5046_v36 = vpack.c.bf16 %v5045_v9, %v5045_v9 }
 0x3f9   :  { %5123 = vmatmul.bf16.vlgmr.msrb.gmra.mxu0 %v5046_v36 }
 0x3fa   :  { %5370 = vmatpush.bf16.msrb.mxu2 %v8346_v47 }
 0x3fe   :  { %5371 = vmatpush.bf16.msrb.mxu2 %v8345_v40  ;;  %v5425_v40 = vld [vmem:[#allocation2] sm:$0x1] }
 0x476   :  { %v5124_v42 = vpop.f32.mrf.mxu0 }
 0x477   :  { %v5125_v62 = vadd.f32 %v8375_v41, %v5124_v42 }
 0x479   :  { %v5129_v55 = vmul.f32 %v5125_v62, %v9090_v37  ;;  %v5128_v11 = vmul.f32 0.5, %v5125_v62  ;;  %v8344_v62 = vld [vmem:[#allocation21 + $0x10] sm:$0xff] }
 0x47a   :  { %5372 = vmatpush.bf16.msrb.mxu2 %v8344_v62 }
 0x47b   :  { %v5130_v27 = vmul.f32 %v5129_v55, %v5129_v55 }
 0x47d   :  { %v5131_v1 = vmin.f32 %v5130_v27, 16.0 }
 0x47e   :  { %v5126_v63 = vpop.f32.mrf.mxu0 }
 0x47f   :  { %v5132_v58 = vmul.f32 2.1237322e-06, %v5131_v1  ;;  %v5143_v57 = vmul.f32 3.8918573e-05, %v5131_v1  ;;  %v8343_v63 = vld [vmem:[#allocation21 + $0x8] sm:$0xff] }
 0x480   :  { %5373 = vmatpush.bf16.msrb.mxu2 %v8343_v63 }
 0x481   :  { %v5133_v56 = vadd.f32 0.00028619796, %v5132_v58  ;;  %v5144_v60 = vadd.f32 0.001143296, %v5143_v57 }
 0x483   :  { %v5134_v61 = vmul.f32 %v5133_v56, %v5131_v1  ;;  %v5145_v24 = vmul.f32 %v5144_v60, %v5131_v1  ;;  %v8342_v56 = vld [vmem:[#allocation21] sm:$0xff] }
 0x484   :  { %5374 = vmatpush.bf16.msrb.mxu2 %v8342_v56 }
 0x485   :  { %v5146_v49 = vadd.f32 0.014752088, %v5145_v24  ;;  %v5135_v51 = vadd.f32 0.0036580483, %v5134_v61 }
 0x487   :  { %v5147_v38 = vmul.f32 %v5146_v49, %v5131_v1  ;;  %v5136_v0 = vmul.f32 %v5135_v51, %v5131_v1 }
 0x489   :  { %v5148_v43 = vadd.f32 0.112945676, %v5147_v38  ;;  %v5137_v34 = vadd.f32 0.05243302, %v5136_v0 }
 0x48b   :  { %v5149_v46 = vmul.f32 %v5148_v43, %v5131_v1  ;;  %v5138_v30 = vmul.f32 %v5137_v34, %v5131_v1 }
 0x48d   :  { %v5150_v4 = vadd.f32 0.4994258, %v5149_v46  ;;  %v5139_v2 = vadd.f32 0.18741608, %v5138_v30 }
 0x48f   :  { %v5151_v39 = vmul.f32 %v5150_v4, %v5131_v1  ;;  %v5140_v23 = vmul.f32 %v5139_v2, %v5131_v1 }
 0x491   :  { %v5152_v31 = vadd.f32 1.0, %v5151_v39  ;;  %v5141_v12 = vadd.f32 1.1283791, %v5140_v23 }
 0x493   :  { %8410 = vrcp.f32 %v5152_v31  ;;  %v5164_v20 = vand.u32 2147483648, %v5152_v31  ;;  %v5162_v18 = vand.u32 2147483647, %v5152_v31  ;;  %vm5158_vm6 = vweird.f32 %v5152_v31 }
 0x494   :  { %v5142_v15 = vmul.f32 %v5141_v12, %v5129_v55 }
 0x495   :  { %v5165_v45 = vor.u32 1.1754944e-38, %v5164_v20  ;;  %vm5163_vm8 = vcmp.eq.f32.partialorder %v5162_v18, 8.507059e+37 }
 0x499   :  { %v8411_v26 = vpop.eup %8410 }
 0x49a   :  { %v5154_v5 = vmul.f32 %v8411_v26, %v5152_v31  ;;  %vm5159_vm5 = vweird.f32 %v8411_v26 }
 0x49b   :  { %vm5160_vm7 = vmor %vm5158_vm6, %vm5159_vm5 }
 0x49c   :  { %v5155_v8 = vsub.f32 1.0, %v5154_v5 }
 0x49e   :  { %v5156_v16 = vmul.f32 %v8411_v26, %v5155_v8 }
 0x4a0   :  { %v5157_v59 = vadd.f32 %v8411_v26, %v5156_v16 }
 0x4a2   :  { %v5161_v22 = vsel %vm5160_vm7, %v8411_v26, %v5157_v59  ;;  %v8377_v59 = vld [vmem:[#allocation23] ss:$0 sm:$0xff] }
 0x4a3   :  { %v5166_v21 = vsel %vm5163_vm8, %v5165_v45, %v5161_v22 }
 0x4a4   :  { %v5167_v44 = vmul.f32 %v5166_v21, %v5142_v15 }
 0x4a6   :  { %v7714_v6 = vclamps-f32 %v5167_v44, 1.0 }
 0x4a8   :  { %v5170_v3 = vadd.f32 1.0, %v7714_v6 }
 0x4aa   :  { %v5171_v28 = vmul.f32 %v5170_v3, %v5128_v11 }
 0x4ac   :  { %v5172_v19 = vpack.c.bf16 %v5171_v28, %v5171_v28 }
 0x4ae   :  { %5249 = vmatmul.bf16.vlgmr.msrb.gmra.mxu1 %v5172_v19 }
 0x52b   :  { %v5250_v32 = vpop.f32.mrf.mxu1 }
 0x52c   :  { %v5251_v33 = vadd.f32 %v8376_v10, %v5250_v32 }
 0x52e   :  { %v5255_v35 = vmul.f32 %v5251_v33, %v9090_v37  ;;  %v5254_v20 = vmul.f32 0.5, %v5251_v33 }
 0x530   :  { %v5256_v25 = vmul.f32 %v5255_v35, %v5255_v35 }
 0x532   :  { %v5257_v9 = vmin.f32 %v5256_v25, 16.0 }
 0x533   :  { %v5252_v36 = vpop.f32.mrf.mxu1 }
 0x534   :  { %v5258_v17 = vmul.f32 2.1237322e-06, %v5257_v9  ;;  %v5269_v41 = vmul.f32 3.8918573e-05, %v5257_v9 }
 0x536   :  { %v5259_v42 = vadd.f32 0.00028619796, %v5258_v17  ;;  %v5270_v50 = vadd.f32 0.001143296, %v5269_v41 }
 0x538   :  { %v5260_v55 = vmul.f32 %v5259_v42, %v5257_v9  ;;  %v5271_v53 = vmul.f32 %v5270_v50, %v5257_v9 }
 0x53a   :  { %v5272_v27 = vadd.f32 0.014752088, %v5271_v53  ;;  %v5261_v1 = vadd.f32 0.0036580483, %v5260_v55 }
 0x53c   :  { %v5273_v7 = vmul.f32 %v5272_v27, %v5257_v9  ;;  %v5262_v57 = vmul.f32 %v5261_v1, %v5257_v9 }
 0x53e   :  { %v5274_v58 = vadd.f32 0.112945676, %v5273_v7  ;;  %v5263_v61 = vadd.f32 0.05243302, %v5262_v57 }
 0x540   :  { %v5275_v60 = vmul.f32 %v5274_v58, %v5257_v9  ;;  %v5264_v51 = vmul.f32 %v5263_v61, %v5257_v9 }
 0x542   :  { %v5276_v54 = vadd.f32 0.4994258, %v5275_v60  ;;  %v5265_v13 = vadd.f32 0.18741608, %v5264_v51 }
 0x544   :  { %v5277_v24 = vmul.f32 %v5276_v54, %v5257_v9  ;;  %v5266_v43 = vmul.f32 %v5265_v13, %v5257_v9 }
 0x546   :  { %v5278_v49 = vadd.f32 1.0, %v5277_v24  ;;  %v5267_v4 = vadd.f32 1.1283791, %v5266_v43 }
 0x548   :  { %8412 = vrcp.f32 %v5278_v49  ;;  %v5290_v46 = vand.u32 2147483648, %v5278_v49  ;;  %v5288_v39 = vand.u32 2147483647, %v5278_v49  ;;  %vm5284_vm10 = vweird.f32 %v5278_v49 }
 0x549   :  { %v5268_v2 = vmul.f32 %v5267_v4, %v5255_v35 }
 0x54a   :  { %v5291_v30 = vor.u32 1.1754944e-38, %v5290_v46  ;;  %vm5289_vm12 = vcmp.eq.f32.partialorder %v5288_v39, 8.507059e+37 }
 0x54e   :  { %v8413_v38 = vpop.eup %8412 }
 0x54f   :  { %v5280_v0 = vmul.f32 %v8413_v38, %v5278_v49  ;;  %vm5285_vm9 = vweird.f32 %v8413_v38 }
 0x550   :  { %vm5286_vm11 = vmor %vm5284_vm10, %vm5285_vm9 }
 0x551   :  { %v5281_v48 = vsub.f32 1.0, %v5280_v0 }
 0x553   :  { %v5282_v34 = vmul.f32 %v8413_v38, %v5281_v48 }
 0x555   :  { %v5283_v31 = vadd.f32 %v8413_v38, %v5282_v34 }
 0x557   :  { %v5287_v26 = vsel %vm5286_vm11, %v8413_v38, %v5283_v31  ;;  %v5424_v38 = vld [vmem:[#allocation24] sm:$0x1] }
 0x558   :  { %v5292_v23 = vsel %vm5289_vm12, %v5291_v30, %v5287_v26 }
 0x559   :  { %v5293_v5 = vmul.f32 %v5292_v23, %v5268_v2 }
 0x55b   :  { %v7747_v8 = vclamps-f32 %v5293_v5, 1.0 }
 0x55d   :  { %v5296_v12 = vadd.f32 1.0, %v7747_v8 }
 0x55f   :  { %v5297_v16 = vmul.f32 %v5296_v12, %v5254_v20 }
 0x561   :  { %v5298_v18 = vpack.c.bf16 %v5297_v16, %v5297_v16 }
 0x563   :  { %5375 = vmatmul.bf16.vlgmr.msrb.gmra.mxu2 %v5298_v18 }
 0x5e6   :  { %v5376_v45 = vpop.f32.mrf.mxu2 }
 0x5e7   :  { %v5377_v15 = vadd.f32 %v8377_v59, %v5376_v45 }
 0x5e9   :  { %v5381_v22 = vmul.f32 %v5377_v15, %v9090_v37  ;;  %v8821_v37 = vmov 0   ;;  %v5380_v49 = vmul.f32 0.5, %v5377_v15 }
 0x5ea   :  { %8373 = vset.pattern.permute.xlu0 %v8821_v37 }
 0x5eb   :  { %v5382_v21 = vmul.f32 %v5381_v22, %v5381_v22  ;;  %5428 = vperm.xlu0 %8373, %v5425_v40  }
 0x5ed   :  { %v5383_v44 = vmin.f32 %v5382_v21, 16.0 }
 0x5ee   :  { %v5378_v6 = vpop.f32.mrf.mxu2 }
 0x5ef   :  { %v5384_v11 = vmul.f32 2.1237322e-06, %v5383_v44  ;;  %v5395_v3 = vmul.f32 3.8918573e-05, %v5383_v44 }
 0x5f1   :  { %v5385_v28 = vadd.f32 0.00028619796, %v5384_v11  ;;  %v5396_v19 = vadd.f32 0.001143296, %v5395_v3 }
 0x5f3   :  { %v5386_v52 = vmul.f32 %v5385_v28, %v5383_v44  ;;  %v5397_v29 = vmul.f32 %v5396_v19, %v5383_v44 }
 0x5f5   :  { %v5398_v10 = vadd.f32 0.014752088, %v5397_v29  ;;  %v5387_v32 = vadd.f32 0.0036580483, %v5386_v52 }
 0x5f7   :  { %v5399_v14 = vmul.f32 %v5398_v10, %v5383_v44  ;;  %v5388_v35 = vmul.f32 %v5387_v32, %v5383_v44 }
 0x5f9   :  { %v5400_v33 = vadd.f32 0.112945676, %v5399_v14  ;;  %v5389_v9 = vadd.f32 0.05243302, %v5388_v35 }
 0x5fb   :  { %v5401_v47 = vmul.f32 %v5400_v33, %v5383_v44  ;;  %v5390_v41 = vmul.f32 %v5389_v9, %v5383_v44 }
 0x5fd   :  { %v5402_v25 = vadd.f32 0.4994258, %v5401_v47  ;;  %v5391_v42 = vadd.f32 0.18741608, %v5390_v41 }
 0x5ff   :  { %v5403_v36 = vmul.f32 %v5402_v25, %v5383_v44  ;;  %v5392_v62 = vmul.f32 %v5391_v42, %v5383_v44 }
 0x601   :  { %v5404_v17 = vadd.f32 1.0, %v5403_v36  ;;  %v5393_v1 = vadd.f32 1.1283791, %v5392_v62 }
 0x603   :  { %8414 = vrcp.f32 %v5404_v17  ;;  %v5416_v27 = vand.u32 2147483648, %v5404_v17  ;;  %v5414_v7 = vand.u32 2147483647, %v5404_v17  ;;  %vm5410_vm14 = vweird.f32 %v5404_v17 }
 0x604   :  { %v5394_v56 = vmul.f32 %v5393_v1, %v5381_v22 }
 0x605   :  { %v5417_v57 = vor.u32 1.1754944e-38, %v5416_v27  ;;  %vm5415_vm0 = vcmp.eq.f32.partialorder %v5414_v7, 8.507059e+37 }
 0x609   :  { %v8415_v50 = vpop.eup %8414 }
 0x60a   :  { %v5406_v55 = vmul.f32 %v8415_v50, %v5404_v17  ;;  %vm5411_vm13 = vweird.f32 %v8415_v50 }
 0x60b   :  { %vm5412_vm15 = vmor %vm5410_vm14, %vm5411_vm13 }
 0x60c   :  { %v5407_v53 = vsub.f32 1.0, %v5406_v55 }
 0x60e   :  { %v5408_v63 = vmul.f32 %v8415_v50, %v5407_v53 }
 0x610   :  { %v5409_v58 = vadd.f32 %v8415_v50, %v5408_v63 }
 0x612   :  { %v5413_v60 = vsel %vm5412_vm15, %v8415_v50, %v5409_v58 }
 0x613   :  { %v5418_v54 = vsel %vm5415_vm0, %v5417_v57, %v5413_v60 }
 0x614   :  { %v5419_v61 = vmul.f32 %v5418_v54, %v5394_v56 }
 0x616   :  { %v7780_v24 = vclamps-f32 %v5419_v61, 1.0 }
 0x618   :  { %v5422_v51 = vadd.f32 1.0, %v7780_v24 }
 0x61a   :  { %v5423_v13 = vmul.f32 %v5422_v51, %v5380_v49 }
 0x61c   :  { %5447 = vmatpush.xpose.msrb.mxu3 %v5423_v13 }
 0x61f   :  { %5448 = vmatmul.f32.vlgmr.msrb.gmra.mxu3 %v5424_v38 }
 0x65d   :  { %v5429_v43 = vpop.permute.xlu0 %5428 }
 0x65e   :  { %v5431_v0 = vperm.slane %v5429_v43, 0 }
 0x6a2   :  { %v5449_v48 = vpop.f32.mrf.mxu3 }
 0x6a3   :  { %v5450_v46 = vadd.f32 %v5449_v48, %v5431_v0 }
 0x6a5   :  { %v7781_v4 = vmul.f32 -1.442695, %v5450_v46 }
 0x6a7   :  { %8416 = vpow2.f32 %v7781_v4 }
 0x6ad   :  { %v8417_v34 = vpop.eup %8416 }
 0x6ae   :  { %v5455_v39 = vadd.f32 1.0, %v8417_v34 }
 0x6b0   :  { %8418 = vrcp.f32 %v5455_v39  ;;  %v5467_v26 = vand.u32 2147483648, %v5455_v39  ;;  %v5465_v5 = vand.u32 2147483647, %v5455_v39  ;;  %vm5461_vm2 = vweird.f32 %v5455_v39 }
 0x6b2   :  { %v5468_v20 = vor.u32 1.1754944e-38, %v5467_v26  ;;  %vm5466_vm5 = vcmp.eq.f32.partialorder %v5465_v5, 8.507059e+37 }
 0x6b6   :  { %v8419_v31 = vpop.eup %8418 }
 0x6b7   :  { %v5457_v30 = vmul.f32 %v8419_v31, %v5455_v39  ;;  %vm5462_vm1 = vweird.f32 %v8419_v31 }
 0x6b8   :  { %vm5463_vm3 = vmor %vm5461_vm2, %vm5462_vm1 }
 0x6b9   :  { %v5458_v2 = vsub.f32 1.0, %v5457_v30 }
 0x6bb   :  { %v5459_v23 = vmul.f32 %v8419_v31, %v5458_v2 }
 0x6bd   :  { %v5460_v8 = vadd.f32 %v8419_v31, %v5459_v23 }
 0x6bf   :  { %v5464_v12 = vsel %vm5463_vm3, %v8419_v31, %v5460_v8 }
 0x6c0   :  { %v5469_v16 = vsel %vm5466_vm5, %v5468_v20, %v5464_v12 }
 0x6c1   :  { %5472 = vst.msk [vmem:[#allocation26] sm:$0x1] %vm5471_vm4, %v5469_v16 }
 0x6c2   :  { %5483 = dma.vmem_to_hbm [thread:$0]  %s5479_s13, 16, %s5481_s22, [#allocation5]  }
 0x6c3   :  { %8798 = dma.done.wait [#allocation5], 16  }
 0x6c4   :  { %8799 = vsyncadd [#allocation5], 4294967280 }
 0x6c5   :  { %5488 = vsyncpa [#allocation4], 1 }
 0x6c6   :  { %5489 = vsyncpa [#allocation7], 1 }
 0x6c7   :  { %5490 = vsyncpa [#allocation10], 1 }
 0x6c8   :  { %5491 = vsyncpa [#allocation13], 1 }
 0x6c9   :  { %5492 = vsyncpa [#allocation16], 1 }
 0x6ca   :  { %5493 = vsyncpa [#allocation19], 1 }
 0x6cb   :  { %5494 = vsyncpa [#allocation22], 1 }
 0x6cc   :  { %5495 = vsyncpa [#allocation25], 1 }
 0x6cd   :  { %5496 = vsyncpa [#allocation5], 1 }

</bundles_post_ra>
